<compile_context>
chip_gen: v5e
topology: v5e:2x2
jax: 0.10.0
libtpu: 0.0.40
codegen_flags: <defaults>
</compile_context>

<pallas_src>
import functools

import numpy as np
import jax
import jax.numpy as jnp
from jax.experimental import pallas as pl
from jax.experimental.pallas import tpu as pltpu


# ----------------------------------------------------------------------------- helpers ---
def _round_up(x, m):
    return ((x + m - 1) // m) * m


def _cdiv(a, b):
    return (a + b - 1) // b


# ------------------------------------------------------------------ flat-padded layout ---
def _pick_tm(w):
    """Row-tile size for the flat-padded layout (must be >= W+3 and a multiple of 8)."""
    return max(256, _round_up(w + 3, 8))


def _to_fp(x_nhwc, tm):
    """NHWC -> bf16 flat-padded slab (N, (PT+2)*tm, Cpad)."""
    n, h, w, c = x_nhwc.shape
    cp = _round_up(c, 128)
    p_log = (h + 2) * (w + 2)
    pt = _cdiv(p_log, tm)
    xpad = jnp.pad(x_nhwc.astype(jnp.float32), ((0, 0), (1, 1), (1, 1), (0, cp - c)))
    flat = xpad.reshape(n, p_log, cp)
    fp = jnp.pad(flat, ((0, 0), (tm, (pt + 2) * tm - p_log - tm), (0, 0)))
    return fp.astype(jnp.bfloat16)


def _from_fp(x_fp, n, h, w, c_keep, tm):
    """bf16 flat-padded slab -> f32 NHWC (keeping the first c_keep channels)."""
    p_log = (h + 2) * (w + 2)
    flat = x_fp[:, tm:tm + p_log, :].astype(jnp.float32)
    grid = flat.reshape(n, h + 2, w + 2, -1)
    return grid[:, 1:h + 1, 1:w + 1, :c_keep]


def _ring_mask(h, w, pt, tm):
    """1.0 at interior pixels of the flat-padded layout, 0.0 at pad ring / overhang rows."""
    p = jnp.arange(pt * tm, dtype=jnp.int32)
    yp = p // (w + 2)
    xp = p % (w + 2)
    valid = (yp >= 1) & (yp <= h) & (xp >= 1) & (xp <= w)
    return valid.astype(jnp.float32)[:, None]


# ---------------------------------------------------------------- Pallas 3x3 conv kernel -
def _conv3x3_kernel(*refs, tm, rs, relu, dual, has_res, has_post):
    n_in = 7 + int(has_res) + int(has_post)
    n_out = 2 if dual else 1
    xl_ref, xm_ref, xh_ref, w_ref, s_ref, t_ref, m_ref = refs[:7]
    pos = 7
    res_ref = refs[pos] if has_res else None
    pos += int(has_res)
    post_ref = refs[pos] if has_post else None
    out_refs = refs[n_in:n_in + n_out]
    slab_ref, acc_ref = refs[n_in + n_out:]

    ci = pl.program_id(3)

    @pl.when(ci == 0)
    def _():
        acc_ref[...] = jnp.zeros_like(acc_ref)

    # Build the (3*tm, tci) slab: prev / current / next row blocks of the input.
    slab_ref[0 * tm:1 * tm, :] = xl_ref[...].astype(jnp.float32)
    slab_ref[1 * tm:2 * tm, :] = xm_ref[...].astype(jnp.float32)
    slab_ref[2 * tm:3 * tm, :] = xh_ref[...].astype(jnp.float32)

    # Implicit im2col: 9 shifted row windows -> 9 bf16 MXU matmuls into the f32 acc.
    for ky in range(3):
        for kx in range(3):
            off = tm + (ky - 1) * rs + (kx - 1)
            lhs = slab_ref[off:off + tm, :].astype(jnp.bfloat16)
            acc_ref[...] += jnp.dot(lhs, w_ref[3 * ky + kx],
                                    preferred_element_type=jnp.float32)

    @pl.when(ci == pl.num_programs(3) - 1)
    def _():
        y = acc_ref[...] * s_ref[...] + t_ref[...]          # bias / folded eval-mode BN
        if has_res:
            y = y + res_ref[...].astype(jnp.float32)        # FTB residual (pre-ReLU)
        keep = m_ref[...] > 0.5                             # zero pad ring / overhang rows
        if dual:
            out_refs[0][...] = jnp.where(keep, y, 0.0).astype(out_refs[0].dtype)
            out_refs[1][...] = jnp.where(keep, jnp.maximum(y, 0.0), 0.0).astype(out_refs[1].dtype)
        else:
            if relu:
                y = jnp.maximum(y, 0.0)
            if has_post:
                y = y + post_ref[...].astype(jnp.float32)   # FFM "+ high" (post-ReLU)
            out_refs[0][...] = jnp.where(keep, y, 0.0).astype(out_refs[0].dtype)


def conv3x3_fp(cp, x_fp, hw, tm, *, relu=False, dual=False, res_fp=None, post_fp=None):
    """3x3/pad1/stride1 conv on a flat-padded bf16 slab, with fully fused epilogue."""
    assert not (dual and (relu or res_fp is not None or post_fp is not None))
    h, w = hw
    n = x_fp.shape[0]
    cinp = x_fp.shape[-1]
    w9, scale, shift = cp["w9"], cp["scale"], cp["shift"]
    assert w9.shape[1] == cinp, (w9.shape, cinp)
    coutp = w9.shape[2]
    p_log = (h + 2) * (w + 2)
    pt = _cdiv(p_log, tm)
    pb = pt + 2
    assert x_fp.shape[1] == pb * tm, (x_fp.shape, pb, tm)
    assert tm >= w + 3
    tci = 256 if cinp % 256 == 0 else 128
    tco = 256 if coutp % 256 == 0 else 128
    cit, cot = cinp // tci, coutp // tco
    rs = w + 2
    mask = _ring_mask(h, w, pt, tm)

    has_res = res_fp is not None
    has_post = post_fp is not None

    in_specs = [
        pl.BlockSpec((None, tm, tci), lambda b, i, co, ci: (b, i, ci)),       # prev rows
        pl.BlockSpec((None, tm, tci), lambda b, i, co, ci: (b, i + 1, ci)),   # current rows
        pl.BlockSpec((None, tm, tci), lambda b, i, co, ci: (b, i + 2, ci)),   # next rows
        pl.BlockSpec((9, tci, tco), lambda b, i, co, ci: (0, ci, co)),        # packed weights
        pl.BlockSpec((1, tco), lambda b, i, co, ci: (0, co)),                 # scale
        pl.BlockSpec((1, tco), lambda b, i, co, ci: (0, co)),                 # shift
        pl.BlockSpec((tm, 1), lambda b, i, co, ci: (i, 0)),                   # ring mask
    ]
    inputs = [x_fp, x_fp, x_fp, w9, scale, shift, mask]
    aligned_spec = pl.BlockSpec((None, tm, tco), lambda b, i, co, ci: (b, i + 1, co))
    if has_res:
        in_specs.append(aligned_spec)
        inputs.append(res_fp)
    if has_post:
        in_specs.append(aligned_spec)
        inputs.append(post_fp)

    out_sds = jax.ShapeDtypeStruct((n, pb * tm, coutp), jnp.bfloat16)
    if dual:
        out_shape = (out_sds, out_sds)
        out_specs = (aligned_spec, aligned_spec)
    else:
        out_shape = out_sds
        out_specs = aligned_spec

    kernel = functools.partial(_conv3x3_kernel, tm=tm, rs=rs, relu=relu, dual=dual,
                               has_res=has_res, has_post=has_post)
    return pl.pallas_call(
        kernel,
        out_shape=out_shape,
        grid_spec=pltpu.PrefetchScalarGridSpec(
            num_scalar_prefetch=0,
            grid=(n, pt, cot, cit),
            in_specs=in_specs,
            out_specs=out_specs,
            scratch_shapes=[pltpu.VMEM((3 * tm, tci), jnp.float32),
                            pltpu.VMEM((tm, tco), jnp.float32)],
        ),
        compiler_params=pltpu.CompilerParams(
            dimension_semantics=("parallel", "parallel", "parallel", "arbitrary")),
    )(*inputs)


# -------------------------------------------------------------- bilinear upsample (glue) ---
def upsample_bilinear_align_corners(x, factor):
    # TODO(synk): kept as XLA einsum glue; not fused into the Pallas conv epilogue.
    n, h, w, c = x.shape
    ho, wo = h * factor, w * factor

    def interp_matrix(out_size, in_size):
        if in_size == 1:
            return jnp.ones((out_size, 1), jnp.float32)
        pos = jnp.arange(out_size, dtype=jnp.float32) * (in_size - 1) / (out_size - 1)
        lo = jnp.clip(jnp.floor(pos).astype(jnp.int32), 0, in_size - 2)
        frac = pos - lo.astype(jnp.float32)
        a = jnp.zeros((out_size, in_size), jnp.float32)
        rows = jnp.arange(out_size)
        a = a.at[rows, lo].add(1.0 - frac)
        a = a.at[rows, lo + 1].add(frac)
        return a

    ah = interp_matrix(ho, h)
    aw = interp_matrix(wo, w)
    return jnp.einsum("oh,pw,nhwc->nopc", ah, aw, x.astype(jnp.float32))


# -------------------------------------------------------------------- parameter creation ---
def _prep_conv(key, cin, cout, bn=False):
    w = 0.01 * jax.random.normal(key, (3, 3, cin, cout), jnp.float32)   # init.normal_(std=0.01)
    b = jnp.zeros((cout,), jnp.float32)                                  # init.constant_(bias, 0)
    cinp, coutp = _round_up(cin, 128), _round_up(cout, 128)
    w9 = jnp.zeros((3, 3, cinp, coutp), jnp.float32).at[:, :, :cin, :cout].set(w)
    w9 = w9.reshape(9, cinp, coutp).astype(jnp.bfloat16)                 # packed once at init
    if bn:
        # eval-mode BN with initialized params: gamma=1, beta=0, mean=0, var=1, eps=1e-5
        s = jnp.full((cout,), 1.0 / np.sqrt(1.0 + 1e-5), jnp.float32)
        sh = b * s
    else:
        s = jnp.ones((cout,), jnp.float32)
        sh = b
    scale = jnp.ones((coutp,), jnp.float32).at[:cout].set(s).reshape(1, coutp)
    shift = jnp.zeros((coutp,), jnp.float32).at[:cout].set(sh).reshape(1, coutp)
    return {"w9": w9, "scale": scale, "shift": shift, "cout": cout,
            "w_f32": w, "b_f32": b, "bn": bn}


def init_decoder_params(key, inchannels, midchannels, outchannels):
    keys = iter(jax.random.split(key, 32))

    def ftb(cin, mid):
        return {"conv1": _prep_conv(next(keys), cin, mid),
                "conv2": _prep_conv(next(keys), mid, mid, bn=True),
                "conv3": _prep_conv(next(keys), mid, mid)}

    def ffm(cin, mid, cout):
        return {"ftb1": ftb(cin, mid), "ftb2": ftb(mid, cout)}

    return {
        "conv": ftb(inchannels[3], midchannels[3]),
        "conv1": _prep_conv(next(keys), midchannels[3], midchannels[2]),
        "ffm2": ffm(inchannels[2], midchannels[2], midchannels[2]),
        "ffm1": ffm(inchannels[1], midchannels[1], midchannels[1]),
        "ffm0": ffm(inchannels[0], midchannels[0], midchannels[0]),
        "outconv": {"conv1": _prep_conv(next(keys), inchannels[0], inchannels[0] // 2, bn=True),
                    "conv2": _prep_conv(next(keys), inchannels[0] // 2, outchannels)},
    }


# ---------------------------------------------------------------------------- forward ------
def ftb_fp(p, x_fp, hw, tm, post_fp=None):
    # FTB: out = relu(conv1(x) + conv3(relu_bn(conv2(relu(conv1(x))))))  [+ high, for FFM]
    x1_fp, r1_fp = conv3x3_fp(p["conv1"], x_fp, hw, tm, dual=True)       # y and relu(y)
    h_fp = conv3x3_fp(p["conv2"], r1_fp, hw, tm, relu=True)              # conv + BN + ReLU
    return conv3x3_fp(p["conv3"], h_fp, hw, tm, relu=True,
                      res_fp=x1_fp, post_fp=post_fp)                     # conv + residual + ReLU (+ high)


def ffm_fp(p, low_nhwc, high_nhwc, upfactor):
    n, h, w, _ = low_nhwc.shape
    tm = _pick_tm(w)
    low_fp = _to_fp(low_nhwc, tm)
    high_fp = _to_fp(high_nhwc, tm)
    x_fp = ftb_fp(p["ftb1"], low_fp, (h, w), tm, post_fp=high_fp)        # ftb1(low) + high, fused
    x_fp = ftb_fp(p["ftb2"], x_fp, (h, w), tm)
    x = _from_fp(x_fp, n, h, w, p["ftb2"]["conv3"]["cout"], tm)
    return upsample_bilinear_align_corners(x, upfactor)


def ao_fp(p, x_nhwc, upfactor=2):
    n, h, w, _ = x_nhwc.shape
    tm = _pick_tm(w)
    x_fp = _to_fp(x_nhwc, tm)
    h_fp = conv3x3_fp(p["conv1"], x_fp, (h, w), tm, relu=True)           # conv + BN + ReLU
    o_fp = conv3x3_fp(p["conv2"], h_fp, (h, w), tm)
    o = _from_fp(o_fp, n, h, w, p["conv2"]["cout"], tm)
    return upsample_bilinear_align_corners(o, upfactor)


def decoder_forward(params, features_nchw, upfactors=(2, 2, 2, 2)):
    """Pallas forward of Decoder.forward(features); features are NCHW like the PyTorch module."""
    feats = [jnp.transpose(f, (0, 2, 3, 1)).astype(jnp.float32) for f in features_nchw]
    feat_out = []

    f3 = feats[3]
    n, h, w, _ = f3.shape
    tm = _pick_tm(w)
    x_fp = _to_fp(f3, tm)
    x_fp = ftb_fp(params["conv"], x_fp, (h, w), tm)                      # self.conv (FTB)
    x_fp = conv3x3_fp(params["conv1"], x_fp, (h, w), tm)                 # self.conv1
    x = _from_fp(x_fp, n, h, w, params["conv1"]["cout"], tm)
    x = upsample_bilinear_align_corners(x, upfactors[3])                 # self.upsample
    feat_out.append(jnp.transpose(x, (0, 3, 1, 2)))

    x = ffm_fp(params["ffm2"], feats[2], x, upfactors[2])
    feat_out.append(jnp.transpose(x, (0, 3, 1, 2)))
    x = ffm_fp(params["ffm1"], feats[1], x, upfactors[1])
    feat_out.append(jnp.transpose(x, (0, 3, 1, 2)))
    x = ffm_fp(params["ffm0"], feats[0], x, upfactors[0])
    feat_out.append(jnp.transpose(x, (0, 3, 1, 2)))

    out = ao_fp(params["outconv"], x, upfactor=2)                        # self.outconv (AO)
    return jnp.transpose(out, (0, 3, 1, 2)), feat_out


# ------------------------------------------------------- pure-JAX f32 reference (check) ----
def _ref_conv(x, p, relu=False):
    y = jax.lax.conv_general_dilated(x, p["w_f32"], window_strides=(1, 1), padding="SAME",
                                     dimension_numbers=("NHWC", "HWIO", "NHWC"))
    y = y + p["b_f32"]
    if p["bn"]:
        y = y * (1.0 / np.sqrt(1.0 + 1e-5))
    if relu:
        y = jnp.maximum(y, 0.0)
    return y


def _ref_ftb(p, x):
    x1 = _ref_conv(x, p["conv1"])
    h = jnp.maximum(x1, 0.0)
    h = _ref_conv(h, p["conv2"], relu=True)
    h = _ref_conv(h, p["conv3"])
    return jnp.maximum(x1 + h, 0.0)


def _ref_ffm(p, low, high, upfactor):
    x = _ref_ftb(p["ftb1"], low) + high
    x = _ref_ftb(p["ftb2"], x)
    return upsample_bilinear_align_corners(x, upfactor)


def ref_decoder_forward(params, features_nchw, upfactors=(2, 2, 2, 2)):
    feats = [jnp.transpose(f, (0, 2, 3, 1)).astype(jnp.float32) for f in features_nchw]
    x = _ref_ftb(params["conv"], feats[3])
    x = _ref_conv(x, params["conv1"])
    x = upsample_bilinear_align_corners(x, upfactors[3])
    x = _ref_ffm(params["ffm2"], feats[2], x, upfactors[2])
    x = _ref_ffm(params["ffm1"], feats[1], x, upfactors[1])
    x = _ref_ffm(params["ffm0"], feats[0], x, upfactors[0])
    x = _ref_conv(x, params["outconv"]["conv1"], relu=True)
    x = _ref_conv(x, params["outconv"]["conv2"])
    x = upsample_bilinear_align_corners(x, 2)
    return jnp.transpose(x, (0, 3, 1, 2))


# ------------------------------------------------------------------------------- main ------
if __name__ == "__main__":
    # Small config consistent with the module constructor (defaults scaled down 8x).
    inchannels = [32, 64, 128, 256]
    midchannels = [32, 32, 32, 64]
    upfactors = (2, 2, 2, 2)
    outchannels = 1

    key = jax.random.PRNGKey(0)
    kf, kp = jax.random.split(key)
    fkeys = jax.random.split(kf, 4)
    n = 1
    base = 4  # spatial size of features[3]; features[i] is at base * 2**(3-i)
    features = [
        jax.random.normal(fkeys[i],
                          (n, inchannels[i], base * 2 ** (3 - i), base * 2 ** (3 - i)),
                          jnp.float32)
        for i in range(4)
    ]

    params = init_decoder_params(kp, inchannels, midchannels, outchannels)

    out, feat = decoder_forward(params, features, upfactors)
    out = jax.block_until_ready(out)

    assert out.shape == (n, outchannels, base * 32, base * 32), out.shape
    assert len(feat) == 4
    assert bool(jnp.all(jnp.isfinite(out)))

    # Loose numerical check against a pure-JAX f32 reference (Pallas path runs in bf16).
    ref = jax.block_until_ready(ref_decoder_forward(params, features, upfactors))
    num = float(jnp.sqrt(jnp.sum((out - ref) ** 2)))
    den = float(jnp.sqrt(jnp.sum(ref ** 2))) + 1e-30
    assert num / den < 0.15, (num, den)

    print("KERNEL_OK")
</pallas_src>

<mosaic_0001>
module attributes {stable_mosaic.version = 11 : i64} {
  func.func @_conv3x3_kernel(%arg0: i32, %arg1: i32, %arg2: i32, %arg3: i32, %arg4: memref<1x256x256xbf16, #tpu.memory_space<vmem>>, %arg5: memref<1x256x256xbf16, #tpu.memory_space<vmem>>, %arg6: memref<1x256x256xbf16, #tpu.memory_space<vmem>>, %arg7: memref<9x256x128xbf16, #tpu.memory_space<vmem>>, %arg8: memref<1x128xf32, #tpu.memory_space<vmem>>, %arg9: memref<1x128xf32, #tpu.memory_space<vmem>>, %arg10: memref<256x1xf32, #tpu.memory_space<vmem>>, %arg11: memref<1x256x128xbf16, #tpu.memory_space<vmem>>, %arg12: memref<1x256x128xbf16, #tpu.memory_space<vmem>>, %arg13: memref<768x256xf32, #tpu.memory_space<vmem>>, %arg14: memref<256x128xf32, #tpu.memory_space<vmem>>) attributes {dimension_semantics = [#tpu.dimension_semantics<parallel>, #tpu.dimension_semantics<parallel>, #tpu.dimension_semantics<parallel>, #tpu.dimension_semantics<arbitrary>], iteration_bounds = array<i64: 1, 1, 1, 1>, scalar_prefetch = 0 : i64, scratch_operands = 2 : i64, tpu.core_type = #tpu.core_type<tc>, window_params = [{transform_indices = @transform_0, window_bounds = array<i64: 1, 256, 256>}, {transform_indices = @transform_1, window_bounds = array<i64: 1, 256, 256>}, {transform_indices = @transform_2, window_bounds = array<i64: 1, 256, 256>}, {transform_indices = @transform_3, window_bounds = array<i64: 9, 256, 128>}, {transform_indices = @transform_4, window_bounds = array<i64: 1, 128>}, {transform_indices = @transform_5, window_bounds = array<i64: 1, 128>}, {transform_indices = @transform_6, window_bounds = array<i64: 256, 1>}, {transform_indices = @transform_7, window_bounds = array<i64: 1, 256, 128>}, {transform_indices = @transform_8, window_bounds = array<i64: 1, 256, 128>}]} {
    %c0_i32 = arith.constant 0 : i32
    %0 = arith.cmpi eq, %arg3, %c0_i32 : i32
    %1 = arith.extui %0 : i1 to i32
    %c0_i32_0 = arith.constant 0 : i32
    %2 = arith.cmpi ne, %1, %c0_i32_0 : i32
    scf.if %2 {
      %cst_88 = arith.constant 0.000000e+00 : f32
      %90 = vector.broadcast %cst_88 : f32 to vector<256x128xf32>
      %c0_89 = arith.constant 0 : index
      %c0_90 = arith.constant 0 : index
      %91 = vector.load %arg14[%c0_89, %c0_90] : memref<256x128xf32, #tpu.memory_space<vmem>>, vector<256x128xf32>
      tpu.vector_store %arg14[%c0_89, %c0_90], %90 {strides = array<i32>} : memref<256x128xf32, #tpu.memory_space<vmem>>, vector<256x128xf32>,
    } else {
    }
    %c0 = arith.constant 0 : index
    %c0_1 = arith.constant 0 : index
    %c0_2 = arith.constant 0 : index
    %3 = vector.load %arg4[%c0, %c0_1, %c0_2] : memref<1x256x256xbf16, #tpu.memory_space<vmem>>, vector<1x256x256xbf16>
    %4 = vector.shape_cast %3 : vector<1x256x256xbf16> to vector<256x256xbf16>
    %5 = arith.extf %4 : vector<256x256xbf16> to vector<256x256xf32>
    %c0_3 = arith.constant 0 : index
    %c0_4 = arith.constant 0 : index
    %6 = vector.load %arg13[%c0_3, %c0_4] : memref<768x256xf32, #tpu.memory_space<vmem>>, vector<256x256xf32>
    tpu.vector_store %arg13[%c0_3, %c0_4], %5 {strides = array<i32>} : memref<768x256xf32, #tpu.memory_space<vmem>>, vector<256x256xf32>,
    %c0_5 = arith.constant 0 : index
    %c0_6 = arith.constant 0 : index
    %c0_7 = arith.constant 0 : index
    %7 = vector.load %arg5[%c0_5, %c0_6, %c0_7] : memref<1x256x256xbf16, #tpu.memory_space<vmem>>, vector<1x256x256xbf16>
    %8 = vector.shape_cast %7 : vector<1x256x256xbf16> to vector<256x256xbf16>
    %9 = arith.extf %8 : vector<256x256xbf16> to vector<256x256xf32>
    %c256 = arith.constant 256 : index
    %c0_8 = arith.constant 0 : index
    %10 = vector.load %arg13[%c256, %c0_8] : memref<768x256xf32, #tpu.memory_space<vmem>>, vector<256x256xf32>
    tpu.vector_store %arg13[%c256, %c0_8], %9 {strides = array<i32>} : memref<768x256xf32, #tpu.memory_space<vmem>>, vector<256x256xf32>,
    %c0_9 = arith.constant 0 : index
    %c0_10 = arith.constant 0 : index
    %c0_11 = arith.constant 0 : index
    %11 = vector.load %arg6[%c0_9, %c0_10, %c0_11] : memref<1x256x256xbf16, #tpu.memory_space<vmem>>, vector<1x256x256xbf16>
    %12 = vector.shape_cast %11 : vector<1x256x256xbf16> to vector<256x256xbf16>
    %13 = arith.extf %12 : vector<256x256xbf16> to vector<256x256xf32>
    %c512 = arith.constant 512 : index
    %c0_12 = arith.constant 0 : index
    %14 = vector.load %arg13[%c512, %c0_12] : memref<768x256xf32, #tpu.memory_space<vmem>>, vector<256x256xf32>
    tpu.vector_store %arg13[%c512, %c0_12], %13 {strides = array<i32>} : memref<768x256xf32, #tpu.memory_space<vmem>>, vector<256x256xf32>,
    %c249 = arith.constant 249 : index
    %c0_13 = arith.constant 0 : index
    %15 = vector.load %arg13[%c249, %c0_13] : memref<768x256xf32, #tpu.memory_space<vmem>>, vector<256x256xf32>
    %16 = arith.truncf %15 : vector<256x256xf32> to vector<256x256xbf16>
    %c0_14 = arith.constant 0 : index
    %c0_15 = arith.constant 0 : index
    %17 = vector.load %arg14[%c0_14, %c0_15] : memref<256x128xf32, #tpu.memory_space<vmem>>, vector<256x128xf32>
    %c0_16 = arith.constant 0 : index
    %c0_17 = arith.constant 0 : index
    %c0_18 = arith.constant 0 : index
    %18 = vector.load %arg7[%c0_16, %c0_17, %c0_18] : memref<9x256x128xbf16, #tpu.memory_space<vmem>>, vector<1x256x128xbf16>
    %19 = vector.shape_cast %18 : vector<1x256x128xbf16> to vector<256x128xbf16>
    %cst = arith.constant dense<0.000000e+00> : vector<256x128xf32>
    %20 = tpu.matmul %16, %19, %cst {dimension_numbers = #tpu.dot_dimension_numbers<[1], [0], [0], [1], [0, 0, 1, 1], [], []>} : vector<256x256xbf16>, vector<256x128xbf16>, vector<256x128xf32> -> vector<256x128xf32>
    %21 = arith.addf %17, %20 : vector<256x128xf32>
    %c0_19 = arith.constant 0 : index
    %c0_20 = arith.constant 0 : index
    %22 = vector.load %arg14[%c0_19, %c0_20] : memref<256x128xf32, #tpu.memory_space<vmem>>, vector<256x128xf32>
    tpu.vector_store %arg14[%c0_19, %c0_20], %21 {strides = array<i32>} : memref<256x128xf32, #tpu.memory_space<vmem>>, vector<256x128xf32>,
    %c250 = arith.constant 250 : index
    %c0_21 = arith.constant 0 : index
    %23 = vector.load %arg13[%c250, %c0_21] : memref<768x256xf32, #tpu.memory_space<vmem>>, vector<256x256xf32>
    %24 = arith.truncf %23 : vector<256x256xf32> to vector<256x256xbf16>
    %c0_22 = arith.constant 0 : index
    %c0_23 = arith.constant 0 : index
    %25 = vector.load %arg14[%c0_22, %c0_23] : memref<256x128xf32, #tpu.memory_space<vmem>>, vector<256x128xf32>
    %c1 = arith.constant 1 : index
    %c0_24 = arith.constant 0 : index
    %c0_25 = arith.constant 0 : index
    %26 = vector.load %arg7[%c1, %c0_24, %c0_25] : memref<9x256x128xbf16, #tpu.memory_space<vmem>>, vector<1x256x128xbf16>
    %27 = vector.shape_cast %26 : vector<1x256x128xbf16> to vector<256x128xbf16>
    %cst_26 = arith.constant dense<0.000000e+00> : vector<256x128xf32>
    %28 = tpu.matmul %24, %27, %cst_26 {dimension_numbers = #tpu.dot_dimension_numbers<[1], [0], [0], [1], [0, 0, 1, 1], [], []>} : vector<256x256xbf16>, vector<256x128xbf16>, vector<256x128xf32> -> vector<256x128xf32>
    %29 = arith.addf %25, %28 : vector<256x128xf32>
    %c0_27 = arith.constant 0 : index
    %c0_28 = arith.constant 0 : index
    %30 = vector.load %arg14[%c0_27, %c0_28] : memref<256x128xf32, #tpu.memory_space<vmem>>, vector<256x128xf32>
    tpu.vector_store %arg14[%c0_27, %c0_28], %29 {strides = array<i32>} : memref<256x128xf32, #tpu.memory_space<vmem>>, vector<256x128xf32>,
    %c251 = arith.constant 251 : index
    %c0_29 = arith.constant 0 : index
    %31 = vector.load %arg13[%c251, %c0_29] : memref<768x256xf32, #tpu.memory_space<vmem>>, vector<256x256xf32>
    %32 = arith.truncf %31 : vector<256x256xf32> to vector<256x256xbf16>
    %c0_30 = arith.constant 0 : index
    %c0_31 = arith.constant 0 : index
    %33 = vector.load %arg14[%c0_30, %c0_31] : memref<256x128xf32, #tpu.memory_space<vmem>>, vector<256x128xf32>
    %c2 = arith.constant 2 : index
    %c0_32 = arith.constant 0 : index
    %c0_33 = arith.constant 0 : index
    %34 = vector.load %arg7[%c2, %c0_32, %c0_33] : memref<9x256x128xbf16, #tpu.memory_space<vmem>>, vector<1x256x128xbf16>
    %35 = vector.shape_cast %34 : vector<1x256x128xbf16> to vector<256x128xbf16>
    %cst_34 = arith.constant dense<0.000000e+00> : vector<256x128xf32>
    %36 = tpu.matmul %32, %35, %cst_34 {dimension_numbers = #tpu.dot_dimension_numbers<[1], [0], [0], [1], [0, 0, 1, 1], [], []>} : vector<256x256xbf16>, vector<256x128xbf16>, vector<256x128xf32> -> vector<256x128xf32>
    %37 = arith.addf %33, %36 : vector<256x128xf32>
    %c0_35 = arith.constant 0 : index
    %c0_36 = arith.constant 0 : index
    %38 = vector.load %arg14[%c0_35, %c0_36] : memref<256x128xf32, #tpu.memory_space<vmem>>, vector<256x128xf32>
    tpu.vector_store %arg14[%c0_35, %c0_36], %37 {strides = array<i32>} : memref<256x128xf32, #tpu.memory_space<vmem>>, vector<256x128xf32>,
    %c255 = arith.constant 255 : index
    %c0_37 = arith.constant 0 : index
    %39 = vector.load %arg13[%c255, %c0_37] : memref<768x256xf32, #tpu.memory_space<vmem>>, vector<256x256xf32>
    %40 = arith.truncf %39 : vector<256x256xf32> to vector<256x256xbf16>
    %c0_38 = arith.constant 0 : index
    %c0_39 = arith.constant 0 : index
    %41 = vector.load %arg14[%c0_38, %c0_39] : memref<256x128xf32, #tpu.memory_space<vmem>>, vector<256x128xf32>
    %c3 = arith.constant 3 : index
    %c0_40 = arith.constant 0 : index
    %c0_41 = arith.constant 0 : index
    %42 = vector.load %arg7[%c3, %c0_40, %c0_41] : memref<9x256x128xbf16, #tpu.memory_space<vmem>>, vector<1x256x128xbf16>
    %43 = vector.shape_cast %42 : vector<1x256x128xbf16> to vector<256x128xbf16>
    %cst_42 = arith.constant dense<0.000000e+00> : vector<256x128xf32>
    %44 = tpu.matmul %40, %43, %cst_42 {dimension_numbers = #tpu.dot_dimension_numbers<[1], [0], [0], [1], [0, 0, 1, 1], [], []>} : vector<256x256xbf16>, vector<256x128xbf16>, vector<256x128xf32> -> vector<256x128xf32>
    %45 = arith.addf %41, %44 : vector<256x128xf32>
    %c0_43 = arith.constant 0 : index
    %c0_44 = arith.constant 0 : index
    %46 = vector.load %arg14[%c0_43, %c0_44] : memref<256x128xf32, #tpu.memory_space<vmem>>, vector<256x128xf32>
    tpu.vector_store %arg14[%c0_43, %c0_44], %45 {strides = array<i32>} : memref<256x128xf32, #tpu.memory_space<vmem>>, vector<256x128xf32>,
    %c256_45 = arith.constant 256 : index
    %c0_46 = arith.constant 0 : index
    %47 = vector.load %arg13[%c256_45, %c0_46] : memref<768x256xf32, #tpu.memory_space<vmem>>, vector<256x256xf32>
    %48 = arith.truncf %47 : vector<256x256xf32> to vector<256x256xbf16>
    %c0_47 = arith.constant 0 : index
    %c0_48 = arith.constant 0 : index
    %49 = vector.load %arg14[%c0_47, %c0_48] : memref<256x128xf32, #tpu.memory_space<vmem>>, vector<256x128xf32>
    %c4 = arith.constant 4 : index
    %c0_49 = arith.constant 0 : index
    %c0_50 = arith.constant 0 : index
    %50 = vector.load %arg7[%c4, %c0_49, %c0_50] : memref<9x256x128xbf16, #tpu.memory_space<vmem>>, vector<1x256x128xbf16>
    %51 = vector.shape_cast %50 : vector<1x256x128xbf16> to vector<256x128xbf16>
    %cst_51 = arith.constant dense<0.000000e+00> : vector<256x128xf32>
    %52 = tpu.matmul %48, %51, %cst_51 {dimension_numbers = #tpu.dot_dimension_numbers<[1], [0], [0], [1], [0, 0, 1, 1], [], []>} : vector<256x256xbf16>, vector<256x128xbf16>, vector<256x128xf32> -> vector<256x128xf32>
    %53 = arith.addf %49, %52 : vector<256x128xf32>
    %c0_52 = arith.constant 0 : index
    %c0_53 = arith.constant 0 : index
    %54 = vector.load %arg14[%c0_52, %c0_53] : memref<256x128xf32, #tpu.memory_space<vmem>>, vector<256x128xf32>
    tpu.vector_store %arg14[%c0_52, %c0_53], %53 {strides = array<i32>} : memref<256x128xf32, #tpu.memory_space<vmem>>, vector<256x128xf32>,
    %c257 = arith.constant 257 : index
    %c0_54 = arith.constant 0 : index
    %55 = vector.load %arg13[%c257, %c0_54] : memref<768x256xf32, #tpu.memory_space<vmem>>, vector<256x256xf32>
    %56 = arith.truncf %55 : vector<256x256xf32> to vector<256x256xbf16>
    %c0_55 = arith.constant 0 : index
    %c0_56 = arith.constant 0 : index
    %57 = vector.load %arg14[%c0_55, %c0_56] : memref<256x128xf32, #tpu.memory_space<vmem>>, vector<256x128xf32>
    %c5 = arith.constant 5 : index
    %c0_57 = arith.constant 0 : index
    %c0_58 = arith.constant 0 : index
    %58 = vector.load %arg7[%c5, %c0_57, %c0_58] : memref<9x256x128xbf16, #tpu.memory_space<vmem>>, vector<1x256x128xbf16>
    %59 = vector.shape_cast %58 : vector<1x256x128xbf16> to vector<256x128xbf16>
    %cst_59 = arith.constant dense<0.000000e+00> : vector<256x128xf32>
    %60 = tpu.matmul %56, %59, %cst_59 {dimension_numbers = #tpu.dot_dimension_numbers<[1], [0], [0], [1], [0, 0, 1, 1], [], []>} : vector<256x256xbf16>, vector<256x128xbf16>, vector<256x128xf32> -> vector<256x128xf32>
    %61 = arith.addf %57, %60 : vector<256x128xf32>
    %c0_60 = arith.constant 0 : index
    %c0_61 = arith.constant 0 : index
    %62 = vector.load %arg14[%c0_60, %c0_61] : memref<256x128xf32, #tpu.memory_space<vmem>>, vector<256x128xf32>
    tpu.vector_store %arg14[%c0_60, %c0_61], %61 {strides = array<i32>} : memref<256x128xf32, #tpu.memory_space<vmem>>, vector<256x128xf32>,
    %c261 = arith.constant 261 : index
    %c0_62 = arith.constant 0 : index
    %63 = vector.load %arg13[%c261, %c0_62] : memref<768x256xf32, #tpu.memory_space<vmem>>, vector<256x256xf32>
    %64 = arith.truncf %63 : vector<256x256xf32> to vector<256x256xbf16>
    %c0_63 = arith.constant 0 : index
    %c0_64 = arith.constant 0 : index
    %65 = vector.load %arg14[%c0_63, %c0_64] : memref<256x128xf32, #tpu.memory_space<vmem>>, vector<256x128xf32>
    %c6 = arith.constant 6 : index
    %c0_65 = arith.constant 0 : index
    %c0_66 = arith.constant 0 : index
    %66 = vector.load %arg7[%c6, %c0_65, %c0_66] : memref<9x256x128xbf16, #tpu.memory_space<vmem>>, vector<1x256x128xbf16>
    %67 = vector.shape_cast %66 : vector<1x256x128xbf16> to vector<256x128xbf16>
    %cst_67 = arith.constant dense<0.000000e+00> : vector<256x128xf32>
    %68 = tpu.matmul %64, %67, %cst_67 {dimension_numbers = #tpu.dot_dimension_numbers<[1], [0], [0], [1], [0, 0, 1, 1], [], []>} : vector<256x256xbf16>, vector<256x128xbf16>, vector<256x128xf32> -> vector<256x128xf32>
    %69 = arith.addf %65, %68 : vector<256x128xf32>
    %c0_68 = arith.constant 0 : index
    %c0_69 = arith.constant 0 : index
    %70 = vector.load %arg14[%c0_68, %c0_69] : memref<256x128xf32, #tpu.memory_space<vmem>>, vector<256x128xf32>
    tpu.vector_store %arg14[%c0_68, %c0_69], %69 {strides = array<i32>} : memref<256x128xf32, #tpu.memory_space<vmem>>, vector<256x128xf32>,
    %c262 = arith.constant 262 : index
    %c0_70 = arith.constant 0 : index
    %71 = vector.load %arg13[%c262, %c0_70] : memref<768x256xf32, #tpu.memory_space<vmem>>, vector<256x256xf32>
    %72 = arith.truncf %71 : vector<256x256xf32> to vector<256x256xbf16>
    %c0_71 = arith.constant 0 : index
    %c0_72 = arith.constant 0 : index
    %73 = vector.load %arg14[%c0_71, %c0_72] : memref<256x128xf32, #tpu.memory_space<vmem>>, vector<256x128xf32>
    %c7 = arith.constant 7 : index
    %c0_73 = arith.constant 0 : index
    %c0_74 = arith.constant 0 : index
    %74 = vector.load %arg7[%c7, %c0_73, %c0_74] : memref<9x256x128xbf16, #tpu.memory_space<vmem>>, vector<1x256x128xbf16>
    %75 = vector.shape_cast %74 : vector<1x256x128xbf16> to vector<256x128xbf16>
    %cst_75 = arith.constant dense<0.000000e+00> : vector<256x128xf32>
    %76 = tpu.matmul %72, %75, %cst_75 {dimension_numbers = #tpu.dot_dimension_numbers<[1], [0], [0], [1], [0, 0, 1, 1], [], []>} : vector<256x256xbf16>, vector<256x128xbf16>, vector<256x128xf32> -> vector<256x128xf32>
    %77 = arith.addf %73, %76 : vector<256x128xf32>
    %c0_76 = arith.constant 0 : index
    %c0_77 = arith.constant 0 : index
    %78 = vector.load %arg14[%c0_76, %c0_77] : memref<256x128xf32, #tpu.memory_space<vmem>>, vector<256x128xf32>
    tpu.vector_store %arg14[%c0_76, %c0_77], %77 {strides = array<i32>} : memref<256x128xf32, #tpu.memory_space<vmem>>, vector<256x128xf32>,
    %c263 = arith.constant 263 : index
    %c0_78 = arith.constant 0 : index
    %79 = vector.load %arg13[%c263, %c0_78] : memref<768x256xf32, #tpu.memory_space<vmem>>, vector<256x256xf32>
    %80 = arith.truncf %79 : vector<256x256xf32> to vector<256x256xbf16>
    %c0_79 = arith.constant 0 : index
    %c0_80 = arith.constant 0 : index
    %81 = vector.load %arg14[%c0_79, %c0_80] : memref<256x128xf32, #tpu.memory_space<vmem>>, vector<256x128xf32>
    %c8 = arith.constant 8 : index
    %c0_81 = arith.constant 0 : index
    %c0_82 = arith.constant 0 : index
    %82 = vector.load %arg7[%c8, %c0_81, %c0_82] : memref<9x256x128xbf16, #tpu.memory_space<vmem>>, vector<1x256x128xbf16>
    %83 = vector.shape_cast %82 : vector<1x256x128xbf16> to vector<256x128xbf16>
    %cst_83 = arith.constant dense<0.000000e+00> : vector<256x128xf32>
    %84 = tpu.matmul %80, %83, %cst_83 {dimension_numbers = #tpu.dot_dimension_numbers<[1], [0], [0], [1], [0, 0, 1, 1], [], []>} : vector<256x256xbf16>, vector<256x128xbf16>, vector<256x128xf32> -> vector<256x128xf32>
    %85 = arith.addf %81, %84 : vector<256x128xf32>
    %c0_84 = arith.constant 0 : index
    %c0_85 = arith.constant 0 : index
    %86 = vector.load %arg14[%c0_84, %c0_85] : memref<256x128xf32, #tpu.memory_space<vmem>>, vector<256x128xf32>
    tpu.vector_store %arg14[%c0_84, %c0_85], %85 {strides = array<i32>} : memref<256x128xf32, #tpu.memory_space<vmem>>, vector<256x128xf32>,
    %c0_i32_86 = arith.constant 0 : i32
    %87 = arith.cmpi eq, %arg3, %c0_i32_86 : i32
    %88 = arith.extui %87 : i1 to i32
    %c0_i32_87 = arith.constant 0 : i32
    %89 = arith.cmpi ne, %88, %c0_i32_87 : i32
    scf.if %89 {
      %c0_88 = arith.constant 0 : index
      %c0_89 = arith.constant 0 : index
      %90 = vector.load %arg14[%c0_88, %c0_89] : memref<256x128xf32, #tpu.memory_space<vmem>>, vector<256x128xf32>
      %c0_90 = arith.constant 0 : index
      %c0_91 = arith.constant 0 : index
      %91 = vector.load %arg8[%c0_90, %c0_91] : memref<1x128xf32, #tpu.memory_space<vmem>>, vector<1x128xf32>
      %92 = vector.broadcast %91 : vector<1x128xf32> to vector<256x128xf32>
      %93 = arith.mulf %90, %92 : vector<256x128xf32>
      %c0_92 = arith.constant 0 : index
      %c0_93 = arith.constant 0 : index
      %94 = vector.load %arg9[%c0_92, %c0_93] : memref<1x128xf32, #tpu.memory_space<vmem>>, vector<1x128xf32>
      %95 = vector.broadcast %94 : vector<1x128xf32> to vector<256x128xf32>
      %96 = arith.addf %93, %95 : vector<256x128xf32>
      %c0_94 = arith.constant 0 : index
      %c0_95 = arith.constant 0 : index
      %97 = vector.load %arg10[%c0_94, %c0_95] : memref<256x1xf32, #tpu.memory_space<vmem>>, vector<256x1xf32>
      %cst_96 = arith.constant 5.000000e-01 : f32
      %98 = vector.broadcast %cst_96 : f32 to vector<256x1xf32>
      %99 = arith.cmpf ogt, %97, %98 : vector<256x1xf32>
      %cst_97 = arith.constant 0.000000e+00 : f32
      %100 = vector.shape_cast %99 : vector<256x1xi1> to vector<256x1xi1>
      %101 = vector.broadcast %100 : vector<256x1xi1> to vector<256x128xi1>
      %102 = vector.broadcast %cst_97 : f32 to vector<256x128xf32>
      %103 = arith.select %101, %96, %102 : vector<256x128xi1>, vector<256x128xf32>
      %104 = arith.truncf %103 : vector<256x128xf32> to vector<256x128xbf16>
      %c0_98 = arith.constant 0 : index
      %c0_99 = arith.constant 0 : index
      %c0_100 = arith.constant 0 : index
      %105 = vector.load %arg11[%c0_98, %c0_99, %c0_100] : memref<1x256x128xbf16, #tpu.memory_space<vmem>>, vector<1x256x128xbf16>
      %106 = vector.shape_cast %105 : vector<1x256x128xbf16> to vector<256x128xbf16>
      %107 = vector.shape_cast %104 : vector<256x128xbf16> to vector<1x256x128xbf16>
      tpu.vector_store %arg11[%c0_98, %c0_99, %c0_100], %107 {strides = array<i32>} : memref<1x256x128xbf16, #tpu.memory_space<vmem>>, vector<1x256x128xbf16>,
      %cst_101 = arith.constant 0.000000e+00 : f32
      %108 = vector.broadcast %cst_101 : f32 to vector<256x128xf32>
      %109 = arith.maximumf %96, %108 : vector<256x128xf32>
      %cst_102 = arith.constant 0.000000e+00 : f32
      %110 = vector.shape_cast %99 : vector<256x1xi1> to vector<256x1xi1>
      %111 = vector.broadcast %110 : vector<256x1xi1> to vector<256x128xi1>
      %112 = vector.broadcast %cst_102 : f32 to vector<256x128xf32>
      %113 = arith.select %111, %109, %112 : vector<256x128xi1>, vector<256x128xf32>
      %114 = arith.truncf %113 : vector<256x128xf32> to vector<256x128xbf16>
      %c0_103 = arith.constant 0 : index
      %c0_104 = arith.constant 0 : index
      %c0_105 = arith.constant 0 : index
      %115 = vector.load %arg12[%c0_103, %c0_104, %c0_105] : memref<1x256x128xbf16, #tpu.memory_space<vmem>>, vector<1x256x128xbf16>
      %116 = vector.shape_cast %115 : vector<1x256x128xbf16> to vector<256x128xbf16>
      %117 = vector.shape_cast %114 : vector<256x128xbf16> to vector<1x256x128xbf16>
      tpu.vector_store %arg12[%c0_103, %c0_104, %c0_105], %117 {strides = array<i32>} : memref<1x256x128xbf16, #tpu.memory_space<vmem>>, vector<1x256x128xbf16>,
    } else {
    }
    return
  }
  func.func @transform_0(%arg0: i32, %arg1: i32, %arg2: i32, %arg3: i32) -> (i32, i32, i32) {
    %c0_i32 = arith.constant 0 : i32
    return %arg0, %arg1, %arg3 : i32, i32, i32
  }
  func.func @transform_1(%arg0: i32, %arg1: i32, %arg2: i32, %arg3: i32) -> (i32, i32, i32) {
    %c1_i32 = arith.constant 1 : i32
    %0 = arith.addi %arg1, %c1_i32 : i32
    %c0_i32 = arith.constant 0 : i32
    return %arg0, %0, %arg3 : i32, i32, i32
  }
  func.func @transform_2(%arg0: i32, %arg1: i32, %arg2: i32, %arg3: i32) -> (i32, i32, i32) {
    %c2_i32 = arith.constant 2 : i32
    %0 = arith.addi %arg1, %c2_i32 : i32
    %c0_i32 = arith.constant 0 : i32
    return %arg0, %0, %arg3 : i32, i32, i32
  }
  func.func @transform_3(%arg0: i32, %arg1: i32, %arg2: i32, %arg3: i32) -> (i32, i32, i32) {
    %c0_i32 = arith.constant 0 : i32
    %c0_i32_0 = arith.constant 0 : i32
    return %c0_i32, %arg3, %arg2 : i32, i32, i32
  }
  func.func @transform_4(%arg0: i32, %arg1: i32, %arg2: i32, %arg3: i32) -> (i32, i32) {
    %c0_i32 = arith.constant 0 : i32
    %c0_i32_0 = arith.constant 0 : i32
    return %c0_i32, %arg2 : i32, i32
  }
  func.func @transform_5(%arg0: i32, %arg1: i32, %arg2: i32, %arg3: i32) -> (i32, i32) {
    %c0_i32 = arith.constant 0 : i32
    %c0_i32_0 = arith.constant 0 : i32
    return %c0_i32, %arg2 : i32, i32
  }
  func.func @transform_6(%arg0: i32, %arg1: i32, %arg2: i32, %arg3: i32) -> (i32, i32) {
    %c0_i32 = arith.constant 0 : i32
    %c0_i32_0 = arith.constant 0 : i32
    return %arg1, %c0_i32 : i32, i32
  }
  func.func @transform_7(%arg0: i32, %arg1: i32, %arg2: i32, %arg3: i32) -> (i32, i32, i32) {
    %c1_i32 = arith.constant 1 : i32
    %0 = arith.addi %arg1, %c1_i32 : i32
    %c0_i32 = arith.constant 0 : i32
    return %arg0, %0, %arg2 : i32, i32, i32
  }
  func.func @transform_8(%arg0: i32, %arg1: i32, %arg2: i32, %arg3: i32) -> (i32, i32, i32) {
    %c1_i32 = arith.constant 1 : i32
    %0 = arith.addi %arg1, %c1_i32 : i32
    %c0_i32 = arith.constant 0 : i32
    return %arg0, %0, %arg2 : i32, i32, i32
  }
}

</mosaic_0001>

<bundles_post_ra>
// kernel: tpu_custom_call.1
= control target key start
LH: loop header
LB: loop body
LE: loop exit
PB: predicated region body
PF: predicated region fallthrough
CT: control target
= control target key end

     0   :  { %14 = vsyncpa [#allocation5], 0  ;;  %s11541_s0 = inlined_call_operand.hbm [shape: bf16[1,768,256], index: 0, kind: input, shape index: {}]   ;;  %s11542_s1 = inlined_call_operand.hbm [shape: bf16[1,768,256], index: 1, kind: input, shape index: {}]   ;;  %s11543_s2 = inlined_call_operand.hbm [shape: bf16[1,768,256], index: 2, kind: input, shape index: {}]   ;;  %s11544_s3 = inlined_call_operand.hbm [shape: bf16[9,256,128], index: 3, kind: input, shape index: {}]   ;;  %s11545_s4 = inlined_call_operand.vmem [shape: f32[1,128], index: 4, kind: input, shape index: {}]   ;;  %s11546_s5 = inlined_call_operand.vmem [shape: f32[1,128], index: 5, kind: input, shape index: {}]   ;;  %s11547_s6 = inlined_call_operand.vmem [shape: f32[256,1], index: 6, kind: input, shape index: {}]   ;;  %s11548_s7 = inlined_call_operand.hbm [shape: bf16[1,768,128], index: 7, kind: output, shape index: {0}]   ;;  %s11549_s8 = inlined_call_operand.hbm [shape: bf16[1,768,128], index: 8, kind: output, shape index: {1}]  }
   0x1   :  { %15 = vsyncpa [#allocation8], 0 }
   0x2   :  { %16 = vsyncpa [#allocation11], 0 }
   0x3   :  { %17 = vsyncpa [#allocation6], 0 }
   0x4   :  { %18 = vsyncpa [#allocation14], 0  ;;  %s7957_s29 = scalar_lea.hbm %s11542_s1, 256  ;;  %s9059_s9 = smov [#allocation7]  }
   0x5   :  { %s41_s30 = sshll.u32 %s7957_s29, 4  ;;  %s43_s10 = sshll.u32 %s9059_s9, 4  ;;  %s42_s30 = int_to_ptr.hbm [resolvable:$true] %s41_s30  ;;  %s44_s10 = int_to_ptr.vmem [resolvable:$true] %s43_s10 }
   0x6   :  { %s9060_s11 = smov 128   ;;  %s9061_s12 = smov 8  }
   0x7   :  { %49 = dma.hbm_to_vmem [thread:$0]  %s42_s30, 4096, %s44_s10, [#allocation8], %s9060_s11, %s9060_s11, %s9061_s12  }
   0x8   :  { %s23_s15 = sshll.u32 %s11541_s0, 4  ;;  %s9062_s16 = smov [#allocation4]   ;;  %s24_s15 = int_to_ptr.hbm [resolvable:$true] %s23_s15 }
   0x9   :  { %s25_s17 = sshll.u32 %s9062_s16, 4  ;;  %s7958_s1 = scalar_lea.hbm %s11543_s2, 512  ;;  %s26_s17 = int_to_ptr.vmem [resolvable:$true] %s25_s17 }
   0xa   :  { %31 = dma.hbm_to_vmem [thread:$0]  %s24_s15, 4096, %s26_s17, [#allocation5], %s9060_s11, %s9060_s11, %s9061_s12  }
   0xb   :  { %s59_s20 = sshll.u32 %s7958_s1, 4  ;;  %s9063_s21 = smov [#allocation9]   ;;  %s60_s20 = int_to_ptr.hbm [resolvable:$true] %s59_s20 }
   0xc   :  { %s61_s22 = sshll.u32 %s9063_s21, 4  ;;  %s72_s25 = sshll.u32 %s11544_s3, 4  ;;  %s62_s22 = int_to_ptr.vmem [resolvable:$true] %s61_s22  ;;  %s73_s25 = int_to_ptr.hbm [resolvable:$true] %s72_s25 }
   0xd   :  { %67 = dma.hbm_to_vmem [thread:$0]  %s60_s20, 4096, %s62_s22, [#allocation8], %s9060_s11, %s9060_s11, %s9061_s12  }
   0xe   :  { %s9064_s0 = smov [#allocation10]   ;;  %s9065_s27 = smov 64  }
   0xf   :  { %s74_s26 = sshll.u32 %s9064_s0, 4  ;;  %s9066_s28 = smov 4   ;;  %s75_s26 = int_to_ptr.vmem [resolvable:$true] %s74_s26 }
  0x10   :  { %80 = dma.hbm_to_vmem [thread:$0]  %s73_s25, 18432, %s75_s26, [#allocation11], %s9065_s27, %s9065_s27, %s9066_s28  }
  0x11   :  { %9049 = dma.done.wait [#allocation5], 4096  }
  0x12   :  { %9050 = vsyncadd [#allocation5], 4294963200 }
  0x13   :  { %9051 = dma.done.wait [#allocation8], 8192  }
  0x14   :  { %9052 = vsyncadd [#allocation8], 4294959104 }
  0x15   :  { %9053 = dma.done.wait [#allocation11], 18432  }
  0x16   :  { %9054 = vsyncadd [#allocation11], 4294948864  ;;  %v8544_v0 = vld [vmem:[#allocation10 + $0x38] sm:$0xff]  ;;  %v8543_v2 = vld [vmem:[#allocation10 + $0x30] sm:$0xff]  ;;  %vm791_vm0 = vsmask.f32 7424 }
  0x17   :  { %v8552_v1 = vld [vmem:[#allocation10 + $0x78] sm:$0xff]  ;;  %1184 = vmatpush.bf16.msra.mxu0 %v8544_v0  ;;  %8871 = vmatpush.bf16.msra.mxu2 %v8544_v0  ;;  %v8551_v3 = vld [vmem:[#allocation10 + $0x70] sm:$0xff]  ;;  %v8542_v4 = vld [vmem:[#allocation10 + $0x28] sm:$0xff]  ;;  %vm1625_vm1 = vcmask 1046528   ;;  %vm2227_vm2 = vsmask.f32 6400 }
  0x18   :  { %1273 = vmatpush.bf16.msra.mxu1 %v8552_v1  ;;  %8879 = vmatpush.bf16.msra.mxu3 %v8552_v1  ;;  %v8550_v5 = vld [vmem:[#allocation10 + $0x68] sm:$0xff]  ;;  %v8541_v6 = vld [vmem:[#allocation10 + $0x20] sm:$0xff]  ;;  %v8540_v8 = vld [vmem:[#allocation10 + $0x18] sm:$0xff]  ;;  %vm3067_vm3 = vsmask.f32 4352  ;;  %vm6079_vm5 = vcmask 1044480  }
  0x19   :  { %v8549_v7 = vld [vmem:[#allocation10 + $0x60] sm:$0xff]  ;;  %v8548_v9 = vld [vmem:[#allocation10 + $0x58] sm:$0xff]  ;;  %v8539_v10 = vld [vmem:[#allocation10 + $0x10] sm:$0xff]  ;;  %vm5205_vm4 = vsmask.f32 5376  ;;  %s7959_s26 = scalar_lea.hbm %s11548_s7, 128 }
  0x1a   :  { %v8547_v11 = vld [vmem:[#allocation10 + $0x50] sm:$0xff]  ;;  %v8538_v12 = vld [vmem:[#allocation10 + $0x8] sm:$0xff]  ;;  %v8537_v14 = vld [vmem:[#allocation10] sm:$0xff]  ;;  %s7960_s29 = scalar_lea.hbm %s11549_s8, 128  ;;  %s9068_s30 = smov [#allocation12]  }
  0x1b   :  { %1185 = vmatpush.bf16.msra.mxu0 %v8543_v2  ;;  %8872 = vmatpush.bf16.msra.mxu2 %v8543_v2  ;;  %v8546_v13 = vld [vmem:[#allocation10 + $0x48] sm:$0xff]  ;;  %v8545_v15 = vld [vmem:[#allocation10 + $0x40] sm:$0xff]  ;;  %v9130_v16 = vld [vmem:[#allocation7 + $0x78] sm:$0xff]  ;;  %s7918_s9 = sshll.u32 %s9068_s30, 4  ;;  %s7920_s10 = sshll.u32 %s7959_s26, 4  ;;  %s7919_s9 = int_to_ptr.vmem [resolvable:$true] %s7918_s9  ;;  %s7921_s10 = int_to_ptr.hbm [resolvable:$true] %s7920_s10 }
  0x1c   :  { %1274 = vmatpush.bf16.msra.mxu1 %v8551_v3  ;;  %8880 = vmatpush.bf16.msra.mxu3 %v8551_v3  ;;  %v9132_v17 = vld [vmem:[#allocation7 + $0x80] sm:$0xff]  ;;  %v369_v18 = vunpack.c.l.bf16 %v9130_v16  ;;  %v9136_v20 = vld [vmem:[#allocation7 + $0x88] sm:$0xff]  ;;  %v9138_v21 = vld [vmem:[#allocation7 + $0x90] sm:$0xff]  ;;  %v370_v31 = vunpack.c.h.bf16 %v9130_v16  ;;  %s9069_s7 = smov [#allocation13]   ;;  %s7937_s12 = sshll.u32 %s7960_s29, 4  ;;  %s7938_s12 = int_to_ptr.hbm [resolvable:$true] %s7937_s12 }
  0x1d   :  { %v371_v19 = vunpack.c.l.bf16 %v9132_v17  ;;  %v373_v22 = vunpack.c.l.bf16 %v9136_v20  ;;  %v375_v23 = vunpack.c.l.bf16 %v9138_v21  ;;  %v372_v33 = vunpack.c.h.bf16 %v9132_v17  ;;  %v178_v45 = vld [vmem:[#allocation4 + $0xf8] sm:$0xff]  ;;  %v9166_v52 = vld [vmem:[#allocation7] sm:$0xff]  ;;  %v308_v53 = vld [vmem:[#allocation7 + $0x8] sm:$0xff]  ;;  %s7935_s11 = sshll.u32 %s9069_s7, 4  ;;  %s7936_s11 = int_to_ptr.vmem [resolvable:$true] %s7935_s11 }
  0x1e   :  { %v374_v34 = vunpack.c.h.bf16 %v9136_v20  ;;  %v376_v35 = vunpack.c.h.bf16 %v9138_v21  ;;  %v8560_v47 = vld [vmem:[#allocation10 + $0xb8] sm:$0xff]  ;;  %v241_v51 = vunpack.c.l.bf16 %v178_v45  ;;  %v309_v54 = vld [vmem:[#allocation7 + $0x10] sm:$0xff]  ;;  %v339_v55 = vunpack.c.l.bf16 %v9166_v52  ;;  %v9171_v59 = vld [vmem:[#allocation7 + $0xa0] sm:$0xff]  ;;  %433 = vst [vmem:[#allocation2 + $0x468] sm:$0xff] %v369_v18 }
  0x1f   :  { %1186 = vmatpush.bf16.msra.mxu0 %v8542_v4  ;;  %8873 = vmatpush.bf16.msra.mxu2 %v8542_v4  ;;  %v709_v24 = vpack.c.bf16 %v371_v19, %v369_v18  ;;  %v711_v25 = vpack.c.bf16 %v375_v23, %v373_v22  ;;  %v710_v37 = vpack.c.bf16 %v372_v33, %v370_v31  ;;  %v8568_v48 = vld [vmem:[#allocation10 + $0xf8] sm:$0xff]  ;;  %v341_v56 = vunpack.c.l.bf16 %v308_v53  ;;  %v9226_v16 = vld [vmem:[#allocation7 + $0xa8] sm:$0xff] }
  0x20   :  { %1275 = vmatpush.bf16.msra.mxu1 %v8550_v5  ;;  %8881 = vmatpush.bf16.msra.mxu3 %v8550_v5  ;;  %v712_v38 = vpack.c.bf16 %v376_v35, %v374_v34  ;;  %v8576_v49 = vld [vmem:[#allocation10 + $0x138] sm:$0xff]  ;;  %v343_v57 = vunpack.c.l.bf16 %v309_v54  ;;  %305 = vst [vmem:[#allocation2 + $0x528] sm:$0xff] %v241_v51  ;;  %v379_v61 = vunpack.c.l.bf16 %v9171_v59  ;;  %v380_v1 = vunpack.c.h.bf16 %v9171_v59  ;;  %v8566_v59 = vld [vmem:[#allocation10 + $0xe8] sm:$0xff] }
  0x21   :  { %v916_v26 = vshll.u32 %v709_v24, 16  ;;  %v928_v27 = vshrl.u32 %v709_v24, 16  ;;  %v932_v28 = vshll.u32 %v711_v25, 16  ;;  %v924_v39 = vshll.u32 %v710_v37, 16  ;;  %v8584_v50 = vld [vmem:[#allocation10 + $0x178] sm:$0xff]  ;;  %403 = vst [vmem:[#allocation2 + $0x5d0] sm:$0xff] %v339_v55 }
  0x22   :  { %v936_v40 = vshrl.u32 %v710_v37, 16  ;;  %v940_v41 = vshll.u32 %v712_v38, 16  ;;  %v9169_v58 = vld [vmem:[#allocation7 + $0x98] sm:$0xff]  ;;  %v944_v62 = vshrl.u32 %v711_v25, 16  ;;  %405 = vst [vmem:[#allocation2 + $0x438] sm:$0xff] %v341_v56  ;;  %v9183_v2 = vpack.c.bf16 %v343_v57, %v341_v56  ;;  %v8559_v24 = vld [vmem:[#allocation10 + $0xb0] sm:$0xff] }
  0x23   :  { %1187 = vmatpush.bf16.msra.mxu0 %v8541_v6  ;;  %8874 = vmatpush.bf16.msra.mxu2 %v8541_v6  ;;  %v9146_v29 = vrot.slane %v916_v26, 1  ;;  %v934_v30 = vrot.slane %v932_v28, 1  ;;  %v9162_v42 = vrot.slane %v924_v39, 1  ;;  %v377_v60 = vunpack.c.l.bf16 %v9169_v58  ;;  %407 = vst [vmem:[#allocation2 + $0x60] sm:$0xff] %v343_v57  ;;  %v8567_v25 = vld [vmem:[#allocation10 + $0xf0] sm:$0xff]  ;;  %v9205_v28 = vld [vmem:[#allocation7 + $0x18] sm:$0xff] }
  0x24   :  { %1276 = vmatpush.bf16.msra.mxu1 %v8549_v7  ;;  %8882 = vmatpush.bf16.msra.mxu3 %v8549_v7  ;;  %v942_v43 = vrot.slane %v940_v41, 1  ;;  %v378_v63 = vunpack.c.h.bf16 %v9169_v58  ;;  %v242_v3 = vunpack.c.h.bf16 %v178_v45  ;;  %v952_v7 = vshrl.u32 %v712_v38, 16  ;;  %435 = vst [vmem:[#allocation2 + $0x458] sm:$0xff] %v371_v19  ;;  %v8575_v26 = vld [vmem:[#allocation10 + $0x130] sm:$0xff] }
  0x25   :  { %v930_v32 = vor.u32 %v928_v27, %v9146_v29  ;;  %v938_v44 = vor.u32 %v936_v40, %v9162_v42  ;;  %v9180_v0 = vpack.c.bf16 %v379_v61, %v377_v60  ;;  %v946_v4 = vor.u32 %v944_v62, %v934_v30  ;;  %437 = vst [vmem:[#allocation2 + $0x400] sm:$0xff] %v373_v22 }
  0x26   :  { %v9190_v6 = vpack.c.bf16 %v380_v1, %v378_v63  ;;  %439 = vst [vmem:[#allocation2 + $0xe8] sm:$0xff] %v375_v23  ;;  %v800_v18 = vshll.u32 %v9183_v2, 16  ;;  %v345_v40 = vunpack.c.l.bf16 %v9205_v28  ;;  %v816_v62 = vshrl.u32 %v9183_v2, 16 }
  0x27   :  { %1188 = vmatpush.bf16.msra.mxu0 %v8540_v8  ;;  %8875 = vmatpush.bf16.msra.mxu2 %v8540_v8  ;;  %v935_v36 = vsel %vm791_vm0, %v930_v32, %v934_v30  ;;  %v943_v46 = vsel %vm791_vm0, %v938_v44, %v942_v43  ;;  %v948_v5 = vshll.u32 %v9180_v0, 16  ;;  %306 = vst [vmem:[#allocation2 + $0x1c0] sm:$0xff] %v242_v3  ;;  %v9207_v30 = vld [vmem:[#allocation7 + $0x20] sm:$0xff]  ;;  %v960_v21 = vshrl.u32 %v9180_v0, 16 }
  0x28   :  { %1277 = vmatpush.bf16.msra.mxu1 %v8548_v9  ;;  %8883 = vmatpush.bf16.msra.mxu3 %v8548_v9  ;;  %v954_v9 = vor.u32 %v952_v7, %v942_v43  ;;  %v9213_v39 = vrot.slane %v800_v18, 1  ;;  %434 = vst [vmem:[#allocation2 + $0x278] sm:$0xff] %v370_v31  ;;  %v347_v41 = vunpack.c.l.bf16 %v9207_v30  ;;  %v9228_v31 = vld [vmem:[#allocation7 + $0xb0] sm:$0xff]  ;;  %v348_v51 = vunpack.c.h.bf16 %v9207_v30  ;;  %v330_v30 = vld [vmem:[#allocation7 + $0xb8] sm:$0xff] }
  0x29   :  { %v9194_v8 = vrot.slane %v948_v5, 1  ;;  %436 = vst [vmem:[#allocation2 + $0x498] sm:$0xff] %v372_v33  ;;  %v383_v20 = vunpack.c.l.bf16 %v9228_v31  ;;  %v968_v0 = vshrl.u32 %v9190_v6, 16 }
  0x2a   :  { %438 = vst [vmem:[#allocation2 + $0x5d8] sm:$0xff] %v374_v34  ;;  %v9234_v34 = vpack.c.bf16 %v347_v41, %v345_v40 }
  0x2b   :  { %1189 = vmatpush.bf16.msra.mxu0 %v8539_v10  ;;  %8876 = vmatpush.bf16.msra.mxu2 %v8539_v10  ;;  %v956_v10 = vshll.u32 %v9190_v6, 16  ;;  %v951_v19 = vsel %vm791_vm0, %v946_v4, %v9194_v8  ;;  %440 = vst [vmem:[#allocation2 + $0x160] sm:$0xff] %v376_v35  ;;  %v962_v56 = vor.u32 %v960_v21, %v9194_v8 }
  0x2c   :  { %1278 = vmatpush.bf16.msra.mxu1 %v8547_v11  ;;  %8884 = vmatpush.bf16.msra.mxu3 %v8547_v11  ;;  %v627_v11 = vld [vmem:[#allocation2 + $0x528] sm:$0xfe]  ;;  %409 = vst [vmem:[#allocation2 + $0x80] sm:$0xff] %v345_v40 }
  0x2d   :  { %v9203_v22 = vrot.slane %v956_v10, 1  ;;  %411 = vst [vmem:[#allocation2 + $0x4b8] sm:$0xff] %v347_v41  ;;  %v8558_v10 = vld [vmem:[#allocation10 + $0xa8] sm:$0xff]  ;;  %v386_v41 = vunpack.c.h.bf16 %v330_v30 }
  0x2e   :  { %v628_v44 = vld [vmem:[#allocation2 + $0x1c0] sm:$0xfe]  ;;  %441 = vst [vmem:[#allocation2 + $0x178] sm:$0xff] %v377_v60  ;;  %v384_v60 = vunpack.c.h.bf16 %v9228_v31 }
  0x2f   :  { %1190 = vmatpush.bf16.msra.mxu0 %v8538_v12  ;;  %8877 = vmatpush.bf16.msra.mxu2 %v8538_v12  ;;  %v340_v12 = vunpack.c.h.bf16 %v9166_v52  ;;  %v959_v32 = vsel %vm791_vm0, %v954_v9, %v9203_v22  ;;  %443 = vst [vmem:[#allocation2 + $0x1e0] sm:$0xff] %v379_v61  ;;  %v9247_v52 = vld [vmem:[#allocation7 + $0x28] sm:$0xff]  ;;  %v820_v61 = vshll.u32 %v9234_v34, 16  ;;  %v970_v9 = vor.u32 %v968_v0, %v9203_v22  ;;  %v9317_v0 = vld [vmem:[#allocation7 + $0x50] sm:$0xff] }
  0x30   :  { %1279 = vmatpush.bf16.msra.mxu1 %v8546_v13  ;;  %8885 = vmatpush.bf16.msra.mxu3 %v8546_v13  ;;  %v342_v13 = vunpack.c.h.bf16 %v308_v53  ;;  %v382_v53 = vunpack.c.h.bf16 %v9226_v16  ;;  %412 = vst [vmem:[#allocation2 + $0x310] sm:$0xff] %v348_v51  ;;  %v349_v4 = vunpack.c.l.bf16 %v9247_v52 }
  0x31   :  { %404 = vst [vmem:[#allocation2 + $0x260] sm:$0xff] %v340_v12  ;;  %v694_v33 = vpack.c.bf16 %v340_v12, %v628_v44  ;;  %v9274_v12 = vrot.slane %v820_v61, 1  ;;  %v9315_v61 = vld [vmem:[#allocation7 + $0x48] sm:$0xff] }
  0x32   :  { %406 = vst [vmem:[#allocation2 + $0xf0] sm:$0xff] %v342_v13  ;;  %v9261_v7 = vpack.c.bf16 %v384_v60, %v382_v53 }
  0x33   :  { %1191 = vmatpush.bf16.msra.mxu0 %v8537_v14  ;;  %8878 = vmatpush.bf16.msra.mxu2 %v8537_v14  ;;  %v344_v14 = vunpack.c.h.bf16 %v309_v54  ;;  %v805_v35 = vshrl.u32 %v694_v33, 16  ;;  %442 = vst [vmem:[#allocation2 + $0x538] sm:$0xff] %v378_v63 }
  0x34   :  { %1280 = vmatpush.bf16.msra.mxu1 %v8545_v15  ;;  %8886 = vmatpush.bf16.msra.mxu3 %v8545_v15  ;;  %v693_v15 = vpack.c.bf16 %v339_v55, %v627_v11  ;;  %v9250_v55 = vld [vmem:[#allocation7 + $0x30] sm:$0xff]  ;;  %444 = vst [vmem:[#allocation2 + $0x390] sm:$0xff] %v380_v1  ;;  %v972_v58 = vshll.u32 %v9261_v7, 16  ;;  %v8574_v1 = vld [vmem:[#allocation10 + $0x128] sm:$0xff]  ;;  %v818_v11 = vor.u32 %v816_v62, %v9213_v39  ;;  %v8581_v62 = vld [vmem:[#allocation10 + $0x160] sm:$0xff] }
  0x35   :  { %408 = vst [vmem:[#allocation2 + $0x200] sm:$0xff] %v344_v14  ;;  %v9211_v37 = vpack.c.bf16 %v344_v14, %v342_v13  ;;  %v351_v8 = vunpack.c.l.bf16 %v9250_v55  ;;  %v350_v13 = vunpack.c.h.bf16 %v9247_v52  ;;  %v352_v18 = vunpack.c.h.bf16 %v9250_v55  ;;  %v8573_v55 = vld [vmem:[#allocation10 + $0x120] sm:$0xff] }
  0x36   :  { %1232 = vmatmul.bf16.vlgmr.msra.gmra.mxu2 %v935_v36  ;;  %v793_v27 = vshrl.u32 %v693_v15, 16  ;;  %v795_v23 = vshll.u32 %v693_v15, 16  ;;  %v8583_v36 = vld [vmem:[#allocation10 + $0x170] sm:$0xff]  ;;  %413 = vst [vmem:[#allocation2 + $0x1e8] sm:$0xff] %v349_v4  ;;  %v974_v14 = vrot.slane %v972_v58, 1  ;;  %v8582_v15 = vld [vmem:[#allocation10 + $0x168] sm:$0xff] }
  0x37   :  { %1321 = vmatmul.bf16.vlgmr.msra.gmra.mxu3 %v943_v46  ;;  %1820 = vmatpush.bf16.msrb.mxu2 %v8560_v47  ;;  %v812_v45 = vshll.u32 %v9211_v37, 16  ;;  %v381_v46 = vunpack.c.l.bf16 %v9226_v16  ;;  %v807_v47 = vshll.u32 %v694_v33, 16  ;;  %415 = vst [vmem:[#allocation2 + $0x40] sm:$0xff] %v351_v8 }
  0x38   :  { %1909 = vmatpush.bf16.msrb.mxu3 %v8568_v48  ;;  %2660 = vmatpush.bf16.msrb.mxu0 %v8576_v49  ;;  %v797_v38 = vrot.slane %v795_v23, 1  ;;  %v346_v48 = vunpack.c.h.bf16 %v9205_v28  ;;  %447 = vst [vmem:[#allocation2 + $0x5b0] sm:$0xff] %v383_v20  ;;  %v975_v22 = vsel %vm791_vm0, %v970_v9, %v974_v14 }
  0x39   :  { %2749 = vmatpush.bf16.msrb.mxu1 %v8584_v50  ;;  %v9240_v49 = vpack.c.bf16 %v383_v20, %v381_v46  ;;  %v9242_v50 = vrot.slane %v812_v45, 1  ;;  %v809_v54 = vrot.slane %v807_v47, 1  ;;  %445 = vst [vmem:[#allocation2 + $0x2c0] sm:$0xff] %v381_v46  ;;  %v984_v20 = vshrl.u32 %v9261_v7, 16 }
  0x3a   :  { %v798_v43 = vor.u32 %v797_v38, %v793_v27  ;;  %410 = vst [vmem:[#allocation2 + $0x5a0] sm:$0xff] %v346_v48  ;;  %v9271_v63 = vpack.c.bf16 %v348_v51, %v346_v48  ;;  %v823_v27 = vsel %vm791_vm0, %v818_v11, %v9274_v12 }
  0x3b   :  { %1821 = vmatpush.bf16.msrb.mxu2 %v8559_v24  ;;  %v964_v57 = vshll.u32 %v9240_v49, 16  ;;  %v810_v3 = vor.u32 %v809_v54, %v805_v35  ;;  %414 = vst [vmem:[#allocation2 + $0x258] sm:$0xff] %v350_v13  ;;  %v9281_v24 = vld [vmem:[#allocation7 + $0x40] sm:$0xff]  ;;  %v976_v40 = vshrl.u32 %v9240_v49, 16  ;;  %v832_v35 = vshrl.u32 %v9234_v34, 16 }
  0x3c   :  { %1910 = vmatpush.bf16.msrb.mxu3 %v8567_v25  ;;  %2661 = vmatpush.bf16.msrb.mxu0 %v8575_v26  ;;  %v803_v17 = vsel %vm791_vm0, %v798_v43, %v9213_v39  ;;  %v824_v25 = vshrl.u32 %v9211_v37, 16  ;;  %v828_v26 = vshll.u32 %v9271_v63, 16  ;;  %416 = vst [vmem:[#allocation2 + $0x4e0] sm:$0xff] %v352_v18  ;;  %v355_v28 = vunpack.c.l.bf16 %v9281_v24  ;;  %v8557_v54 = vld [vmem:[#allocation10 + $0xa0] sm:$0xff] }
  0x3d   :  { %2750 = vmatpush.bf16.msrb.mxu1 %v8583_v36  ;;  %1192 = vmatmul.bf16.vlgmr.msra.gmra.mxu0 %v803_v17  ;;  %v966_v5 = vrot.slane %v964_v57, 1  ;;  %v815_v2 = vsel %vm791_vm0, %v810_v3, %v9242_v50  ;;  %446 = vst [vmem:[#allocation2 + $0x228] sm:$0xff] %v382_v53  ;;  %v385_v36 = vunpack.c.l.bf16 %v330_v30  ;;  %v9295_v43 = vpack.c.bf16 %v351_v8, %v349_v4  ;;  %v8565_v34 = vld [vmem:[#allocation10 + $0xe0] sm:$0xff] }
  0x3e   :  { %1281 = vmatmul.bf16.vlgmr.msra.gmra.mxu1 %v815_v2  ;;  %448 = vst [vmem:[#allocation2 + $0xc0] sm:$0xff] %v384_v60  ;;  %v826_v38 = vor.u32 %v824_v25, %v9242_v50  ;;  %v830_v39 = vrot.slane %v828_v26, 1  ;;  %v356_v31 = vunpack.c.h.bf16 %v9281_v24  ;;  %v986_v49 = vor.u32 %v984_v20, %v974_v14  ;;  %v332_v2 = vld [vmem:[#allocation7 + $0xc8] sm:$0xff]  ;;  %v9357_v20 = vld [vmem:[#allocation7 + $0x60] sm:$0xff] }
  0x3f   :  { %v967_v6 = vsel %vm791_vm0, %v962_v56, %v966_v5  ;;  %1822 = vmatpush.bf16.msrb.mxu2 %v8558_v10  ;;  %419 = vst [vmem:[#allocation2 + $0x418] sm:$0xff] %v355_v28  ;;  %v978_v17 = vor.u32 %v976_v40, %v966_v5  ;;  %v836_v47 = vshll.u32 %v9295_v43, 16  ;;  %v9311_v53 = vpack.c.bf16 %v352_v18, %v350_v13  ;;  %v8556_v40 = vld [vmem:[#allocation10 + $0x98] sm:$0xff] }
  0x40   :  { %1911 = vmatpush.bf16.msrb.mxu3 %v8566_v59  ;;  %2662 = vmatpush.bf16.msrb.mxu0 %v8574_v1  ;;  %449 = vst [vmem:[#allocation2 + $0xd8] sm:$0xff] %v385_v36  ;;  %v831_v21 = vsel %vm791_vm0, %v826_v38, %v830_v39  ;;  %v834_v56 = vor.u32 %v832_v35, %v9274_v12  ;;  %v357_v3 = vunpack.c.l.bf16 %v9315_v61  ;;  %v359_v4 = vunpack.c.l.bf16 %v9317_v0  ;;  %v334_v35 = vld [vmem:[#allocation7 + $0xd8] sm:$0xff] }
  0x41   :  { %2751 = vmatpush.bf16.msrb.mxu1 %v8582_v15  ;;  %420 = vst [vmem:[#allocation2 + $0x5c8] sm:$0xff] %v356_v31  ;;  %v838_v57 = vrot.slane %v836_v47, 1  ;;  %v840_v5 = vshrl.u32 %v9271_v63, 16  ;;  %v844_v7 = vshll.u32 %v9311_v53, 16  ;;  %v389_v9 = vunpack.c.l.bf16 %v332_v2  ;;  %v335_v47 = vld [vmem:[#allocation7 + $0xe0] sm:$0xff] }
  0x42   :  { %450 = vst [vmem:[#allocation2 + $0x428] sm:$0xff] %v386_v41  ;;  %v390_v63 = vunpack.c.h.bf16 %v332_v2  ;;  %v358_v13 = vunpack.c.h.bf16 %v9315_v61  ;;  %v360_v15 = vunpack.c.h.bf16 %v9317_v0  ;;  %v363_v24 = vunpack.c.l.bf16 %v9357_v20 }
  0x43   :  { %1823 = vmatpush.bf16.msrb.mxu2 %v8557_v54  ;;  %421 = vst [vmem:[#allocation2 + $0x340] sm:$0xff] %v357_v3  ;;  %v839_v8 = vsel %vm791_vm0, %v834_v56, %v838_v57  ;;  %v842_v10 = vor.u32 %v840_v5, %v830_v39  ;;  %v846_v59 = vrot.slane %v844_v7, 1  ;;  %v394_v54 = vunpack.c.h.bf16 %v334_v35 }
  0x44   :  { %1912 = vmatpush.bf16.msrb.mxu3 %v8565_v34  ;;  %2663 = vmatpush.bf16.msrb.mxu0 %v8573_v55  ;;  %423 = vst [vmem:[#allocation2 + $0x3b8] sm:$0xff] %v359_v4  ;;  %v9372_v34 = vpack.c.bf16 %v359_v4, %v357_v3 }
  0x45   :  { %2752 = vmatpush.bf16.msrb.mxu1 %v8581_v62  ;;  %453 = vst [vmem:[#allocation2 + $0x208] sm:$0xff] %v389_v9 }
  0x46   :  { %1237 = vmatmul.bf16.gmra.mxu2 %v951_v19  ;;  %v9278_v19 = vld [vmem:[#allocation7 + $0x38] sm:$0xff]  ;;  %422 = vst [vmem:[#allocation2 + $0x360] sm:$0xff] %v358_v13  ;;  %v868_v2 = vshll.u32 %v9372_v34, 16 }
  0x47   :  { %1326 = vmatmul.bf16.gmra.mxu3 %v959_v32  ;;  %v353_v23 = vunpack.c.l.bf16 %v9278_v19  ;;  %v331_v32 = vld [vmem:[#allocation7 + $0xc0] sm:$0xff]  ;;  %v354_v45 = vunpack.c.h.bf16 %v9278_v19  ;;  %424 = vst [vmem:[#allocation2 + $0x530] sm:$0xff] %v360_v15  ;;  %1824 = vmatpush.bf16.msrb.mxu2 %v8556_v40 }
  0x48   :  { %v387_v37 = vunpack.c.l.bf16 %v331_v32  ;;  %v388_v16 = vunpack.c.h.bf16 %v331_v32  ;;  %454 = vst [vmem:[#allocation2 + $0x4a8] sm:$0xff] %v390_v63 }
  0x49   :  { %417 = vst [vmem:[#allocation2 + $0x198] sm:$0xff] %v353_v23  ;;  %v9332_v11 = vpack.c.bf16 %v355_v28, %v353_v23  ;;  %v848_v23 = vshrl.u32 %v9295_v43, 16  ;;  %v9352_v39 = vpack.c.bf16 %v356_v31, %v354_v45  ;;  %v8572_v43 = vld [vmem:[#allocation10 + $0x118] sm:$0xff] }
  0x4a   :  { %v717_v44 = vpack.c.bf16 %v387_v37, %v385_v36  ;;  %451 = vst [vmem:[#allocation2 + $0x30] sm:$0xff] %v387_v37  ;;  %v9301_v46 = vpack.c.bf16 %v388_v16, %v386_v41  ;;  %v8564_v41 = vld [vmem:[#allocation10 + $0xd8] sm:$0xff]  ;;  %2664 = vmatpush.bf16.msrb.mxu0 %v8572_v43 }
  0x4b   :  { %418 = vst [vmem:[#allocation2 + $0x550] sm:$0xff] %v354_v45  ;;  %v852_v28 = vshll.u32 %v9332_v11, 16  ;;  %1913 = vmatpush.bf16.msrb.mxu3 %v8564_v41  ;;  %v856_v45 = vshrl.u32 %v9311_v53, 16  ;;  %v860_v31 = vshll.u32 %v9352_v39, 16  ;;  %v864_v4 = vshrl.u32 %v9332_v11, 16  ;;  %v8563_v11 = vld [vmem:[#allocation10 + $0xd0] sm:$0xff] }
  0x4c   :  { %v980_v33 = vshll.u32 %v717_v44, 16  ;;  %v988_v50 = vshll.u32 %v9301_v46, 16  ;;  %452 = vst [vmem:[#allocation2 + $0x410] sm:$0xff] %v388_v16  ;;  %v992_v1 = vshrl.u32 %v717_v44, 16  ;;  %v1000_v26 = vshrl.u32 %v9301_v46, 16  ;;  %v9355_v46 = vld [vmem:[#allocation7 + $0x58] sm:$0xff] }
  0x4d   :  { %1197 = vmatmul.bf16.gmra.mxu0 %v823_v27  ;;  %v847_v27 = vsel %vm791_vm0, %v842_v10, %v846_v59  ;;  %v850_v44 = vor.u32 %v848_v23, %v838_v57  ;;  %v854_v16 = vrot.slane %v852_v28, 1  ;;  %v361_v19 = vunpack.c.l.bf16 %v9355_v46  ;;  %427 = vst [vmem:[#allocation2 + $0x460] sm:$0xff] %v363_v24  ;;  %v336_v28 = vld [vmem:[#allocation7 + $0xe8] sm:$0xff] }
  0x4e   :  { %v982_v48 = vrot.slane %v980_v33, 1  ;;  %v990_v52 = vrot.slane %v988_v50, 1  ;;  %1286 = vmatmul.bf16.gmra.mxu1 %v831_v21  ;;  %v8580_v33 = vld [vmem:[#allocation10 + $0x158] sm:$0xff]  ;;  %v858_v50 = vor.u32 %v856_v45, %v846_v59  ;;  %v362_v56 = vunpack.c.h.bf16 %v9355_v46  ;;  %458 = vst [vmem:[#allocation2 + $0x298] sm:$0xff] %v394_v54 }
  0x4f   :  { %2753 = vmatpush.bf16.msrb.mxu1 %v8580_v33  ;;  %425 = vst [vmem:[#allocation2 + $0x1f0] sm:$0xff] %v361_v19  ;;  %v855_v21 = vsel %vm791_vm0, %v850_v44, %v854_v16  ;;  %v396_v57 = vunpack.c.h.bf16 %v335_v47  ;;  %1914 = vmatpush.bf16.msrb.mxu3 %v8563_v11  ;;  %v398_v41 = vunpack.c.h.bf16 %v336_v28  ;;  %v9416_v43 = vpack.c.bf16 %v363_v24, %v361_v19 }
  0x50   :  { %v983_v51 = vsel %vm791_vm0, %v978_v17, %v982_v48  ;;  %v991_v60 = vsel %vm791_vm0, %v986_v49, %v990_v52  ;;  %v994_v18 = vor.u32 %v992_v1, %v982_v48  ;;  %v1002_v32 = vor.u32 %v1000_v26, %v990_v52  ;;  %426 = vst [vmem:[#allocation2 + $0x3a0] sm:$0xff] %v362_v56  ;;  %v9397_v26 = vld [vmem:[#allocation7 + $0x68] sm:$0xff] }
  0x51   :  { %v393_v48 = vunpack.c.l.bf16 %v334_v35  ;;  %v395_v49 = vunpack.c.l.bf16 %v335_v47  ;;  %v9378_v7 = vpack.c.bf16 %v396_v57, %v394_v54  ;;  %460 = vst [vmem:[#allocation2 + $0x88] sm:$0xff] %v396_v57  ;;  %v9392_v1 = vpack.c.bf16 %v360_v15, %v358_v13 }
  0x52   :  { %v365_v61 = vunpack.c.l.bf16 %v9397_v26  ;;  %v872_v13 = vshrl.u32 %v9352_v39, 16  ;;  %v880_v19 = vshrl.u32 %v9372_v34, 16  ;;  %v884_v24 = vshll.u32 %v9416_v43, 16  ;;  %462 = vst [vmem:[#allocation2 + $0x5f0] sm:$0xff] %v398_v41 }
  0x53   :  { %457 = vst [vmem:[#allocation2 + $0x368] sm:$0xff] %v393_v48  ;;  %v721_v55 = vpack.c.bf16 %v395_v49, %v393_v48  ;;  %v876_v15 = vshll.u32 %v9392_v1, 16  ;;  %v1032_v35 = vshrl.u32 %v9378_v7, 16  ;;  %v888_v46 = vshrl.u32 %v9392_v1, 16 }
  0x54   :  { %459 = vst [vmem:[#allocation2 + $0x420] sm:$0xff] %v395_v49 }
  0x55   :  { %v1012_v5 = vshll.u32 %v721_v55, 16  ;;  %429 = vst [vmem:[#allocation2 + $0x1d0] sm:$0xff] %v365_v61  ;;  %v1024_v40 = vshrl.u32 %v721_v55, 16 }
  0x56   :  { %1242 = vmatmul.bf16.gmra.mxu2 %v967_v6  ;;  %v333_v6 = vld [vmem:[#allocation7 + $0xd0] sm:$0xff] }
  0x57   :  { %1331 = vmatmul.bf16.gmra.mxu3 %v975_v22  ;;  %v391_v58 = vunpack.c.l.bf16 %v333_v6  ;;  %v392_v14 = vunpack.c.h.bf16 %v333_v6  ;;  %v1014_v6 = vrot.slane %v1012_v5, 1  ;;  %v8562_v5 = vld [vmem:[#allocation10 + $0xc8] sm:$0xff] }
  0x58   :  { %1915 = vmatpush.bf16.msrb.mxu3 %v8562_v5 }
  0x59   :  { %v719_v12 = vpack.c.bf16 %v391_v58, %v389_v9  ;;  %455 = vst [vmem:[#allocation2 + $0x5b8] sm:$0xff] %v391_v58  ;;  %v9338_v25 = vpack.c.bf16 %v392_v14, %v390_v63  ;;  %v1020_v58 = vshll.u32 %v9378_v7, 16  ;;  %v8555_v63 = vld [vmem:[#allocation10 + $0x90] sm:$0xff]  ;;  %v1026_v45 = vor.u32 %v1024_v40, %v1014_v6  ;;  %v8570_v7 = vld [vmem:[#allocation10 + $0x108] sm:$0xff]  ;;  %v8569_v40 = vld [vmem:[#allocation10 + $0x100] sm:$0xff] }
  0x5a   :  { %456 = vst [vmem:[#allocation2 + $0x218] sm:$0xff] %v392_v14  ;;  %v866_v14 = vor.u32 %v864_v4, %v854_v16  ;;  %1825 = vmatpush.bf16.msrb.mxu2 %v8555_v63  ;;  %v366_v16 = vunpack.c.h.bf16 %v9397_v26  ;;  %v886_v4 = vrot.slane %v884_v24, 1 }
  0x5b   :  { %v996_v22 = vshll.u32 %v719_v12, 16  ;;  %v1004_v36 = vshll.u32 %v9338_v25, 16  ;;  %v1008_v52 = vshrl.u32 %v719_v12, 16  ;;  %v1022_v59 = vrot.slane %v1020_v58, 1  ;;  %v8571_v12 = vld [vmem:[#allocation10 + $0x110] sm:$0xff] }
  0x5c   :  { %2665 = vmatpush.bf16.msrb.mxu0 %v8571_v12  ;;  %430 = vst [vmem:[#allocation2 + $0x4f0] sm:$0xff] %v366_v16 }
  0x5d   :  { %1202 = vmatmul.bf16.gmra.mxu0 %v839_v8  ;;  %v998_v30 = vrot.slane %v996_v22, 1  ;;  %v1006_v38 = vrot.slane %v1004_v36, 1  ;;  %v1016_v8 = vshrl.u32 %v9338_v25, 16  ;;  %v8579_v25 = vld [vmem:[#allocation10 + $0x150] sm:$0xff]  ;;  %v1034_v49 = vor.u32 %v1032_v35, %v1022_v59 }
  0x5e   :  { %1291 = vmatmul.bf16.gmra.mxu1 %v847_v27  ;;  %v9399_v27 = vld [vmem:[#allocation7 + $0x70] sm:$0xff] }
  0x5f   :  { %v999_v37 = vsel %vm791_vm0, %v994_v18, %v998_v30  ;;  %v1007_v17 = vsel %vm791_vm0, %v1002_v32, %v1006_v38  ;;  %v1010_v62 = vor.u32 %v1008_v52, %v998_v30  ;;  %v1018_v9 = vor.u32 %v1016_v8, %v1006_v38  ;;  %2754 = vmatpush.bf16.msrb.mxu1 %v8579_v25  ;;  %v337_v30 = vld [vmem:[#allocation7 + $0xf0] sm:$0xff] }
  0x60   :  { %v870_v18 = vrot.slane %v868_v2, 1  ;;  %v367_v0 = vunpack.c.l.bf16 %v9399_v27  ;;  %v397_v32 = vunpack.c.l.bf16 %v336_v28  ;;  %v399_v36 = vunpack.c.l.bf16 %v337_v30  ;;  %2666 = vmatpush.bf16.msrb.mxu0 %v8570_v7 }
  0x61   :  { %v1015_v10 = vsel %vm791_vm0, %v1010_v62, %v1014_v6  ;;  %v1023_v22 = vsel %vm791_vm0, %v1018_v9, %v1022_v59  ;;  %v878_v38 = vrot.slane %v876_v15, 1  ;;  %v368_v33 = vunpack.c.h.bf16 %v9399_v27  ;;  %v8554_v62 = vld [vmem:[#allocation10 + $0x88] sm:$0xff] }
  0x62   :  { %v871_v23 = vsel %vm791_vm0, %v866_v14, %v870_v18  ;;  %431 = vst [vmem:[#allocation2 + $0x50] sm:$0xff] %v367_v0  ;;  %v723_v44 = vpack.c.bf16 %v399_v36, %v397_v32  ;;  %v8578_v9 = vld [vmem:[#allocation10 + $0x148] sm:$0xff]  ;;  %1826 = vmatpush.bf16.msrb.mxu2 %v8554_v62  ;;  %v9449_v63 = vpack.c.bf16 %v367_v0, %v365_v61  ;;  %v896_v28 = vshrl.u32 %v9416_v43, 16  ;;  %v8553_v0 = vld [vmem:[#allocation10 + $0x80] sm:$0xff] }
  0x63   :  { %461 = vst [vmem:[#allocation2 + $0x130] sm:$0xff] %v397_v32  ;;  %2755 = vmatpush.bf16.msrb.mxu1 %v8578_v9  ;;  %v9457_v61 = vpack.c.bf16 %v368_v33, %v366_v16 }
  0x64   :  { %463 = vst [vmem:[#allocation2 + $0x230] sm:$0xff] %v399_v36  ;;  %v1040_v59 = vshrl.u32 %v723_v44, 16  ;;  %2667 = vmatpush.bf16.msrb.mxu0 %v8569_v40 }
  0x65   :  { %432 = vst [vmem:[#allocation2 + $0x4a0] sm:$0xff] %v368_v33  ;;  %v908_v16 = vshll.u32 %v9457_v61, 16 }
  0x66   :  { %1247 = vmatmul.bf16.gmra.mxu2 %v983_v51  ;;  %v862_v51 = vrot.slane %v860_v31, 1  ;;  %v1028_v31 = vshll.u32 %v723_v44, 16 }
  0x67   :  { %1336 = vmatmul.bf16.gmra.mxu3 %v991_v60  ;;  %v364_v60 = vunpack.c.h.bf16 %v9357_v20  ;;  %1827 = vmatpush.bf16.msrb.mxu2 %v8553_v0  ;;  %v910_v35 = vrot.slane %v908_v16, 1 }
  0x68   :  { %v863_v3 = vsel %vm791_vm0, %v858_v50, %v862_v51  ;;  %v1030_v48 = vrot.slane %v1028_v31, 1  ;;  %v1430_v31 = vld [vmem:[#allocation2 + $0x438] sm:$0xff] }
  0x69   :  { %428 = vst [vmem:[#allocation2 + $0x2c8] sm:$0xff] %v364_v60  ;;  %v9431_v57 = vpack.c.bf16 %v364_v60, %v362_v56  ;;  %v890_v60 = vor.u32 %v888_v46, %v878_v38 }
  0x6a   :  { %v1031_v52 = vsel %vm791_vm0, %v1026_v45, %v1030_v48  ;;  %v8577_v45 = vld [vmem:[#allocation10 + $0x140] sm:$0xff] }
  0x6b   :  { %v892_v20 = vshll.u32 %v9431_v57, 16  ;;  %2756 = vmatpush.bf16.msrb.mxu1 %v8577_v45  ;;  %v904_v26 = vshrl.u32 %v9431_v57, 16 }
  0x6d   :  { %1207 = vmatmul.bf16.gmra.mxu0 %v855_v21  ;;  %v894_v58 = vrot.slane %v892_v20, 1 }
  0x6e   :  { %1296 = vmatmul.bf16.gmra.mxu1 %v863_v3  ;;  %v882_v3 = vor.u32 %v880_v19, %v870_v18  ;;  %v1042_v18 = vor.u32 %v1040_v59, %v1030_v48  ;;  %v1431_v48 = vld [vmem:[#allocation2 + $0xf0] sm:$0xff] }
  0x70   :  { %v887_v56 = vsel %vm791_vm0, %v882_v3, %v886_v4  ;;  %v912_v3 = vshrl.u32 %v9449_v63, 16 }
  0x76   :  { %1252 = vmatmul.bf16.gmra.mxu2 %v999_v37  ;;  %v874_v37 = vor.u32 %v872_v13, %v862_v51  ;;  %v338_v51 = vld [vmem:[#allocation7 + $0xf8] sm:$0xff]  ;;  %v895_v13 = vsel %vm791_vm0, %v890_v60, %v894_v58 }
  0x77   :  { %1341 = vmatmul.bf16.gmra.mxu3 %v1007_v17  ;;  %v400_v17 = vunpack.c.h.bf16 %v337_v30  ;;  %v401_v55 = vunpack.c.l.bf16 %v338_v51  ;;  %v402_v8 = vunpack.c.h.bf16 %v338_v51  ;;  %v900_v30 = vshll.u32 %v9449_v63, 16  ;;  %v1426_v51 = vld [vmem:[#allocation2 + $0x528] sm:$0xfc] }
  0x78   :  { %v879_v47 = vsel %vm791_vm0, %v874_v37, %v878_v38  ;;  %v8561_v38 = vld [vmem:[#allocation10 + $0xc0] sm:$0xff] }
  0x79   :  { %v724_v21 = vpack.c.bf16 %v400_v17, %v398_v41  ;;  %464 = vst [vmem:[#allocation2 + $0x2e0] sm:$0xff] %v400_v17  ;;  %v898_v41 = vor.u32 %v896_v28, %v886_v4  ;;  %v902_v44 = vrot.slane %v900_v30, 1  ;;  %1916 = vmatpush.bf16.msrb.mxu3 %v8561_v38 }
  0x7a   :  { %465 = vst [vmem:[#allocation2 + $0x110] sm:$0xff] %v401_v55 }
  0x7b   :  { %v1036_v50 = vshll.u32 %v724_v21, 16  ;;  %466 = vst [vmem:[#allocation2 + $0xa8] sm:$0xff] %v402_v8  ;;  %v1048_v25 = vshrl.u32 %v724_v21, 16  ;;  %v903_v33 = vsel %vm791_vm0, %v898_v41, %v902_v44  ;;  %v906_v21 = vor.u32 %v904_v26, %v894_v58  ;;  %v8592_v58 = vld [vmem:[#allocation10 + $0x1b8] sm:$0xff] }
  0x7c   :  { %3500 = vmatpush.bf16.msra.mxu2 %v8592_v58  ;;  %v1436_v41 = vld [vmem:[#allocation2 + $0x4b8] sm:$0xff] }
  0x7d   :  { %1212 = vmatmul.bf16.gmra.mxu0 %v871_v23  ;;  %v1038_v54 = vrot.slane %v1036_v50, 1  ;;  %v1428_v50 = vld [vmem:[#allocation2 + $0x5d0] sm:$0xff]  ;;  %v911_v8 = vsel %vm791_vm0, %v906_v21, %v910_v35 }
  0x7e   :  { %1301 = vmatmul.bf16.gmra.mxu1 %v879_v47  ;;  %v1432_v47 = vld [vmem:[#allocation2 + $0x60] sm:$0xff]  ;;  %v1492_v55 = vpack.c.bf16 %v1428_v50, %v1426_v51 }
  0x7f   :  { %v1039_v6 = vsel %vm791_vm0, %v1034_v49, %v1038_v54  ;;  %v1050_v36 = vor.u32 %v1048_v25, %v1038_v54  ;;  %v1433_v49 = vld [vmem:[#allocation2 + $0x200] sm:$0xff]  ;;  %v1494_v62 = vpack.c.bf16 %v1432_v47, %v1430_v31 }
  0x80   :  { %v1429_v54 = vld [vmem:[#allocation2 + $0x260] sm:$0xff]  ;;  %v9471_v7 = vpack.c.bf16 %v1433_v49, %v1431_v48  ;;  %v1626_v4 = vrot.slane %v1492_v55, 1 }
  0x81   :  { %v2237_v38 = vshrl.u32 %v1494_v62, 16  ;;  %v2240_v40 = vshll.u32 %v1494_v62, 16 }
  0x82   :  { %v692_v12 = vld [vmem:[#allocation2 + $0xa8] sm:$0x1] }
  0x83   :  { %v726_v14 = vpack.c.bf16 %v692_v12, %v692_v12  ;;  %v2239_v48 = vrot.slane %v2237_v38, 1  ;;  %v2242_v49 = vrot.slane %v2240_v40, 2 }
  0x85   :  { %v1052_v23 = vshll.u32 %v726_v14, 16  ;;  %v2062_v14 = vld [vmem:[#allocation2 + $0x528] sm:$0xf8] }
  0x86   :  { %1257 = vmatmul.bf16.gmra.mxu2 %v1015_v10  ;;  %v691_v10 = vld [vmem:[#allocation2 + $0x110] sm:$0x1] }
  0x87   :  { %1346 = vmatmul.bf16.gmra.mxu3 %v1023_v22  ;;  %v725_v11 = vpack.c.bf16 %v691_v10, %v691_v10  ;;  %v1054_v37 = vrot.slane %v1052_v23, 1  ;;  %v8600_v10 = vld [vmem:[#allocation10 + $0x1f8] sm:$0xff] }
  0x88   :  { %3589 = vmatpush.bf16.msra.mxu3 %v8600_v10  ;;  %v2243_v10 = vor.u32 %v2242_v49, %v2239_v48 }
  0x89   :  { %v1044_v22 = vshll.u32 %v725_v11, 16  ;;  %v1055_v17 = vsel %vm791_vm0, %v1050_v36, %v1054_v37  ;;  %v914_v11 = vor.u32 %v912_v3, %v902_v44  ;;  %v8616_v36 = vld [vmem:[#allocation10 + $0x278] sm:$0xff]  ;;  %v1435_v44 = vld [vmem:[#allocation2 + $0x5a0] sm:$0xff] }
  0x8a   :  { %4088 = vmatpush.bf16.msra.mxu1 %v8616_v36 }
  0x8b   :  { %v1046_v32 = vrot.slane %v1044_v22, 1  ;;  %v2128_v22 = vpack.c.bf16 %v1428_v50, %v2062_v14 }
  0x8d   :  { %1217 = vmatmul.bf16.gmra.mxu0 %v887_v56  ;;  %v1047_v27 = vsel %vm791_vm0, %v1042_v18, %v1046_v32  ;;  %v1630_v56 = vrot.slane %v9471_v7, 1  ;;  %v920_v18 = vshrl.u32 %v9457_v61, 16  ;;  %v8608_v32 = vld [vmem:[#allocation10 + $0x238] sm:$0xff]  ;;  %v2229_v0 = vshrl.u32 %v2128_v22, 16 }
  0x8e   :  { %1306 = vmatmul.bf16.gmra.mxu1 %v895_v13  ;;  %v919_v13 = vsel %vm791_vm0, %v914_v11, %v9146_v29  ;;  %v2232_v45 = vshll.u32 %v2128_v22, 16  ;;  %3999 = vmatpush.bf16.msra.mxu0 %v8608_v32 }
  0x8f   :  { %v922_v37 = vor.u32 %v920_v18, %v910_v35  ;;  %v2231_v35 = vrot.slane %v2229_v0, 1 }
  0x91   :  { %v927_v31 = vsel %vm791_vm0, %v922_v37, %v9162_v42  ;;  %v2254_v42 = vshrl.u32 %v9471_v7, 16  ;;  %v1438_v37 = vld [vmem:[#allocation2 + $0x1e8] sm:$0xff] }
  0x93   :  { %v2256_v14 = vrot.slane %v2254_v42, 1 }
  0x96   :  { %1262 = vmatmul.bf16.gmra.mxu2 %v1031_v52  ;;  %v1427_v52 = vld [vmem:[#allocation2 + $0x1c0] sm:$0xfc] }
  0x97   :  { %1351 = vmatmul.bf16.gmra.mxu3 %v1039_v6  ;;  %v1493_v5 = vpack.c.bf16 %v1429_v54, %v1427_v52  ;;  %v1627_v6 = vrot.slane %v1494_v62, 1  ;;  %v2234_v52 = vrot.slane %v2232_v45, 2 }
  0x99   :  { %v1629_v9 = vrot.slane %v1493_v5, 1  ;;  %v1628_v60 = vsel %vm1625_vm1, %v1626_v4, %v1627_v6  ;;  %v2235_v58 = vor.u32 %v2234_v52, %v2231_v35  ;;  %v8591_v52 = vld [vmem:[#allocation10 + $0x1b0] sm:$0xff] }
  0x9a   :  { %3501 = vmatpush.bf16.msra.mxu2 %v8591_v52 }
  0x9b   :  { %v1631_v12 = vsel %vm1625_vm1, %v1629_v9, %v1630_v56 }
  0x9d   :  { %1222 = vmatmul.bf16.gmra.mxu0 %v903_v33  ;;  %v2063_v33 = vld [vmem:[#allocation2 + $0x1c0] sm:$0xf8] }
  0x9e   :  { %1311 = vmatmul.bf16.gmra.mxu1 %v911_v8  ;;  %v2129_v50 = vpack.c.bf16 %v1429_v54, %v2063_v33 }
  0xa0   :  { %v2246_v4 = vshrl.u32 %v2129_v50, 16  ;;  %v2249_v9 = vshll.u32 %v2129_v50, 16 }
  0xa2   :  { %v2248_v11 = vrot.slane %v2246_v4, 1 }
  0xa6   :  { %1267 = vmatmul.bf16.gmra.mxu2 %v1047_v27  ;;  %v1434_v27 = vld [vmem:[#allocation2 + $0x80] sm:$0xff] }
  0xa7   :  { %1356 = vmatmul.bf16.gmra.mxu3 %v1055_v17  ;;  %v1437_v17 = vld [vmem:[#allocation2 + $0x310] sm:$0xff]  ;;  %v1496_v21 = vpack.c.bf16 %v1436_v41, %v1434_v27  ;;  %v1440_v27 = vld [vmem:[#allocation2 + $0x40] sm:$0xff] }
  0xa8   :  { %v9489_v47 = vpack.c.bf16 %v1437_v17, %v1435_v44  ;;  %v1498_v40 = vpack.c.bf16 %v1440_v27, %v1438_v37  ;;  %v2077_v37 = vld [vmem:[#allocation2 + $0x4e0] sm:$0xff] }
  0xa9   :  { %v1632_v62 = vrot.slane %v1496_v21, 1  ;;  %v2263_v0 = vshrl.u32 %v1496_v21, 16 }
  0xaa   :  { %v1634_v5 = vrot.slane %v9489_v47, 1 }
  0xab   :  { %v1633_v8 = vsel %vm1625_vm1, %v1627_v6, %v1632_v62  ;;  %v2265_v45 = vrot.slane %v2263_v0, 1 }
  0xac   :  { %v1635_v54 = vsel %vm1625_vm1, %v1630_v56, %v1634_v5  ;;  %v2266_v56 = vshll.u32 %v1496_v21, 16  ;;  %v2272_v21 = vshrl.u32 %v9489_v47, 16 }
  0xad   :  { %1227 = vmatmul.bf16.gmra.mxu0 %v919_v13 }
  0xae   :  { %1316 = vmatmul.bf16.gmra.mxu1 %v927_v31  ;;  %v2268_v33 = vrot.slane %v2266_v56, 2  ;;  %v1638_v31 = vrot.slane %v9311_v53, 1  ;;  %v2274_v42 = vrot.slane %v2272_v21, 1 }
  0xb0   :  { %v2269_v4 = vor.u32 %v2268_v33, %v2265_v45  ;;  %v1642_v33 = vrot.slane %v9352_v39, 1 }
  0xb6   :  { %1828 = vmatmul.bf16.vlgmr.msrb.gmra.mxu2 %v1628_v60  ;;  %v2257_v60 = vshll.u32 %v9471_v7, 16 }
  0xb7   :  { %1917 = vmatmul.bf16.vlgmr.msrb.gmra.mxu3 %v1631_v12  ;;  %v2251_v12 = vrot.slane %v2249_v9, 2  ;;  %v1639_v9 = vsel %vm1625_vm1, %v1634_v5, %v1638_v31  ;;  %v1442_v5 = vld [vmem:[#allocation2 + $0x198] sm:$0xff] }
  0xb8   :  { %v2259_v22 = vrot.slane %v2257_v60, 2 }
  0xb9   :  { %v1233_v59 = vpop.f32.mrf.mxu2  ;;  %v2252_v7 = vor.u32 %v2251_v12, %v2248_v11  ;;  %v8607_v11 = vld [vmem:[#allocation10 + $0x230] sm:$0xff] }
  0xba   :  { %v1322_v25 = vpop.f32.mrf.mxu3  ;;  %v1193_v6 = vpop.f32.mrf.mxu0  ;;  %v2260_v36 = vor.u32 %v2259_v22, %v2256_v14  ;;  %4000 = vmatpush.bf16.msra.mxu0 %v8607_v11 }
  0xbb   :  { %v9483_v23 = vadd.f32 %v1322_v25, %v1233_v59  ;;  %v2244_v25 = vsel %vm2227_vm2, %v2235_v58, %v2243_v10  ;;  %v1282_v44 = vpop.f32.mrf.mxu1 }
  0xbc   :  { %v2261_v41 = vsel %vm2227_vm2, %v2252_v7, %v2260_v36  ;;  %v9503_v35 = vadd.f32 %v1282_v44, %v1193_v6  ;;  %v1444_v6 = vld [vmem:[#allocation2 + $0x418] sm:$0xff] }
  0xbd   :  { %2668 = vmatmul.bf16.vlgmr.msrb.gmra.mxu0 %v2244_v25  ;;  %v2281_v25 = vshrl.u32 %v1498_v40, 16  ;;  %v2075_v7 = vld [vmem:[#allocation2 + $0x258] sm:$0xff]  ;;  %v1500_v0 = vpack.c.bf16 %v1444_v6, %v1442_v5  ;;  %v2079_v5 = vld [vmem:[#allocation2 + $0x550] sm:$0xff]  ;;  %v2081_v6 = vld [vmem:[#allocation2 + $0x5c8] sm:$0xff] }
  0xbe   :  { %2757 = vmatmul.bf16.vlgmr.msrb.gmra.mxu1 %v2261_v41  ;;  %v2135_v56 = vpack.c.bf16 %v2077_v37, %v2075_v7 }
  0xbf   :  { %v2283_v44 = vrot.slane %v2281_v25, 1  ;;  %v1640_v45 = vrot.slane %v1500_v0, 1 }
  0xc0   :  { %v2290_v21 = vshrl.u32 %v2135_v56, 16 }
  0xc1   :  { %v1235_v29 = vpop.f32.mrf.mxu2 }
  0xc2   :  { %v1324_v51 = vpop.f32.mrf.mxu3  ;;  %v1195_v17 = vpop.f32.mrf.mxu0 }
  0xc3   :  { %v9491_v55 = vadd.f32 %v1324_v51, %v1235_v29  ;;  %v1636_v29 = vrot.slane %v1498_v40, 1  ;;  %v2275_v51 = vshll.u32 %v9489_v47, 16  ;;  %v1284_v58 = vpop.f32.mrf.mxu1  ;;  %v8615_v47 = vld [vmem:[#allocation10 + $0x270] sm:$0xff] }
  0xc4   :  { %4089 = vmatpush.bf16.msra.mxu1 %v8615_v47  ;;  %v2299_v47 = vshrl.u32 %v1500_v0, 16 }
  0xc5   :  { %v1637_v50 = vsel %vm1625_vm1, %v1632_v62, %v1636_v29  ;;  %v2277_v60 = vrot.slane %v2275_v51, 2  ;;  %v2270_v62 = vsel %vm2227_vm2, %v2243_v10, %v2269_v4  ;;  %v2293_v51 = vshll.u32 %v2135_v56, 16 }
  0xc6   :  { %1833 = vmatmul.bf16.gmra.mxu2 %v1633_v8  ;;  %v8599_v8 = vld [vmem:[#allocation10 + $0x1f0] sm:$0xff]  ;;  %v1646_v56 = vrot.slane %v9392_v1, 1  ;;  %v2337_v1 = vrot.slane %v896_v28, 1 }
  0xc7   :  { %1922 = vmatmul.bf16.gmra.mxu3 %v1635_v54  ;;  %v2278_v14 = vor.u32 %v2277_v60, %v2274_v42  ;;  %v2295_v42 = vrot.slane %v2293_v51, 2 }
  0xc8   :  { %3590 = vmatpush.bf16.msra.mxu3 %v8599_v8  ;;  %v1643_v8 = vsel %vm1625_vm1, %v1638_v31, %v1642_v33  ;;  %v1647_v51 = vsel %vm1625_vm1, %v1642_v33, %v1646_v56 }
  0xc9   :  { %v1238_v59 = vpop.f32.mrf.mxu2  ;;  %v2279_v10 = vsel %vm2227_vm2, %v2260_v36, %v2278_v14 }
  0xca   :  { %v1327_v13 = vpop.f32.mrf.mxu3  ;;  %v1198_v54 = vpop.f32.mrf.mxu0 }
  0xcb   :  { %v9499_v32 = vadd.f32 %v1327_v13, %v1238_v59  ;;  %v9512_v59 = vadd.f32 %v1284_v58, %v1195_v17  ;;  %v2284_v13 = vshll.u32 %v1498_v40, 16  ;;  %v1641_v40 = vsel %vm1625_vm1, %v1636_v29, %v1640_v45 }
  0xcd   :  { %2673 = vmatmul.bf16.gmra.mxu0 %v2270_v62  ;;  %v2286_v17 = vrot.slane %v2284_v13, 2  ;;  %v2137_v13 = vpack.c.bf16 %v2081_v6, %v2079_v5 }
  0xce   :  { %2762 = vmatmul.bf16.gmra.mxu1 %v2279_v10 }
  0xcf   :  { %v2287_v36 = vor.u32 %v2286_v17, %v2283_v44  ;;  %v2311_v17 = vshll.u32 %v2137_v13, 16 }
  0xd1   :  { %v1240_v38 = vpop.f32.mrf.mxu2  ;;  %v2288_v58 = vsel %vm2227_vm2, %v2269_v4, %v2287_v36  ;;  %v1644_v4 = vrot.slane %v9372_v34, 1  ;;  %v2328_v34 = vrot.slane %v888_v46, 1 }
  0xd2   :  { %v1329_v48 = vpop.f32.mrf.mxu3  ;;  %v1200_v41 = vpop.f32.mrf.mxu0 }
  0xd3   :  { %v9505_v49 = vadd.f32 %v1329_v48, %v1240_v38  ;;  %v1287_v38 = vpop.f32.mrf.mxu1  ;;  %v1645_v44 = vsel %vm1625_vm1, %v1640_v45, %v1644_v4 }
  0xd4   :  { %v9518_v48 = vadd.f32 %v1287_v38, %v1198_v54 }
  0xd6   :  { %1838 = vmatmul.bf16.gmra.mxu2 %v1637_v50 }
  0xd7   :  { %1927 = vmatmul.bf16.gmra.mxu3 %v1639_v9 }
  0xd9   :  { %v1243_v53 = vpop.f32.mrf.mxu2 }
  0xda   :  { %v1332_v12 = vpop.f32.mrf.mxu3  ;;  %v1203_v39 = vpop.f32.mrf.mxu0 }
  0xdb   :  { %v9514_v22 = vadd.f32 %v1332_v12, %v1243_v53  ;;  %v2292_v53 = vrot.slane %v2290_v21, 1  ;;  %v1289_v60 = vpop.f32.mrf.mxu1  ;;  %v2302_v12 = vshll.u32 %v1500_v0, 16  ;;  %v2308_v0 = vshrl.u32 %v2137_v13, 16 }
  0xdc   :  { %v9525_v54 = vadd.f32 %v1289_v60, %v1200_v41  ;;  %v2319_v13 = vrot.slane %v880_v19, 1 }
  0xdd   :  { %2678 = vmatmul.bf16.gmra.mxu0 %v2288_v58  ;;  %v2296_v62 = vor.u32 %v2295_v42, %v2292_v53  ;;  %v2304_v10 = vrot.slane %v2302_v12, 2  ;;  %v2313_v53 = vrot.slane %v2311_v17, 2  ;;  %v8606_v58 = vld [vmem:[#allocation10 + $0x228] sm:$0xff] }
  0xde   :  { %4001 = vmatpush.bf16.msra.mxu0 %v8606_v58 }
  0xdf   :  { %v2297_v25 = vsel %vm2227_vm2, %v2278_v14, %v2296_v62  ;;  %v8590_v14 = vld [vmem:[#allocation10 + $0x1a8] sm:$0xff] }
  0xe0   :  { %2767 = vmatmul.bf16.gmra.mxu1 %v2297_v25  ;;  %3502 = vmatpush.bf16.msra.mxu2 %v8590_v14 }
  0xe1   :  { %v1245_v27 = vpop.f32.mrf.mxu2 }
  0xe2   :  { %v1334_v50 = vpop.f32.mrf.mxu3  ;;  %v1205_v37 = vpop.f32.mrf.mxu0 }
  0xe3   :  { %v9521_v52 = vadd.f32 %v1334_v50, %v1245_v27  ;;  %v1292_v7 = vpop.f32.mrf.mxu1  ;;  %v2301_v27 = vrot.slane %v2299_v47, 1 }
  0xe4   :  { %v9532_v38 = vadd.f32 %v1292_v7, %v1203_v39  ;;  %v1648_v7 = vrot.slane %v9416_v43, 1 }
  0xe5   :  { %v2305_v21 = vor.u32 %v2304_v10, %v2301_v27 }
  0xe6   :  { %1843 = vmatmul.bf16.gmra.mxu2 %v1641_v40  ;;  %v8598_v40 = vld [vmem:[#allocation10 + $0x1e8] sm:$0xff] }
  0xe7   :  { %1932 = vmatmul.bf16.gmra.mxu3 %v1643_v8  ;;  %v2306_v45 = vsel %vm2227_vm2, %v2287_v36, %v2305_v21  ;;  %v2322_v36 = vrot.slane %v868_v2, 2  ;;  %v2331_v2 = vrot.slane %v876_v15, 2  ;;  %v2340_v15 = vrot.slane %v884_v24, 2 }
  0xe8   :  { %3591 = vmatpush.bf16.msra.mxu3 %v8598_v40  ;;  %v2346_v24 = vrot.slane %v904_v26, 1  ;;  %v1460_v26 = vld [vmem:[#allocation2 + $0x458] sm:$0xff] }
  0xe9   :  { %v1248_v9 = vpop.f32.mrf.mxu2 }
  0xea   :  { %v1337_v29 = vpop.f32.mrf.mxu3  ;;  %v1208_v60 = vpop.f32.mrf.mxu0 }
  0xeb   :  { %v9527_v11 = vadd.f32 %v1337_v29, %v1248_v9  ;;  %v2310_v9 = vrot.slane %v2308_v0, 1  ;;  %v1294_v42 = vpop.f32.mrf.mxu1  ;;  %v8614_v29 = vld [vmem:[#allocation10 + $0x268] sm:$0xff] }
  0xec   :  { %v9539_v39 = vadd.f32 %v1294_v42, %v1205_v37  ;;  %4090 = vmatpush.bf16.msra.mxu1 %v8614_v29  ;;  %v1650_v37 = vrot.slane %v9431_v57, 1  ;;  %v1461_v57 = vld [vmem:[#allocation2 + $0x498] sm:$0xff] }
  0xed   :  { %2683 = vmatmul.bf16.gmra.mxu0 %v2306_v45  ;;  %v2314_v12 = vor.u32 %v2313_v53, %v2310_v9 }
  0xee   :  { %v1651_v0 = vsel %vm1625_vm1, %v1646_v56, %v1650_v37 }
  0xef   :  { %v2315_v6 = vsel %vm2227_vm2, %v2296_v62, %v2314_v12  ;;  %v2323_v62 = vor.u32 %v2322_v36, %v2319_v13 }
  0xf0   :  { %2772 = vmatmul.bf16.gmra.mxu1 %v2315_v6  ;;  %v2341_v6 = vor.u32 %v2340_v15, %v2337_v1 }
  0xf1   :  { %v1250_v31 = vpop.f32.mrf.mxu2  ;;  %v2324_v40 = vsel %vm2227_vm2, %v2305_v21, %v2323_v62  ;;  %v1652_v21 = vrot.slane %v9449_v63, 1  ;;  %v2367_v63 = vrot.slane %v908_v16, 2 }
  0xf2   :  { %v1339_v41 = vpop.f32.mrf.mxu3  ;;  %v1210_v25 = vpop.f32.mrf.mxu0  ;;  %v2342_v36 = vsel %vm2227_vm2, %v2323_v62, %v2341_v6 }
  0xf3   :  { %v9535_v50 = vadd.f32 %v1339_v41, %v1250_v31  ;;  %v1297_v31 = vpop.f32.mrf.mxu1  ;;  %v1649_v41 = vsel %vm1625_vm1, %v1644_v4, %v1648_v7  ;;  %v1653_v29 = vsel %vm1625_vm1, %v1648_v7, %v1652_v21 }
  0xf4   :  { %v9550_v27 = vadd.f32 %v1297_v31, %v1208_v60  ;;  %v1654_v60 = vrot.slane %v9457_v61, 1  ;;  %v2349_v31 = vrot.slane %v892_v20, 2 }
  0xf6   :  { %1848 = vmatmul.bf16.gmra.mxu2 %v1645_v44  ;;  %v1655_v28 = vsel %vm1625_vm1, %v1650_v37, %v1654_v60  ;;  %v1458_v37 = vld [vmem:[#allocation2 + $0x468] sm:$0xff] }
  0xf7   :  { %1937 = vmatmul.bf16.gmra.mxu3 %v1647_v51 }
  0xf9   :  { %v1253_v8 = vpop.f32.mrf.mxu2 }
  0xfa   :  { %v1342_v47 = vpop.f32.mrf.mxu3  ;;  %v1213_v14 = vpop.f32.mrf.mxu0 }
  0xfb   :  { %v9541_v5 = vadd.f32 %v1342_v47, %v1253_v8  ;;  %v1299_v17 = vpop.f32.mrf.mxu1  ;;  %v2332_v8 = vor.u32 %v2331_v2, %v2328_v34  ;;  %v1459_v2 = vld [vmem:[#allocation2 + $0x278] sm:$0xff] }
  0xfc   :  { %v9561_v4 = vadd.f32 %v1299_v17, %v1210_v25  ;;  %v1508_v17 = vpack.c.bf16 %v1460_v26, %v1458_v37 }
  0xfd   :  { %2688 = vmatmul.bf16.gmra.mxu0 %v2324_v40  ;;  %v2333_v53 = vsel %vm2227_vm2, %v2314_v12, %v2332_v8  ;;  %v8589_v12 = vld [vmem:[#allocation10 + $0x1a0] sm:$0xff] }
  0xfe   :  { %3503 = vmatpush.bf16.msra.mxu2 %v8589_v12 }
 0x100   :  { %2777 = vmatmul.bf16.gmra.mxu1 %v2333_v53  ;;  %v2358_v53 = vrot.slane %v900_v30, 2 }
 0x101   :  { %v1255_v33 = vpop.f32.mrf.mxu2 }
 0x102   :  { %v1344_v10 = vpop.f32.mrf.mxu3  ;;  %v1215_v46 = vpop.f32.mrf.mxu0 }
 0x103   :  { %v9553_v44 = vadd.f32 %v1344_v10, %v1255_v33  ;;  %v1302_v42 = vpop.f32.mrf.mxu1  ;;  %v8597_v33 = vld [vmem:[#allocation10 + $0x1e0] sm:$0xff] }
 0x104   :  { %v9572_v45 = vadd.f32 %v1302_v42, %v1213_v14  ;;  %3592 = vmatpush.bf16.msra.mxu3 %v8597_v33  ;;  %v8605_v10 = vld [vmem:[#allocation10 + $0x220] sm:$0xff]  ;;  %v1509_v14 = vpack.c.bf16 %v1461_v57, %v1459_v2  ;;  %v1656_v42 = vrot.slane %v1508_v17, 1 }
 0x105   :  { %4002 = vmatpush.bf16.msra.mxu0 %v8605_v10  ;;  %v1465_v10 = vld [vmem:[#allocation2 + $0x160] sm:$0xff] }
 0x106   :  { %1853 = vmatmul.bf16.gmra.mxu2 %v1649_v41  ;;  %v8613_v41 = vld [vmem:[#allocation10 + $0x260] sm:$0xff] }
 0x107   :  { %1942 = vmatmul.bf16.gmra.mxu3 %v1651_v0  ;;  %4091 = vmatpush.bf16.msra.mxu1 %v8613_v41  ;;  %v2374_v41 = vshll.u32 %v1508_v17, 16 }
 0x109   :  { %v1258_v19 = vpop.f32.mrf.mxu2  ;;  %v2376_v57 = vrot.slane %v2374_v41, 2  ;;  %v1467_v41 = vld [vmem:[#allocation2 + $0x538] sm:$0xff] }
 0x10a   :  { %v1347_v51 = vpop.f32.mrf.mxu3  ;;  %v1218_v13 = vpop.f32.mrf.mxu0 }
 0x10b   :  { %v9563_v9 = vadd.f32 %v1347_v51, %v1258_v19  ;;  %v1304_v25 = vpop.f32.mrf.mxu1  ;;  %v2350_v19 = vor.u32 %v2349_v31, %v2346_v24  ;;  %v1462_v31 = vld [vmem:[#allocation2 + $0x400] sm:$0xff] }
 0x10c   :  { %v9583_v7 = vadd.f32 %v1304_v25, %v1215_v46  ;;  %v1658_v46 = vrot.slane %v1509_v14, 1 }
 0x10d   :  { %2693 = vmatmul.bf16.gmra.mxu0 %v2342_v36  ;;  %v2351_v62 = vsel %vm2227_vm2, %v2332_v8, %v2350_v19  ;;  %v1463_v36 = vld [vmem:[#allocation2 + $0x5d8] sm:$0xff] }
 0x10e   :  { %v1659_v12 = vsel %vm1625_vm1, %v1654_v60, %v1658_v46  ;;  %v1464_v60 = vld [vmem:[#allocation2 + $0xe8] sm:$0xff] }
 0x10f   :  { %v1510_v16 = vpack.c.bf16 %v1464_v60, %v1462_v31  ;;  %v8612_v31 = vld [vmem:[#allocation10 + $0x258] sm:$0xff] }
 0x110   :  { %2782 = vmatmul.bf16.gmra.mxu1 %v2351_v62 }
 0x111   :  { %v1260_v56 = vpop.f32.mrf.mxu2  ;;  %4092 = vmatpush.bf16.msra.mxu1 %v8612_v31 }
 0x112   :  { %v1349_v58 = vpop.f32.mrf.mxu3  ;;  %v1220_v51 = vpop.f32.mrf.mxu0 }
 0x113   :  { %v9575_v47 = vadd.f32 %v1349_v58, %v1260_v56  ;;  %v1307_v40 = vpop.f32.mrf.mxu1  ;;  %v2355_v56 = vrot.slane %v912_v3, 1  ;;  %v1657_v58 = vsel %vm1625_vm1, %v1652_v21, %v1656_v42  ;;  %v2364_v3 = vrot.slane %v920_v18, 1 }
 0x114   :  { %v9592_v1 = vadd.f32 %v1307_v40, %v1218_v13  ;;  %v2371_v18 = vshrl.u32 %v1508_v17, 16  ;;  %v2380_v17 = vshrl.u32 %v1509_v14, 16 }
 0x115   :  { %v2359_v8 = vor.u32 %v2358_v53, %v2355_v56  ;;  %v2368_v25 = vor.u32 %v2367_v63, %v2364_v3  ;;  %v2383_v53 = vshll.u32 %v1509_v14, 16  ;;  %v8604_v14 = vld [vmem:[#allocation10 + $0x218] sm:$0xff] }
 0x116   :  { %1858 = vmatmul.bf16.gmra.mxu2 %v1653_v29  ;;  %v2373_v2 = vrot.slane %v2371_v18, 1  ;;  %v2382_v63 = vrot.slane %v2380_v17, 1  ;;  %4003 = vmatpush.bf16.msra.mxu0 %v8604_v14 }
 0x117   :  { %1947 = vmatmul.bf16.gmra.mxu3 %v1655_v28  ;;  %v2369_v37 = vsel %vm2227_vm2, %v2350_v19, %v2368_v25  ;;  %v8596_v19 = vld [vmem:[#allocation10 + $0x1d8] sm:$0xff] }
 0x118   :  { %3593 = vmatpush.bf16.msra.mxu3 %v8596_v19 }
 0x119   :  { %v1263_v43 = vpop.f32.mrf.mxu2 }
 0x11a   :  { %v1352_v0 = vpop.f32.mrf.mxu3  ;;  %v1223_v28 = vpop.f32.mrf.mxu0 }
 0x11b   :  { %v9585_v34 = vadd.f32 %v1352_v0, %v1263_v43  ;;  %v1309_v30 = vpop.f32.mrf.mxu1  ;;  %v2360_v43 = vsel %vm2227_vm2, %v2341_v6, %v2359_v8  ;;  %v9607_v0 = vpack.c.bf16 %v1465_v10, %v1463_v36  ;;  %v1466_v36 = vld [vmem:[#allocation2 + $0x178] sm:$0xff] }
 0x11c   :  { %v9603_v21 = vadd.f32 %v1309_v30, %v1220_v51  ;;  %v2385_v30 = vrot.slane %v2383_v53, 2 }
 0x11d   :  { %2698 = vmatmul.bf16.gmra.mxu0 %v2360_v43  ;;  %v1662_v62 = vrot.slane %v9607_v0, 1 }
 0x11e   :  { %v2386_v10 = vor.u32 %v2385_v30, %v2382_v63  ;;  %v2401_v30 = vshll.u32 %v9607_v0, 16 }
 0x120   :  { %2787 = vmatmul.bf16.gmra.mxu1 %v2369_v37  ;;  %v2389_v37 = vshrl.u32 %v1510_v16, 16 }
 0x121   :  { %v1265_v20 = vpop.f32.mrf.mxu2 }
 0x122   :  { %v1354_v15 = vpop.f32.mrf.mxu3  ;;  %v1225_v26 = vpop.f32.mrf.mxu0  ;;  %v2391_v53 = vrot.slane %v2389_v37, 1 }
 0x123   :  { %v9595_v29 = vadd.f32 %v1354_v15, %v1265_v20  ;;  %v1312_v6 = vpop.f32.mrf.mxu1  ;;  %v1660_v20 = vrot.slane %v1510_v16, 1 }
 0x124   :  { %v9611_v40 = vadd.f32 %v1312_v6, %v1223_v28  ;;  %v2392_v6 = vshll.u32 %v1510_v16, 16 }
 0x125   :  { %v1661_v56 = vsel %vm1625_vm1, %v1656_v42, %v1660_v20 }
 0x126   :  { %1863 = vmatmul.bf16.gmra.mxu2 %v1657_v58  ;;  %v8588_v58 = vld [vmem:[#allocation10 + $0x198] sm:$0xff] }
 0x127   :  { %1952 = vmatmul.bf16.gmra.mxu3 %v1659_v12  ;;  %v2377_v12 = vor.u32 %v2376_v57, %v2373_v2  ;;  %3504 = vmatpush.bf16.msra.mxu2 %v8588_v58  ;;  %v2394_v58 = vrot.slane %v2392_v6, 2  ;;  %v1472_v6 = vld [vmem:[#allocation2 + $0x5b0] sm:$0xff] }
 0x129   :  { %v1268_v33 = vpop.f32.mrf.mxu2  ;;  %v2378_v42 = vsel %vm2227_vm2, %v2359_v8, %v2377_v12 }
 0x12a   :  { %v1357_v24 = vpop.f32.mrf.mxu3  ;;  %v1228_v43 = vpop.f32.mrf.mxu0 }
 0x12b   :  { %v9605_v13 = vadd.f32 %v1357_v24, %v1268_v33  ;;  %v1663_v33 = vsel %vm1625_vm1, %v1658_v46, %v1662_v62  ;;  %v1314_v28 = vpop.f32.mrf.mxu1  ;;  %v1468_v46 = vld [vmem:[#allocation2 + $0x1e0] sm:$0xff] }
 0x12c   :  { %v9618_v24 = vadd.f32 %v1314_v28, %v1225_v26  ;;  %v1512_v8 = vpack.c.bf16 %v1468_v46, %v1466_v36 }
 0x12d   :  { %2703 = vmatmul.bf16.gmra.mxu0 %v2378_v42 }
 0x12e   :  { %v1664_v19 = vrot.slane %v1512_v8, 1 }
 0x130   :  { %v1665_v16 = vsel %vm1625_vm1, %v1660_v20, %v1664_v19 }
 0x131   :  { %v1270_v61 = vpop.f32.mrf.mxu2 }
 0x132   :  { %v1359_v51 = vpop.f32.mrf.mxu3  ;;  %v1230_v17 = vpop.f32.mrf.mxu0 }
 0x133   :  { %v9614_v15 = vadd.f32 %v1359_v51, %v1270_v61  ;;  %v1469_v61 = vld [vmem:[#allocation2 + $0x390] sm:$0xff]  ;;  %v2387_v51 = vsel %vm2227_vm2, %v2368_v25, %v2386_v10  ;;  %v2395_v25 = vor.u32 %v2394_v58, %v2391_v53 }
 0x134   :  { %v9621_v26 = vpack.c.bf16 %v1469_v61, %v1467_v41  ;;  %2792 = vmatmul.bf16.gmra.mxu1 %v2387_v51  ;;  %v2410_v51 = vshll.u32 %v1512_v8, 16 }
 0x135   :  { %v2396_v20 = vsel %vm2227_vm2, %v2377_v12, %v2395_v25 }
 0x136   :  { %1868 = vmatmul.bf16.gmra.mxu2 %v1661_v56  ;;  %v1317_v56 = vpop.f32.mrf.mxu1 }
 0x137   :  { %1957 = vmatmul.bf16.gmra.mxu3 %v1663_v33  ;;  %v1666_v33 = vrot.slane %v9621_v26, 1 }
 0x139   :  { %v1829_v3 = vpop.f32.mrf.mxu2  ;;  %v1667_v42 = vsel %vm1625_vm1, %v1662_v62, %v1666_v33  ;;  %v1471_v62 = vld [vmem:[#allocation2 + $0x228] sm:$0xff] }
 0x13a   :  { %v1918_v60 = vpop.f32.mrf.mxu3 }
 0x13b   :  { %v1919_v18 = vadd.f32 %v1918_v60, %v1829_v3  ;;  %v9625_v3 = vadd.f32 %v1317_v56, %v1228_v43  ;;  %v2403_v43 = vrot.slane %v2401_v30, 2  ;;  %v2412_v30 = vrot.slane %v2410_v51, 2 }
 0x13d   :  { %v1998_v2 = vadd.f32 %v1919_v18, %v9503_v35  ;;  %v2398_v35 = vshrl.u32 %v9607_v0, 16  ;;  %v2669_v18 = vpop.f32.mrf.mxu0  ;;  %v1470_v0 = vld [vmem:[#allocation2 + $0x2c0] sm:$0xff]  ;;  %2708 = vmatmul.bf16.gmra.mxu0 %v2396_v20  ;;  %v8595_v20 = vld [vmem:[#allocation10 + $0x1d0] sm:$0xff] }
 0x13e   :  { %v1319_v36 = vpop.f32.mrf.mxu1  ;;  %v9640_v58 = vpack.c.bf16 %v1472_v6, %v1470_v0  ;;  %3594 = vmatpush.bf16.msra.mxu3 %v8595_v20 }
 0x13f   :  { %v2400_v60 = vrot.slane %v2398_v35, 1  ;;  %v9635_v46 = vadd.f32 %v1319_v36, %v1230_v17 }
 0x141   :  { %v1831_v57 = vpop.f32.mrf.mxu2  ;;  %v2404_v61 = vor.u32 %v2403_v43, %v2400_v60  ;;  %v2416_v60 = vshrl.u32 %v9621_v26, 16  ;;  %v2419_v43 = vshll.u32 %v9621_v26, 16 }
 0x142   :  { %v1920_v63 = vpop.f32.mrf.mxu3 }
 0x143   :  { %v1921_v28 = vadd.f32 %v1920_v63, %v1831_v57  ;;  %v1473_v57 = vld [vmem:[#allocation2 + $0xc0] sm:$0xff]  ;;  %v2405_v12 = vsel %vm2227_vm2, %v2386_v10, %v2404_v61  ;;  %v8587_v10 = vld [vmem:[#allocation10 + $0x190] sm:$0xff] }
 0x144   :  { %v9642_v63 = vpack.c.bf16 %v1473_v57, %v1471_v62  ;;  %2797 = vmatmul.bf16.gmra.mxu1 %v2405_v12  ;;  %3505 = vmatpush.bf16.msra.mxu2 %v8587_v10  ;;  %v2421_v62 = vrot.slane %v2419_v43, 2 }
 0x145   :  { %v9632_v14 = vadd.f32 %v1921_v28, %v9512_v59  ;;  %v2407_v59 = vshrl.u32 %v1512_v8, 16  ;;  %v1668_v28 = vrot.slane %v9640_v58, 1 }
 0x146   :  { %1873 = vmatmul.bf16.gmra.mxu2 %v1665_v16  ;;  %v2758_v17 = vpop.f32.mrf.mxu1  ;;  %v2671_v16 = vpop.f32.mrf.mxu0 }
 0x147   :  { %1962 = vmatmul.bf16.gmra.mxu3 %v1667_v42  ;;  %v2409_v35 = vrot.slane %v2407_v59, 1  ;;  %v1670_v42 = vrot.slane %v9642_v63, 1 }
 0x149   :  { %v1834_v31 = vpop.f32.mrf.mxu2  ;;  %v2413_v0 = vor.u32 %v2412_v30, %v2409_v35  ;;  %v1475_v30 = vld [vmem:[#allocation2 + $0x428] sm:$0xff] }
 0x14a   :  { %v1923_v41 = vpop.f32.mrf.mxu3 }
 0x14b   :  { %v1924_v37 = vadd.f32 %v1923_v41, %v1834_v31  ;;  %v2759_v31 = vadd.f32 %v2758_v17, %v2669_v18  ;;  %v2418_v18 = vrot.slane %v2416_v60, 1  ;;  %v2414_v59 = vsel %vm2227_vm2, %v2395_v25, %v2413_v0  ;;  %v1474_v17 = vld [vmem:[#allocation2 + $0xd8] sm:$0xff] }
 0x14d   :  { %v9638_v56 = vadd.f32 %v1924_v37, %v9518_v48  ;;  %v1669_v48 = vsel %vm1625_vm1, %v1664_v19, %v1668_v28  ;;  %v9650_v41 = vadd.f32 %v2759_v31, %v1998_v2  ;;  %v1671_v37 = vsel %vm1625_vm1, %v1666_v33, %v1670_v42  ;;  %v8611_v2 = vld [vmem:[#allocation10 + $0x250] sm:$0xff]  ;;  %2713 = vmatmul.bf16.gmra.mxu0 %v2414_v59 }
 0x14e   :  { %v2760_v57 = vpop.f32.mrf.mxu1  ;;  %v2674_v26 = vpop.f32.mrf.mxu0  ;;  %v2422_v33 = vor.u32 %v2421_v62, %v2418_v18  ;;  %4093 = vmatpush.bf16.msra.mxu1 %v8611_v2  ;;  %v1477_v31 = vld [vmem:[#allocation2 + $0x410] sm:$0xff] }
 0x14f   :  { %v2761_v51 = vadd.f32 %v2760_v57, %v2671_v16 }
 0x150   :  { %v2423_v10 = vsel %vm2227_vm2, %v2404_v61, %v2422_v33 }
 0x151   :  { %v1836_v53 = vpop.f32.mrf.mxu2  ;;  %v9660_v60 = vadd.f32 %v2761_v51, %v9632_v14  ;;  %v2437_v51 = vshll.u32 %v9642_v63, 16 }
 0x152   :  { %v1925_v8 = vpop.f32.mrf.mxu3 }
 0x153   :  { %v1926_v36 = vadd.f32 %v1925_v8, %v1836_v53  ;;  %v8603_v53 = vld [vmem:[#allocation10 + $0x210] sm:$0xff]  ;;  %v2425_v8 = vshrl.u32 %v9640_v58, 16 }
 0x154   :  { %4004 = vmatpush.bf16.msra.mxu0 %v8603_v53  ;;  %2802 = vmatmul.bf16.gmra.mxu1 %v2423_v10  ;;  %v1480_v10 = vld [vmem:[#allocation2 + $0x5b8] sm:$0xff] }
 0x155   :  { %v9654_v6 = vadd.f32 %v1926_v36, %v9525_v54  ;;  %v1476_v54 = vld [vmem:[#allocation2 + $0x30] sm:$0xff]  ;;  %v9665_v36 = vpack.c.bf16 %v1477_v31, %v1475_v30 }
 0x156   :  { %1878 = vmatmul.bf16.gmra.mxu2 %v1669_v48  ;;  %v2428_v48 = vshll.u32 %v9640_v58, 16  ;;  %v1516_v43 = vpack.c.bf16 %v1476_v54, %v1474_v17  ;;  %v2763_v20 = vpop.f32.mrf.mxu1  ;;  %v2439_v54 = vrot.slane %v2437_v51, 2 }
 0x157   :  { %1967 = vmatmul.bf16.gmra.mxu3 %v1671_v37  ;;  %v2676_v37 = vpop.f32.mrf.mxu0  ;;  %v1674_v58 = vrot.slane %v9665_v36, 1  ;;  %v2764_v57 = vadd.f32 %v2763_v20, %v2674_v26  ;;  %v1481_v20 = vld [vmem:[#allocation2 + $0x218] sm:$0xff] }
 0x158   :  { %v2430_v18 = vrot.slane %v2428_v48, 2  ;;  %v1672_v62 = vrot.slane %v1516_v43, 1  ;;  %v1478_v48 = vld [vmem:[#allocation2 + $0x208] sm:$0xff] }
 0x159   :  { %v1839_v19 = vpop.f32.mrf.mxu2  ;;  %v9673_v61 = vadd.f32 %v2764_v57, %v9638_v56 }
 0x15a   :  { %v1928_v12 = vpop.f32.mrf.mxu3  ;;  %v1673_v14 = vsel %vm1625_vm1, %v1668_v28, %v1672_v62 }
 0x15b   :  { %v1929_v35 = vadd.f32 %v1928_v12, %v1839_v19  ;;  %v2427_v19 = vrot.slane %v2425_v8, 1  ;;  %v1675_v12 = vsel %vm1625_vm1, %v1670_v42, %v1674_v58  ;;  %v1479_v42 = vld [vmem:[#allocation2 + $0x4a8] sm:$0xff] }
 0x15d   :  { %v9663_v25 = vadd.f32 %v1929_v35, %v9532_v38  ;;  %v2434_v38 = vshrl.u32 %v9642_v63, 16  ;;  %v2431_v2 = vor.u32 %v2430_v18, %v2427_v19  ;;  %v2443_v19 = vshrl.u32 %v1516_v43, 16 }
 0x15e   :  { %v2765_v28 = vpop.f32.mrf.mxu1  ;;  %v2446_v18 = vshll.u32 %v1516_v43, 16 }
 0x15f   :  { %v2436_v35 = vrot.slane %v2434_v38, 1  ;;  %v2679_v30 = vpop.f32.mrf.mxu0  ;;  %v2432_v31 = vsel %vm2227_vm2, %v2413_v0, %v2431_v2  ;;  %v2766_v63 = vadd.f32 %v2765_v28, %v2676_v37  ;;  %v9688_v0 = vpack.c.bf16 %v1480_v10, %v1478_v48 }
 0x160   :  { %2718 = vmatmul.bf16.gmra.mxu0 %v2432_v31  ;;  %v9690_v37 = vpack.c.bf16 %v1481_v20, %v1479_v42  ;;  %v2455_v28 = vshll.u32 %v9665_v36, 16 }
 0x161   :  { %v1841_v16 = vpop.f32.mrf.mxu2  ;;  %v9680_v56 = vor.u32 %v2439_v54, %v2436_v35  ;;  %v2452_v54 = vshrl.u32 %v9665_v36, 16 }
 0x162   :  { %v1930_v59 = vpop.f32.mrf.mxu3  ;;  %v2457_v42 = vrot.slane %v2455_v28, 2 }
 0x163   :  { %v1931_v53 = vadd.f32 %v1930_v59, %v1841_v16  ;;  %v2454_v10 = vrot.slane %v2452_v54, 1 }
 0x165   :  { %v9677_v17 = vadd.f32 %v1931_v53, %v9539_v39  ;;  %v9683_v39 = vadd.f32 %v2766_v63, %v9654_v6  ;;  %v2445_v53 = vrot.slane %v2443_v19, 1  ;;  %v1676_v6 = vrot.slane %v9688_v0, 1  ;;  %v8594_v63 = vld [vmem:[#allocation10 + $0x1c8] sm:$0xff] }
 0x166   :  { %1883 = vmatmul.bf16.gmra.mxu2 %v1673_v14  ;;  %v2441_v14 = vsel %vm2227_vm2, %v2422_v33, %v9680_v56  ;;  %v2768_v38 = vpop.f32.mrf.mxu1  ;;  %v8586_v33 = vld [vmem:[#allocation10 + $0x188] sm:$0xff]  ;;  %3595 = vmatpush.bf16.msra.mxu3 %v8594_v63 }
 0x167   :  { %1972 = vmatmul.bf16.gmra.mxu3 %v1675_v12  ;;  %v2681_v51 = vpop.f32.mrf.mxu0  ;;  %v2448_v12 = vrot.slane %v2446_v18, 2  ;;  %v2769_v43 = vadd.f32 %v2768_v38, %v2679_v30  ;;  %2807 = vmatmul.bf16.gmra.mxu1 %v2441_v14  ;;  %v1482_v38 = vld [vmem:[#allocation2 + $0x368] sm:$0xff] }
 0x168   :  { %3506 = vmatpush.bf16.msra.mxu2 %v8586_v33 }
 0x169   :  { %v1844_v26 = vpop.f32.mrf.mxu2  ;;  %v2449_v48 = vor.u32 %v2448_v12, %v2445_v53  ;;  %v1483_v12 = vld [vmem:[#allocation2 + $0x298] sm:$0xff] }
 0x16a   :  { %v1933_v8 = vpop.f32.mrf.mxu3 }
 0x16b   :  { %v1934_v16 = vadd.f32 %v1933_v8, %v1844_v26  ;;  %v1678_v26 = vrot.slane %v9690_v37, 1  ;;  %v9700_v8 = vadd.f32 %v2769_v43, %v9663_v25  ;;  %v2450_v19 = vsel %vm2227_vm2, %v2431_v2, %v2449_v48  ;;  %v8610_v25 = vld [vmem:[#allocation10 + $0x248] sm:$0xff] }
 0x16c   :  { %4094 = vmatpush.bf16.msra.mxu1 %v8610_v25  ;;  %v1485_v43 = vld [vmem:[#allocation2 + $0x88] sm:$0xff] }
 0x16d   :  { %v9686_v57 = vadd.f32 %v1934_v16, %v9550_v27  ;;  %v1677_v27 = vsel %vm1625_vm1, %v1672_v62, %v1676_v6  ;;  %11555 = vst [vmem:[#allocation20_spill] sm:$0xff] %v9700_v8  ;;  %v1679_v16 = vsel %vm1625_vm1, %v1674_v58, %v1678_v26  ;;  %v2458_v58 = vor.u32 %v2457_v42, %v2454_v10 }
 0x16e   :  { %v2770_v36 = vpop.f32.mrf.mxu1 }
 0x16f   :  { %v2684_v20 = vpop.f32.mrf.mxu0  ;;  %v2771_v18 = vadd.f32 %v2770_v36, %v2681_v51  ;;  %v2459_v33 = vsel %vm2227_vm2, %v9680_v56, %v2458_v58 }
 0x170   :  { %2723 = vmatmul.bf16.gmra.mxu0 %v2450_v19 }
 0x171   :  { %v1846_v59 = vpop.f32.mrf.mxu2  ;;  %v9710_v54 = vadd.f32 %v2771_v18, %v9677_v17  ;;  %v2473_v18 = vshll.u32 %v9690_v37, 16 }
 0x172   :  { %v1935_v35 = vpop.f32.mrf.mxu3 }
 0x173   :  { %v1936_v31 = vadd.f32 %v1935_v35, %v1846_v59  ;;  %v8602_v59 = vld [vmem:[#allocation10 + $0x208] sm:$0xff]  ;;  %v2461_v35 = vshrl.u32 %v9688_v0, 16  ;;  %11556 = vst [vmem:[#allocation21_spill] sm:$0xff] %v9710_v54 }
 0x174   :  { %4005 = vmatpush.bf16.msra.mxu0 %v8602_v59 }
 0x175   :  { %v9704_v30 = vadd.f32 %v1936_v31, %v9561_v4  ;;  %v1484_v4 = vld [vmem:[#allocation2 + $0x420] sm:$0xff]  ;;  %v9715_v31 = vpack.c.bf16 %v1485_v43, %v1483_v12 }
 0x176   :  { %1888 = vmatmul.bf16.gmra.mxu2 %v1677_v27  ;;  %v2464_v27 = vshll.u32 %v9688_v0, 16  ;;  %v1520_v28 = vpack.c.bf16 %v1484_v4, %v1482_v38  ;;  %v2773_v63 = vpop.f32.mrf.mxu1  ;;  %v2475_v4 = vrot.slane %v2473_v18, 2 }
 0x177   :  { %1977 = vmatmul.bf16.gmra.mxu3 %v1679_v16  ;;  %v2686_v16 = vpop.f32.mrf.mxu0  ;;  %v1682_v0 = vrot.slane %v9715_v31, 1  ;;  %v2774_v36 = vadd.f32 %v2773_v63, %v2684_v20  ;;  %2812 = vmatmul.bf16.gmra.mxu1 %v2459_v33  ;;  %v1488_v33 = vld [vmem:[#allocation2 + $0x230] sm:$0xff] }
 0x178   :  { %v2466_v10 = vrot.slane %v2464_v27, 2  ;;  %v1680_v42 = vrot.slane %v1520_v28, 1  ;;  %v1486_v27 = vld [vmem:[#allocation2 + $0x130] sm:$0xff] }
 0x179   :  { %v1849_v62 = vpop.f32.mrf.mxu2  ;;  %v9724_v56 = vadd.f32 %v2774_v36, %v9686_v57  ;;  %v1487_v63 = vld [vmem:[#allocation2 + $0x5f0] sm:$0xff] }
 0x17a   :  { %v1938_v14 = vpop.f32.mrf.mxu3  ;;  %v1681_v19 = vsel %vm1625_vm1, %v1676_v6, %v1680_v42 }
 0x17b   :  { %v1939_v53 = vadd.f32 %v1938_v14, %v1849_v62  ;;  %v2463_v62 = vrot.slane %v2461_v35, 1  ;;  %11557 = vst [vmem:[#allocation22_spill] sm:$0xff] %v9724_v56  ;;  %v1683_v14 = vsel %vm1625_vm1, %v1678_v26, %v1682_v0  ;;  %v1489_v26 = vld [vmem:[#allocation2 + $0x2e0] sm:$0xff] }
 0x17d   :  { %v9713_v2 = vadd.f32 %v1939_v53, %v9572_v45  ;;  %v2470_v45 = vshrl.u32 %v9690_v37, 16  ;;  %v2467_v25 = vor.u32 %v2466_v10, %v2463_v62  ;;  %v2479_v62 = vshrl.u32 %v1520_v28, 16 }
 0x17e   :  { %v2775_v6 = vpop.f32.mrf.mxu1  ;;  %v2482_v10 = vshll.u32 %v1520_v28, 16 }
 0x17f   :  { %v2472_v20 = vrot.slane %v2470_v45, 1  ;;  %v2689_v12 = vpop.f32.mrf.mxu0  ;;  %v2468_v43 = vsel %vm2227_vm2, %v2449_v48, %v2467_v25  ;;  %v2776_v35 = vadd.f32 %v2775_v6, %v2686_v16  ;;  %v9737_v48 = vpack.c.bf16 %v1488_v33, %v1486_v27 }
 0x180   :  { %2728 = vmatmul.bf16.gmra.mxu0 %v2468_v43  ;;  %v9739_v16 = vpack.c.bf16 %v1489_v26, %v1487_v63  ;;  %v2491_v6 = vshll.u32 %v9715_v31, 16 }
 0x181   :  { %v1851_v51 = vpop.f32.mrf.mxu2 }
 0x182   :  { %v1940_v17 = vpop.f32.mrf.mxu3 }
 0x183   :  { %v1941_v59 = vadd.f32 %v1940_v17, %v1851_v51  ;;  %v9729_v51 = vor.u32 %v2475_v4, %v2472_v20  ;;  %v2488_v4 = vshrl.u32 %v9715_v31, 16  ;;  %v2493_v31 = vrot.slane %v2491_v6, 2 }
 0x185   :  { %v2007_v38 = vadd.f32 %v1941_v59, %v9583_v7  ;;  %v9732_v7 = vadd.f32 %v2776_v35, %v9704_v30  ;;  %v2481_v59 = vrot.slane %v2479_v62, 1  ;;  %v1684_v30 = vrot.slane %v9737_v48, 1  ;;  %v8593_v35 = vld [vmem:[#allocation10 + $0x1c0] sm:$0xff] }
 0x186   :  { %1893 = vmatmul.bf16.gmra.mxu2 %v1681_v19  ;;  %v2477_v19 = vsel %vm2227_vm2, %v2458_v58, %v9729_v51  ;;  %v2778_v45 = vpop.f32.mrf.mxu1  ;;  %v8585_v58 = vld [vmem:[#allocation10 + $0x180] sm:$0xff]  ;;  %3596 = vmatpush.bf16.msra.mxu3 %v8593_v35  ;;  %v2490_v33 = vrot.slane %v2488_v4, 1 }
 0x187   :  { %1982 = vmatmul.bf16.gmra.mxu3 %v1683_v14  ;;  %11558 = vst [vmem:[#allocation23_spill] sm:$0xff] %v9732_v7  ;;  %v2691_v18 = vpop.f32.mrf.mxu0  ;;  %v2484_v14 = vrot.slane %v2482_v10, 2  ;;  %v2779_v28 = vadd.f32 %v2778_v45, %v2689_v12  ;;  %2817 = vmatmul.bf16.gmra.mxu1 %v2477_v19  ;;  %v8601_v10 = vld [vmem:[#allocation10 + $0x200] sm:$0xff] }
 0x188   :  { %3507 = vmatpush.bf16.msra.mxu2 %v8585_v58  ;;  %v2494_v45 = vor.u32 %v2493_v31, %v2490_v33  ;;  %4006 = vmatpush.bf16.msra.mxu0 %v8601_v10  ;;  %v2126_v31 = vld [vmem:[#allocation2 + $0x110] sm:$0x7] }
 0x189   :  { %v1854_v53 = vpop.f32.mrf.mxu2  ;;  %v2485_v27 = vor.u32 %v2484_v14, %v2481_v59  ;;  %v2497_v59 = vshrl.u32 %v9737_v48, 16  ;;  %v2500_v14 = vshll.u32 %v9737_v48, 16 }
 0x18a   :  { %v1943_v37 = vpop.f32.mrf.mxu3 }
 0x18b   :  { %v1944_v57 = vadd.f32 %v1943_v37, %v1854_v53  ;;  %v1686_v53 = vrot.slane %v9739_v16, 1  ;;  %v9749_v37 = vadd.f32 %v2779_v28, %v9713_v2  ;;  %v2486_v62 = vsel %vm2227_vm2, %v2467_v25, %v2485_v27  ;;  %v1491_v25 = vld [vmem:[#allocation2 + $0xa8] sm:$0x3] }
 0x18c   :  { %v2502_v48 = vrot.slane %v2500_v14, 2 }
 0x18d   :  { %v9735_v36 = vadd.f32 %v1944_v57, %v9592_v1  ;;  %v1685_v1 = vsel %vm1625_vm1, %v1680_v42, %v1684_v30  ;;  %11559 = vst [vmem:[#allocation24_spill] sm:$0xff] %v9749_v37  ;;  %v1687_v12 = vsel %vm1625_vm1, %v1682_v0, %v1686_v53 }
 0x18e   :  { %v2780_v63 = vpop.f32.mrf.mxu1 }
 0x18f   :  { %v2694_v26 = vpop.f32.mrf.mxu0  ;;  %v2781_v2 = vadd.f32 %v2780_v63, %v2691_v18  ;;  %v2506_v18 = vshrl.u32 %v9739_v16, 16 }
 0x190   :  { %2733 = vmatmul.bf16.gmra.mxu0 %v2486_v62 }
 0x191   :  { %v1856_v17 = vpop.f32.mrf.mxu2  ;;  %v2508_v63 = vrot.slane %v2506_v18, 1 }
 0x192   :  { %v1945_v20 = vpop.f32.mrf.mxu3 }
 0x193   :  { %v1946_v43 = vadd.f32 %v1945_v20, %v1856_v17  ;;  %v8609_v17 = vld [vmem:[#allocation10 + $0x240] sm:$0xff]  ;;  %v1490_v20 = vld [vmem:[#allocation2 + $0x110] sm:$0x3] }
 0x194   :  { %4095 = vmatpush.bf16.msra.mxu1 %v8609_v17  ;;  %v1524_v6 = vpack.c.bf16 %v1490_v20, %v1490_v20 }
 0x195   :  { %v9755_v57 = vadd.f32 %v1946_v43, %v9603_v21  ;;  %v9758_v21 = vadd.f32 %v2781_v2, %v2007_v38  ;;  %v1525_v43 = vpack.c.bf16 %v1491_v25, %v1491_v25  ;;  %v2495_v38 = vsel %vm2227_vm2, %v9729_v51, %v2494_v45 }
 0x196   :  { %1898 = vmatmul.bf16.gmra.mxu2 %v1685_v1  ;;  %v2509_v1 = vshll.u32 %v9739_v16, 16  ;;  %v2783_v58 = vpop.f32.mrf.mxu1  ;;  %v9785_v16 = vld [vmem:[#allocation2 + $0x5d0] sm:$0xff] }
 0x197   :  { %1987 = vmatmul.bf16.gmra.mxu3 %v1687_v12  ;;  %11560 = vst [vmem:[#allocation25_spill] sm:$0xff] %v9758_v21  ;;  %v2696_v35 = vpop.f32.mrf.mxu0  ;;  %v2499_v12 = vrot.slane %v2497_v59, 1  ;;  %v1690_v33 = vrot.slane %v1525_v43, 1  ;;  %2822 = vmatmul.bf16.gmra.mxu1 %v2495_v38  ;;  %v2160_v59 = vpack.c.bf16 %v2126_v31, %v2126_v31  ;;  %v9802_v31 = vld [vmem:[#allocation2 + $0x200] sm:$0xff] }
 0x198   :  { %v2511_v62 = vrot.slane %v2509_v1, 2 }
 0x199   :  { %v1859_v42 = vpop.f32.mrf.mxu2  ;;  %v9773_v51 = vor.u32 %v2502_v48, %v2499_v12  ;;  %v2515_v1 = vshrl.u32 %v2160_v59, 16  ;;  %v2518_v43 = vshll.u32 %v2160_v59, 16  ;;  %v9793_v12 = vld [vmem:[#allocation2 + $0x60] sm:$0xff] }
 0x19a   :  { %v1948_v19 = vpop.f32.mrf.mxu3  ;;  %v9781_v14 = vor.u32 %v2511_v62, %v2508_v63 }
 0x19b   :  { %v1949_v0 = vadd.f32 %v1948_v19, %v1859_v42  ;;  %v1688_v42 = vrot.slane %v1524_v6, 1  ;;  %v2902_v6 = vld [vmem:[#allocation2 + $0x528] sm:$0x80]  ;;  %v2517_v62 = vrot.slane %v2515_v1, 1  ;;  %v2520_v21 = vrot.slane %v2518_v43, 2 }
 0x19c   :  { %v2968_v48 = vpack.c.bf16 %v9785_v16, %v2902_v6 }
 0x19d   :  { %v9763_v28 = vadd.f32 %v1949_v0, %v9611_v40  ;;  %v2784_v40 = vadd.f32 %v2783_v58, %v2694_v26  ;;  %v1689_v10 = vsel %vm1625_vm1, %v1684_v30, %v1688_v42  ;;  %v1691_v0 = vsel %vm1625_vm1, %v1686_v53, %v1690_v33  ;;  %v2127_v30 = vld [vmem:[#allocation2 + $0xa8] sm:$0x7]  ;;  %v9787_v53 = vld [vmem:[#allocation2 + $0x438] sm:$0xff]  ;;  %v2903_v42 = vld [vmem:[#allocation2 + $0x1c0] sm:$0x80] }
 0x19e   :  { %v2785_v25 = vpop.f32.mrf.mxu1  ;;  %v9791_v38 = vpack.c.bf16 %v2127_v30, %v2127_v30  ;;  %v2970_v33 = vpack.c.bf16 %v9793_v12, %v9787_v53  ;;  %v2521_v43 = vor.u32 %v2520_v21, %v2517_v62  ;;  %v8640_v62 = vld [vmem:[#allocation10 + $0x338] sm:$0xff] }
 0x19f   :  { %v9771_v19 = vadd.f32 %v2784_v40, %v9735_v36  ;;  %v2699_v18 = vpop.f32.mrf.mxu0  ;;  %v2504_v36 = vsel %vm2227_vm2, %v2485_v27, %v9773_v51  ;;  %v9796_v27 = vld [vmem:[#allocation2 + $0x260] sm:$0xff]  ;;  %v9800_v40 = vld [vmem:[#allocation2 + $0xf0] sm:$0xff]  ;;  %5638 = vmatpush.bf16.msrb.mxu0 %v8640_v62 }
 0x1a0   :  { %2738 = vmatmul.bf16.gmra.mxu0 %v2504_v36  ;;  %v3077_v59 = vshrl.u32 %v2970_v33, 16 }
 0x1a1   :  { %v1861_v4 = vpop.f32.mrf.mxu2  ;;  %11561 = vst [vmem:[#allocation26_spill] sm:$0xff] %v9771_v19 }
 0x1a2   :  { %v1950_v2 = vpop.f32.mrf.mxu3  ;;  %v3079_v19 = vrot.slane %v3077_v59, 3  ;;  %v8624_v59 = vld [vmem:[#allocation10 + $0x2b8] sm:$0xff] }
 0x1a3   :  { %v1951_v17 = vadd.f32 %v1950_v2, %v1861_v4  ;;  %v2786_v4 = vadd.f32 %v2785_v25, %v2696_v35  ;;  %v3069_v2 = vshrl.u32 %v2968_v48, 16  ;;  %4798 = vmatpush.bf16.msrb.mxu2 %v8624_v59 }
 0x1a5   :  { %v9779_v26 = vadd.f32 %v1951_v17, %v9618_v24  ;;  %v2513_v24 = vsel %vm2227_vm2, %v2494_v45, %v9781_v14  ;;  %v2969_v45 = vpack.c.bf16 %v9796_v27, %v2903_v42  ;;  %v9806_v63 = vadd.f32 %v2786_v4, %v9755_v57 }
 0x1a6   :  { %1903 = vmatmul.bf16.gmra.mxu2 %v1689_v10  ;;  %v3072_v10 = vshll.u32 %v2968_v48, 16  ;;  %v2971_v17 = vpack.c.bf16 %v9802_v31, %v9800_v40  ;;  %v3071_v36 = vrot.slane %v3069_v2, 3 }
 0x1a7   :  { %1992 = vmatmul.bf16.gmra.mxu3 %v1691_v0  ;;  %11562 = vst [vmem:[#allocation27_spill] sm:$0xff] %v9806_v63  ;;  %v3086_v30 = vshrl.u32 %v2969_v45, 16  ;;  %v2788_v63 = vpop.f32.mrf.mxu1  ;;  %v2701_v48 = vpop.f32.mrf.mxu0  ;;  %2827 = vmatmul.bf16.gmra.mxu1 %v2513_v24 }
 0x1a8   :  { %v3074_v6 = vrot.slane %v3072_v10, 4  ;;  %v3094_v42 = vshrl.u32 %v2971_v17, 16  ;;  %v3097_v1 = vshll.u32 %v2971_v17, 16 }
 0x1a9   :  { %v1864_v20 = vpop.f32.mrf.mxu2  ;;  %v3088_v4 = vrot.slane %v3086_v30, 3  ;;  %v2524_v30 = vshrl.u32 %v9791_v38, 16 }
 0x1aa   :  { %v1953_v58 = vpop.f32.mrf.mxu3  ;;  %v3075_v37 = vor.u32 %v3074_v6, %v3071_v36  ;;  %v3096_v56 = vrot.slane %v3094_v42, 3  ;;  %v9827_v36 = vld [vmem:[#allocation2 + $0x4b8] sm:$0xff]  ;;  %v9831_v6 = vld [vmem:[#allocation2 + $0x310] sm:$0xff] }
 0x1ab   :  { %v1954_v35 = vadd.f32 %v1953_v58, %v1864_v20  ;;  %v3080_v20 = vshll.u32 %v2970_v33, 16  ;;  %v3089_v58 = vshll.u32 %v2969_v45, 16  ;;  %v3099_v33 = vrot.slane %v3097_v1, 4 }
 0x1ac   :  { %v2526_v21 = vrot.slane %v2524_v30, 1 }
 0x1ad   :  { %v9811_v0 = vadd.f32 %v1954_v35, %v9625_v3  ;;  %v3082_v57 = vrot.slane %v3080_v20, 4  ;;  %v3091_v7 = vrot.slane %v3089_v58, 4  ;;  %v2789_v3 = vadd.f32 %v2788_v63, %v2699_v18  ;;  %v8632_v20 = vld [vmem:[#allocation10 + $0x2f8] sm:$0xff] }
 0x1ae   :  { %v3100_v10 = vor.u32 %v3099_v33, %v3096_v56  ;;  %v2527_v18 = vshll.u32 %v9791_v38, 16  ;;  %4887 = vmatpush.bf16.msrb.mxu3 %v8632_v20  ;;  %v8648_v38 = vld [vmem:[#allocation10 + $0x378] sm:$0xff] }
 0x1af   :  { %v3083_v35 = vor.u32 %v3082_v57, %v3079_v19  ;;  %v3092_v8 = vor.u32 %v3091_v7, %v3088_v4  ;;  %v9815_v17 = vadd.f32 %v2789_v3, %v9763_v28  ;;  %v2790_v56 = vpop.f32.mrf.mxu1  ;;  %v2522_v28 = vsel %vm2227_vm2, %v9773_v51, %v2521_v43  ;;  %5727 = vmatpush.bf16.msrb.mxu1 %v8648_v38 }
 0x1b0   :  { %v2529_v24 = vrot.slane %v2527_v18, 2  ;;  %v2791_v63 = vadd.f32 %v2790_v56, %v2701_v48  ;;  %2743 = vmatmul.bf16.gmra.mxu0 %v2522_v28 }
 0x1b1   :  { %v1866_v25 = vpop.f32.mrf.mxu2  ;;  %v3084_v45 = vsel %vm3067_vm3, %v3075_v37, %v3083_v35  ;;  %v3101_v7 = vsel %vm3067_vm3, %v3092_v8, %v3100_v10  ;;  %v2704_v37 = vpop.f32.mrf.mxu0  ;;  %v9829_v8 = vld [vmem:[#allocation2 + $0x5a0] sm:$0xff] }
 0x1b2   :  { %v1955_v54 = vpop.f32.mrf.mxu3  ;;  %v2973_v42 = vpack.c.bf16 %v9831_v6, %v9829_v8  ;;  %v2530_v57 = vor.u32 %v2529_v24, %v2526_v21  ;;  %v9838_v4 = vadd.f32 %v2791_v63, %v9779_v26 }
 0x1b3   :  { %v1956_v2 = vadd.f32 %v1955_v54, %v1866_v25  ;;  %v9825_v25 = vld [vmem:[#allocation2 + $0x80] sm:$0xff] }
 0x1b4   :  { %v2972_v51 = vpack.c.bf16 %v9827_v36, %v9825_v25  ;;  %v3112_v33 = vshrl.u32 %v2973_v42, 16  ;;  %v2531_v18 = vsel %vm2227_vm2, %v9781_v14, %v2530_v57 }
 0x1b5   :  { %v9820_v19 = vadd.f32 %v1956_v2, %v9635_v46 }
 0x1b6   :  { %3508 = vmatmul.bf16.vlgmr.msra.gmra.mxu2 %v3084_v45  ;;  %v3103_v48 = vshrl.u32 %v2972_v51, 16  ;;  %v3106_v3 = vshll.u32 %v2972_v51, 16  ;;  %v3115_v45 = vshll.u32 %v2973_v42, 16  ;;  %v3114_v43 = vrot.slane %v3112_v33, 3  ;;  %v9853_v42 = vld [vmem:[#allocation2 + $0x1e8] sm:$0xff] }
 0x1b7   :  { %3597 = vmatmul.bf16.vlgmr.msra.gmra.mxu3 %v3101_v7  ;;  %v2793_v30 = vpop.f32.mrf.mxu1  ;;  %2832 = vmatmul.bf16.gmra.mxu1 %v2531_v18  ;;  %v3807_v18 = vpack.c.bf16 %v9800_v40, %v9796_v27 }
 0x1b8   :  { %v3105_v59 = vrot.slane %v3103_v48, 3  ;;  %v3108_v20 = vrot.slane %v3106_v3, 4  ;;  %v2794_v56 = vadd.f32 %v2793_v30, %v2704_v37  ;;  %v3806_v37 = vpack.c.bf16 %v9787_v53, %v9785_v16 }
 0x1b9   :  { %v1869_v54 = vpop.f32.mrf.mxu2  ;;  %v2706_v7 = vpop.f32.mrf.mxu0 }
 0x1ba   :  { %v1958_v46 = vpop.f32.mrf.mxu3  ;;  %v3109_v28 = vor.u32 %v3108_v20, %v3105_v59  ;;  %v9845_v63 = vadd.f32 %v2794_v56, %v9811_v0  ;;  %v9857_v0 = vld [vmem:[#allocation2 + $0x258] sm:$0xff] }
 0x1bb   :  { %v1959_v58 = vadd.f32 %v1958_v46, %v1869_v54  ;;  %v3117_v54 = vrot.slane %v3115_v45, 4 }
 0x1bc   :  { %v3110_v24 = vsel %vm3067_vm3, %v3083_v35, %v3109_v28  ;;  %v9855_v35 = vld [vmem:[#allocation2 + $0x40] sm:$0xff] }
 0x1bd   :  { %v2014_v1 = vadd.f32 %v1959_v58, %v9483_v23  ;;  %v3118_v21 = vor.u32 %v3117_v54, %v3114_v43 }
 0x1bf   :  { %v3119_v62 = vsel %vm3067_vm3, %v3100_v10, %v3118_v21  ;;  %v2795_v46 = vpop.f32.mrf.mxu1  ;;  %v2974_v10 = vpack.c.bf16 %v9855_v35, %v9853_v42 }
 0x1c0   :  { %v2796_v51 = vadd.f32 %v2795_v46, %v2706_v7  ;;  %4007 = vmatmul.bf16.vlgmr.msra.gmra.mxu0 %v3806_v37  ;;  %v8623_v37 = vld [vmem:[#allocation10 + $0x2b0] sm:$0xff] }
 0x1c1   :  { %v1871_v2 = vpop.f32.mrf.mxu2  ;;  %v2709_v58 = vpop.f32.mrf.mxu0  ;;  %v3121_v3 = vshrl.u32 %v2974_v10, 16  ;;  %v3124_v33 = vshll.u32 %v2974_v10, 16  ;;  %v8631_v46 = vld [vmem:[#allocation10 + $0x2f0] sm:$0xff]  ;;  %4799 = vmatpush.bf16.msrb.mxu2 %v8623_v37 }
 0x1c2   :  { %v1960_v26 = vpop.f32.mrf.mxu3  ;;  %v9866_v53 = vadd.f32 %v2796_v51, %v9820_v19  ;;  %4888 = vmatpush.bf16.msrb.mxu3 %v8631_v46 }
 0x1c3   :  { %v1961_v23 = vadd.f32 %v1960_v26, %v1871_v2  ;;  %v3123_v43 = vrot.slane %v3121_v3, 3  ;;  %v3126_v30 = vrot.slane %v3124_v33, 4  ;;  %v8647_v3 = vld [vmem:[#allocation10 + $0x370] sm:$0xff]  ;;  %v9880_v33 = vld [vmem:[#allocation2 + $0x198] sm:$0xff] }
 0x1c4   :  { %5728 = vmatpush.bf16.msrb.mxu1 %v8647_v3 }
 0x1c5   :  { %v9849_v38 = vadd.f32 %v1961_v23, %v9491_v55  ;;  %v9861_v55 = vld [vmem:[#allocation2 + $0x4e0] sm:$0xff]  ;;  %v3127_v23 = vor.u32 %v3126_v30, %v3123_v43 }
 0x1c6   :  { %3513 = vmatmul.bf16.gmra.mxu2 %v3110_v24  ;;  %v2975_v16 = vpack.c.bf16 %v9861_v55, %v9857_v0 }
 0x1c7   :  { %3602 = vmatmul.bf16.gmra.mxu3 %v3119_v62  ;;  %v2798_v56 = vpop.f32.mrf.mxu1  ;;  %4096 = vmatmul.bf16.vlgmr.msra.gmra.mxu1 %v3807_v18 }
 0x1c8   :  { %v3130_v45 = vshrl.u32 %v2975_v16, 16  ;;  %v3133_v59 = vshll.u32 %v2975_v16, 16  ;;  %v2799_v19 = vadd.f32 %v2798_v56, %v2709_v58  ;;  %v3808_v58 = vpack.c.bf16 %v9825_v25, %v9793_v12  ;;  %v8639_v16 = vld [vmem:[#allocation10 + $0x330] sm:$0xff] }
 0x1c9   :  { %v1874_v14 = vpop.f32.mrf.mxu2  ;;  %v2711_v26 = vpop.f32.mrf.mxu0  ;;  %5639 = vmatpush.bf16.msrb.mxu0 %v8639_v16 }
 0x1ca   :  { %v1963_v57 = vpop.f32.mrf.mxu3  ;;  %v3132_v7 = vrot.slane %v3130_v45, 3  ;;  %v3135_v54 = vrot.slane %v3133_v59, 4  ;;  %v9874_v51 = vadd.f32 %v2799_v19, %v2014_v1  ;;  %v9882_v45 = vld [vmem:[#allocation2 + $0x418] sm:$0xff] }
 0x1cb   :  { %v1964_v48 = vadd.f32 %v1963_v57, %v1874_v14  ;;  %v3128_v14 = vsel %vm3067_vm3, %v3109_v28, %v3127_v23  ;;  %v2976_v12 = vpack.c.bf16 %v9882_v45, %v9880_v33 }
 0x1cc   :  { %v3136_v24 = vor.u32 %v3135_v54, %v3132_v7 }
 0x1cd   :  { %v9869_v2 = vadd.f32 %v1964_v48, %v9499_v32  ;;  %v3139_v30 = vshrl.u32 %v2976_v12, 16  ;;  %v3142_v18 = vshll.u32 %v2976_v12, 16  ;;  %v9908_v12 = vld [vmem:[#allocation2 + $0x340] sm:$0xff] }
 0x1ce   :  { %v3137_v57 = vsel %vm3067_vm3, %v3118_v21, %v3136_v24  ;;  %v9884_v21 = vld [vmem:[#allocation2 + $0x550] sm:$0xff] }
 0x1cf   :  { %v2800_v10 = vpop.f32.mrf.mxu1  ;;  %v3141_v19 = vrot.slane %v3139_v30, 3 }
 0x1d0   :  { %v2801_v48 = vadd.f32 %v2800_v10, %v2711_v26  ;;  %4012 = vmatmul.bf16.gmra.mxu0 %v3808_v58  ;;  %v3809_v26 = vpack.c.bf16 %v9829_v8, %v9802_v31 }
 0x1d1   :  { %v1876_v20 = vpop.f32.mrf.mxu2  ;;  %v2714_v28 = vpop.f32.mrf.mxu0 }
 0x1d2   :  { %v1965_v62 = vpop.f32.mrf.mxu3 }
 0x1d3   :  { %v1966_v32 = vadd.f32 %v1965_v62, %v1876_v20  ;;  %v9893_v20 = vadd.f32 %v2801_v48, %v9849_v38  ;;  %v3144_v62 = vrot.slane %v3142_v18, 4 }
 0x1d5   :  { %v2017_v27 = vadd.f32 %v1966_v32, %v9505_v49  ;;  %v9886_v49 = vld [vmem:[#allocation2 + $0x5c8] sm:$0xff] }
 0x1d6   :  { %3518 = vmatmul.bf16.gmra.mxu2 %v3128_v14  ;;  %v2977_v25 = vpack.c.bf16 %v9886_v49, %v9884_v21 }
 0x1d7   :  { %3607 = vmatmul.bf16.gmra.mxu3 %v3137_v57  ;;  %v2803_v32 = vpop.f32.mrf.mxu1  ;;  %4101 = vmatmul.bf16.gmra.mxu1 %v3809_v26 }
 0x1d8   :  { %v3148_v7 = vshrl.u32 %v2977_v25, 16  ;;  %v3151_v56 = vshll.u32 %v2977_v25, 16  ;;  %v2804_v57 = vadd.f32 %v2803_v32, %v2714_v28  ;;  %v3810_v28 = vpack.c.bf16 %v9853_v42, %v9827_v36 }
 0x1d9   :  { %v1879_v40 = vpop.f32.mrf.mxu2  ;;  %v2716_v37 = vpop.f32.mrf.mxu0  ;;  %v3811_v32 = vpack.c.bf16 %v9857_v0, %v9831_v6 }
 0x1da   :  { %v1968_v1 = vpop.f32.mrf.mxu3  ;;  %v3150_v14 = vrot.slane %v3148_v7, 3  ;;  %v3153_v46 = vrot.slane %v3151_v56, 4  ;;  %v9900_v48 = vadd.f32 %v2804_v57, %v9869_v2  ;;  %v9912_v2 = vld [vmem:[#allocation2 + $0x360] sm:$0xff] }
 0x1db   :  { %v1969_v59 = vadd.f32 %v1968_v1, %v1879_v40  ;;  %v3145_v40 = vor.u32 %v3144_v62, %v3141_v19 }
 0x1dc   :  { %v3154_v58 = vor.u32 %v3153_v46, %v3150_v14 }
 0x1dd   :  { %v2018_v43 = vadd.f32 %v1969_v59, %v9514_v22  ;;  %v3146_v10 = vsel %vm3067_vm3, %v3127_v23, %v3145_v40  ;;  %v9910_v23 = vld [vmem:[#allocation2 + $0x3b8] sm:$0xff] }
 0x1de   :  { %v3155_v31 = vsel %vm3067_vm3, %v3136_v24, %v3154_v58  ;;  %v2978_v24 = vpack.c.bf16 %v9910_v23, %v9908_v12 }
 0x1df   :  { %v2805_v3 = vpop.f32.mrf.mxu1 }
 0x1e0   :  { %v2806_v59 = vadd.f32 %v2805_v3, %v2716_v37  ;;  %4017 = vmatmul.bf16.gmra.mxu0 %v3810_v28  ;;  %v3157_v18 = vshrl.u32 %v2978_v24, 16  ;;  %v3160_v7 = vshll.u32 %v2978_v24, 16  ;;  %v8622_v28 = vld [vmem:[#allocation10 + $0x2a8] sm:$0xff] }
 0x1e1   :  { %v1881_v54 = vpop.f32.mrf.mxu2  ;;  %v2719_v1 = vpop.f32.mrf.mxu0  ;;  %v8630_v3 = vld [vmem:[#allocation10 + $0x2e8] sm:$0xff]  ;;  %4800 = vmatpush.bf16.msrb.mxu2 %v8622_v28 }
 0x1e2   :  { %v1970_v38 = vpop.f32.mrf.mxu3  ;;  %v9920_v42 = vadd.f32 %v2806_v59, %v2017_v27  ;;  %v3159_v62 = vrot.slane %v3157_v18, 3  ;;  %v3162_v14 = vrot.slane %v3160_v7, 4  ;;  %4889 = vmatpush.bf16.msrb.mxu3 %v8630_v3  ;;  %v8646_v18 = vld [vmem:[#allocation10 + $0x368] sm:$0xff]  ;;  %v9934_v7 = vld [vmem:[#allocation2 + $0x1f0] sm:$0xff] }
 0x1e3   :  { %v1971_v22 = vadd.f32 %v1970_v38, %v1881_v54  ;;  %5729 = vmatpush.bf16.msrb.mxu1 %v8646_v18 }
 0x1e5   :  { %v9904_v8 = vadd.f32 %v1971_v22, %v9521_v52  ;;  %v9916_v52 = vld [vmem:[#allocation2 + $0x530] sm:$0xff]  ;;  %v3163_v22 = vor.u32 %v3162_v14, %v3159_v62 }
 0x1e6   :  { %3523 = vmatmul.bf16.gmra.mxu2 %v3146_v10  ;;  %v2979_v36 = vpack.c.bf16 %v9916_v52, %v9912_v2 }
 0x1e7   :  { %3612 = vmatmul.bf16.gmra.mxu3 %v3155_v31  ;;  %v2808_v57 = vpop.f32.mrf.mxu1  ;;  %4106 = vmatmul.bf16.gmra.mxu1 %v3811_v32 }
 0x1e8   :  { %v3166_v56 = vshrl.u32 %v2979_v36, 16  ;;  %v3169_v26 = vshll.u32 %v2979_v36, 16  ;;  %v2809_v27 = vadd.f32 %v2808_v57, %v2719_v1  ;;  %v3812_v1 = vpack.c.bf16 %v9880_v33, %v9855_v35  ;;  %v8638_v36 = vld [vmem:[#allocation10 + $0x328] sm:$0xff] }
 0x1e9   :  { %v1884_v16 = vpop.f32.mrf.mxu2  ;;  %v2721_v38 = vpop.f32.mrf.mxu0  ;;  %5640 = vmatpush.bf16.msrb.mxu0 %v8638_v36 }
 0x1ea   :  { %v1973_v25 = vpop.f32.mrf.mxu3  ;;  %v3168_v37 = vrot.slane %v3166_v56, 3  ;;  %v3171_v46 = vrot.slane %v3169_v26, 4  ;;  %v9928_v59 = vadd.f32 %v2809_v27, %v2018_v43  ;;  %v9936_v56 = vld [vmem:[#allocation2 + $0x460] sm:$0xff] }
 0x1eb   :  { %v1974_v30 = vadd.f32 %v1973_v25, %v1884_v16  ;;  %v3164_v16 = vsel %vm3067_vm3, %v3145_v40, %v3163_v22  ;;  %v2980_v35 = vpack.c.bf16 %v9936_v56, %v9934_v7 }
 0x1ec   :  { %v3172_v10 = vor.u32 %v3171_v46, %v3168_v37 }
 0x1ed   :  { %v9923_v54 = vadd.f32 %v1974_v30, %v9527_v11  ;;  %v3175_v14 = vshrl.u32 %v2980_v35, 16  ;;  %v3178_v32 = vshll.u32 %v2980_v35, 16  ;;  %v9962_v35 = vld [vmem:[#allocation2 + $0x1d0] sm:$0xff] }
 0x1ee   :  { %v3173_v25 = vsel %vm3067_vm3, %v3154_v58, %v3172_v10  ;;  %v9938_v58 = vld [vmem:[#allocation2 + $0x3a0] sm:$0xff] }
 0x1ef   :  { %v2810_v24 = vpop.f32.mrf.mxu1  ;;  %v3177_v27 = vrot.slane %v3175_v14, 3 }
 0x1f0   :  { %v2811_v30 = vadd.f32 %v2810_v24, %v2721_v38  ;;  %4022 = vmatmul.bf16.gmra.mxu0 %v3812_v1  ;;  %v3813_v38 = vpack.c.bf16 %v9884_v21, %v9861_v55 }
 0x1f1   :  { %v1886_v19 = vpop.f32.mrf.mxu2  ;;  %v2724_v40 = vpop.f32.mrf.mxu0 }
 0x1f2   :  { %v1975_v31 = vpop.f32.mrf.mxu3 }
 0x1f3   :  { %v1976_v11 = vadd.f32 %v1975_v31, %v1886_v19  ;;  %v9947_v19 = vadd.f32 %v2811_v30, %v9904_v8  ;;  %v3180_v31 = vrot.slane %v3178_v32, 4 }
 0x1f5   :  { %v2021_v6 = vadd.f32 %v1976_v11, %v9535_v50  ;;  %v9940_v50 = vld [vmem:[#allocation2 + $0x2c8] sm:$0xff] }
 0x1f6   :  { %3528 = vmatmul.bf16.gmra.mxu2 %v3164_v16  ;;  %v2981_v33 = vpack.c.bf16 %v9940_v50, %v9938_v58 }
 0x1f7   :  { %3617 = vmatmul.bf16.gmra.mxu3 %v3173_v25  ;;  %v2813_v11 = vpop.f32.mrf.mxu1  ;;  %4111 = vmatmul.bf16.gmra.mxu1 %v3813_v38 }
 0x1f8   :  { %v3184_v37 = vshrl.u32 %v2981_v33, 16  ;;  %v3187_v57 = vshll.u32 %v2981_v33, 16  ;;  %v2814_v25 = vadd.f32 %v2813_v11, %v2724_v40  ;;  %v3814_v40 = vpack.c.bf16 %v9908_v12, %v9882_v45 }
 0x1f9   :  { %v1889_v0 = vpop.f32.mrf.mxu2  ;;  %v2726_v28 = vpop.f32.mrf.mxu0  ;;  %v3815_v11 = vpack.c.bf16 %v9912_v2, %v9886_v49 }
 0x1fa   :  { %v1978_v43 = vpop.f32.mrf.mxu3  ;;  %v3186_v16 = vrot.slane %v3184_v37, 3  ;;  %v3189_v3 = vrot.slane %v3187_v57, 4  ;;  %v9954_v30 = vadd.f32 %v2814_v25, %v9923_v54  ;;  %v9966_v54 = vld [vmem:[#allocation2 + $0x4f0] sm:$0xff] }
 0x1fb   :  { %v1979_v26 = vadd.f32 %v1978_v43, %v1889_v0  ;;  %v3181_v0 = vor.u32 %v3180_v31, %v3177_v27 }
 0x1fc   :  { %v3190_v1 = vor.u32 %v3189_v3, %v3186_v16 }
 0x1fd   :  { %v2022_v62 = vadd.f32 %v1979_v26, %v9541_v5  ;;  %v3182_v24 = vsel %vm3067_vm3, %v3163_v22, %v3181_v0  ;;  %v9964_v22 = vld [vmem:[#allocation2 + $0x50] sm:$0xff] }
 0x1fe   :  { %v3191_v55 = vsel %vm3067_vm3, %v3172_v10, %v3190_v1  ;;  %v2982_v10 = vpack.c.bf16 %v9964_v22, %v9962_v35 }
 0x1ff   :  { %v2815_v18 = vpop.f32.mrf.mxu1 }
 0x200   :  { %v2816_v26 = vadd.f32 %v2815_v18, %v2726_v28  ;;  %4027 = vmatmul.bf16.gmra.mxu0 %v3814_v40  ;;  %v3193_v32 = vshrl.u32 %v2982_v10, 16  ;;  %v3196_v37 = vshll.u32 %v2982_v10, 16  ;;  %v8621_v40 = vld [vmem:[#allocation10 + $0x2a0] sm:$0xff] }
 0x201   :  { %v1891_v46 = vpop.f32.mrf.mxu2  ;;  %v2729_v43 = vpop.f32.mrf.mxu0  ;;  %v8629_v18 = vld [vmem:[#allocation10 + $0x2e0] sm:$0xff]  ;;  %4801 = vmatpush.bf16.msrb.mxu2 %v8621_v40 }
 0x202   :  { %v1980_v8 = vpop.f32.mrf.mxu3  ;;  %v9974_v12 = vadd.f32 %v2816_v26, %v2021_v6  ;;  %v3195_v31 = vrot.slane %v3193_v32, 3  ;;  %v3198_v16 = vrot.slane %v3196_v37, 4  ;;  %4890 = vmatpush.bf16.msrb.mxu3 %v8629_v18  ;;  %v8645_v32 = vld [vmem:[#allocation10 + $0x360] sm:$0xff]  ;;  %v9988_v37 = vld [vmem:[#allocation2 + $0x468] sm:$0xff] }
 0x203   :  { %v1981_v5 = vadd.f32 %v1980_v8, %v1891_v46  ;;  %5730 = vmatpush.bf16.msrb.mxu1 %v8645_v32 }
 0x205   :  { %v9958_v21 = vadd.f32 %v1981_v5, %v9553_v44  ;;  %v9970_v44 = vld [vmem:[#allocation2 + $0x4a0] sm:$0xff]  ;;  %v3199_v5 = vor.u32 %v3198_v16, %v3195_v31 }
 0x206   :  { %3533 = vmatmul.bf16.gmra.mxu2 %v3182_v24  ;;  %v2983_v45 = vpack.c.bf16 %v9970_v44, %v9966_v54 }
 0x207   :  { %3622 = vmatmul.bf16.gmra.mxu3 %v3191_v55  ;;  %v2818_v25 = vpop.f32.mrf.mxu1  ;;  %4116 = vmatmul.bf16.gmra.mxu1 %v3815_v11 }
 0x208   :  { %v3202_v57 = vshrl.u32 %v2983_v45, 16  ;;  %v3205_v38 = vshll.u32 %v2983_v45, 16  ;;  %v2819_v6 = vadd.f32 %v2818_v25, %v2729_v43  ;;  %v3816_v43 = vpack.c.bf16 %v9934_v7, %v9910_v23  ;;  %v8637_v45 = vld [vmem:[#allocation10 + $0x320] sm:$0xff] }
 0x209   :  { %v1894_v36 = vpop.f32.mrf.mxu2  ;;  %v2731_v8 = vpop.f32.mrf.mxu0  ;;  %5641 = vmatpush.bf16.msrb.mxu0 %v8637_v45 }
 0x20a   :  { %v1983_v33 = vpop.f32.mrf.mxu3  ;;  %v3204_v28 = vrot.slane %v3202_v57, 3  ;;  %v3207_v3 = vrot.slane %v3205_v38, 4  ;;  %v9982_v26 = vadd.f32 %v2819_v6, %v2022_v62  ;;  %v9990_v57 = vld [vmem:[#allocation2 + $0x458] sm:$0xff] }
 0x20b   :  { %v1984_v14 = vadd.f32 %v1983_v33, %v1894_v36  ;;  %v3200_v36 = vsel %vm3067_vm3, %v3181_v0, %v3199_v5  ;;  %v2984_v23 = vpack.c.bf16 %v9990_v57, %v9988_v37 }
 0x20c   :  { %v3208_v24 = vor.u32 %v3207_v3, %v3204_v28 }
 0x20d   :  { %v9977_v46 = vadd.f32 %v1984_v14, %v9563_v9  ;;  %v3211_v16 = vshrl.u32 %v2984_v23, 16  ;;  %v3214_v11 = vshll.u32 %v2984_v23, 16  ;;  %v10016_v23 = vld [vmem:[#allocation2 + $0x400] sm:$0xff] }
 0x20e   :  { %v3209_v33 = vsel %vm3067_vm3, %v3190_v1, %v3208_v24  ;;  %v9992_v1 = vld [vmem:[#allocation2 + $0x278] sm:$0xff] }
 0x20f   :  { %v2820_v10 = vpop.f32.mrf.mxu1  ;;  %v3213_v6 = vrot.slane %v3211_v16, 3 }
 0x210   :  { %v2821_v14 = vadd.f32 %v2820_v10, %v2731_v8  ;;  %4032 = vmatmul.bf16.gmra.mxu0 %v3816_v43  ;;  %v3817_v8 = vpack.c.bf16 %v9938_v58, %v9916_v52 }
 0x211   :  { %v1896_v27 = vpop.f32.mrf.mxu2  ;;  %v2734_v0 = vpop.f32.mrf.mxu0 }
 0x212   :  { %v1985_v55 = vpop.f32.mrf.mxu3 }
 0x213   :  { %v1986_v9 = vadd.f32 %v1985_v55, %v1896_v27  ;;  %v10001_v27 = vadd.f32 %v2821_v14, %v9958_v21  ;;  %v3216_v55 = vrot.slane %v3214_v11, 4 }
 0x215   :  { %v2025_v49 = vadd.f32 %v1986_v9, %v9575_v47  ;;  %v9994_v47 = vld [vmem:[#allocation2 + $0x498] sm:$0xff] }
 0x216   :  { %3538 = vmatmul.bf16.gmra.mxu2 %v3200_v36  ;;  %v2985_v7 = vpack.c.bf16 %v9994_v47, %v9992_v1 }
 0x217   :  { %3627 = vmatmul.bf16.gmra.mxu3 %v3209_v33  ;;  %v2823_v9 = vpop.f32.mrf.mxu1  ;;  %4121 = vmatmul.bf16.gmra.mxu1 %v3817_v8 }
 0x218   :  { %v3220_v28 = vshrl.u32 %v2985_v7, 16  ;;  %v3223_v25 = vshll.u32 %v2985_v7, 16  ;;  %v2824_v33 = vadd.f32 %v2823_v9, %v2734_v0  ;;  %v3818_v0 = vpack.c.bf16 %v9962_v35, %v9936_v56 }
 0x219   :  { %v1899_v2 = vpop.f32.mrf.mxu2  ;;  %v2736_v40 = vpop.f32.mrf.mxu0  ;;  %v3819_v9 = vpack.c.bf16 %v9966_v54, %v9940_v50  ;;  %v3820_v54 = vpack.c.bf16 %v9988_v37, %v9964_v22 }
 0x21a   :  { %v1988_v62 = vpop.f32.mrf.mxu3  ;;  %v3222_v36 = vrot.slane %v3220_v28, 3  ;;  %v3225_v18 = vrot.slane %v3223_v25, 4  ;;  %v10008_v14 = vadd.f32 %v2824_v33, %v9977_v46  ;;  %v10020_v46 = vld [vmem:[#allocation2 + $0x5d8] sm:$0xff] }
 0x21b   :  { %v1989_v38 = vadd.f32 %v1988_v62, %v1899_v2  ;;  %v3217_v2 = vor.u32 %v3216_v55, %v3213_v6 }
 0x21c   :  { %v3226_v43 = vor.u32 %v3225_v18, %v3222_v36 }
 0x21d   :  { %v2026_v31 = vadd.f32 %v1989_v38, %v9585_v34  ;;  %v3218_v10 = vsel %vm3067_vm3, %v3199_v5, %v3217_v2  ;;  %v10018_v5 = vld [vmem:[#allocation2 + $0xe8] sm:$0xff] }
 0x21e   :  { %v3227_v52 = vsel %vm3067_vm3, %v3208_v24, %v3226_v43  ;;  %v2986_v24 = vpack.c.bf16 %v10018_v5, %v10016_v23 }
 0x21f   :  { %v2825_v32 = vpop.f32.mrf.mxu1 }
 0x220   :  { %v2826_v38 = vadd.f32 %v2825_v32, %v2736_v40  ;;  %4037 = vmatmul.bf16.gmra.mxu0 %v3818_v0  ;;  %v3229_v11 = vshrl.u32 %v2986_v24, 16  ;;  %v3232_v28 = vshll.u32 %v2986_v24, 16  ;;  %v8620_v0 = vld [vmem:[#allocation10 + $0x298] sm:$0xff] }
 0x221   :  { %v1901_v3 = vpop.f32.mrf.mxu2  ;;  %v2739_v62 = vpop.f32.mrf.mxu0  ;;  %v8628_v32 = vld [vmem:[#allocation10 + $0x2d8] sm:$0xff]  ;;  %4802 = vmatpush.bf16.msrb.mxu2 %v8620_v0 }
 0x222   :  { %v1990_v21 = vpop.f32.mrf.mxu3  ;;  %v10028_v35 = vadd.f32 %v2826_v38, %v2025_v49  ;;  %v3231_v55 = vrot.slane %v3229_v11, 3  ;;  %v3234_v36 = vrot.slane %v3232_v28, 4  ;;  %4891 = vmatpush.bf16.msrb.mxu3 %v8628_v32  ;;  %v8644_v11 = vld [vmem:[#allocation10 + $0x358] sm:$0xff] }
 0x223   :  { %v1991_v34 = vadd.f32 %v1990_v21, %v1901_v3  ;;  %v10042_v28 = vld [vmem:[#allocation2 + $0x178] sm:$0xff]  ;;  %5731 = vmatpush.bf16.msrb.mxu1 %v8644_v11 }
 0x225   :  { %v10012_v58 = vadd.f32 %v1991_v34, %v9595_v29  ;;  %v10024_v29 = vld [vmem:[#allocation2 + $0x160] sm:$0xff]  ;;  %v3235_v34 = vor.u32 %v3234_v36, %v3231_v55 }
 0x226   :  { %3543 = vmatmul.bf16.gmra.mxu2 %v3218_v10  ;;  %v2987_v56 = vpack.c.bf16 %v10024_v29, %v10020_v46 }
 0x227   :  { %3632 = vmatmul.bf16.gmra.mxu3 %v3227_v52  ;;  %v2828_v33 = vpop.f32.mrf.mxu1  ;;  %4126 = vmatmul.bf16.gmra.mxu1 %v3819_v9 }
 0x228   :  { %v3238_v25 = vshrl.u32 %v2987_v56, 16  ;;  %v3241_v8 = vshll.u32 %v2987_v56, 16  ;;  %v2829_v49 = vadd.f32 %v2828_v33, %v2739_v62  ;;  %v8636_v56 = vld [vmem:[#allocation10 + $0x318] sm:$0xff]  ;;  %v3821_v33 = vpack.c.bf16 %v9992_v1, %v9970_v44 }
 0x229   :  { %v1904_v45 = vpop.f32.mrf.mxu2  ;;  %v2741_v21 = vpop.f32.mrf.mxu0  ;;  %5642 = vmatpush.bf16.msrb.mxu0 %v8636_v56  ;;  %v3822_v56 = vpack.c.bf16 %v10016_v23, %v9990_v57 }
 0x22a   :  { %v1993_v7 = vpop.f32.mrf.mxu3  ;;  %v3240_v40 = vrot.slane %v3238_v25, 3  ;;  %v3243_v18 = vrot.slane %v3241_v8, 4  ;;  %v10036_v38 = vadd.f32 %v2829_v49, %v2026_v31  ;;  %v10044_v25 = vld [vmem:[#allocation2 + $0x1e0] sm:$0xff] }
 0x22b   :  { %v1994_v16 = vadd.f32 %v1993_v7, %v1904_v45  ;;  %v3236_v45 = vsel %vm3067_vm3, %v3217_v2, %v3235_v34  ;;  %v2988_v22 = vpack.c.bf16 %v10044_v25, %v10042_v28 }
 0x22c   :  { %v3244_v10 = vor.u32 %v3243_v18, %v3240_v40 }
 0x22d   :  { %v10031_v3 = vadd.f32 %v1994_v16, %v9605_v13  ;;  %v3247_v36 = vshrl.u32 %v2988_v22, 16  ;;  %v3250_v9 = vshll.u32 %v2988_v22, 16  ;;  %v10070_v22 = vld [vmem:[#allocation2 + $0x2c0] sm:$0xff] }
 0x22e   :  { %v3245_v7 = vsel %vm3067_vm3, %v3226_v43, %v3244_v10  ;;  %v10046_v43 = vld [vmem:[#allocation2 + $0x538] sm:$0xff] }
 0x22f   :  { %v2830_v24 = vpop.f32.mrf.mxu1  ;;  %v3249_v49 = vrot.slane %v3247_v36, 3 }
 0x230   :  { %v2831_v16 = vadd.f32 %v2830_v24, %v2741_v21  ;;  %4042 = vmatmul.bf16.gmra.mxu0 %v3820_v54 }
 0x231   :  { %v1906_v6 = vpop.f32.mrf.mxu2  ;;  %v2744_v2 = vpop.f32.mrf.mxu0 }
 0x232   :  { %v1995_v52 = vpop.f32.mrf.mxu3 }
 0x233   :  { %v1996_v13 = vadd.f32 %v1995_v52, %v1906_v6  ;;  %v10055_v6 = vadd.f32 %v2831_v16, %v10012_v58  ;;  %v3252_v52 = vrot.slane %v3250_v9, 4 }
 0x235   :  { %v2029_v50 = vadd.f32 %v1996_v13, %v9614_v15  ;;  %v10048_v15 = vld [vmem:[#allocation2 + $0x390] sm:$0xff]  ;;  %v3253_v54 = vor.u32 %v3252_v52, %v3249_v49 }
 0x236   :  { %3548 = vmatmul.bf16.gmra.mxu2 %v3236_v45  ;;  %v2989_v37 = vpack.c.bf16 %v10048_v15, %v10046_v43 }
 0x237   :  { %3637 = vmatmul.bf16.gmra.mxu3 %v3245_v7  ;;  %v2833_v13 = vpop.f32.mrf.mxu1  ;;  %4131 = vmatmul.bf16.gmra.mxu1 %v3821_v33  ;;  %v3254_v24 = vsel %vm3067_vm3, %v3235_v34, %v3253_v54  ;;  %v10072_v34 = vld [vmem:[#allocation2 + $0x5b0] sm:$0xff] }
 0x238   :  { %v3256_v40 = vshrl.u32 %v2989_v37, 16  ;;  %v3259_v18 = vshll.u32 %v2989_v37, 16  ;;  %v2834_v7 = vadd.f32 %v2833_v13, %v2744_v2 }
 0x239   :  { %v3509_v62 = vpop.f32.mrf.mxu2  ;;  %v2746_v0 = vpop.f32.mrf.mxu0 }
 0x23a   :  { %v3598_v31 = vpop.f32.mrf.mxu3  ;;  %v3258_v45 = vrot.slane %v3256_v40, 3  ;;  %v3261_v32 = vrot.slane %v3259_v18, 4  ;;  %v10062_v16 = vadd.f32 %v2834_v7, %v10031_v3  ;;  %v10074_v3 = vld [vmem:[#allocation2 + $0x228] sm:$0xff] }
 0x23b   :  { %v3599_v8 = vadd.f32 %v3598_v31, %v3509_v62 }
 0x23c   :  { %v3262_v62 = vor.u32 %v3261_v32, %v3258_v45  ;;  %v3823_v45 = vpack.c.bf16 %v10020_v46, %v9994_v47 }
 0x23d   :  { %v3678_v55 = vadd.f32 %v3599_v8, %v9650_v41 }
 0x23e   :  { %v3263_v44 = vsel %vm3067_vm3, %v3244_v10, %v3262_v62  ;;  %v2990_v10 = vpack.c.bf16 %v10072_v34, %v10070_v22 }
 0x23f   :  { %v2835_v11 = vpop.f32.mrf.mxu1 }
 0x240   :  { %v2836_v8 = vadd.f32 %v2835_v11, %v2746_v0  ;;  %4047 = vmatmul.bf16.gmra.mxu0 %v3822_v56  ;;  %v3265_v9 = vshrl.u32 %v2990_v10, 16  ;;  %v3268_v40 = vshll.u32 %v2990_v10, 16  ;;  %v8627_v11 = vld [vmem:[#allocation10 + $0x2d0] sm:$0xff] }
 0x241   :  { %v3511_v21 = vpop.f32.mrf.mxu2  ;;  %v4008_v31 = vpop.f32.mrf.mxu0  ;;  %4892 = vmatpush.bf16.msrb.mxu3 %v8627_v11 }
 0x242   :  { %v3600_v58 = vpop.f32.mrf.mxu3  ;;  %v10082_v23 = vadd.f32 %v2836_v8, %v2029_v50  ;;  %v3267_v49 = vrot.slane %v3265_v9, 3  ;;  %v3270_v52 = vrot.slane %v3268_v40, 4  ;;  %v8643_v9 = vld [vmem:[#allocation10 + $0x350] sm:$0xff]  ;;  %v10096_v40 = vld [vmem:[#allocation2 + $0xd8] sm:$0xff] }
 0x243   :  { %v3601_v41 = vadd.f32 %v3600_v58, %v3511_v21  ;;  %5732 = vmatpush.bf16.msrb.mxu1 %v8643_v9 }
 0x245   :  { %v10066_v1 = vadd.f32 %v3601_v41, %v9660_v60  ;;  %v10078_v60 = vld [vmem:[#allocation2 + $0xc0] sm:$0xff]  ;;  %v3271_v41 = vor.u32 %v3270_v52, %v3267_v49 }
 0x246   :  { %3553 = vmatmul.bf16.gmra.mxu2 %v3254_v24  ;;  %v2991_v57 = vpack.c.bf16 %v10078_v60, %v10074_v3  ;;  %v11563_v52 = vld [vmem:[#allocation20_spill] sm:$0xff] }
 0x247   :  { %3642 = vmatmul.bf16.gmra.mxu3 %v3263_v44  ;;  %v4097_v7 = vpop.f32.mrf.mxu1  ;;  %v3272_v56 = vsel %vm3067_vm3, %v3253_v54, %v3271_v41  ;;  %4136 = vmatmul.bf16.gmra.mxu1 %v3823_v45 }
 0x248   :  { %v3274_v33 = vshrl.u32 %v2991_v57, 16  ;;  %v3277_v21 = vshll.u32 %v2991_v57, 16  ;;  %v4098_v50 = vadd.f32 %v4097_v7, %v4008_v31  ;;  %v3824_v31 = vpack.c.bf16 %v10042_v28, %v10018_v5  ;;  %v8635_v57 = vld [vmem:[#allocation10 + $0x310] sm:$0xff] }
 0x249   :  { %v3514_v2 = vpop.f32.mrf.mxu2  ;;  %v4010_v58 = vpop.f32.mrf.mxu0  ;;  %5643 = vmatpush.bf16.msrb.mxu0 %v8635_v57 }
 0x24a   :  { %v3603_v37 = vpop.f32.mrf.mxu3  ;;  %v3276_v0 = vrot.slane %v3274_v33, 3  ;;  %v3279_v32 = vrot.slane %v3277_v21, 4  ;;  %v10090_v8 = vadd.f32 %v4098_v50, %v3678_v55  ;;  %v10098_v33 = vld [vmem:[#allocation2 + $0x30] sm:$0xff] }
 0x24b   :  { %v3604_v36 = vadd.f32 %v3603_v37, %v3514_v2  ;;  %v8619_v2 = vld [vmem:[#allocation10 + $0x290] sm:$0xff]  ;;  %v2992_v5 = vpack.c.bf16 %v10098_v33, %v10096_v40 }
 0x24c   :  { %v3280_v24 = vor.u32 %v3279_v32, %v3276_v0  ;;  %4803 = vmatpush.bf16.msrb.mxu2 %v8619_v2 }
 0x24d   :  { %v10085_v18 = vadd.f32 %v3604_v36, %v9673_v61  ;;  %v3286_v0 = vshll.u32 %v2992_v5, 16 }
 0x24e   :  { %v3281_v47 = vsel %vm3067_vm3, %v3262_v62, %v3280_v24  ;;  %v10100_v62 = vld [vmem:[#allocation2 + $0x428] sm:$0xff] }
 0x24f   :  { %v4099_v10 = vpop.f32.mrf.mxu1 }
 0x250   :  { %v4100_v36 = vadd.f32 %v4099_v10, %v4010_v58  ;;  %4052 = vmatmul.bf16.gmra.mxu0 %v3824_v31  ;;  %v3825_v58 = vpack.c.bf16 %v10046_v43, %v10024_v29  ;;  %v11564_v43 = vld [vmem:[#allocation21_spill] sm:$0xff] }
 0x251   :  { %v3516_v13 = vpop.f32.mrf.mxu2  ;;  %v4013_v54 = vpop.f32.mrf.mxu0 }
 0x252   :  { %v3605_v44 = vpop.f32.mrf.mxu3  ;;  %v10109_v49 = vadd.f32 %v4100_v36, %v10066_v1 }
 0x253   :  { %v3606_v61 = vadd.f32 %v3605_v44, %v3516_v13  ;;  %v3283_v13 = vshrl.u32 %v2992_v5, 16 }
 0x255   :  { %v3681_v46 = vadd.f32 %v3606_v61, %v9683_v39  ;;  %v10102_v39 = vld [vmem:[#allocation2 + $0x410] sm:$0xff]  ;;  %v3285_v44 = vrot.slane %v3283_v13, 3  ;;  %v10124_v13 = vld [vmem:[#allocation2 + $0x208] sm:$0xff] }
 0x256   :  { %3558 = vmatmul.bf16.gmra.mxu2 %v3272_v56  ;;  %v2993_v28 = vpack.c.bf16 %v10102_v39, %v10100_v62  ;;  %v3288_v56 = vrot.slane %v3286_v0, 4 }
 0x257   :  { %3647 = vmatmul.bf16.gmra.mxu3 %v3281_v47  ;;  %v4102_v2 = vpop.f32.mrf.mxu1  ;;  %4141 = vmatmul.bf16.gmra.mxu1 %v3825_v58 }
 0x258   :  { %v3292_v32 = vshrl.u32 %v2993_v28, 16  ;;  %v3295_v7 = vshll.u32 %v2993_v28, 16  ;;  %v4103_v31 = vadd.f32 %v4102_v2, %v4013_v54 }
 0x259   :  { %v3519_v37 = vpop.f32.mrf.mxu2  ;;  %v4015_v11 = vpop.f32.mrf.mxu0 }
 0x25a   :  { %v3608_v55 = vpop.f32.mrf.mxu3  ;;  %v3294_v61 = vrot.slane %v3292_v32, 3  ;;  %v3297_v47 = vrot.slane %v3295_v7, 4  ;;  %v10116_v9 = vadd.f32 %v4103_v31, %v10085_v18  ;;  %v10128_v18 = vld [vmem:[#allocation2 + $0x4a8] sm:$0xff]  ;;  %v10132_v32 = vld [vmem:[#allocation2 + $0x218] sm:$0xff]  ;;  %v3827_v31 = vpack.c.bf16 %v10074_v3, %v10048_v15 }
 0x25b   :  { %v3609_v21 = vadd.f32 %v3608_v55, %v3519_v37  ;;  %v3289_v37 = vor.u32 %v3288_v56, %v3285_v44  ;;  %v11565_v44 = vld [vmem:[#allocation22_spill] sm:$0xff]  ;;  %v11566_v3 = vld [vmem:[#allocation23_spill] sm:$0xff] }
 0x25c   :  { %v3298_v10 = vor.u32 %v3297_v47, %v3294_v61 }
 0x25d   :  { %v3682_v45 = vadd.f32 %v3609_v21, %v11563_v52  ;;  %v3290_v57 = vsel %vm3067_vm3, %v3271_v41, %v3289_v37  ;;  %v3826_v21 = vpack.c.bf16 %v10070_v22, %v10044_v25  ;;  %v10126_v41 = vld [vmem:[#allocation2 + $0x5b8] sm:$0xff]  ;;  %v2995_v25 = vpack.c.bf16 %v10132_v32, %v10128_v18 }
 0x25e   :  { %v3299_v29 = vsel %vm3067_vm3, %v3280_v24, %v3298_v10  ;;  %v2994_v24 = vpack.c.bf16 %v10126_v41, %v10124_v13 }
 0x25f   :  { %v4104_v5 = vpop.f32.mrf.mxu1  ;;  %v3310_v61 = vshrl.u32 %v2995_v25, 16  ;;  %v3313_v2 = vshll.u32 %v2995_v25, 16 }
 0x260   :  { %v4105_v52 = vadd.f32 %v4104_v5, %v4015_v11  ;;  %4057 = vmatmul.bf16.gmra.mxu0 %v3826_v21  ;;  %v3301_v58 = vshrl.u32 %v2994_v24, 16 }
 0x261   :  { %v3521_v50 = vpop.f32.mrf.mxu2  ;;  %v4018_v28 = vpop.f32.mrf.mxu0 }
 0x262   :  { %v3610_v1 = vpop.f32.mrf.mxu3  ;;  %v10136_v22 = vadd.f32 %v4105_v52, %v3681_v46  ;;  %v3303_v11 = vrot.slane %v3301_v58, 3 }
 0x263   :  { %v3611_v36 = vadd.f32 %v3610_v1, %v3521_v50  ;;  %v3304_v50 = vshll.u32 %v2994_v24, 16  ;;  %v8618_v24 = vld [vmem:[#allocation10 + $0x288] sm:$0xff] }
 0x264   :  { %4804 = vmatpush.bf16.msrb.mxu2 %v8618_v24  ;;  %v3829_v24 = vpack.c.bf16 %v10100_v62, %v10078_v60  ;;  %v11569_v62 = vld [vmem:[#allocation25_spill] sm:$0xff] }
 0x265   :  { %v10120_v55 = vadd.f32 %v3611_v36, %v11564_v43  ;;  %v3306_v47 = vrot.slane %v3304_v50, 4  ;;  %v3312_v36 = vrot.slane %v3310_v61, 3 }
 0x266   :  { %3563 = vmatmul.bf16.gmra.mxu2 %v3290_v57  ;;  %v3315_v57 = vrot.slane %v3313_v2, 4  ;;  %v8634_v2 = vld [vmem:[#allocation10 + $0x308] sm:$0xff] }
 0x267   :  { %3652 = vmatmul.bf16.gmra.mxu3 %v3299_v29  ;;  %v4107_v29 = vpop.f32.mrf.mxu1  ;;  %v3307_v21 = vor.u32 %v3306_v47, %v3303_v11  ;;  %4146 = vmatmul.bf16.gmra.mxu1 %v3827_v31  ;;  %v8642_v11 = vld [vmem:[#allocation10 + $0x348] sm:$0xff]  ;;  %v10152_v31 = vld [vmem:[#allocation2 + $0x420] sm:$0xff] }
 0x268   :  { %v4108_v46 = vadd.f32 %v4107_v29, %v4018_v28  ;;  %v3828_v28 = vpack.c.bf16 %v10096_v40, %v10072_v34  ;;  %v10150_v47 = vld [vmem:[#allocation2 + $0x368] sm:$0xff]  ;;  %5733 = vmatpush.bf16.msrb.mxu1 %v8642_v11  ;;  %5644 = vmatpush.bf16.msrb.mxu0 %v8634_v2  ;;  %v11567_v29 = vld [vmem:[#allocation24_spill] sm:$0xff] }
 0x269   :  { %v3524_v54 = vpop.f32.mrf.mxu2  ;;  %v4020_v43 = vpop.f32.mrf.mxu0  ;;  %v3308_v52 = vsel %vm3067_vm3, %v3289_v37, %v3307_v21  ;;  %v2996_v34 = vpack.c.bf16 %v10152_v31, %v10150_v47 }
 0x26a   :  { %v3613_v0 = vpop.f32.mrf.mxu3  ;;  %v10144_v25 = vadd.f32 %v4108_v46, %v3682_v45 }
 0x26b   :  { %v3614_v7 = vadd.f32 %v3613_v0, %v3524_v54  ;;  %v3316_v54 = vor.u32 %v3315_v57, %v3312_v36  ;;  %v3319_v46 = vshrl.u32 %v2996_v34, 16 }
 0x26d   :  { %v10139_v56 = vadd.f32 %v3614_v7, %v11565_v44  ;;  %v8626_v7 = vld [vmem:[#allocation10 + $0x2c8] sm:$0xff]  ;;  %v3317_v15 = vsel %vm3067_vm3, %v3298_v10, %v3316_v54  ;;  %v10154_v10 = vld [vmem:[#allocation2 + $0x298] sm:$0xff] }
 0x26e   :  { %4893 = vmatpush.bf16.msrb.mxu3 %v8626_v7 }
 0x26f   :  { %v4109_v44 = vpop.f32.mrf.mxu1 }
 0x270   :  { %v4110_v61 = vadd.f32 %v4109_v44, %v4020_v43  ;;  %4062 = vmatmul.bf16.gmra.mxu0 %v3828_v28 }
 0x271   :  { %v3526_v1 = vpop.f32.mrf.mxu2  ;;  %v4023_v37 = vpop.f32.mrf.mxu0 }
 0x272   :  { %v3615_v5 = vpop.f32.mrf.mxu3  ;;  %v10163_v57 = vadd.f32 %v4110_v61, %v10120_v55 }
 0x273   :  { %v3616_v0 = vadd.f32 %v3615_v5, %v3526_v1  ;;  %v10156_v1 = vld [vmem:[#allocation2 + $0x88] sm:$0xff]  ;;  %v3322_v5 = vshll.u32 %v2996_v34, 16 }
 0x274   :  { %v2997_v40 = vpack.c.bf16 %v10156_v1, %v10154_v10 }
 0x275   :  { %v3685_v58 = vadd.f32 %v3616_v0, %v11566_v3  ;;  %v3324_v3 = vrot.slane %v3322_v5, 4 }
 0x276   :  { %3568 = vmatmul.bf16.gmra.mxu2 %v3308_v52  ;;  %v3328_v52 = vshrl.u32 %v2997_v40, 16  ;;  %v3331_v0 = vshll.u32 %v2997_v40, 16 }
 0x277   :  { %3657 = vmatmul.bf16.gmra.mxu3 %v3317_v15  ;;  %v3321_v15 = vrot.slane %v3319_v46, 3  ;;  %4151 = vmatmul.bf16.gmra.mxu1 %v3829_v24  ;;  %v3830_v46 = vpack.c.bf16 %v10124_v13, %v10098_v33  ;;  %v10176_v24 = vld [vmem:[#allocation2 + $0x130] sm:$0xff] }
 0x278   :  { %v3330_v28 = vrot.slane %v3328_v52, 3  ;;  %v3333_v11 = vrot.slane %v3331_v0, 4 }
 0x279   :  { %v3529_v50 = vpop.f32.mrf.mxu2  ;;  %v4025_v44 = vpop.f32.mrf.mxu0 }
 0x27a   :  { %v3618_v45 = vpop.f32.mrf.mxu3  ;;  %v3334_v61 = vor.u32 %v3333_v11, %v3330_v28 }
 0x27b   :  { %v3619_v36 = vadd.f32 %v3618_v45, %v3529_v50  ;;  %v4112_v50 = vpop.f32.mrf.mxu1  ;;  %v3325_v45 = vor.u32 %v3324_v3, %v3321_v15  ;;  %v10184_v15 = vld [vmem:[#allocation2 + $0x2e0] sm:$0xff] }
 0x27c   :  { %v4113_v2 = vadd.f32 %v4112_v50, %v4023_v37  ;;  %v3335_v60 = vsel %vm3067_vm3, %v3316_v54, %v3334_v61 }
 0x27d   :  { %v3686_v43 = vadd.f32 %v3619_v36, %v11567_v29  ;;  %v3326_v34 = vsel %vm3067_vm3, %v3307_v21, %v3325_v45  ;;  %v10180_v21 = vld [vmem:[#allocation2 + $0x5f0] sm:$0xff] }
 0x27e   :  { %v10170_v40 = vadd.f32 %v4113_v2, %v10139_v56  ;;  %v2999_v33 = vpack.c.bf16 %v10184_v15, %v10180_v21 }
 0x280   :  { %11568 = vst [vmem:[#allocation20_spill] sm:$0xff] %v10170_v40  ;;  %4067 = vmatmul.bf16.gmra.mxu0 %v3830_v46  ;;  %v3346_v2 = vshrl.u32 %v2999_v33, 16 }
 0x281   :  { %v3531_v7 = vpop.f32.mrf.mxu2  ;;  %v4028_v52 = vpop.f32.mrf.mxu0 }
 0x282   :  { %v3620_v55 = vpop.f32.mrf.mxu3  ;;  %v3348_v46 = vrot.slane %v3346_v2, 3 }
 0x283   :  { %v3621_v36 = vadd.f32 %v3620_v55, %v3531_v7  ;;  %v4114_v5 = vpop.f32.mrf.mxu1  ;;  %v10178_v7 = vld [vmem:[#allocation2 + $0x230] sm:$0xff]  ;;  %v3349_v55 = vshll.u32 %v2999_v33, 16  ;;  %v8625_v33 = vld [vmem:[#allocation10 + $0x2c0] sm:$0xff] }
 0x284   :  { %v4115_v0 = vadd.f32 %v4114_v5, %v4025_v44  ;;  %v2998_v54 = vpack.c.bf16 %v10178_v7, %v10176_v24  ;;  %v11571_v44 = vld [vmem:[#allocation26_spill] sm:$0xff]  ;;  %4894 = vmatpush.bf16.msrb.mxu3 %v8625_v33  ;;  %v3833_v33 = vpack.c.bf16 %v10154_v10, %v10132_v32  ;;  %v3834_v10 = vpack.c.bf16 %v10176_v24, %v10152_v31  ;;  %v4248_v31 = vld [vmem:[#allocation2 + $0x5a0] sm:$0xff] }
 0x285   :  { %v3687_v29 = vadd.f32 %v3621_v36, %v11569_v62 }
 0x286   :  { %3573 = vmatmul.bf16.gmra.mxu2 %v3326_v34  ;;  %v10188_v13 = vadd.f32 %v4115_v0, %v3685_v58  ;;  %v3337_v28 = vshrl.u32 %v2998_v54, 16  ;;  %v3340_v50 = vshll.u32 %v2998_v54, 16 }
 0x287   :  { %3662 = vmatmul.bf16.gmra.mxu3 %v3335_v60  ;;  %v3831_v60 = vpack.c.bf16 %v10128_v18, %v10102_v39  ;;  %v11572_v18 = vld [vmem:[#allocation27_spill] sm:$0xff] }
 0x288   :  { %11570 = vst [vmem:[#allocation21_spill] sm:$0xff] %v10188_v13  ;;  %v3339_v36 = vrot.slane %v3337_v28, 3  ;;  %v3342_v34 = vrot.slane %v3340_v50, 4 }
 0x289   :  { %v3534_v37 = vpop.f32.mrf.mxu2  ;;  %4156 = vmatmul.bf16.gmra.mxu1 %v3831_v60 }
 0x28a   :  { %v3623_v56 = vpop.f32.mrf.mxu3  ;;  %v3343_v40 = vor.u32 %v3342_v34, %v3339_v36  ;;  %v8633_v36 = vld [vmem:[#allocation10 + $0x300] sm:$0xff] }
 0x28b   :  { %v3624_v3 = vadd.f32 %v3623_v56, %v3534_v37  ;;  %v3351_v37 = vrot.slane %v3349_v55, 4  ;;  %v4117_v5 = vpop.f32.mrf.mxu1  ;;  %v4030_v56 = vpop.f32.mrf.mxu0  ;;  %v8641_v34 = vld [vmem:[#allocation10 + $0x340] sm:$0xff]  ;;  %5645 = vmatpush.bf16.msrb.mxu0 %v8633_v36 }
 0x28c   :  { %v4118_v58 = vadd.f32 %v4117_v5, %v4028_v52  ;;  %v3344_v54 = vsel %vm3067_vm3, %v3325_v45, %v3343_v40  ;;  %v3832_v52 = vpack.c.bf16 %v10150_v47, %v10126_v41  ;;  %5734 = vmatpush.bf16.msrb.mxu1 %v8641_v34 }
 0x28d   :  { %v10191_v11 = vadd.f32 %v3624_v3, %v11571_v44  ;;  %v3352_v0 = vor.u32 %v3351_v37, %v3348_v46  ;;  %v8617_v44 = vld [vmem:[#allocation10 + $0x280] sm:$0xff]  ;;  %v2967_v46 = vld [vmem:[#allocation2 + $0xa8] sm:$0x7f] }
 0x28e   :  { %v10196_v28 = vadd.f32 %v4118_v58, %v3686_v43  ;;  %4805 = vmatpush.bf16.msrb.mxu2 %v8617_v44  ;;  %v2966_v43 = vld [vmem:[#allocation2 + $0x110] sm:$0x7f]  ;;  %v3001_v37 = vpack.c.bf16 %v2967_v46, %v2967_v46 }
 0x28f   :  { %v3353_v39 = vsel %vm3067_vm3, %v3334_v61, %v3352_v0 }
 0x290   :  { %4072 = vmatmul.bf16.gmra.mxu0 %v3832_v52 }
 0x291   :  { %v3536_v62 = vpop.f32.mrf.mxu2 }
 0x292   :  { %v3625_v13 = vpop.f32.mrf.mxu3 }
 0x293   :  { %v3626_v3 = vadd.f32 %v3625_v13, %v3536_v62  ;;  %v4119_v45 = vpop.f32.mrf.mxu1  ;;  %v4033_v55 = vpop.f32.mrf.mxu0  ;;  %v3000_v62 = vpack.c.bf16 %v2966_v43, %v2966_v43 }
 0x294   :  { %v4120_v13 = vadd.f32 %v4119_v45, %v4030_v56  ;;  %v3367_v56 = vshll.u32 %v3001_v37, 16 }
 0x295   :  { %v10200_v50 = vadd.f32 %v3626_v3, %v11572_v18  ;;  %v3355_v58 = vshrl.u32 %v3000_v62, 16  ;;  %v3358_v41 = vshll.u32 %v3000_v62, 16 }
 0x296   :  { %3578 = vmatmul.bf16.gmra.mxu2 %v3344_v54  ;;  %v10204_v5 = vadd.f32 %v4120_v13, %v3687_v29  ;;  %v3364_v54 = vshrl.u32 %v3001_v37, 16  ;;  %v3369_v52 = vrot.slane %v3367_v56, 4 }
 0x297   :  { %3667 = vmatmul.bf16.gmra.mxu3 %v3353_v39  ;;  %v3357_v3 = vrot.slane %v3355_v58, 3  ;;  %v3360_v44 = vrot.slane %v3358_v41, 4  ;;  %v4243_v58 = vld [vmem:[#allocation2 + $0x438] sm:$0xff]  ;;  %v4245_v41 = vld [vmem:[#allocation2 + $0x60] sm:$0xff] }
 0x298   :  { %v3366_v18 = vrot.slane %v3364_v54, 3 }
 0x299   :  { %v3539_v2 = vpop.f32.mrf.mxu2  ;;  %v3361_v29 = vor.u32 %v3360_v44, %v3357_v3  ;;  %4161 = vmatmul.bf16.gmra.mxu1 %v3833_v33  ;;  %v4242_v3 = vld [vmem:[#allocation2 + $0x260] sm:$0xfe]  ;;  %v10221_v44 = vld [vmem:[#allocation2 + $0xf0] sm:$0xff] }
 0x29a   :  { %v3628_v60 = vpop.f32.mrf.mxu3  ;;  %v3370_v36 = vor.u32 %v3369_v52, %v3366_v18  ;;  %v4246_v33 = vld [vmem:[#allocation2 + $0x200] sm:$0xff]  ;;  %v4308_v24 = vpack.c.bf16 %v10221_v44, %v4242_v3  ;;  %v5040_v3 = vld [vmem:[#allocation2 + $0x5d0] sm:$0xe0] }
 0x29b   :  { %v3629_v61 = vadd.f32 %v3628_v60, %v3539_v2  ;;  %v4122_v2 = vpop.f32.mrf.mxu1  ;;  %v4035_v45 = vpop.f32.mrf.mxu0  ;;  %v3362_v43 = vsel %vm3067_vm3, %v3343_v40, %v3361_v29  ;;  %v4241_v40 = vld [vmem:[#allocation2 + $0x5d0] sm:$0xfe]  ;;  %v10229_v52 = vpack.c.bf16 %v4248_v31, %v4246_v33 }
 0x29c   :  { %v4123_v13 = vadd.f32 %v4122_v2, %v4033_v55  ;;  %v3371_v62 = vsel %vm3067_vm3, %v3352_v0, %v3370_v36  ;;  %v4307_v56 = vpack.c.bf16 %v4243_v58, %v4241_v40  ;;  %v4421_v29 = vshll.u32 %v4308_v24, 16 }
 0x29d   :  { %v10207_v47 = vadd.f32 %v3629_v61, %v9815_v17 }
 0x29e   :  { %v10213_v60 = vadd.f32 %v4123_v13, %v10191_v11  ;;  %v4247_v11 = vld [vmem:[#allocation2 + $0x80] sm:$0xff]  ;;  %v4409_v18 = vshll.u32 %v4307_v56, 16  ;;  %v4407_v13 = vshrl.u32 %v4307_v56, 16 }
 0x29f   :  { %v10223_v0 = vpack.c.bf16 %v4247_v11, %v4245_v41 }
 0x2a0   :  { %4077 = vmatmul.bf16.gmra.mxu0 %v3834_v10  ;;  %v4411_v36 = vrot.slane %v4409_v18, 1 }
 0x2a1   :  { %v3541_v39 = vpop.f32.mrf.mxu2 }
 0x2a2   :  { %v3630_v34 = vpop.f32.mrf.mxu3 }
 0x2a3   :  { %v3631_v17 = vadd.f32 %v3630_v34, %v3541_v39  ;;  %v4124_v46 = vpop.f32.mrf.mxu1  ;;  %v4038_v61 = vpop.f32.mrf.mxu0  ;;  %v4419_v34 = vshrl.u32 %v4308_v24, 16 }
 0x2a4   :  { %v4125_v37 = vadd.f32 %v4124_v46, %v4035_v45  ;;  %v4414_v45 = vshll.u32 %v10223_v0, 16  ;;  %v4412_v46 = vor.u32 %v4411_v36, %v4407_v13 }
 0x2a5   :  { %v10217_v32 = vadd.f32 %v3631_v17, %v9838_v4  ;;  %v3835_v17 = vpack.c.bf16 %v10180_v21, %v10156_v1  ;;  %v8656_v1 = vld [vmem:[#allocation10 + $0x3b8] sm:$0xff] }
 0x2a6   :  { %3583 = vmatmul.bf16.gmra.mxu2 %v3362_v43  ;;  %v10227_v39 = vadd.f32 %v4125_v37, %v10200_v50  ;;  %v4426_v43 = vshll.u32 %v10229_v52, 16  ;;  %v4423_v50 = vrot.slane %v4421_v29, 1  ;;  %v8664_v21 = vld [vmem:[#allocation10 + $0x3f8] sm:$0xff] }
 0x2a7   :  { %3672 = vmatmul.bf16.gmra.mxu3 %v3371_v62  ;;  %6274 = vmatpush.bf16.msra.mxu2 %v8656_v1 }
 0x2a8   :  { %v4428_v37 = vrot.slane %v4426_v43, 1  ;;  %v4424_v41 = vor.u32 %v4423_v50, %v4419_v34  ;;  %6363 = vmatpush.bf16.msra.mxu3 %v8664_v21  ;;  %v3805_v34 = vld [vmem:[#allocation2 + $0xa8] sm:$0xff]  ;;  %v8672_v50 = vld [vmem:[#allocation10 + $0x438] sm:$0xff] }
 0x2a9   :  { %v3544_v55 = vpop.f32.mrf.mxu2  ;;  %4166 = vmatmul.bf16.gmra.mxu1 %v3835_v17  ;;  %v5041_v17 = vld [vmem:[#allocation2 + $0x260] sm:$0xe0]  ;;  %7113 = vmatpush.bf16.msra.mxu0 %v8672_v50  ;;  %v3837_v1 = vpack.c.bf16 %v3805_v34, %v10184_v15 }
 0x2aa   :  { %v3633_v54 = vpop.f32.mrf.mxu3  ;;  %v4429_v33 = vsel %vm791_vm0, %v4424_v41, %v4428_v37  ;;  %v4251_v41 = vld [vmem:[#allocation2 + $0x1e8] sm:$0xff]  ;;  %v5107_v21 = vpack.c.bf16 %v10221_v44, %v5041_v17 }
 0x2ab   :  { %v3634_v4 = vadd.f32 %v3633_v54, %v3544_v55  ;;  %v4127_v10 = vpop.f32.mrf.mxu1  ;;  %v4040_v55 = vpop.f32.mrf.mxu0 }
 0x2ac   :  { %v4128_v40 = vadd.f32 %v4127_v10, %v4038_v61  ;;  %v5106_v61 = vpack.c.bf16 %v4243_v58, %v5040_v3  ;;  %v8680_v10 = vld [vmem:[#allocation10 + $0x478] sm:$0xff] }
 0x2ad   :  { %v10232_v2 = vadd.f32 %v3634_v4, %v9845_v63  ;;  %v4416_v63 = vrot.slane %v4414_v45, 1  ;;  %v3804_v4 = vld [vmem:[#allocation2 + $0x110] sm:$0xff]  ;;  %7202 = vmatpush.bf16.msra.mxu1 %v8680_v10 }
 0x2ae   :  { %v10245_v31 = vadd.f32 %v4128_v40, %v10207_v47  ;;  %v3836_v18 = vpack.c.bf16 %v3804_v4, %v10178_v7  ;;  %v5207_v47 = vshrl.u32 %v5106_v61, 16  ;;  %v5215_v40 = vshrl.u32 %v10223_v0, 16 }
 0x2af   :  { %v4417_v11 = vsel %vm791_vm0, %v4412_v46, %v4416_v63  ;;  %v4249_v46 = vld [vmem:[#allocation2 + $0x4b8] sm:$0xff]  ;;  %v5210_v58 = vshll.u32 %v5106_v61, 16  ;;  %v4438_v61 = vshrl.u32 %v10229_v52, 16 }
 0x2b0   :  { %4082 = vmatmul.bf16.gmra.mxu0 %v3836_v18  ;;  %v5217_v10 = vrot.slane %v5215_v40, 2  ;;  %v4432_v34 = vor.u32 %v5215_v40, %v4416_v63 }
 0x2b1   :  { %v3546_v62 = vpop.f32.mrf.mxu2  ;;  %v4440_v17 = vor.u32 %v4438_v61, %v4428_v37 }
 0x2b2   :  { %v3635_v54 = vpop.f32.mrf.mxu3 }
 0x2b3   :  { %v3636_v56 = vadd.f32 %v3635_v54, %v3546_v62  ;;  %v4129_v13 = vpop.f32.mrf.mxu1  ;;  %v4043_v36 = vpop.f32.mrf.mxu0  ;;  %v4250_v54 = vld [vmem:[#allocation2 + $0x310] sm:$0xff] }
 0x2b4   :  { %v4130_v62 = vadd.f32 %v4129_v13, %v4040_v55  ;;  %v5212_v13 = vrot.slane %v5210_v58, 3 }
 0x2b5   :  { %v10248_v24 = vadd.f32 %v3636_v56, %v9866_v53  ;;  %v10252_v56 = vpack.c.bf16 %v4251_v41, %v4249_v46  ;;  %v5227_v41 = vshll.u32 %v5107_v21, 16 }
 0x2b6   :  { %4806 = vmatmul.bf16.vlgmr.msrb.gmra.mxu2 %v4417_v11  ;;  %v4252_v11 = vld [vmem:[#allocation2 + $0x258] sm:$0xff]  ;;  %v10257_v55 = vadd.f32 %v4130_v62, %v10217_v32  ;;  %v5220_v32 = vrot.slane %v4414_v45, 3 }
 0x2b7   :  { %4895 = vmatmul.bf16.vlgmr.msrb.gmra.mxu3 %v4429_v33  ;;  %v10254_v3 = vpack.c.bf16 %v4252_v11, %v4250_v54  ;;  %v4434_v33 = vshll.u32 %v10252_v56, 16  ;;  %v5229_v40 = vrot.slane %v5227_v41, 3  ;;  %v5241_v52 = vshrl.u32 %v10252_v56, 16 }
 0x2b8   :  { %v10275_v58 = vor.u32 %v5220_v32, %v5217_v10  ;;  %v4253_v10 = vld [vmem:[#allocation2 + $0x40] sm:$0xff]  ;;  %v4255_v32 = vld [vmem:[#allocation2 + $0x198] sm:$0xff] }
 0x2b9   :  { %v3549_v29 = vpop.f32.mrf.mxu2  ;;  %v4442_v18 = vshll.u32 %v10254_v3, 16  ;;  %v4436_v44 = vrot.slane %v4434_v33, 1  ;;  %4171 = vmatmul.bf16.gmra.mxu1 %v3837_v1  ;;  %v5237_v1 = vrot.slane %v4426_v43, 3  ;;  %v5246_v56 = vrot.slane %v4434_v33, 3 }
 0x2ba   :  { %v3638_v53 = vpop.f32.mrf.mxu3 }
 0x2bb   :  { %v3639_v7 = vadd.f32 %v3638_v53, %v3549_v29  ;;  %v5209_v29 = vrot.slane %v5207_v47, 2  ;;  %v4132_v50 = vpop.f32.mrf.mxu1  ;;  %v4045_v15 = vpop.f32.mrf.mxu0  ;;  %v5224_v53 = vshrl.u32 %v5107_v21, 16  ;;  %v4437_v47 = vsel %vm791_vm0, %v4432_v34, %v4436_v44 }
 0x2bc   :  { %v4133_v46 = vadd.f32 %v4132_v50, %v4043_v36  ;;  %v4254_v50 = vld [vmem:[#allocation2 + $0x4e0] sm:$0xff] }
 0x2bd   :  { %v10262_v4 = vadd.f32 %v3639_v7, %v9874_v51  ;;  %v4444_v51 = vrot.slane %v4442_v18, 1  ;;  %v5213_v45 = vor.u32 %v5212_v13, %v5209_v29  ;;  %v5226_v36 = vrot.slane %v5224_v53, 2 }
 0x2be   :  { %v10273_v0 = vadd.f32 %v4133_v46, %v10232_v2  ;;  %v5234_v7 = vrot.slane %v4438_v61, 2  ;;  %v10287_v46 = vpack.c.bf16 %v4255_v32, %v4253_v10  ;;  %v4256_v61 = vld [vmem:[#allocation2 + $0x550] sm:$0xff] }
 0x2bf   :  { %v4445_v63 = vsel %vm791_vm0, %v4440_v17, %v4444_v51  ;;  %v5222_v29 = vsel %vm5205_vm4, %v5213_v45, %v10275_v58  ;;  %v5230_v34 = vor.u32 %v5229_v40, %v5226_v36  ;;  %v10290_v53 = vpack.c.bf16 %v4256_v61, %v4254_v50  ;;  %v8655_v32 = vld [vmem:[#allocation10 + $0x3b0] sm:$0xff] }
 0x2c0   :  { %5646 = vmatmul.bf16.vlgmr.msrb.gmra.mxu0 %v5222_v29  ;;  %v8663_v50 = vld [vmem:[#allocation10 + $0x3f0] sm:$0xff]  ;;  %6275 = vmatpush.bf16.msra.mxu2 %v8655_v32 }
 0x2c1   :  { %v3551_v62 = vpop.f32.mrf.mxu2  ;;  %6364 = vmatpush.bf16.msra.mxu3 %v8663_v50 }
 0x2c2   :  { %v3640_v54 = vpop.f32.mrf.mxu3 }
 0x2c3   :  { %v3641_v11 = vadd.f32 %v3640_v54, %v3551_v62  ;;  %v4134_v2 = vpop.f32.mrf.mxu1  ;;  %v4048_v62 = vpop.f32.mrf.mxu0  ;;  %v4450_v54 = vshll.u32 %v10287_v46, 16 }
 0x2c4   :  { %v4135_v13 = vadd.f32 %v4134_v2, %v4045_v15 }
 0x2c5   :  { %v10279_v37 = vadd.f32 %v3641_v11, %v9893_v20  ;;  %v10285_v20 = vor.u32 %v5237_v1, %v5234_v7  ;;  %v4458_v11 = vshll.u32 %v10290_v53, 16  ;;  %v4448_v1 = vor.u32 %v5241_v52, %v4436_v44 }
 0x2c6   :  { %4811 = vmatmul.bf16.gmra.mxu2 %v4437_v47  ;;  %v10293_v41 = vadd.f32 %v4135_v13, %v10248_v24  ;;  %v4454_v47 = vshrl.u32 %v10254_v3, 16  ;;  %v4452_v24 = vrot.slane %v4450_v54, 1  ;;  %v5259_v3 = vshrl.u32 %v10287_v46, 16 }
 0x2c7   :  { %4900 = vmatmul.bf16.gmra.mxu3 %v4445_v63  ;;  %v5239_v45 = vsel %vm5205_vm4, %v5230_v34, %v10285_v20  ;;  %v5243_v63 = vrot.slane %v5241_v52, 2 }
 0x2c8   :  { %v4453_v13 = vsel %vm791_vm0, %v4448_v1, %v4452_v24  ;;  %v4259_v1 = vld [vmem:[#allocation2 + $0x340] sm:$0xff]  ;;  %v5261_v50 = vrot.slane %v5259_v3, 2 }
 0x2c9   :  { %v3554_v21 = vpop.f32.mrf.mxu2  ;;  %5735 = vmatmul.bf16.vlgmr.msrb.gmra.mxu1 %v5239_v45  ;;  %v5247_v33 = vor.u32 %v5246_v56, %v5243_v63  ;;  %v8671_v63 = vld [vmem:[#allocation10 + $0x430] sm:$0xff] }
 0x2ca   :  { %v3643_v17 = vpop.f32.mrf.mxu3  ;;  %v8679_v56 = vld [vmem:[#allocation10 + $0x470] sm:$0xff]  ;;  %7114 = vmatpush.bf16.msra.mxu0 %v8671_v63 }
 0x2cb   :  { %v3644_v43 = vadd.f32 %v3643_v17, %v3554_v21  ;;  %v4137_v40 = vpop.f32.mrf.mxu1  ;;  %v4050_v7 = vpop.f32.mrf.mxu0  ;;  %v4456_v21 = vor.u32 %v4454_v47, %v4444_v51  ;;  %v5255_v17 = vrot.slane %v4442_v18, 3  ;;  %7203 = vmatpush.bf16.msra.mxu1 %v8679_v56 }
 0x2cc   :  { %v4138_v2 = vadd.f32 %v4137_v40, %v4048_v62  ;;  %v5252_v62 = vrot.slane %v4454_v47, 2 }
 0x2cd   :  { %v10296_v15 = vadd.f32 %v3644_v43, %v9900_v48  ;;  %v4460_v48 = vrot.slane %v4458_v11, 1 }
 0x2ce   :  { %v10307_v34 = vadd.f32 %v4138_v2, %v10262_v4  ;;  %v5248_v4 = vsel %vm5205_vm4, %v10275_v58, %v5247_v33  ;;  %v5256_v40 = vor.u32 %v5255_v17, %v5252_v62  ;;  %v4260_v2 = vld [vmem:[#allocation2 + $0x360] sm:$0xff] }
 0x2cf   :  { %v4461_v44 = vsel %vm791_vm0, %v4456_v21, %v4460_v48  ;;  %v4258_v21 = vld [vmem:[#allocation2 + $0x5c8] sm:$0xff] }
 0x2d0   :  { %5651 = vmatmul.bf16.gmra.mxu0 %v5248_v4  ;;  %v5257_v46 = vsel %vm5205_vm4, %v10285_v20, %v5256_v40 }
 0x2d1   :  { %v3556_v36 = vpop.f32.mrf.mxu2 }
 0x2d2   :  { %v3645_v29 = vpop.f32.mrf.mxu3 }
 0x2d3   :  { %v3646_v10 = vadd.f32 %v3645_v29, %v3556_v36  ;;  %v4139_v52 = vpop.f32.mrf.mxu1  ;;  %v4053_v43 = vpop.f32.mrf.mxu0  ;;  %v4257_v36 = vld [vmem:[#allocation2 + $0x418] sm:$0xff]  ;;  %v10318_v29 = vpack.c.bf16 %v4260_v2, %v4258_v21 }
 0x2d4   :  { %v4140_v45 = vadd.f32 %v4139_v52, %v4050_v7  ;;  %v4315_v47 = vpack.c.bf16 %v4259_v1, %v4257_v36  ;;  %v4464_v52 = vor.u32 %v5259_v3, %v4452_v24  ;;  %v5273_v1 = vrot.slane %v4458_v11, 3 }
 0x2d5   :  { %v10311_v51 = vadd.f32 %v3646_v10, %v9920_v42  ;;  %v4470_v10 = vshrl.u32 %v10290_v53, 16  ;;  %v4474_v32 = vshll.u32 %v10318_v29, 16 }
 0x2d6   :  { %4816 = vmatmul.bf16.gmra.mxu2 %v4453_v13  ;;  %v10321_v58 = vadd.f32 %v4140_v45, %v10279_v37  ;;  %v4466_v13 = vshll.u32 %v4315_v47, 16 }
 0x2d7   :  { %4905 = vmatmul.bf16.gmra.mxu3 %v4461_v44  ;;  %v5264_v44 = vrot.slane %v4450_v54, 3  ;;  %v4472_v37 = vor.u32 %v4470_v10, %v4460_v48  ;;  %v5270_v48 = vrot.slane %v4470_v10, 2  ;;  %v5277_v10 = vshrl.u32 %v4315_v47, 16 }
 0x2d8   :  { %v4468_v4 = vrot.slane %v4466_v13, 1  ;;  %v5282_v47 = vrot.slane %v4466_v13, 3 }
 0x2d9   :  { %v3559_v61 = vpop.f32.mrf.mxu2  ;;  %5740 = vmatmul.bf16.gmra.mxu1 %v5257_v46  ;;  %v5265_v20 = vor.u32 %v5264_v44, %v5261_v50  ;;  %v4263_v46 = vld [vmem:[#allocation2 + $0x1f0] sm:$0xff]  ;;  %v10343_v44 = vor.u32 %v5273_v1, %v5270_v48 }
 0x2da   :  { %v3648_v42 = vpop.f32.mrf.mxu3  ;;  %v4469_v56 = vsel %vm791_vm0, %v4464_v52, %v4468_v4  ;;  %v4262_v50 = vld [vmem:[#allocation2 + $0x530] sm:$0xff]  ;;  %v4480_v1 = vor.u32 %v5277_v10, %v4468_v4 }
 0x2db   :  { %v3649_v18 = vadd.f32 %v3648_v42, %v3559_v61  ;;  %v4142_v17 = vpop.f32.mrf.mxu1  ;;  %v4055_v61 = vpop.f32.mrf.mxu0  ;;  %v5266_v3 = vsel %vm5205_vm4, %v5247_v33, %v5265_v20 }
 0x2dc   :  { %v4143_v45 = vadd.f32 %v4142_v17, %v4053_v43 }
 0x2dd   :  { %v10324_v7 = vadd.f32 %v3649_v18, %v9928_v59  ;;  %v4476_v59 = vrot.slane %v4474_v32, 1 }
 0x2de   :  { %v10334_v42 = vadd.f32 %v4143_v45, %v10296_v15  ;;  %v4261_v15 = vld [vmem:[#allocation2 + $0x3b8] sm:$0xff] }
 0x2df   :  { %v4477_v54 = vsel %vm791_vm0, %v4472_v37, %v4476_v59  ;;  %v10345_v17 = vpack.c.bf16 %v4263_v46, %v4261_v15  ;;  %v4486_v37 = vshrl.u32 %v10318_v29, 16  ;;  %v8654_v46 = vld [vmem:[#allocation10 + $0x3a8] sm:$0xff] }
 0x2e0   :  { %5656 = vmatmul.bf16.gmra.mxu0 %v5266_v3  ;;  %6276 = vmatpush.bf16.msra.mxu2 %v8654_v46 }
 0x2e1   :  { %v3561_v62 = vpop.f32.mrf.mxu2 }
 0x2e2   :  { %v3650_v63 = vpop.f32.mrf.mxu3 }
 0x2e3   :  { %v3651_v36 = vadd.f32 %v3650_v63, %v3561_v62  ;;  %v4144_v21 = vpop.f32.mrf.mxu1  ;;  %v4058_v2 = vpop.f32.mrf.mxu0  ;;  %v5275_v63 = vsel %vm5205_vm4, %v5256_v40, %v10343_v44 }
 0x2e4   :  { %v4145_v18 = vadd.f32 %v4144_v21, %v4055_v61  ;;  %v4482_v61 = vshll.u32 %v10345_v17, 16 }
 0x2e5   :  { %v10338_v24 = vadd.f32 %v3651_v36, %v9947_v19  ;;  %v4264_v19 = vld [vmem:[#allocation2 + $0x3a0] sm:$0xff] }
 0x2e6   :  { %4821 = vmatmul.bf16.gmra.mxu2 %v4469_v56  ;;  %v10347_v11 = vpack.c.bf16 %v4264_v19, %v4262_v50  ;;  %v10350_v52 = vadd.f32 %v4145_v18, %v10311_v51  ;;  %v5279_v56 = vrot.slane %v5277_v10, 2  ;;  %v4484_v51 = vrot.slane %v4482_v61, 1  ;;  %v8662_v50 = vld [vmem:[#allocation10 + $0x3e8] sm:$0xff] }
 0x2e7   :  { %4910 = vmatmul.bf16.gmra.mxu3 %v4477_v54 }
 0x2e8   :  { %v4490_v45 = vshll.u32 %v10347_v11, 16  ;;  %v4485_v18 = vsel %vm791_vm0, %v4480_v1, %v4484_v51  ;;  %v5283_v13 = vor.u32 %v5282_v47, %v5279_v56  ;;  %6365 = vmatpush.bf16.msra.mxu3 %v8662_v50  ;;  %v8670_v56 = vld [vmem:[#allocation10 + $0x428] sm:$0xff] }
 0x2e9   :  { %v3564_v43 = vpop.f32.mrf.mxu2  ;;  %5745 = vmatmul.bf16.gmra.mxu1 %v5275_v63  ;;  %v8678_v47 = vld [vmem:[#allocation10 + $0x468] sm:$0xff]  ;;  %7115 = vmatpush.bf16.msra.mxu0 %v8670_v56 }
 0x2ea   :  { %v3653_v62 = vpop.f32.mrf.mxu3  ;;  %7204 = vmatpush.bf16.msra.mxu1 %v8678_v47 }
 0x2eb   :  { %v3654_v53 = vadd.f32 %v3653_v62, %v3564_v43  ;;  %v4147_v54 = vpop.f32.mrf.mxu1  ;;  %v4060_v48 = vpop.f32.mrf.mxu0  ;;  %v4488_v43 = vor.u32 %v4486_v37, %v4476_v59  ;;  %v5291_v62 = vrot.slane %v4474_v32, 3 }
 0x2ec   :  { %v4148_v21 = vadd.f32 %v4147_v54, %v4058_v2  ;;  %v5288_v2 = vrot.slane %v4486_v37, 2  ;;  %v5295_v37 = vshrl.u32 %v10345_v17, 16 }
 0x2ed   :  { %v10353_v33 = vadd.f32 %v3654_v53, %v9954_v30  ;;  %v4492_v30 = vrot.slane %v4490_v45, 1 }
 0x2ee   :  { %v10364_v40 = vadd.f32 %v4148_v21, %v10324_v7  ;;  %v5284_v7 = vsel %vm5205_vm4, %v5265_v20, %v5283_v13  ;;  %v5292_v54 = vor.u32 %v5291_v62, %v5288_v2  ;;  %v4268_v21 = vld [vmem:[#allocation2 + $0x4f0] sm:$0xff]  ;;  %v5297_v50 = vrot.slane %v5295_v37, 2 }
 0x2ef   :  { %v4493_v4 = vsel %vm791_vm0, %v4488_v43, %v4492_v30  ;;  %v4266_v43 = vld [vmem:[#allocation2 + $0x2c8] sm:$0xff] }
 0x2f0   :  { %5661 = vmatmul.bf16.gmra.mxu0 %v5284_v7  ;;  %v5293_v17 = vsel %vm5205_vm4, %v10343_v44, %v5292_v54 }
 0x2f1   :  { %v3566_v36 = vpop.f32.mrf.mxu2 }
 0x2f2   :  { %v3655_v3 = vpop.f32.mrf.mxu3 }
 0x2f3   :  { %v3656_v15 = vadd.f32 %v3655_v3, %v3566_v36  ;;  %v4149_v10 = vpop.f32.mrf.mxu1  ;;  %v4063_v53 = vpop.f32.mrf.mxu0  ;;  %v4265_v36 = vld [vmem:[#allocation2 + $0x460] sm:$0xff]  ;;  %v10374_v3 = vpack.c.bf16 %v4268_v21, %v4266_v43 }
 0x2f4   :  { %v4150_v63 = vadd.f32 %v4149_v10, %v4060_v48  ;;  %v4496_v10 = vor.u32 %v5295_v37, %v4484_v51 }
 0x2f5   :  { %v10368_v59 = vadd.f32 %v3656_v15, %v9974_v12  ;;  %v4267_v12 = vld [vmem:[#allocation2 + $0x1d0] sm:$0xff]  ;;  %v4502_v15 = vshrl.u32 %v10347_v11, 16  ;;  %v4506_v46 = vshll.u32 %v10374_v3, 16 }
 0x2f6   :  { %4826 = vmatmul.bf16.gmra.mxu2 %v4485_v18  ;;  %v4319_v32 = vpack.c.bf16 %v4267_v12, %v4265_v36  ;;  %v10377_v20 = vadd.f32 %v4150_v63, %v10338_v24  ;;  %v5309_v12 = vrot.slane %v4490_v45, 3 }
 0x2f7   :  { %4915 = vmatmul.bf16.gmra.mxu3 %v4493_v4  ;;  %v5300_v4 = vrot.slane %v4482_v61, 3  ;;  %v4504_v24 = vor.u32 %v4502_v15, %v4492_v30  ;;  %v5306_v30 = vrot.slane %v4502_v15, 2 }
 0x2f8   :  { %v4498_v18 = vshll.u32 %v4319_v32, 16  ;;  %v5313_v15 = vshrl.u32 %v4319_v32, 16 }
 0x2f9   :  { %v3569_v19 = vpop.f32.mrf.mxu2  ;;  %5750 = vmatmul.bf16.gmra.mxu1 %v5293_v17  ;;  %v5301_v44 = vor.u32 %v5300_v4, %v5297_v50  ;;  %v4271_v17 = vld [vmem:[#allocation2 + $0x468] sm:$0xff]  ;;  %v4270_v50 = vld [vmem:[#allocation2 + $0x4a0] sm:$0xff]  ;;  %v10399_v4 = vor.u32 %v5309_v12, %v5306_v30 }
 0x2fa   :  { %v3658_v1 = vpop.f32.mrf.mxu3  ;;  %v4500_v7 = vrot.slane %v4498_v18, 1  ;;  %v5318_v32 = vrot.slane %v4498_v18, 3 }
 0x2fb   :  { %v3659_v29 = vadd.f32 %v3658_v1, %v3569_v19  ;;  %v4152_v62 = vpop.f32.mrf.mxu1  ;;  %v4065_v19 = vpop.f32.mrf.mxu0  ;;  %v5302_v37 = vsel %vm5205_vm4, %v5283_v13, %v5301_v44 }
 0x2fc   :  { %v4153_v63 = vadd.f32 %v4152_v62, %v4063_v53  ;;  %v4501_v47 = vsel %vm791_vm0, %v4496_v10, %v4500_v7  ;;  %v4512_v12 = vor.u32 %v5313_v15, %v4500_v7 }
 0x2fd   :  { %v10380_v48 = vadd.f32 %v3659_v29, %v9982_v26  ;;  %v4508_v26 = vrot.slane %v4506_v46, 1 }
 0x2fe   :  { %v10390_v1 = vadd.f32 %v4153_v63, %v10353_v33  ;;  %v4269_v33 = vld [vmem:[#allocation2 + $0x50] sm:$0xff] }
 0x2ff   :  { %v4509_v61 = vsel %vm791_vm0, %v4504_v24, %v4508_v26  ;;  %v10401_v62 = vpack.c.bf16 %v4271_v17, %v4269_v33  ;;  %v4518_v24 = vshrl.u32 %v10374_v3, 16  ;;  %v8653_v17 = vld [vmem:[#allocation10 + $0x3a0] sm:$0xff] }
 0x300   :  { %5666 = vmatmul.bf16.gmra.mxu0 %v5302_v37  ;;  %6277 = vmatpush.bf16.msra.mxu2 %v8653_v17 }
 0x301   :  { %v3571_v2 = vpop.f32.mrf.mxu2 }
 0x302   :  { %v3660_v56 = vpop.f32.mrf.mxu3 }
 0x303   :  { %v3661_v36 = vadd.f32 %v3660_v56, %v3571_v2  ;;  %v4154_v43 = vpop.f32.mrf.mxu1  ;;  %v4068_v21 = vpop.f32.mrf.mxu0  ;;  %v5311_v56 = vsel %vm5205_vm4, %v5292_v54, %v10399_v4 }
 0x304   :  { %v4155_v29 = vadd.f32 %v4154_v43, %v4065_v19  ;;  %v4514_v19 = vshll.u32 %v10401_v62, 16 }
 0x305   :  { %v10394_v51 = vadd.f32 %v3661_v36, %v10001_v27  ;;  %v4272_v27 = vld [vmem:[#allocation2 + $0x278] sm:$0xff] }
 0x306   :  { %4831 = vmatmul.bf16.gmra.mxu2 %v4501_v47  ;;  %v10403_v45 = vpack.c.bf16 %v4272_v27, %v4270_v50  ;;  %v10406_v10 = vadd.f32 %v4155_v29, %v10368_v59  ;;  %v5315_v47 = vrot.slane %v5313_v15, 2  ;;  %v4516_v59 = vrot.slane %v4514_v19, 1  ;;  %v8661_v50 = vld [vmem:[#allocation10 + $0x3e0] sm:$0xff] }
 0x307   :  { %4920 = vmatmul.bf16.gmra.mxu3 %v4509_v61 }
 0x308   :  { %v4522_v63 = vshll.u32 %v10403_v45, 16  ;;  %v4517_v29 = vsel %vm791_vm0, %v4512_v12, %v4516_v59  ;;  %v5319_v18 = vor.u32 %v5318_v32, %v5315_v47  ;;  %6366 = vmatpush.bf16.msra.mxu3 %v8661_v50  ;;  %v8669_v47 = vld [vmem:[#allocation10 + $0x420] sm:$0xff] }
 0x309   :  { %v3574_v53 = vpop.f32.mrf.mxu2  ;;  %5755 = vmatmul.bf16.gmra.mxu1 %v5311_v56  ;;  %v8677_v32 = vld [vmem:[#allocation10 + $0x460] sm:$0xff]  ;;  %7116 = vmatpush.bf16.msra.mxu0 %v8669_v47 }
 0x30a   :  { %v3663_v2 = vpop.f32.mrf.mxu3  ;;  %7205 = vmatpush.bf16.msra.mxu1 %v8677_v32 }
 0x30b   :  { %v3664_v11 = vadd.f32 %v3663_v2, %v3574_v53  ;;  %v4157_v61 = vpop.f32.mrf.mxu1  ;;  %v4070_v30 = vpop.f32.mrf.mxu0  ;;  %v4520_v53 = vor.u32 %v4518_v24, %v4508_v26  ;;  %v5327_v2 = vrot.slane %v4506_v46, 3 }
 0x30c   :  { %v4158_v43 = vadd.f32 %v4157_v61, %v4068_v21  ;;  %v5324_v21 = vrot.slane %v4518_v24, 2  ;;  %v5331_v24 = vshrl.u32 %v10401_v62, 16 }
 0x30d   :  { %v10409_v13 = vadd.f32 %v3664_v11, %v10008_v14  ;;  %v4524_v14 = vrot.slane %v4522_v63, 1 }
 0x30e   :  { %v10420_v54 = vadd.f32 %v4158_v43, %v10380_v48  ;;  %v5320_v48 = vsel %vm5205_vm4, %v5301_v44, %v5319_v18  ;;  %v5328_v61 = vor.u32 %v5327_v2, %v5324_v21  ;;  %v4276_v43 = vld [vmem:[#allocation2 + $0x5d8] sm:$0xff]  ;;  %v5333_v50 = vrot.slane %v5331_v24, 2 }
 0x30f   :  { %v4525_v7 = vsel %vm791_vm0, %v4520_v53, %v4524_v14  ;;  %v4274_v53 = vld [vmem:[#allocation2 + $0x498] sm:$0xff] }
 0x310   :  { %5671 = vmatmul.bf16.gmra.mxu0 %v5320_v48  ;;  %v5329_v62 = vsel %vm5205_vm4, %v10399_v4, %v5328_v61 }
 0x311   :  { %v3576_v36 = vpop.f32.mrf.mxu2 }
 0x312   :  { %v3665_v37 = vpop.f32.mrf.mxu3 }
 0x313   :  { %v3666_v33 = vadd.f32 %v3665_v37, %v3576_v36  ;;  %v4159_v15 = vpop.f32.mrf.mxu1  ;;  %v4073_v11 = vpop.f32.mrf.mxu0  ;;  %v4273_v36 = vld [vmem:[#allocation2 + $0x458] sm:$0xff]  ;;  %v10430_v37 = vpack.c.bf16 %v4276_v43, %v4274_v53 }
 0x314   :  { %v4160_v56 = vadd.f32 %v4159_v15, %v4070_v30  ;;  %v4528_v15 = vor.u32 %v5331_v24, %v4516_v59 }
 0x315   :  { %v10424_v26 = vadd.f32 %v3666_v33, %v10028_v35  ;;  %v4275_v35 = vld [vmem:[#allocation2 + $0x400] sm:$0xff]  ;;  %v4534_v33 = vshrl.u32 %v10403_v45, 16  ;;  %v4538_v17 = vshll.u32 %v10430_v37, 16 }
 0x316   :  { %4836 = vmatmul.bf16.gmra.mxu2 %v4517_v29  ;;  %v4323_v46 = vpack.c.bf16 %v4275_v35, %v4273_v36  ;;  %v10433_v44 = vadd.f32 %v4160_v56, %v10394_v51  ;;  %v5345_v35 = vrot.slane %v4522_v63, 3 }
 0x317   :  { %4925 = vmatmul.bf16.gmra.mxu3 %v4525_v7  ;;  %v5336_v7 = vrot.slane %v4514_v19, 3  ;;  %v4536_v51 = vor.u32 %v4534_v33, %v4524_v14  ;;  %v5342_v14 = vrot.slane %v4534_v33, 2 }
 0x318   :  { %v4530_v29 = vshll.u32 %v4323_v46, 16  ;;  %v5349_v33 = vshrl.u32 %v4323_v46, 16 }
 0x319   :  { %v3579_v27 = vpop.f32.mrf.mxu2  ;;  %5760 = vmatmul.bf16.gmra.mxu1 %v5329_v62  ;;  %v5337_v4 = vor.u32 %v5336_v7, %v5333_v50  ;;  %v4279_v62 = vld [vmem:[#allocation2 + $0x178] sm:$0xff]  ;;  %v4278_v50 = vld [vmem:[#allocation2 + $0x160] sm:$0xff]  ;;  %v10455_v7 = vor.u32 %v5345_v35, %v5342_v14 }
 0x31a   :  { %v3668_v12 = vpop.f32.mrf.mxu3  ;;  %v4532_v48 = vrot.slane %v4530_v29, 1  ;;  %v5354_v46 = vrot.slane %v4530_v29, 3 }
 0x31b   :  { %v3669_v3 = vadd.f32 %v3668_v12, %v3579_v27  ;;  %v4162_v2 = vpop.f32.mrf.mxu1  ;;  %v4075_v27 = vpop.f32.mrf.mxu0  ;;  %v5338_v24 = vsel %vm5205_vm4, %v5319_v18, %v5337_v4 }
 0x31c   :  { %v4163_v56 = vadd.f32 %v4162_v2, %v4073_v11  ;;  %v4533_v32 = vsel %vm791_vm0, %v4528_v15, %v4532_v48  ;;  %v4544_v35 = vor.u32 %v5349_v33, %v4532_v48 }
 0x31d   :  { %v10436_v30 = vadd.f32 %v3669_v3, %v10036_v38  ;;  %v4540_v38 = vrot.slane %v4538_v17, 1 }
 0x31e   :  { %v10446_v12 = vadd.f32 %v4163_v56, %v10409_v13  ;;  %v4277_v13 = vld [vmem:[#allocation2 + $0xe8] sm:$0xff] }
 0x31f   :  { %v4541_v19 = vsel %vm791_vm0, %v4536_v51, %v4540_v38  ;;  %v10457_v2 = vpack.c.bf16 %v4279_v62, %v4277_v13  ;;  %v4550_v51 = vshrl.u32 %v10430_v37, 16  ;;  %v8652_v62 = vld [vmem:[#allocation10 + $0x398] sm:$0xff] }
 0x320   :  { %5676 = vmatmul.bf16.gmra.mxu0 %v5338_v24  ;;  %6278 = vmatpush.bf16.msra.mxu2 %v8652_v62 }
 0x321   :  { %v3581_v21 = vpop.f32.mrf.mxu2 }
 0x322   :  { %v3670_v47 = vpop.f32.mrf.mxu3 }
 0x323   :  { %v3671_v36 = vadd.f32 %v3670_v47, %v3581_v21  ;;  %v4164_v53 = vpop.f32.mrf.mxu1  ;;  %v4078_v43 = vpop.f32.mrf.mxu0  ;;  %v5347_v47 = vsel %vm5205_vm4, %v5328_v61, %v10455_v7 }
 0x324   :  { %v4165_v3 = vadd.f32 %v4164_v53, %v4075_v27  ;;  %v4546_v27 = vshll.u32 %v10457_v2, 16 }
 0x325   :  { %v10450_v59 = vadd.f32 %v3671_v36, %v10055_v6  ;;  %v4280_v6 = vld [vmem:[#allocation2 + $0x538] sm:$0xff] }
 0x326   :  { %4841 = vmatmul.bf16.gmra.mxu2 %v4533_v32  ;;  %v10459_v63 = vpack.c.bf16 %v4280_v6, %v4278_v50  ;;  %v10462_v15 = vadd.f32 %v4165_v3, %v10424_v26  ;;  %v5351_v32 = vrot.slane %v5349_v33, 2  ;;  %v4548_v26 = vrot.slane %v4546_v27, 1  ;;  %v8660_v50 = vld [vmem:[#allocation10 + $0x3d8] sm:$0xff] }
 0x327   :  { %4930 = vmatmul.bf16.gmra.mxu3 %v4541_v19 }
 0x328   :  { %v4554_v56 = vshll.u32 %v10459_v63, 16  ;;  %v4549_v3 = vsel %vm791_vm0, %v4544_v35, %v4548_v26  ;;  %v5355_v29 = vor.u32 %v5354_v46, %v5351_v32  ;;  %6367 = vmatpush.bf16.msra.mxu3 %v8660_v50  ;;  %v8668_v32 = vld [vmem:[#allocation10 + $0x418] sm:$0xff] }
 0x329   :  { %v3584_v11 = vpop.f32.mrf.mxu2  ;;  %5765 = vmatmul.bf16.gmra.mxu1 %v5347_v47  ;;  %v8676_v46 = vld [vmem:[#allocation10 + $0x458] sm:$0xff]  ;;  %7117 = vmatpush.bf16.msra.mxu0 %v8668_v32 }
 0x32a   :  { %v3673_v21 = vpop.f32.mrf.mxu3  ;;  %7206 = vmatpush.bf16.msra.mxu1 %v8676_v46 }
 0x32b   :  { %v3674_v45 = vadd.f32 %v3673_v21, %v3584_v11  ;;  %v4167_v19 = vpop.f32.mrf.mxu1  ;;  %v4080_v14 = vpop.f32.mrf.mxu0  ;;  %v4552_v11 = vor.u32 %v4550_v51, %v4540_v38  ;;  %v5363_v21 = vrot.slane %v4538_v17, 3 }
 0x32c   :  { %v4168_v53 = vadd.f32 %v4167_v19, %v4078_v43  ;;  %v5360_v43 = vrot.slane %v4550_v51, 2  ;;  %v5367_v51 = vshrl.u32 %v10457_v2, 16 }
 0x32d   :  { %v10465_v18 = vadd.f32 %v3674_v45, %v10062_v16  ;;  %v4556_v16 = vrot.slane %v4554_v56, 1 }
 0x32e   :  { %v10476_v61 = vadd.f32 %v4168_v53, %v10436_v30  ;;  %v5356_v30 = vsel %vm5205_vm4, %v5337_v4, %v5355_v29  ;;  %v5364_v19 = vor.u32 %v5363_v21, %v5360_v43  ;;  %v4284_v53 = vld [vmem:[#allocation2 + $0x228] sm:$0xff]  ;;  %v5369_v50 = vrot.slane %v5367_v51, 2 }
 0x32f   :  { %v4557_v48 = vsel %vm791_vm0, %v4552_v11, %v4556_v16  ;;  %v4282_v11 = vld [vmem:[#allocation2 + $0x390] sm:$0xff] }
 0x330   :  { %5681 = vmatmul.bf16.gmra.mxu0 %v5356_v30  ;;  %v5365_v2 = vsel %vm5205_vm4, %v10455_v7, %v5364_v19 }
 0x331   :  { %v3586_v36 = vpop.f32.mrf.mxu2 }
 0x332   :  { %v3675_v24 = vpop.f32.mrf.mxu3 }
 0x333   :  { %v3676_v13 = vadd.f32 %v3675_v24, %v3586_v36  ;;  %v4169_v33 = vpop.f32.mrf.mxu1  ;;  %v4083_v45 = vpop.f32.mrf.mxu0  ;;  %v4281_v36 = vld [vmem:[#allocation2 + $0x1e0] sm:$0xff]  ;;  %v10486_v24 = vpack.c.bf16 %v4284_v53, %v4282_v11 }
 0x334   :  { %v4170_v47 = vadd.f32 %v4169_v33, %v4080_v14  ;;  %v4560_v33 = vor.u32 %v5367_v51, %v4548_v26 }
 0x335   :  { %v10480_v38 = vadd.f32 %v3676_v13, %v10082_v23  ;;  %v4283_v23 = vld [vmem:[#allocation2 + $0x2c0] sm:$0xff]  ;;  %v4566_v13 = vshrl.u32 %v10459_v63, 16  ;;  %v4570_v62 = vshll.u32 %v10486_v24, 16 }
 0x336   :  { %4846 = vmatmul.bf16.gmra.mxu2 %v4549_v3  ;;  %v4327_v17 = vpack.c.bf16 %v4283_v23, %v4281_v36  ;;  %v10489_v4 = vadd.f32 %v4170_v47, %v10450_v59  ;;  %v5381_v23 = vrot.slane %v4554_v56, 3 }
 0x337   :  { %4935 = vmatmul.bf16.gmra.mxu3 %v4557_v48  ;;  %v5372_v48 = vrot.slane %v4546_v27, 3  ;;  %v4568_v59 = vor.u32 %v4566_v13, %v4556_v16  ;;  %v5378_v16 = vrot.slane %v4566_v13, 2 }
 0x338   :  { %v4562_v3 = vshll.u32 %v4327_v17, 16  ;;  %v5385_v13 = vshrl.u32 %v4327_v17, 16 }
 0x339   :  { %v4807_v6 = vpop.f32.mrf.mxu2  ;;  %5770 = vmatmul.bf16.gmra.mxu1 %v5365_v2  ;;  %v5373_v7 = vor.u32 %v5372_v48, %v5369_v50  ;;  %v4287_v2 = vld [vmem:[#allocation2 + $0xd8] sm:$0xff]  ;;  %v4286_v50 = vld [vmem:[#allocation2 + $0xc0] sm:$0xff]  ;;  %v10511_v48 = vor.u32 %v5381_v23, %v5378_v16 }
 0x33a   :  { %v4896_v35 = vpop.f32.mrf.mxu3  ;;  %v4564_v30 = vrot.slane %v4562_v3, 1  ;;  %v5390_v17 = vrot.slane %v4562_v3, 3 }
 0x33b   :  { %v4897_v37 = vadd.f32 %v4896_v35, %v4807_v6  ;;  %v4172_v21 = vpop.f32.mrf.mxu1  ;;  %v4085_v6 = vpop.f32.mrf.mxu0  ;;  %v5374_v51 = vsel %vm5205_vm4, %v5355_v29, %v5373_v7 }
 0x33c   :  { %v4173_v47 = vadd.f32 %v4172_v21, %v4083_v45  ;;  %v4565_v46 = vsel %vm791_vm0, %v4560_v33, %v4564_v30  ;;  %v4576_v23 = vor.u32 %v5385_v13, %v4564_v30 }
 0x33d   :  { %v10492_v14 = vadd.f32 %v4897_v37, %v10090_v8  ;;  %v4572_v8 = vrot.slane %v4570_v62, 1 }
 0x33e   :  { %v10502_v35 = vadd.f32 %v4173_v47, %v10465_v18  ;;  %v4285_v18 = vld [vmem:[#allocation2 + $0x5b0] sm:$0xff] }
 0x33f   :  { %v4573_v27 = vsel %vm791_vm0, %v4568_v59, %v4572_v8  ;;  %v10513_v21 = vpack.c.bf16 %v4287_v2, %v4285_v18  ;;  %v4582_v59 = vshrl.u32 %v10486_v24, 16  ;;  %v8651_v2 = vld [vmem:[#allocation10 + $0x390] sm:$0xff] }
 0x340   :  { %5686 = vmatmul.bf16.gmra.mxu0 %v5374_v51  ;;  %6279 = vmatpush.bf16.msra.mxu2 %v8651_v2 }
 0x341   :  { %v4809_v43 = vpop.f32.mrf.mxu2 }
 0x342   :  { %v4898_v32 = vpop.f32.mrf.mxu3 }
 0x343   :  { %v4899_v36 = vadd.f32 %v4898_v32, %v4809_v43  ;;  %v4174_v11 = vpop.f32.mrf.mxu1  ;;  %v5647_v53 = vpop.f32.mrf.mxu0  ;;  %v5383_v32 = vsel %vm5205_vm4, %v5364_v19, %v10511_v48 }
 0x344   :  { %v4175_v37 = vadd.f32 %v4174_v11, %v4085_v6  ;;  %v4578_v6 = vshll.u32 %v10513_v21, 16 }
 0x345   :  { %v10506_v26 = vadd.f32 %v4899_v36, %v10109_v49  ;;  %v4288_v49 = vld [vmem:[#allocation2 + $0x428] sm:$0xff] }
 0x346   :  { %4851 = vmatmul.bf16.gmra.mxu2 %v4565_v46  ;;  %v10515_v56 = vpack.c.bf16 %v4288_v49, %v4286_v50  ;;  %v10518_v33 = vadd.f32 %v4175_v37, %v10480_v38  ;;  %v5387_v46 = vrot.slane %v5385_v13, 2  ;;  %v4580_v38 = vrot.slane %v4578_v6, 1  ;;  %v8659_v50 = vld [vmem:[#allocation10 + $0x3d0] sm:$0xff] }
 0x347   :  { %4940 = vmatmul.bf16.gmra.mxu3 %v4573_v27 }
 0x348   :  { %v4586_v47 = vshll.u32 %v10515_v56, 16  ;;  %v4581_v37 = vsel %vm791_vm0, %v4576_v23, %v4580_v38  ;;  %v5391_v3 = vor.u32 %v5390_v17, %v5387_v46  ;;  %6368 = vmatpush.bf16.msra.mxu3 %v8659_v50  ;;  %v8667_v46 = vld [vmem:[#allocation10 + $0x410] sm:$0xff] }
 0x349   :  { %v4812_v45 = vpop.f32.mrf.mxu2  ;;  %5775 = vmatmul.bf16.gmra.mxu1 %v5383_v32  ;;  %v8675_v17 = vld [vmem:[#allocation10 + $0x450] sm:$0xff]  ;;  %7118 = vmatpush.bf16.msra.mxu0 %v8667_v46 }
 0x34a   :  { %v4901_v43 = vpop.f32.mrf.mxu3  ;;  %7207 = vmatpush.bf16.msra.mxu1 %v8675_v17 }
 0x34b   :  { %v4902_v63 = vadd.f32 %v4901_v43, %v4812_v45  ;;  %v5736_v27 = vpop.f32.mrf.mxu1  ;;  %v5649_v16 = vpop.f32.mrf.mxu0  ;;  %v4584_v45 = vor.u32 %v4582_v59, %v4572_v8  ;;  %v5399_v43 = vrot.slane %v4570_v62, 3 }
 0x34c   :  { %v5737_v11 = vadd.f32 %v5736_v27, %v5647_v53  ;;  %v5396_v53 = vrot.slane %v4582_v59, 2  ;;  %v5403_v59 = vshrl.u32 %v10513_v21, 16 }
 0x34d   :  { %v10521_v29 = vadd.f32 %v4902_v63, %v10116_v9  ;;  %v4588_v9 = vrot.slane %v4586_v47, 1 }
 0x34e   :  { %v10532_v19 = vadd.f32 %v5737_v11, %v10492_v14  ;;  %v5392_v14 = vsel %vm5205_vm4, %v5373_v7, %v5391_v3  ;;  %v5400_v27 = vor.u32 %v5399_v43, %v5396_v53  ;;  %v4292_v11 = vld [vmem:[#allocation2 + $0x4a8] sm:$0xff]  ;;  %v5405_v50 = vrot.slane %v5403_v59, 2 }
 0x34f   :  { %v4589_v30 = vsel %vm791_vm0, %v4584_v45, %v4588_v9  ;;  %v4290_v45 = vld [vmem:[#allocation2 + $0x410] sm:$0xff] }
 0x350   :  { %5691 = vmatmul.bf16.gmra.mxu0 %v5392_v14  ;;  %v5401_v21 = vsel %vm5205_vm4, %v10511_v48, %v5400_v27 }
 0x351   :  { %v4814_v36 = vpop.f32.mrf.mxu2 }
 0x352   :  { %v4903_v51 = vpop.f32.mrf.mxu3 }
 0x353   :  { %v4904_v18 = vadd.f32 %v4903_v51, %v4814_v36  ;;  %v5738_v13 = vpop.f32.mrf.mxu1  ;;  %v5652_v63 = vpop.f32.mrf.mxu0  ;;  %v4289_v36 = vld [vmem:[#allocation2 + $0x30] sm:$0xff]  ;;  %v10542_v51 = vpack.c.bf16 %v4292_v11, %v4290_v45 }
 0x354   :  { %v5739_v32 = vadd.f32 %v5738_v13, %v5649_v16  ;;  %v4592_v13 = vor.u32 %v5403_v59, %v4580_v38 }
 0x355   :  { %v10536_v8 = vadd.f32 %v4904_v18, %v10136_v22  ;;  %v4291_v22 = vld [vmem:[#allocation2 + $0x208] sm:$0xff]  ;;  %v4598_v18 = vshrl.u32 %v10515_v56, 16  ;;  %v4602_v2 = vshll.u32 %v10542_v51, 16 }
 0x356   :  { %4856 = vmatmul.bf16.gmra.mxu2 %v4581_v37  ;;  %v4331_v62 = vpack.c.bf16 %v4291_v22, %v4289_v36  ;;  %v10545_v7 = vadd.f32 %v5739_v32, %v10506_v26  ;;  %v5417_v22 = vrot.slane %v4586_v47, 3 }
 0x357   :  { %4945 = vmatmul.bf16.gmra.mxu3 %v4589_v30  ;;  %v5408_v30 = vrot.slane %v4578_v6, 3  ;;  %v4600_v26 = vor.u32 %v4598_v18, %v4588_v9  ;;  %v5414_v9 = vrot.slane %v4598_v18, 2 }
 0x358   :  { %v4594_v37 = vshll.u32 %v4331_v62, 16  ;;  %v5421_v18 = vshrl.u32 %v4331_v62, 16 }
 0x359   :  { %v4817_v49 = vpop.f32.mrf.mxu2  ;;  %5780 = vmatmul.bf16.gmra.mxu1 %v5401_v21  ;;  %v5409_v48 = vor.u32 %v5408_v30, %v5405_v50  ;;  %v4295_v21 = vld [vmem:[#allocation2 + $0x368] sm:$0xff]  ;;  %v4294_v50 = vld [vmem:[#allocation2 + $0x218] sm:$0xff]  ;;  %v10567_v30 = vor.u32 %v5417_v22, %v5414_v9 }
 0x35a   :  { %v4906_v23 = vpop.f32.mrf.mxu3  ;;  %v4596_v14 = vrot.slane %v4594_v37, 1  ;;  %v5426_v62 = vrot.slane %v4594_v37, 3 }
 0x35b   :  { %v4907_v24 = vadd.f32 %v4906_v23, %v4817_v49  ;;  %v5741_v43 = vpop.f32.mrf.mxu1  ;;  %v5654_v49 = vpop.f32.mrf.mxu0  ;;  %v5410_v59 = vsel %vm5205_vm4, %v5391_v3, %v5409_v48 }
 0x35c   :  { %v5742_v32 = vadd.f32 %v5741_v43, %v5652_v63  ;;  %v4597_v17 = vsel %vm791_vm0, %v4592_v13, %v4596_v14 }
 0x35d   :  { %v10548_v16 = vadd.f32 %v4907_v24, %v10144_v25  ;;  %v4604_v25 = vrot.slane %v4602_v2, 1 }
 0x35e   :  { %v10558_v23 = vadd.f32 %v5742_v32, %v10521_v29  ;;  %v4293_v29 = vld [vmem:[#allocation2 + $0x5b8] sm:$0xff]  ;;  %v4614_v32 = vshrl.u32 %v10542_v51, 16 }
 0x35f   :  { %v4605_v6 = vsel %vm791_vm0, %v4600_v26, %v4604_v25  ;;  %v10569_v43 = vpack.c.bf16 %v4295_v21, %v4293_v29  ;;  %v11573_v26 = vld [vmem:[#allocation20_spill] sm:$0xff] }
 0x360   :  { %5696 = vmatmul.bf16.gmra.mxu0 %v5410_v59 }
 0x361   :  { %v4819_v53 = vpop.f32.mrf.mxu2 }
 0x362   :  { %v4908_v46 = vpop.f32.mrf.mxu3 }
 0x363   :  { %v4909_v36 = vadd.f32 %v4908_v46, %v4819_v53  ;;  %v5743_v45 = vpop.f32.mrf.mxu1  ;;  %v5657_v11 = vpop.f32.mrf.mxu0 }
 0x364   :  { %v5744_v24 = vadd.f32 %v5743_v45, %v5654_v49  ;;  %v4610_v49 = vshll.u32 %v10569_v43, 16  ;;  %v4616_v45 = vor.u32 %v4614_v32, %v4604_v25 }
 0x365   :  { %v10562_v38 = vadd.f32 %v4909_v36, %v10163_v57  ;;  %v4296_v57 = vld [vmem:[#allocation2 + $0x298] sm:$0xff]  ;;  %v5423_v36 = vrot.slane %v5421_v18, 2 }
 0x366   :  { %4861 = vmatmul.bf16.gmra.mxu2 %v4597_v17  ;;  %v10571_v47 = vpack.c.bf16 %v4296_v57, %v4294_v50  ;;  %v10574_v13 = vadd.f32 %v5744_v24, %v10536_v8  ;;  %v5419_v17 = vsel %vm5205_vm4, %v5400_v27, %v10567_v30  ;;  %v4612_v8 = vrot.slane %v4610_v49, 1  ;;  %v8658_v57 = vld [vmem:[#allocation10 + $0x3c8] sm:$0xff] }
 0x367   :  { %4950 = vmatmul.bf16.gmra.mxu3 %v4605_v6  ;;  %v5427_v37 = vor.u32 %v5426_v62, %v5423_v36  ;;  %v8666_v36 = vld [vmem:[#allocation10 + $0x408] sm:$0xff] }
 0x368   :  { %v4618_v46 = vshll.u32 %v10571_v47, 16  ;;  %6369 = vmatpush.bf16.msra.mxu3 %v8658_v57  ;;  %v8674_v62 = vld [vmem:[#allocation10 + $0x448] sm:$0xff]  ;;  %7119 = vmatpush.bf16.msra.mxu0 %v8666_v36 }
 0x369   :  { %v4822_v63 = vpop.f32.mrf.mxu2  ;;  %5785 = vmatmul.bf16.gmra.mxu1 %v5419_v17 }
 0x36a   :  { %v4911_v53 = vpop.f32.mrf.mxu3  ;;  %v4620_v59 = vrot.slane %v4618_v46, 1  ;;  %7208 = vmatpush.bf16.msra.mxu1 %v8674_v62 }
 0x36b   :  { %v4912_v56 = vadd.f32 %v4911_v53, %v4822_v63  ;;  %v5746_v9 = vpop.f32.mrf.mxu1  ;;  %v5659_v22 = vpop.f32.mrf.mxu0  ;;  %v4608_v63 = vor.u32 %v5421_v18, %v4596_v14  ;;  %v8650_v53 = vld [vmem:[#allocation10 + $0x388] sm:$0xff] }
 0x36c   :  { %v5747_v24 = vadd.f32 %v5746_v9, %v5657_v11  ;;  %v4621_v14 = vsel %vm791_vm0, %v4616_v45, %v4620_v59  ;;  %v11574_v18 = vld [vmem:[#allocation21_spill] sm:$0xff]  ;;  %6280 = vmatpush.bf16.msra.mxu2 %v8650_v53  ;;  %v5432_v11 = vrot.slane %v4614_v32, 2  ;;  %v5439_v32 = vshrl.u32 %v10569_v43, 16 }
 0x36d   :  { %v10577_v3 = vadd.f32 %v4912_v56, %v11573_v26  ;;  %v4613_v21 = vsel %vm791_vm0, %v4608_v63, %v4612_v8  ;;  %v5435_v56 = vrot.slane %v4602_v2, 3  ;;  %v4297_v63 = vld [vmem:[#allocation2 + $0x420] sm:$0xff] }
 0x36e   :  { %v10588_v27 = vadd.f32 %v5747_v24, %v10548_v16  ;;  %v5428_v16 = vsel %vm5205_vm4, %v5409_v48, %v5427_v37  ;;  %v4624_v36 = vor.u32 %v5439_v32, %v4612_v8 }
 0x36f   :  { %v5436_v45 = vor.u32 %v5435_v56, %v5432_v11  ;;  %v5441_v11 = vrot.slane %v5439_v32, 2  ;;  %v5444_v56 = vrot.slane %v4610_v49, 3 }
 0x370   :  { %5701 = vmatmul.bf16.gmra.mxu0 %v5428_v16 }
 0x371   :  { %v4824_v6 = vpop.f32.mrf.mxu2  ;;  %v5437_v43 = vsel %vm5205_vm4, %v10567_v30, %v5436_v45  ;;  %v10616_v30 = vor.u32 %v5444_v56, %v5441_v11  ;;  %v4301_v11 = vld [vmem:[#allocation2 + $0x230] sm:$0xff] }
 0x372   :  { %v4913_v29 = vpop.f32.mrf.mxu3  ;;  %v4303_v56 = vld [vmem:[#allocation2 + $0x110] sm:$0xff] }
 0x373   :  { %v4914_v50 = vadd.f32 %v4913_v29, %v4824_v6  ;;  %v5748_v17 = vpop.f32.mrf.mxu1  ;;  %v5662_v6 = vpop.f32.mrf.mxu0  ;;  %v4299_v29 = vld [vmem:[#allocation2 + $0x130] sm:$0xff] }
 0x374   :  { %v5749_v9 = vadd.f32 %v5748_v17, %v5659_v22  ;;  %v4335_v2 = vpack.c.bf16 %v4299_v29, %v4297_v63 }
 0x375   :  { %v10592_v25 = vadd.f32 %v4914_v50, %v11574_v18  ;;  %v4300_v50 = vld [vmem:[#allocation2 + $0x5f0] sm:$0xff] }
 0x376   :  { %4866 = vmatmul.bf16.gmra.mxu2 %v4613_v21  ;;  %v4298_v21 = vld [vmem:[#allocation2 + $0x88] sm:$0xff]  ;;  %v10601_v48 = vadd.f32 %v5749_v9, %v10562_v38  ;;  %v4626_v57 = vshll.u32 %v4335_v2, 16 }
 0x377   :  { %4955 = vmatmul.bf16.gmra.mxu3 %v4621_v14  ;;  %v10598_v53 = vpack.c.bf16 %v4300_v50, %v4298_v21  ;;  %v4630_v14 = vshrl.u32 %v10571_v47, 16  ;;  %v5457_v47 = vshrl.u32 %v4335_v2, 16 }
 0x378   :  { %v4628_v62 = vrot.slane %v4626_v57, 1  ;;  %v5462_v2 = vrot.slane %v4626_v57, 3  ;;  %v8657_v57 = vld [vmem:[#allocation10 + $0x3c0] sm:$0xff] }
 0x379   :  { %v4827_v26 = vpop.f32.mrf.mxu2  ;;  %v11550_v18 = vshll.u32 %v10598_v53, 16  ;;  %v4632_v38 = vor.u32 %v4630_v14, %v4620_v59  ;;  %5790 = vmatmul.bf16.gmra.mxu1 %v5437_v43  ;;  %v5450_v59 = vrot.slane %v4630_v14, 2  ;;  %v4304_v14 = vld [vmem:[#allocation2 + $0xa8] sm:$0xff]  ;;  %6370 = vmatpush.bf16.msra.mxu3 %v8657_v57 }
 0x37a   :  { %v4916_v24 = vpop.f32.mrf.mxu3 }
 0x37b   :  { %v4917_v51 = vadd.f32 %v4916_v24, %v4827_v26  ;;  %v5751_v17 = vpop.f32.mrf.mxu1  ;;  %v5664_v16 = vpop.f32.mrf.mxu0  ;;  %v4629_v24 = vsel %vm791_vm0, %v4624_v36, %v4628_v62 }
 0x37c   :  { %v5752_v9 = vadd.f32 %v5751_v17, %v5662_v6  ;;  %v5453_v6 = vrot.slane %v4618_v46, 3 }
 0x37d   :  { %v10604_v22 = vadd.f32 %v4917_v51, %v10196_v28  ;;  %v4636_v28 = vrot.slane %v11550_v18, 1 }
 0x37e   :  { %v10614_v21 = vadd.f32 %v5752_v9, %v10577_v3  ;;  %v5446_v3 = vsel %vm5205_vm4, %v5427_v37, %v10616_v30  ;;  %v10626_v17 = vor.u32 %v5453_v6, %v5450_v59  ;;  %v467_v6 = vld [vmem:[#allocation9] sm:$0xff] }
 0x37f   :  { %v4637_v49 = vsel %vm791_vm0, %v4632_v38, %v4636_v28 }
 0x380   :  { %5706 = vmatmul.bf16.gmra.mxu0 %v5446_v3 }
 0x381   :  { %v4829_v26 = vpop.f32.mrf.mxu2 }
 0x382   :  { %v4918_v63 = vpop.f32.mrf.mxu3 }
 0x383   :  { %v4919_v29 = vadd.f32 %v4918_v63, %v4829_v26  ;;  %v5753_v32 = vpop.f32.mrf.mxu1  ;;  %v5667_v51 = vpop.f32.mrf.mxu0  ;;  %v4302_v26 = vld [vmem:[#allocation2 + $0x2e0] sm:$0xff]  ;;  %v4646_v63 = vshrl.u32 %v10598_v53, 16 }
 0x384   :  { %v5754_v43 = vadd.f32 %v5753_v32, %v5664_v16  ;;  %v10630_v38 = vpack.c.bf16 %v4304_v14, %v4302_v26  ;;  %v500_v14 = vunpack.c.h.bf16 %v467_v6 }
 0x385   :  { %v10620_v8 = vadd.f32 %v4919_v29, %v10204_v5  ;;  %v10628_v5 = vpack.c.bf16 %v4303_v56, %v4301_v11  ;;  %v5455_v29 = vsel %vm5205_vm4, %v5436_v45, %v10626_v17  ;;  %v499_v56 = vunpack.c.l.bf16 %v467_v6 }
 0x386   :  { %4871 = vmatmul.bf16.gmra.mxu2 %v4629_v24  ;;  %v10633_v9 = vadd.f32 %v5754_v43, %v10592_v25  ;;  %v4650_v24 = vshll.u32 %v10630_v38, 16  ;;  %v4640_v25 = vor.u32 %v5457_v47, %v4628_v62  ;;  %v4648_v43 = vor.u32 %v4646_v63, %v4636_v28  ;;  %564 = vst [vmem:[#allocation2 + $0x1a8] sm:$0xff] %v500_v14 }
 0x387   :  { %4960 = vmatmul.bf16.gmra.mxu3 %v4637_v49  ;;  %v4642_v16 = vshll.u32 %v10628_v5, 16  ;;  %v5459_v49 = vrot.slane %v5457_v47, 2  ;;  %563 = vst [vmem:[#allocation2 + $0x190] sm:$0xff] %v499_v56  ;;  %v5468_v47 = vrot.slane %v4646_v63, 2  ;;  %v5475_v63 = vshrl.u32 %v10628_v5, 16 }
 0x389   :  { %v4832_v50 = vpop.f32.mrf.mxu2  ;;  %v4644_v3 = vrot.slane %v4642_v16, 1  ;;  %5795 = vmatmul.bf16.gmra.mxu1 %v5455_v29  ;;  %v10646_v18 = vor.u32 %v5462_v2, %v5459_v49  ;;  %v11575_v29 = vshll.u32 %v10598_v53, 16 }
 0x38a   :  { %v4921_v36 = vpop.f32.mrf.mxu3 }
 0x38b   :  { %v4922_v46 = vadd.f32 %v4921_v36, %v4832_v50  ;;  %v5756_v50 = vpop.f32.mrf.mxu1  ;;  %v5669_v32 = vpop.f32.mrf.mxu0  ;;  %v4645_v36 = vsel %vm791_vm0, %v4640_v25, %v4644_v3 }
 0x38c   :  { %v5757_v11 = vadd.f32 %v5756_v50, %v5667_v51  ;;  %v5464_v50 = vsel %vm5205_vm4, %v10616_v30, %v10646_v18 }
 0x38d   :  { %v10636_v37 = vadd.f32 %v4922_v46, %v10213_v60  ;;  %v4652_v60 = vrot.slane %v4650_v24, 1  ;;  %v8649_v46 = vld [vmem:[#allocation10 + $0x380] sm:$0xff] }
 0x38e   :  { %v10650_v28 = vadd.f32 %v5757_v11, %v10604_v22  ;;  %6281 = vmatpush.bf16.msra.mxu2 %v8649_v46  ;;  %v8665_v22 = vld [vmem:[#allocation10 + $0x400] sm:$0xff]  ;;  %v4305_v53 = vld [vmem:[#allocation2 + $0x190] sm:$0x1]  ;;  %v4662_v46 = vshrl.u32 %v10630_v38, 16 }
 0x38f   :  { %v4653_v62 = vsel %vm791_vm0, %v4648_v43, %v4652_v60  ;;  %v8673_v43 = vld [vmem:[#allocation10 + $0x440] sm:$0xff]  ;;  %7120 = vmatpush.bf16.msra.mxu0 %v8665_v22  ;;  %v4339_v14 = vpack.c.bf16 %v4305_v53, %v4305_v53 }
 0x390   :  { %5711 = vmatmul.bf16.gmra.mxu0 %v5464_v50  ;;  %7209 = vmatpush.bf16.msra.mxu1 %v8673_v43  ;;  %v4664_v50 = vor.u32 %v4662_v46, %v4652_v60  ;;  %v5486_v60 = vrot.slane %v4662_v46, 2 }
 0x391   :  { %v4834_v59 = vpop.f32.mrf.mxu2 }
 0x392   :  { %v4923_v26 = vpop.f32.mrf.mxu3 }
 0x393   :  { %v4924_v45 = vadd.f32 %v4923_v26, %v4834_v59  ;;  %v5471_v59 = vrot.slane %v11575_v29, 3  ;;  %v5758_v49 = vpop.f32.mrf.mxu1  ;;  %v5672_v2 = vpop.f32.mrf.mxu0  ;;  %v4306_v26 = vld [vmem:[#allocation2 + $0x1a8] sm:$0x1] }
 0x394   :  { %v5759_v25 = vadd.f32 %v5758_v49, %v5669_v32  ;;  %v4658_v32 = vshll.u32 %v4339_v14, 16 }
 0x395   :  { %v10653_v51 = vadd.f32 %v4924_v45, %v10227_v39  ;;  %v10660_v39 = vor.u32 %v5471_v59, %v5468_v47  ;;  %v4340_v45 = vpack.c.bf16 %v4306_v26, %v4306_v26  ;;  %v5480_v47 = vrot.slane %v4642_v16, 3  ;;  %v5104_v16 = vld [vmem:[#allocation2 + $0x190] sm:$0x1f] }
 0x396   :  { %4876 = vmatmul.bf16.gmra.mxu2 %v4645_v36  ;;  %v10664_v36 = vadd.f32 %v5759_v25, %v10620_v8  ;;  %v4660_v49 = vrot.slane %v4658_v32, 1 }
 0x397   :  { %4965 = vmatmul.bf16.gmra.mxu3 %v4653_v62  ;;  %v4666_v57 = vshll.u32 %v4340_v45, 16  ;;  %v5473_v5 = vsel %vm5205_vm4, %v10626_v17, %v10660_v39  ;;  %v5477_v62 = vrot.slane %v5475_v63, 2 }
 0x399   :  { %v4837_v6 = vpop.f32.mrf.mxu2  ;;  %v4668_v25 = vrot.slane %v4666_v57, 1  ;;  %5800 = vmatmul.bf16.gmra.mxu1 %v5473_v5  ;;  %v10677_v53 = vor.u32 %v5480_v47, %v5477_v62  ;;  %v5105_v5 = vld [vmem:[#allocation2 + $0x1a8] sm:$0x1f] }
 0x39a   :  { %v4926_v11 = vpop.f32.mrf.mxu3 }
 0x39b   :  { %v4927_v56 = vadd.f32 %v4926_v11, %v4837_v6  ;;  %v5761_v59 = vpop.f32.mrf.mxu1  ;;  %v5674_v8 = vpop.f32.mrf.mxu0  ;;  %v4656_v6 = vor.u32 %v5475_v63, %v4644_v3  ;;  %v4669_v17 = vsel %vm791_vm0, %v4664_v50, %v4668_v25  ;;  %v5138_v63 = vpack.c.bf16 %v5104_v16, %v5104_v16  ;;  %v5881_v25 = vld [vmem:[#allocation2 + $0x260] sm:$0xc0] }
 0x39c   :  { %v5762_v22 = vadd.f32 %v5761_v59, %v5672_v2  ;;  %v5489_v2 = vrot.slane %v4650_v24, 3  ;;  %v5886_v24 = vld [vmem:[#allocation2 + $0x80] sm:$0xff]  ;;  %v5139_v50 = vpack.c.bf16 %v5105_v5, %v5105_v5 }
 0x39d   :  { %v10667_v30 = vadd.f32 %v4927_v56, %v10245_v31  ;;  %v4661_v43 = vsel %vm791_vm0, %v4656_v6, %v4660_v49  ;;  %v5493_v46 = vshrl.u32 %v5138_v63, 16  ;;  %v5496_v47 = vshll.u32 %v5138_v63, 16  ;;  %v5887_v59 = vld [vmem:[#allocation2 + $0x5a0] sm:$0xff]  ;;  %v5882_v49 = vld [vmem:[#allocation2 + $0x438] sm:$0xff] }
 0x39e   :  { %v10675_v56 = vadd.f32 %v5762_v22, %v10636_v37  ;;  %v5482_v37 = vsel %vm5205_vm4, %v10646_v18, %v10677_v53  ;;  %v10688_v57 = vor.u32 %v5489_v2, %v5486_v60  ;;  %v5883_v22 = vld [vmem:[#allocation2 + $0xf0] sm:$0xff] }
 0x39f   :  { %v5498_v60 = vrot.slane %v5496_v47, 3 }
 0x3a0   :  { %5716 = vmatmul.bf16.gmra.mxu0 %v5482_v37  ;;  %v5491_v16 = vsel %vm5205_vm4, %v10660_v39, %v10688_v57 }
 0x3a1   :  { %v4839_v29 = vpop.f32.mrf.mxu2 }
 0x3a2   :  { %v4928_v31 = vpop.f32.mrf.mxu3 }
 0x3a3   :  { %v4929_v11 = vadd.f32 %v4928_v31, %v4839_v29  ;;  %v5763_v14 = vpop.f32.mrf.mxu1  ;;  %v5677_v45 = vpop.f32.mrf.mxu0  ;;  %v5885_v29 = vld [vmem:[#allocation2 + $0x200] sm:$0xff] }
 0x3a4   :  { %v5764_v32 = vadd.f32 %v5763_v14, %v5674_v8  ;;  %v5880_v8 = vld [vmem:[#allocation2 + $0x5d0] sm:$0xc0] }
 0x3a5   :  { %v10681_v3 = vadd.f32 %v4929_v11, %v10257_v55  ;;  %v5884_v55 = vld [vmem:[#allocation2 + $0x60] sm:$0xff]  ;;  %v5946_v31 = vpack.c.bf16 %v5882_v49, %v5880_v8  ;;  %v5947_v11 = vpack.c.bf16 %v5883_v22, %v5881_v25 }
 0x3a6   :  { %4881 = vmatmul.bf16.gmra.mxu2 %v4661_v43  ;;  %v10691_v6 = vadd.f32 %v5764_v32, %v10653_v51  ;;  %v10696_v43 = vpack.c.bf16 %v5886_v24, %v5884_v55  ;;  %v5495_v51 = vrot.slane %v5493_v46, 2  ;;  %v5505_v55 = vshll.u32 %v5139_v50, 16 }
 0x3a7   :  { %4970 = vmatmul.bf16.gmra.mxu3 %v4669_v17  ;;  %v10698_v17 = vpack.c.bf16 %v5887_v59, %v5885_v29  ;;  %v6083_v37 = vrot.slane %v5947_v11, 3 }
 0x3a8   :  { %v6081_v14 = vrot.slane %v10696_v43, 3  ;;  %v5499_v46 = vor.u32 %v5498_v60, %v5495_v51 }
 0x3a9   :  { %v4842_v26 = vpop.f32.mrf.mxu2  ;;  %v6084_v32 = vrot.slane %v10698_v17, 3  ;;  %5805 = vmatmul.bf16.gmra.mxu1 %v5491_v16 }
 0x3aa   :  { %v4931_v62 = vpop.f32.mrf.mxu3  ;;  %v5500_v16 = vsel %vm5205_vm4, %v10677_v53, %v5499_v46 }
 0x3ab   :  { %v4932_v38 = vadd.f32 %v4931_v62, %v4842_v26  ;;  %v5766_v63 = vpop.f32.mrf.mxu1  ;;  %v5679_v26 = vpop.f32.mrf.mxu0  ;;  %v5502_v62 = vshrl.u32 %v5139_v50, 16  ;;  %v6085_v47 = vsel %vm6079_vm5, %v6083_v37, %v6084_v32  ;;  %v5507_v50 = vrot.slane %v5505_v55, 3  ;;  %v5889_v55 = vld [vmem:[#allocation2 + $0x310] sm:$0xff] }
 0x3ac   :  { %v5767_v5 = vadd.f32 %v5766_v63, %v5677_v45  ;;  %v6516_v45 = vld [vmem:[#allocation2 + $0x5d0] sm:$0x80]  ;;  %v6517_v63 = vld [vmem:[#allocation2 + $0x260] sm:$0x80]  ;;  %v6693_v37 = vshll.u32 %v10696_v43, 16 }
 0x3ad   :  { %v10694_v18 = vadd.f32 %v4932_v38, %v10273_v0  ;;  %v6080_v0 = vrot.slane %v5946_v31, 3  ;;  %v5504_v8 = vrot.slane %v5502_v62, 2  ;;  %v6582_v51 = vpack.c.bf16 %v5882_v49, %v6516_v45  ;;  %v5890_v62 = vld [vmem:[#allocation2 + $0x1e8] sm:$0xff] }
 0x3ae   :  { %v10710_v29 = vadd.f32 %v5767_v5, %v10667_v30  ;;  %v5888_v30 = vld [vmem:[#allocation2 + $0x4b8] sm:$0xff] }
 0x3af   :  { %v6082_v24 = vsel %vm6079_vm5, %v6080_v0, %v6081_v14  ;;  %v6685_v53 = vshll.u32 %v6582_v51, 16  ;;  %v10725_v46 = vpack.c.bf16 %v5890_v62, %v5888_v30 }
 0x3b0   :  { %5721 = vmatmul.bf16.gmra.mxu0 %v5500_v16 }
 0x3b1   :  { %v4844_v2 = vpop.f32.mrf.mxu2  ;;  %v6687_v16 = vrot.slane %v6685_v53, 4 }
 0x3b2   :  { %v4933_v38 = vpop.f32.mrf.mxu3 }
 0x3b3   :  { %v4934_v39 = vadd.f32 %v4933_v38, %v4844_v2  ;;  %v5768_v31 = vpop.f32.mrf.mxu1  ;;  %v5682_v11 = vpop.f32.mrf.mxu0  ;;  %v5508_v2 = vor.u32 %v5507_v50, %v5504_v8  ;;  %v5891_v38 = vld [vmem:[#allocation2 + $0x258] sm:$0xff]  ;;  %v6695_v8 = vrot.slane %v6693_v37, 4 }
 0x3b4   :  { %v5769_v60 = vadd.f32 %v5768_v31, %v5679_v26  ;;  %v6583_v26 = vpack.c.bf16 %v5883_v22, %v6517_v63 }
 0x3b5   :  { %v10713_v59 = vadd.f32 %v4934_v39, %v10293_v41  ;;  %v6690_v41 = vshrl.u32 %v10696_v43, 16  ;;  %v6682_v39 = vshrl.u32 %v6582_v51, 16  ;;  %v5509_v43 = vsel %vm5205_vm4, %v10688_v57, %v5508_v2 }
 0x3b6   :  { %6282 = vmatmul.bf16.vlgmr.msra.gmra.mxu2 %v6082_v24  ;;  %v10720_v24 = vadd.f32 %v5769_v60, %v10681_v3  ;;  %v6086_v51 = vrot.slane %v10725_v46, 3  ;;  %v6699_v22 = vshrl.u32 %v6583_v26, 16  ;;  %v6702_v63 = vshll.u32 %v6583_v26, 16 }
 0x3b7   :  { %6371 = vmatmul.bf16.vlgmr.msra.gmra.mxu3 %v6085_v47  ;;  %v10727_v47 = vpack.c.bf16 %v5891_v38, %v5889_v55  ;;  %v6692_v45 = vrot.slane %v6690_v41, 3  ;;  %v6684_v3 = vrot.slane %v6682_v39, 3  ;;  %v6707_v57 = vshrl.u32 %v10698_v17, 16 }
 0x3b8   :  { %v6087_v30 = vsel %vm6079_vm5, %v6081_v14, %v6086_v51  ;;  %v6710_v2 = vshll.u32 %v10698_v17, 16  ;;  %v6701_v55 = vrot.slane %v6699_v22, 3  ;;  %v6704_v38 = vrot.slane %v6702_v63, 4  ;;  %v7462_v17 = vld [vmem:[%s11547_s6] sm:$0xff]  ;;  %v5895_v63 = vld [vmem:[#allocation2 + $0x550] sm:$0xff] }
 0x3b9   :  { %v4847_v25 = vpop.f32.mrf.mxu2  ;;  %5810 = vmatmul.bf16.gmra.mxu1 %v5509_v43  ;;  %v10739_v62 = vor.u32 %v6695_v8, %v6692_v45  ;;  %v6709_v39 = vrot.slane %v6707_v57, 3  ;;  %vm7494_vm6 = vcmp.gt.f32.partialorder %v7462_v17, 0.5  ;;  %v5893_v22 = vld [vmem:[#allocation2 + $0x4e0] sm:$0xff]  ;;  %v6719_v57 = vshll.u32 %v10725_v46, 16  ;;  %v7463_v17 = vld [vmem:[%s11547_s6 + $0x8] sm:$0xff] }
 0x3ba   :  { %v4936_v0 = vpop.f32.mrf.mxu3  ;;  %v6712_v53 = vrot.slane %v6710_v2, 4  ;;  %vm7495_vm7 = vcmp.gt.f32.partialorder %v7463_v17, 0.5 }
 0x3bb   :  { %v4937_v5 = vadd.f32 %v4936_v0, %v4847_v25  ;;  %v5771_v25 = vpop.f32.mrf.mxu1  ;;  %v5684_v31 = vpop.f32.mrf.mxu0 }
 0x3bc   :  { %v5772_v60 = vadd.f32 %v5771_v25, %v5682_v11  ;;  %v5892_v25 = vld [vmem:[#allocation2 + $0x40] sm:$0xff] }
 0x3bd   :  { %v10723_v49 = vadd.f32 %v4937_v5, %v10307_v34  ;;  %v6088_v34 = vrot.slane %v10727_v47, 3  ;;  %v6688_v5 = vor.u32 %v6687_v16, %v6684_v3  ;;  %v10756_v3 = vor.u32 %v6712_v53, %v6709_v39 }
 0x3be   :  { %v10737_v37 = vadd.f32 %v5772_v60, %v10694_v18  ;;  %v6721_v53 = vrot.slane %v6719_v57, 4 }
 0x3bf   :  { %v6089_v11 = vsel %vm6079_vm5, %v6084_v32, %v6088_v34  ;;  %v6697_v45 = vsel %vm3067_vm3, %v6688_v5, %v10739_v62  ;;  %v6705_v32 = vor.u32 %v6704_v38, %v6701_v55  ;;  %v10770_v5 = vpack.c.bf16 %v5895_v63, %v5893_v22 }
 0x3c0   :  { %7121 = vmatmul.bf16.vlgmr.msra.gmra.mxu0 %v6697_v45 }
 0x3c1   :  { %v4849_v50 = vpop.f32.mrf.mxu2 }
 0x3c2   :  { %v4938_v0 = vpop.f32.mrf.mxu3 }
 0x3c3   :  { %v4939_v41 = vadd.f32 %v4938_v0, %v4849_v50  ;;  %v5773_v26 = vpop.f32.mrf.mxu1  ;;  %v5687_v43 = vpop.f32.mrf.mxu0 }
 0x3c4   :  { %v5774_v8 = vadd.f32 %v5773_v26, %v5684_v31  ;;  %v5894_v31 = vld [vmem:[#allocation2 + $0x198] sm:$0xff] }
 0x3c5   :  { %v10747_v14 = vadd.f32 %v4939_v41, %v10321_v58  ;;  %v11552_v58 = vmov 0   ;;  %v10768_v41 = vpack.c.bf16 %v5894_v31, %v5892_v25 }
 0x3c6   :  { %6287 = vmatmul.bf16.gmra.mxu2 %v6087_v30  ;;  %8898 = vset.pattern.permute.xlu0 %v11552_v58  ;;  %v7526_v60 = vsel %vm7494_vm6, 1, %v11552_v58  ;;  %v10761_v0 = vadd.f32 %v5774_v8, %v10713_v59  ;;  %v6716_v30 = vshrl.u32 %v10725_v46, 16  ;;  %v6092_v46 = vrot.slane %v10770_v5, 3 }
 0x3c7   :  { %6376 = vmatmul.bf16.gmra.mxu3 %v6089_v11  ;;  %8899 = vset.pattern.permute.xlu1 %v11552_v58  ;;  %v6714_v11 = vsel %vm3067_vm3, %v6705_v32, %v10756_v3  ;;  %v6728_v32 = vshll.u32 %v10727_v47, 16 }
 0x3c8   :  { %8900 = vset.pattern.permute.xlu2 %v11552_v58  ;;  %7559 = vperm.xlu0 %8898, %v7526_v60   ;;  %v6718_v59 = vrot.slane %v6716_v30, 3 }
 0x3c9   :  { %v4852_v18 = vpop.f32.mrf.mxu2  ;;  %7210 = vmatmul.bf16.vlgmr.msra.gmra.mxu1 %v6714_v11  ;;  %v6730_v22 = vrot.slane %v6728_v32, 4 }
 0x3ca   :  { %v4941_v50 = vpop.f32.mrf.mxu3 }
 0x3cb   :  { %v4942_v16 = vadd.f32 %v4941_v50, %v4852_v18  ;;  %v5776_v38 = vpop.f32.mrf.mxu1  ;;  %v5689_v39 = vpop.f32.mrf.mxu0  ;;  %v6090_v18 = vrot.slane %v10768_v41, 3 }
 0x3cc   :  { %v5777_v26 = vadd.f32 %v5776_v38, %v5687_v43  ;;  %v7527_v43 = vsel %vm7495_vm7, 1, %v11552_v58 }
 0x3cd   :  { %v10766_v2 = vadd.f32 %v4942_v16, %v10334_v42  ;;  %v6725_v42 = vshrl.u32 %v10727_v47, 16  ;;  %v6091_v8 = vsel %vm6079_vm5, %v6086_v51, %v6090_v18  ;;  %v10785_v16 = vor.u32 %v6721_v53, %v6718_v59  ;;  %v7464_v47 = vld [vmem:[%s11547_s6 + $0x10] sm:$0xff]  ;;  %v5898_v53 = vld [vmem:[#allocation2 + $0x340] sm:$0xff] }
 0x3ce   :  { %v10783_v25 = vadd.f32 %v5777_v26, %v10723_v49  ;;  %v6093_v51 = vsel %vm6079_vm5, %v6088_v34, %v6092_v46  ;;  %vm7496_vm8 = vcmp.gt.f32.partialorder %v7464_v47, 0.5  ;;  %v5897_v26 = vld [vmem:[#allocation2 + $0x5c8] sm:$0xff]  ;;  %v7465_v47 = vld [vmem:[%s11547_s6 + $0x18] sm:$0xff] }
 0x3cf   :  { %v6727_v31 = vrot.slane %v6725_v42, 3  ;;  %v6723_v57 = vsel %vm3067_vm3, %v10739_v62, %v10785_v16  ;;  %v7528_v59 = vsel %vm7496_vm8, 1, %v11552_v58  ;;  %v5899_v42 = vld [vmem:[#allocation2 + $0x360] sm:$0xff]  ;;  %v6734_v62 = vshrl.u32 %v10768_v41, 16 }
 0x3d0   :  { %7562 = vperm.xlu0 %8898, %v7527_v43   ;;  %7126 = vmatmul.bf16.gmra.mxu0 %v6723_v57  ;;  %v10809_v32 = vpack.c.bf16 %v5899_v42, %v5897_v26  ;;  %vm7497_vm9 = vcmp.gt.f32.partialorder %v7465_v47, 0.5 }
 0x3d1   :  { %v4854_v55 = vpop.f32.mrf.mxu2  ;;  %7565 = vperm.xlu1 %8899, %v7528_v59  }
 0x3d2   :  { %v4943_v45 = vpop.f32.mrf.mxu3 }
 0x3d3   :  { %v4944_v50 = vadd.f32 %v4943_v45, %v4854_v55  ;;  %v5778_v63 = vpop.f32.mrf.mxu1  ;;  %v5692_v30 = vpop.f32.mrf.mxu0  ;;  %v6731_v55 = vor.u32 %v6730_v22, %v6727_v31  ;;  %v6736_v22 = vrot.slane %v6734_v62, 3 }
 0x3d4   :  { %v5779_v11 = vadd.f32 %v5778_v63, %v5689_v39  ;;  %v6737_v39 = vshll.u32 %v10768_v41, 16  ;;  %v6096_v63 = vrot.slane %v10809_v32, 3  ;;  %v6743_v41 = vshrl.u32 %v10770_v5, 16 }
 0x3d5   :  { %v10794_v60 = vadd.f32 %v4944_v50, %v10350_v52  ;;  %v5896_v52 = vld [vmem:[#allocation2 + $0x418] sm:$0xff]  ;;  %v6732_v50 = vsel %vm3067_vm3, %v10756_v3, %v6731_v55  ;;  %v6746_v3 = vshll.u32 %v10770_v5, 16 }
 0x3d6   :  { %6292 = vmatmul.bf16.gmra.mxu2 %v6091_v8  ;;  %v10804_v45 = vadd.f32 %v5779_v11, %v10747_v14  ;;  %v5954_v17 = vpack.c.bf16 %v5898_v53, %v5896_v52  ;;  %v6745_v53 = vrot.slane %v6743_v41, 3  ;;  %v5900_v5 = vld [vmem:[#allocation2 + $0x3b8] sm:$0xff] }
 0x3d7   :  { %6381 = vmatmul.bf16.gmra.mxu3 %v6093_v51  ;;  %v6748_v26 = vrot.slane %v6746_v3, 4 }
 0x3d8   :  { %v6094_v14 = vrot.slane %v5954_v17, 3  ;;  %v6752_v41 = vshrl.u32 %v5954_v17, 16 }
 0x3d9   :  { %v4857_v49 = vpop.f32.mrf.mxu2  ;;  %7215 = vmatmul.bf16.gmra.mxu1 %v6732_v50 }
 0x3da   :  { %v4946_v34 = vpop.f32.mrf.mxu3 }
 0x3db   :  { %v4947_v38 = vadd.f32 %v4946_v34, %v4857_v49  ;;  %v5781_v43 = vpop.f32.mrf.mxu1  ;;  %v5694_v31 = vpop.f32.mrf.mxu0  ;;  %v6739_v49 = vrot.slane %v6737_v39, 4 }
 0x3dc   :  { %v5782_v57 = vadd.f32 %v5781_v43, %v5692_v30  ;;  %v6097_v30 = vsel %vm6079_vm5, %v6092_v46, %v6096_v63  ;;  %v6749_v46 = vor.u32 %v6748_v26, %v6745_v53 }
 0x3dd   :  { %v4996_v8 = vadd.f32 %v4947_v38, %v10364_v40  ;;  %v6095_v40 = vsel %vm6079_vm5, %v6090_v18, %v6094_v14  ;;  %v6740_v38 = vor.u32 %v6739_v49, %v6736_v22  ;;  %v7529_v18 = vsel %vm7497_vm9, 1, %v11552_v58  ;;  %v5902_v22 = vld [vmem:[#allocation2 + $0x1f0] sm:$0xff] }
 0x3de   :  { %v10821_v52 = vadd.f32 %v5782_v57, %v10766_v2  ;;  %7568 = vperm.xlu1 %8899, %v7529_v18   ;;  %v5901_v49 = vld [vmem:[#allocation2 + $0x530] sm:$0xff]  ;;  %v5956_v47 = vpack.c.bf16 %v5902_v22, %v5900_v5  ;;  %v6754_v18 = vrot.slane %v6752_v41, 3 }
 0x3df   :  { %v6741_v2 = vsel %vm3067_vm3, %v10785_v16, %v6740_v38  ;;  %v6750_v16 = vsel %vm3067_vm3, %v6731_v55, %v6749_v46  ;;  %v6761_v55 = vshrl.u32 %v10809_v32, 16 }
 0x3e0   :  { %7131 = vmatmul.bf16.gmra.mxu0 %v6741_v2  ;;  %v6098_v26 = vrot.slane %v5956_v47, 3 }
 0x3e1   :  { %v4859_v51 = vpop.f32.mrf.mxu2 }
 0x3e2   :  { %v4948_v11 = vpop.f32.mrf.mxu3 }
 0x3e3   :  { %v4949_v34 = vadd.f32 %v4948_v11, %v4859_v51  ;;  %v5783_v62 = vpop.f32.mrf.mxu1  ;;  %v5697_v39 = vpop.f32.mrf.mxu0  ;;  %v6755_v11 = vshll.u32 %v5954_v17, 16  ;;  %v6099_v17 = vsel %vm6079_vm5, %v6094_v14, %v6098_v26 }
 0x3e4   :  { %v5784_v50 = vadd.f32 %v5783_v62, %v5694_v31 }
 0x3e5   :  { %v10828_v59 = vadd.f32 %v4949_v34, %v10377_v20  ;;  %v5903_v20 = vld [vmem:[#allocation2 + $0x3a0] sm:$0xff]  ;;  %v6757_v53 = vrot.slane %v6755_v11, 4  ;;  %v6770_v11 = vshrl.u32 %v5956_v47, 16 }
 0x3e6   :  { %6297 = vmatmul.bf16.gmra.mxu2 %v6095_v40  ;;  %v10833_v57 = vadd.f32 %v5784_v50, %v10794_v60  ;;  %v10838_v3 = vpack.c.bf16 %v5903_v20, %v5901_v49  ;;  %v6763_v49 = vrot.slane %v6761_v55, 3 }
 0x3e7   :  { %6386 = vmatmul.bf16.gmra.mxu3 %v6097_v30  ;;  %v10845_v50 = vor.u32 %v6757_v53, %v6754_v18  ;;  %v5906_v18 = vld [vmem:[#allocation2 + $0x1d0] sm:$0xff]  ;;  %v5905_v53 = vld [vmem:[#allocation2 + $0x2c8] sm:$0xff]  ;;  %v6772_v55 = vrot.slane %v6770_v11, 3  ;;  %v7466_v11 = vld [vmem:[%s11547_s6 + $0x20] sm:$0xff] }
 0x3e8   :  { %vm7498_vm11 = vcmp.gt.f32.partialorder %v7466_v11, 0.5 }
 0x3e9   :  { %v4862_v42 = vpop.f32.mrf.mxu2  ;;  %7220 = vmatmul.bf16.gmra.mxu1 %v6750_v16 }
 0x3ea   :  { %v4951_v51 = vpop.f32.mrf.mxu3 }
 0x3eb   :  { %v4952_v43 = vadd.f32 %v4951_v51, %v4862_v42  ;;  %v5786_v34 = vpop.f32.mrf.mxu1  ;;  %v5699_v30 = vpop.f32.mrf.mxu0  ;;  %v6100_v42 = vrot.slane %v10838_v3, 3  ;;  %v6764_v51 = vshll.u32 %v10809_v32, 16  ;;  %v7468_v32 = vld [vmem:[%s11547_s6 + $0x30] sm:$0xff] }
 0x3ec   :  { %v5787_v60 = vadd.f32 %v5786_v34, %v5697_v39  ;;  %vm7500_vm10 = vcmp.gt.f32.partialorder %v7468_v32, 0.5 }
 0x3ed   :  { %v10836_v40 = vadd.f32 %v4952_v43, %v10390_v1  ;;  %v6101_v5 = vsel %vm6079_vm5, %v6096_v63, %v6100_v42  ;;  %v6766_v20 = vrot.slane %v6764_v51, 4  ;;  %v5904_v63 = vld [vmem:[#allocation2 + $0x460] sm:$0xff]  ;;  %v7532_v34 = vsel %vm7500_vm10, 1, %v11552_v58 }
 0x3ee   :  { %v10843_v2 = vadd.f32 %v5787_v60, %v4996_v8  ;;  %v6759_v8 = vsel %vm3067_vm3, %v6740_v38, %v10845_v50  ;;  %v5907_v60 = vld [vmem:[#allocation2 + $0x4f0] sm:$0xff]  ;;  %7577 = vperm.xlu0 %8898, %v7532_v34  }
 0x3f0   :  { %7136 = vmatmul.bf16.gmra.mxu0 %v6759_v8 }
 0x3f1   :  { %v4864_v31 = vpop.f32.mrf.mxu2 }
 0x3f2   :  { %v4953_v62 = vpop.f32.mrf.mxu3 }
 0x3f3   :  { %v4954_v1 = vadd.f32 %v4953_v62, %v4864_v31  ;;  %v5788_v22 = vpop.f32.mrf.mxu1  ;;  %v5702_v14 = vpop.f32.mrf.mxu0 }
 0x3f4   :  { %v5789_v41 = vadd.f32 %v5788_v22, %v5699_v30  ;;  %v6767_v30 = vor.u32 %v6766_v20, %v6763_v49  ;;  %v6779_v20 = vshrl.u32 %v10838_v3, 16 }
 0x3f5   :  { %v10851_v43 = vadd.f32 %v4954_v1, %v10406_v10  ;;  %v6773_v10 = vshll.u32 %v5956_v47, 16  ;;  %v10867_v1 = vpack.c.bf16 %v5907_v60, %v5905_v53 }
 0x3f6   :  { %6302 = vmatmul.bf16.gmra.mxu2 %v6099_v17  ;;  %v10860_v38 = vadd.f32 %v5789_v41, %v10828_v59  ;;  %v10865_v17 = vpack.c.bf16 %v5906_v18, %v5904_v63  ;;  %v6781_v34 = vrot.slane %v6779_v20, 3  ;;  %v5910_v20 = vld [vmem:[#allocation2 + $0x468] sm:$0xff] }
 0x3f7   :  { %6391 = vmatmul.bf16.gmra.mxu3 %v6101_v5  ;;  %v6775_v47 = vrot.slane %v6773_v10, 4  ;;  %v6104_v59 = vrot.slane %v10867_v1, 3 }
 0x3f8   :  { %v6102_v8 = vrot.slane %v10865_v17, 3 }
 0x3f9   :  { %v4867_v39 = vpop.f32.mrf.mxu2 }
 0x3fa   :  { %v4956_v16 = vpop.f32.mrf.mxu3  ;;  %v6103_v32 = vsel %vm6079_vm5, %v6098_v26, %v6102_v8  ;;  %v7530_v26 = vsel %vm7498_vm11, 1, %v11552_v58 }
 0x3fb   :  { %v4957_v31 = vadd.f32 %v4956_v16, %v4867_v39  ;;  %v5791_v5 = vpop.f32.mrf.mxu1  ;;  %v6768_v39 = vsel %vm3067_vm3, %v6749_v46, %v6767_v30  ;;  %v5704_v22 = vpop.f32.mrf.mxu0  ;;  %v7469_v46 = vld [vmem:[%s11547_s6 + $0x38] sm:$0xff]  ;;  %v10881_v16 = vor.u32 %v6775_v47, %v6772_v55  ;;  %7571 = vperm.xlu2 %8900, %v7530_v26  }
 0x3fc   :  { %v5792_v49 = vadd.f32 %v5791_v5, %v5702_v14  ;;  %7225 = vmatmul.bf16.gmra.mxu1 %v6768_v39  ;;  %vm7501_vm12 = vcmp.gt.f32.partialorder %v7469_v46, 0.5 }
 0x3fd   :  { %v10863_v62 = vadd.f32 %v4957_v31, %v10420_v54  ;;  %v6782_v54 = vshll.u32 %v10838_v3, 16  ;;  %v6105_v3 = vsel %vm6079_vm5, %v6100_v42, %v6104_v59  ;;  %v7533_v14 = vsel %vm7501_vm12, 1, %v11552_v58 }
 0x3fe   :  { %v10889_v10 = vadd.f32 %v5792_v49, %v10836_v40  ;;  %7580 = vperm.xlu1 %8899, %v7533_v14   ;;  %v6777_v42 = vsel %vm3067_vm3, %v10845_v50, %v10881_v16  ;;  %v7467_v40 = vld [vmem:[%s11547_s6 + $0x28] sm:$0xff]  ;;  %v6788_v50 = vshrl.u32 %v10865_v17, 16 }
 0x3ff   :  { %v6784_v18 = vrot.slane %v6782_v54, 4  ;;  %vm7499_vm13 = vcmp.gt.f32.partialorder %v7467_v40, 0.5  ;;  %v5909_v54 = vld [vmem:[#allocation2 + $0x4a0] sm:$0xff]  ;;  %v7471_v40 = vld [vmem:[%s11547_s6 + $0x48] sm:$0xff] }
 0x400   :  { %7141 = vmatmul.bf16.gmra.mxu0 %v6777_v42  ;;  %v7531_v49 = vsel %vm7499_vm13, 1, %v11552_v58  ;;  %vm7503_vm14 = vcmp.gt.f32.partialorder %v7471_v40, 0.5 }
 0x401   :  { %v4869_v51 = vpop.f32.mrf.mxu2  ;;  %v10900_v5 = vor.u32 %v6784_v18, %v6781_v34 }
 0x402   :  { %v4958_v41 = vpop.f32.mrf.mxu3 }
 0x403   :  { %v4959_v63 = vadd.f32 %v4958_v41, %v4869_v51  ;;  %v5793_v60 = vpop.f32.mrf.mxu1  ;;  %v5707_v55 = vpop.f32.mrf.mxu0  ;;  %v5911_v41 = vld [vmem:[#allocation2 + $0x278] sm:$0xff]  ;;  %7574 = vperm.xlu2 %8900, %v7531_v49  }
 0x404   :  { %v5794_v47 = vadd.f32 %v5793_v60, %v5704_v22  ;;  %v6791_v22 = vshll.u32 %v10865_v17, 16 }
 0x405   :  { %v10892_v31 = vadd.f32 %v4959_v63, %v10433_v44  ;;  %v5908_v44 = vld [vmem:[#allocation2 + $0x50] sm:$0xff]  ;;  %v10913_v63 = vpack.c.bf16 %v5911_v41, %v5909_v54 }
 0x406   :  { %6307 = vmatmul.bf16.gmra.mxu2 %v6103_v32  ;;  %v10904_v32 = vadd.f32 %v5794_v47, %v10851_v43  ;;  %v10911_v46 = vpack.c.bf16 %v5910_v20, %v5908_v44  ;;  %v6790_v43 = vrot.slane %v6788_v50, 3  ;;  %v6793_v18 = vrot.slane %v6791_v22, 4 }
 0x407   :  { %6396 = vmatmul.bf16.gmra.mxu3 %v6105_v3  ;;  %v6786_v3 = vsel %vm3067_vm3, %v6767_v30, %v10900_v5  ;;  %v6108_v17 = vrot.slane %v10913_v63, 3  ;;  %v6800_v30 = vshll.u32 %v10867_v1, 16 }
 0x409   :  { %v4872_v53 = vpop.f32.mrf.mxu2  ;;  %v6802_v54 = vrot.slane %v6800_v30, 4 }
 0x40a   :  { %v4961_v51 = vpop.f32.mrf.mxu3 }
 0x40b   :  { %v4962_v39 = vadd.f32 %v4961_v51, %v4872_v53  ;;  %v5796_v14 = vpop.f32.mrf.mxu1  ;;  %v5709_v34 = vpop.f32.mrf.mxu0  ;;  %v6106_v53 = vrot.slane %v10911_v46, 3 }
 0x40c   :  { %v5797_v60 = vadd.f32 %v5796_v14, %v5707_v55  ;;  %7230 = vmatmul.bf16.gmra.mxu1 %v6786_v3  ;;  %v7535_v55 = vsel %vm7503_vm14, 1, %v11552_v58 }
 0x40d   :  { %v10909_v11 = vadd.f32 %v4962_v39, %v10446_v12  ;;  %v6797_v12 = vshrl.u32 %v10867_v1, 16  ;;  %v6107_v47 = vsel %vm6079_vm5, %v6102_v8, %v6106_v53  ;;  %v10928_v39 = vor.u32 %v6793_v18, %v6790_v43  ;;  %7586 = vperm.xlu0 %8898, %v7535_v55   ;;  %v7472_v1 = vld [vmem:[%s11547_s6 + $0x50] sm:$0xff]  ;;  %v5914_v18 = vld [vmem:[#allocation2 + $0x400] sm:$0xff] }
 0x40e   :  { %v10926_v44 = vadd.f32 %v5797_v60, %v10863_v62  ;;  %v6109_v8 = vsel %vm6079_vm5, %v6104_v59, %v6108_v17  ;;  %vm7504_vm15 = vcmp.gt.f32.partialorder %v7472_v1, 0.5  ;;  %v5913_v60 = vld [vmem:[#allocation2 + $0x498] sm:$0xff]  ;;  %v7470_v1 = vld [vmem:[%s11547_s6 + $0x40] sm:$0xff] }
 0x40f   :  { %v6799_v20 = vrot.slane %v6797_v12, 3  ;;  %v6795_v22 = vsel %vm3067_vm3, %v10881_v16, %v10928_v39  ;;  %v7536_v43 = vsel %vm7504_vm15, 1, %v11552_v58  ;;  %v5915_v12 = vld [vmem:[#allocation2 + $0x5d8] sm:$0xff]  ;;  %v6806_v16 = vshrl.u32 %v10911_v46, 16 }
 0x410   :  { %7146 = vmatmul.bf16.gmra.mxu0 %v6795_v22  ;;  %7589 = vperm.xlu1 %8899, %v7536_v43   ;;  %v10958_v30 = vpack.c.bf16 %v5915_v12, %v5913_v60  ;;  %vm7502_vm0 = vcmp.gt.f32.partialorder %v7470_v1, 0.5 }
 0x411   :  { %v4874_v26 = vpop.f32.mrf.mxu2 }
 0x412   :  { %v4963_v42 = vpop.f32.mrf.mxu3 }
 0x413   :  { %v4964_v51 = vadd.f32 %v4963_v42, %v4874_v26  ;;  %v5798_v41 = vpop.f32.mrf.mxu1  ;;  %v5712_v50 = vpop.f32.mrf.mxu0  ;;  %v10945_v26 = vor.u32 %v6802_v54, %v6799_v20  ;;  %v6808_v20 = vrot.slane %v6806_v16, 3 }
 0x414   :  { %v5799_v3 = vadd.f32 %v5798_v41, %v5709_v34  ;;  %v6809_v34 = vshll.u32 %v10911_v46, 16  ;;  %v6112_v46 = vrot.slane %v10958_v30, 3 }
 0x415   :  { %v10937_v49 = vadd.f32 %v4964_v51, %v10462_v15  ;;  %v5912_v15 = vld [vmem:[#allocation2 + $0x458] sm:$0xff]  ;;  %v6804_v51 = vsel %vm3067_vm3, %v10900_v5, %v10945_v26  ;;  %v6818_v5 = vshll.u32 %v10913_v63, 16 }
 0x416   :  { %6312 = vmatmul.bf16.gmra.mxu2 %v6107_v47  ;;  %v10949_v42 = vadd.f32 %v5799_v3, %v10892_v31  ;;  %v10956_v40 = vpack.c.bf16 %v5914_v18, %v5912_v15  ;;  %v6811_v54 = vrot.slane %v6809_v34, 4 }
 0x417   :  { %6401 = vmatmul.bf16.gmra.mxu3 %v6109_v8  ;;  %v6820_v60 = vrot.slane %v6818_v5, 4 }
 0x419   :  { %v4877_v62 = vpop.f32.mrf.mxu2 }
 0x41a   :  { %v4966_v59 = vpop.f32.mrf.mxu3 }
 0x41b   :  { %v4967_v14 = vadd.f32 %v4966_v59, %v4877_v62  ;;  %v5801_v55 = vpop.f32.mrf.mxu1  ;;  %v5714_v31 = vpop.f32.mrf.mxu0  ;;  %v6110_v62 = vrot.slane %v10956_v40, 3 }
 0x41c   :  { %v5802_v41 = vadd.f32 %v5801_v55, %v5712_v50  ;;  %7235 = vmatmul.bf16.gmra.mxu1 %v6804_v51  ;;  %v7534_v50 = vsel %vm7502_vm0, 1, %v11552_v58 }
 0x41d   :  { %v10954_v47 = vadd.f32 %v4967_v14, %v10476_v61  ;;  %v6815_v61 = vshrl.u32 %v10913_v63, 16  ;;  %v6111_v3 = vsel %vm6079_vm5, %v6106_v53, %v6110_v62  ;;  %v10974_v14 = vor.u32 %v6811_v54, %v6808_v20  ;;  %7583 = vperm.xlu2 %8900, %v7534_v50   ;;  %v7474_v63 = vld [vmem:[%s11547_s6 + $0x60] sm:$0xff]  ;;  %v5918_v54 = vld [vmem:[#allocation2 + $0x178] sm:$0xff] }
 0x41e   :  { %v10972_v15 = vadd.f32 %v5802_v41, %v10909_v11  ;;  %v6113_v53 = vsel %vm6079_vm5, %v6108_v17, %v6112_v46  ;;  %vm7506_vm1 = vcmp.gt.f32.partialorder %v7474_v63, 0.5  ;;  %v5917_v41 = vld [vmem:[#allocation2 + $0x160] sm:$0xff]  ;;  %v7475_v63 = vld [vmem:[%s11547_s6 + $0x68] sm:$0xff] }
 0x41f   :  { %v6817_v18 = vrot.slane %v6815_v61, 3  ;;  %v6813_v34 = vsel %vm3067_vm3, %v10928_v39, %v10974_v14  ;;  %v7538_v20 = vsel %vm7506_vm1, 1, %v11552_v58  ;;  %v5919_v61 = vld [vmem:[#allocation2 + $0x538] sm:$0xff]  ;;  %v6824_v39 = vshrl.u32 %v10956_v40, 16 }
 0x420   :  { %7151 = vmatmul.bf16.gmra.mxu0 %v6813_v34  ;;  %7595 = vperm.xlu0 %8898, %v7538_v20   ;;  %v11000_v5 = vpack.c.bf16 %v5919_v61, %v5917_v41  ;;  %vm7507_vm2 = vcmp.gt.f32.partialorder %v7475_v63, 0.5 }
 0x421   :  { %v4879_v8 = vpop.f32.mrf.mxu2 }
 0x422   :  { %v4968_v22 = vpop.f32.mrf.mxu3 }
 0x423   :  { %v4969_v59 = vadd.f32 %v4968_v22, %v4879_v8  ;;  %v5803_v12 = vpop.f32.mrf.mxu1  ;;  %v5717_v16 = vpop.f32.mrf.mxu0  ;;  %v6821_v8 = vor.u32 %v6820_v60, %v6817_v18  ;;  %v6826_v60 = vrot.slane %v6824_v39, 3 }
 0x424   :  { %v5804_v51 = vadd.f32 %v5803_v12, %v5714_v31  ;;  %v6827_v31 = vshll.u32 %v10956_v40, 16  ;;  %v6116_v12 = vrot.slane %v11000_v5, 3  ;;  %v6833_v40 = vshrl.u32 %v10958_v30, 16 }
 0x425   :  { %v10983_v43 = vadd.f32 %v4969_v59, %v10489_v4  ;;  %v5916_v4 = vld [vmem:[#allocation2 + $0xe8] sm:$0xff]  ;;  %v6822_v59 = vsel %vm3067_vm3, %v10945_v26, %v6821_v8  ;;  %v6836_v26 = vshll.u32 %v10958_v30, 16  ;;  %v7473_v30 = vld [vmem:[%s11547_s6 + $0x58] sm:$0xff] }
 0x426   :  { %6317 = vmatmul.bf16.gmra.mxu2 %v6111_v3  ;;  %v10993_v22 = vadd.f32 %v5804_v51, %v10937_v49  ;;  %v5964_v1 = vpack.c.bf16 %v5918_v54, %v5916_v4  ;;  %v6829_v49 = vrot.slane %v6827_v31, 4  ;;  %v6835_v54 = vrot.slane %v6833_v40, 3 }
 0x427   :  { %6406 = vmatmul.bf16.gmra.mxu3 %v6113_v53  ;;  %v6838_v41 = vrot.slane %v6836_v26, 4  ;;  %vm7505_vm4 = vcmp.gt.f32.partialorder %v7473_v30, 0.5  ;;  %v6854_v30 = vshll.u32 %v11000_v5, 16 }
 0x429   :  { %v4882_v11 = vpop.f32.mrf.mxu2 }
 0x42a   :  { %v4971_v17 = vpop.f32.mrf.mxu3 }
 0x42b   :  { %v4972_v55 = vadd.f32 %v4971_v17, %v4882_v11  ;;  %v5806_v50 = vpop.f32.mrf.mxu1  ;;  %v5719_v18 = vpop.f32.mrf.mxu0  ;;  %v6114_v11 = vrot.slane %v5964_v1, 3 }
 0x42c   :  { %v5807_v34 = vadd.f32 %v5806_v50, %v5717_v16  ;;  %7240 = vmatmul.bf16.gmra.mxu1 %v6822_v59  ;;  %v6117_v16 = vsel %vm6079_vm5, %v6112_v46, %v6116_v12  ;;  %v7537_v50 = vsel %vm7505_vm4, 1, %v11552_v58 }
 0x42d   :  { %v10998_v3 = vadd.f32 %v4972_v55, %v10502_v35  ;;  %v6115_v35 = vsel %vm6079_vm5, %v6110_v62, %v6114_v11  ;;  %v6830_v55 = vor.u32 %v6829_v49, %v6826_v60  ;;  %v7539_v62 = vsel %vm7507_vm2, 1, %v11552_v58  ;;  %v5922_v60 = vld [vmem:[#allocation2 + $0x2c0] sm:$0xff]  ;;  %v5921_v49 = vld [vmem:[#allocation2 + $0x390] sm:$0xff]  ;;  %7592 = vperm.xlu2 %8900, %v7537_v50  }
 0x42e   :  { %v11012_v4 = vadd.f32 %v5807_v34, %v10954_v47  ;;  %7598 = vperm.xlu1 %8899, %v7539_v62   ;;  %v5923_v34 = vld [vmem:[#allocation2 + $0x228] sm:$0xff] }
 0x42f   :  { %v6831_v47 = vsel %vm3067_vm3, %v10974_v14, %v6830_v55  ;;  %v6845_v14 = vshll.u32 %v5964_v1, 16 }
 0x430   :  { %7156 = vmatmul.bf16.gmra.mxu0 %v6831_v47 }
 0x431   :  { %v4884_v53 = vpop.f32.mrf.mxu2 }
 0x432   :  { %v4973_v51 = vpop.f32.mrf.mxu3 }
 0x433   :  { %v4974_v17 = vadd.f32 %v4973_v51, %v4884_v53  ;;  %v5808_v39 = vpop.f32.mrf.mxu1  ;;  %v5722_v31 = vpop.f32.mrf.mxu0  ;;  %v5920_v53 = vld [vmem:[#allocation2 + $0x1e0] sm:$0xff]  ;;  %v6842_v51 = vshrl.u32 %v5964_v1, 16 }
 0x434   :  { %v5809_v59 = vadd.f32 %v5808_v39, %v5719_v18  ;;  %v11030_v18 = vpack.c.bf16 %v5922_v60, %v5920_v53 }
 0x435   :  { %v11019_v20 = vadd.f32 %v4974_v17, %v10518_v33  ;;  %v6839_v33 = vor.u32 %v6838_v41, %v6835_v54  ;;  %v6844_v62 = vrot.slane %v6842_v51, 3  ;;  %v6847_v54 = vrot.slane %v6845_v14, 4 }
 0x436   :  { %6322 = vmatmul.bf16.gmra.mxu2 %v6115_v35  ;;  %v11028_v40 = vadd.f32 %v5809_v59, %v10983_v43  ;;  %v11032_v35 = vpack.c.bf16 %v5923_v34, %v5921_v49  ;;  %v6118_v41 = vrot.slane %v11030_v18, 3  ;;  %v7477_v59 = vld [vmem:[%s11547_s6 + $0x78] sm:$0xff]  ;;  %v6856_v49 = vrot.slane %v6854_v30, 4 }
 0x437   :  { %6411 = vmatmul.bf16.gmra.mxu3 %v6117_v16  ;;  %v6840_v63 = vsel %vm3067_vm3, %v6821_v8, %v6839_v33  ;;  %v6851_v8 = vshrl.u32 %v11000_v5, 16  ;;  %vm7509_vm6 = vcmp.gt.f32.partialorder %v7477_v59, 0.5  ;;  %v11048_v50 = vor.u32 %v6847_v54, %v6844_v62  ;;  %v5925_v59 = vld [vmem:[#allocation2 + $0xc0] sm:$0xff] }
 0x438   :  { %11576 = vst [vmem:[#allocation22_spill] sm:$0xff] %v11028_v40  ;;  %v6120_v43 = vrot.slane %v11032_v35, 3  ;;  %v6119_v1 = vsel %vm6079_vm5, %v6114_v11, %v6118_v41  ;;  %v6863_v30 = vshll.u32 %v11030_v18, 16 }
 0x439   :  { %v6283_v61 = vpop.f32.mrf.mxu2  ;;  %v6853_v60 = vrot.slane %v6851_v8, 3  ;;  %v5927_v8 = vld [vmem:[#allocation2 + $0x428] sm:$0xff] }
 0x43a   :  { %v6372_v46 = vpop.f32.mrf.mxu3  ;;  %v6121_v11 = vsel %vm6079_vm5, %v6116_v12, %v6120_v43  ;;  %v5924_v12 = vld [vmem:[#allocation2 + $0x5b0] sm:$0xff] }
 0x43b   :  { %v5811_v17 = vpop.f32.mrf.mxu1  ;;  %v5724_v16 = vpop.f32.mrf.mxu0  ;;  %v11063_v62 = vor.u32 %v6856_v49, %v6853_v60  ;;  %v6373_v54 = vadd.f32 %v6372_v46, %v6283_v61 }
 0x43c   :  { %v5812_v39 = vadd.f32 %v5811_v17, %v5722_v31  ;;  %7245 = vmatmul.bf16.gmra.mxu1 %v6840_v63  ;;  %v7541_v31 = vsel %vm7509_vm6, 1, %v11552_v58  ;;  %v7478_v63 = vld [vmem:[%s11547_s6 + $0x80] sm:$0xff] }
 0x43d   :  { %7604 = vperm.xlu0 %8898, %v7541_v31   ;;  %vm7510_vm7 = vcmp.gt.f32.partialorder %v7478_v63, 0.5  ;;  %v11073_v31 = vpack.c.bf16 %v5927_v8, %v5925_v59  ;;  %v6858_v61 = vsel %vm3067_vm3, %v6839_v33, %v11063_v62  ;;  %v6452_v46 = vadd.f32 %v6373_v54, %v10532_v19  ;;  %v7476_v33 = vld [vmem:[%s11547_s6 + $0x70] sm:$0xff] }
 0x43e   :  { %v11046_v53 = vadd.f32 %v5812_v39, %v10998_v3  ;;  %v6849_v3 = vsel %vm3067_vm3, %v6830_v55, %v11048_v50  ;;  %v7542_v39 = vsel %vm7510_vm7, 1, %v11552_v58  ;;  %v6872_v8 = vshll.u32 %v11032_v35, 16 }
 0x43f   :  { %7607 = vperm.xlu1 %8899, %v7542_v39   ;;  %v6869_v39 = vshrl.u32 %v11032_v35, 16  ;;  %vm7508_vm8 = vcmp.gt.f32.partialorder %v7476_v33, 0.5 }
 0x440   :  { %11577 = vst [vmem:[#allocation23_spill] sm:$0xff] %v11046_v53  ;;  %7161 = vmatmul.bf16.gmra.mxu0 %v6849_v3  ;;  %v6865_v3 = vrot.slane %v6863_v30, 4  ;;  %v7480_v30 = vld [vmem:[%s11547_s6 + $0x90] sm:$0xff]  ;;  %v6890_v53 = vshll.u32 %v11073_v31, 16 }
 0x441   :  { %v11035_v26 = vpop.f32.mrf.mxu2  ;;  %vm7512_vm10 = vcmp.gt.f32.partialorder %v7480_v30, 0.5  ;;  %v5929_v30 = vld [vmem:[#allocation2 + $0x410] sm:$0xff] }
 0x442   :  { %v6374_v47 = vpop.f32.mrf.mxu3 }
 0x443   :  { %v5813_v5 = vpop.f32.mrf.mxu1  ;;  %v7122_v51 = vpop.f32.mrf.mxu0  ;;  %v6375_v59 = vadd.f32 %v6374_v47, %v11035_v26  ;;  %v7540_v47 = vsel %vm7508_vm8, 1, %v11552_v58 }
 0x444   :  { %v5814_v14 = vadd.f32 %v5813_v5, %v5724_v16  ;;  %v6860_v16 = vshrl.u32 %v11030_v18, 16  ;;  %v11551_v18 = vrot.slane %v11073_v31, 3  ;;  %7601 = vperm.xlu2 %8900, %v7540_v47   ;;  %v5930_v47 = vld [vmem:[#allocation2 + $0x208] sm:$0xff] }
 0x446   :  { %6327 = vmatmul.bf16.gmra.mxu2 %v6119_v1  ;;  %v5926_v1 = vld [vmem:[#allocation2 + $0xd8] sm:$0xff]  ;;  %v11067_v55 = vadd.f32 %v5814_v14, %v11019_v20  ;;  %v6862_v20 = vrot.slane %v6860_v16, 3  ;;  %v6125_v26 = vsel %vm6079_vm5, %v6120_v43, %v11551_v18  ;;  %v11121_v43 = vld [vmem:[%s11546_s5] ss:$0 sm:$0xff] }
 0x447   :  { %6416 = vmatmul.bf16.gmra.mxu3 %v6121_v11  ;;  %v11071_v11 = vpack.c.bf16 %v5926_v1, %v5924_v12  ;;  %v11082_v12 = vpop.permute.xlu0 %7559 }
 0x448   :  { %11578 = vst [vmem:[#allocation24_spill] sm:$0xff] %v11067_v55  ;;  %v11103_v16 = vor.u32 %v6865_v3, %v6862_v20  ;;  %v6871_v20 = vrot.slane %v6869_v39, 3  ;;  %v6874_v3 = vrot.slane %v6872_v8, 4  ;;  %vm7654_vm13 = vcmp.eq.s32.totalorder %v11082_v12, 1  ;;  %v7487_v12 = vld [vmem:[%s11547_s6 + $0xc8] sm:$0xff] }
 0x449   :  { %v11054_v34 = vpop.f32.mrf.mxu2  ;;  %v11554_v14 = vrot.slane %v11071_v11, 3  ;;  %vm7519_vm15 = vcmp.gt.f32.partialorder %v7487_v12, 0.5  ;;  %v5935_v12 = vld [vmem:[#allocation2 + $0x298] sm:$0xff] }
 0x44a   :  { %v11061_v17 = vpop.f32.mrf.mxu3  ;;  %v11131_v8 = vor.u32 %v6874_v3, %v6871_v20 }
 0x44b   :  { %v7211_v49 = vpop.f32.mrf.mxu1  ;;  %v7124_v5 = vpop.f32.mrf.mxu0  ;;  %v6123_v19 = vsel %vm6079_vm5, %v6118_v41, %v11554_v14  ;;  %v7481_v41 = vld [vmem:[%s11547_s6 + $0x98] sm:$0xff] }
 0x44c   :  { %v7212_v63 = vadd.f32 %v7211_v49, %v7122_v51  ;;  %7250 = vmatmul.bf16.gmra.mxu1 %v6858_v61  ;;  %v11097_v51 = vld [vmem:[%s11545_s4] ss:$0 sm:$0xff]  ;;  %vm7513_vm9 = vcmp.gt.f32.partialorder %v7481_v41, 0.5  ;;  %v6453_v49 = vadd.f32 %v6375_v59, %v10545_v7  ;;  %v6867_v41 = vsel %vm3067_vm3, %v11048_v50, %v11103_v16  ;;  %v7484_v50 = vld [vmem:[%s11547_s6 + $0xb0] sm:$0xff] }
 0x44d   :  { %v7545_v61 = vsel %vm7513_vm9, 1, %v11552_v58  ;;  %vm7516_vm11 = vcmp.gt.f32.partialorder %v7484_v50, 0.5  ;;  %v6876_v50 = vsel %vm3067_vm3, %v11063_v62, %v11131_v8 }
 0x44e   :  { %v7291_v54 = vadd.f32 %v7212_v63, %v6452_v46  ;;  %7616 = vperm.xlu1 %8899, %v7545_v61   ;;  %v7544_v46 = vsel %vm7512_vm10, 1, %v11552_v58 }
 0x44f   :  { %7613 = vperm.xlu0 %8898, %v7544_v46   ;;  %v7563_v46 = vpop.permute.xlu0 %7562 }
 0x450   :  { %v7394_v35 = vmul.f32 %v11097_v51, %v7291_v54  ;;  %v5928_v54 = vld [vmem:[#allocation2 + $0x30] sm:$0xff]  ;;  %7166 = vmatmul.bf16.gmra.mxu0 %v6867_v41  ;;  %vm7655_vm14 = vcmp.eq.s32.totalorder %v7563_v46, 1  ;;  %v7486_v46 = vld [vmem:[%s11547_s6 + $0xc0] sm:$0xff] }
 0x451   :  { %v11078_v60 = vpop.f32.mrf.mxu2  ;;  %v11147_v3 = vpack.c.bf16 %v5930_v47, %v5928_v54  ;;  %vm7518_vm0 = vcmp.gt.f32.partialorder %v7486_v46, 0.5 }
 0x452   :  { %v11085_v1 = vpop.f32.mrf.mxu3  ;;  %v7430_v39 = vadd.f32 %v11121_v43, %v7394_v35  ;;  %v6881_v35 = vshll.u32 %v11071_v11, 16 }
 0x453   :  { %v7127_v33 = vpop.f32.mrf.mxu0  ;;  %v6126_v54 = vrot.slane %v11147_v3, 3  ;;  %v6896_v46 = vshrl.u32 %v11147_v3, 16 }
 0x456   :  { %6332 = vmatmul.bf16.gmra.mxu2 %v6123_v19  ;;  %v7213_v19 = vpop.f32.mrf.mxu1 }
 0x457   :  { %6421 = vmatmul.bf16.gmra.mxu3 %v6125_v26  ;;  %v7214_v7 = vadd.f32 %v7213_v19, %v7124_v5  ;;  %v6378_v26 = vadd.f32 %v11061_v17, %v11054_v34  ;;  %v7483_v5 = vld [vmem:[%s11547_s6 + $0xa8] sm:$0xff]  ;;  %v7548_v34 = vsel %vm7516_vm11, 1, %v11552_v58 }
 0x458   :  { %v5931_v19 = vld [vmem:[#allocation2 + $0x4a8] sm:$0xff]  ;;  %vm7515_vm12 = vcmp.gt.f32.partialorder %v7483_v5, 0.5  ;;  %7625 = vperm.xlu1 %8899, %v7548_v34   ;;  %v6883_v34 = vrot.slane %v6881_v35, 4  ;;  %v11579_v35 = vrot.slane %v11071_v11, 3 }
 0x459   :  { %v11123_v63 = vpop.f32.mrf.mxu2  ;;  %v7292_v61 = vadd.f32 %v7214_v7, %v6453_v49  ;;  %v6878_v49 = vshrl.u32 %v11071_v11, 16  ;;  %v7547_v17 = vsel %vm7515_vm12, 1, %v11552_v58  ;;  %v11149_v41 = vpack.c.bf16 %v5931_v19, %v5929_v30 }
 0x45a   :  { %v11128_v59 = vpop.f32.mrf.mxu3  ;;  %v7782_v7 = vmax.f32 %v7430_v39, 0.0  ;;  %v6454_v5 = vadd.f32 %v6378_v26, %v10558_v23  ;;  %7622 = vperm.xlu0 %8898, %v7547_v17   ;;  %v7686_v30 = vsel %vm7654_vm13, %v7430_v39, 0.0  ;;  %v11163_v26 = vpop.permute.xlu1 %7565  ;;  %v6887_v17 = vshrl.u32 %v11073_v31, 16 }
 0x45b   :  { %v7395_v20 = vmul.f32 %v11097_v51, %v7292_v61  ;;  %v7129_v14 = vpop.f32.mrf.mxu0  ;;  %v6880_v55 = vrot.slane %v6878_v49, 3  ;;  %v6127_v47 = vsel %vm6079_vm5, %v11579_v35, %v6126_v54  ;;  %v11580_v40 = vrot.slane %v11149_v41, 3 }
 0x45c   :  { %7255 = vmatmul.bf16.gmra.mxu1 %v6876_v50  ;;  %v11581_v11 = vrot.slane %v11073_v31, 3  ;;  %vm7656_vm6 = vcmp.eq.s32.totalorder %v11163_v26, 1 }
 0x45d   :  { %v7431_v61 = vadd.f32 %v11121_v43, %v7395_v20 }
 0x45e   :  { %v7216_v58 = vpop.f32.mrf.mxu1  ;;  %v6129_v35 = vsel %vm6079_vm5, %v11581_v11, %v11580_v40  ;;  %v7490_v11 = vld [vmem:[%s11547_s6 + $0xe0] sm:$0xff] }
 0x45f   :  { %v7217_v19 = vadd.f32 %v7216_v58, %v7127_v33  ;;  %v7687_v62 = vsel %vm7655_vm14, %v7431_v61, 0.0  ;;  %v7783_v23 = vmax.f32 %v7431_v61, 0.0  ;;  %v7814_v58 = vsel %vm7654_vm13, %v7782_v7, 0.0 }
 0x460   :  { %v8684_v20 = vpack.c.bf16 %v7687_v62, %v7686_v30  ;;  %v6380_v61 = vadd.f32 %v11085_v1, %v11078_v60  ;;  %v11179_v62 = vor.u32 %v6883_v34, %v6880_v55  ;;  %v6889_v60 = vrot.slane %v6887_v17, 3  ;;  %v5932_v17 = vld [vmem:[#allocation2 + $0x5b8] sm:$0xff] }
 0x461   :  { %v11156_v18 = vpop.f32.mrf.mxu2  ;;  %v7293_v33 = vadd.f32 %v7217_v19, %v6454_v5  ;;  %v7815_v39 = vsel %vm7655_vm14, %v7783_v23, 0.0  ;;  %v6892_v55 = vrot.slane %v6890_v53, 4  ;;  %v11582_v1 = vmov 0  }
 0x462   :  { %v11167_v49 = vpop.f32.mrf.mxu3  ;;  %8685 = vst [vmem:[#allocation12] sm:$0xff] %v8684_v20   ;;  %v8764_v30 = vpack.c.bf16 %v7815_v39, %v7814_v58  ;;  %v7551_v7 = vsel %vm7519_vm15, 1, %v11582_v1  ;;  %v6455_v50 = vadd.f32 %v6380_v61, %v10574_v13  ;;  %v7550_v5 = vsel %vm7518_vm0, 1, %v11582_v1  ;;  %v7479_v13 = vld [vmem:[%s11547_s6 + $0x88] sm:$0xff] }
 0x463   :  { %v7396_v31 = vmul.f32 %v11097_v51, %v7293_v33  ;;  %7634 = vperm.xlu1 %8899, %v7551_v7   ;;  %v6885_v19 = vsel %vm3067_vm3, %v11103_v16, %v11179_v62  ;;  %7631 = vperm.xlu0 %8898, %v7550_v5   ;;  %v11204_v23 = vor.u32 %v6892_v55, %v6889_v60  ;;  %vm7511_vm1 = vcmp.gt.f32.partialorder %v7479_v13, 0.5  ;;  %v5934_v58 = vld [vmem:[#allocation2 + $0x368] sm:$0xff]  ;;  %v5933_v33 = vld [vmem:[#allocation2 + $0x218] sm:$0xff] }
 0x464   :  { %8765 = vst [vmem:[#allocation13] sm:$0xff] %v8764_v30   ;;  %7171 = vmatmul.bf16.gmra.mxu0 %v6885_v19  ;;  %v6383_v16 = vadd.f32 %v11128_v59, %v11123_v63  ;;  %v7543_v30 = vsel %vm7511_vm1, 1, %v11582_v1  ;;  %v6899_v60 = vshll.u32 %v11147_v3, 16  ;;  %vm7522_vm2 = vcmp.gt.f32.partialorder %v7490_v11, 0.5 }
 0x465   :  { %v7432_v61 = vadd.f32 %v11121_v43, %v7396_v31  ;;  %7610 = vperm.xlu2 %8900, %v7543_v30   ;;  %v7554_v59 = vsel %vm7522_vm2, 1, %v11582_v1  ;;  %v11224_v7 = vpack.c.bf16 %v5934_v58, %v5932_v17  ;;  %v6894_v5 = vsel %vm3067_vm3, %v11131_v8, %v11204_v23 }
 0x466   :  { %6337 = vmatmul.bf16.gmra.mxu2 %v6127_v47  ;;  %v7218_v34 = vpop.f32.mrf.mxu1  ;;  %v7132_v47 = vpop.f32.mrf.mxu0  ;;  %v6898_v30 = vrot.slane %v6896_v46, 3  ;;  %v6901_v11 = vrot.slane %v6899_v60, 4  ;;  %v6908_v46 = vshll.u32 %v11149_v41, 16  ;;  %v11583_v3 = vrot.slane %v11149_v41, 3 }
 0x467   :  { %6426 = vmatmul.bf16.gmra.mxu3 %v6129_v35  ;;  %v7219_v53 = vadd.f32 %v7218_v34, %v7129_v14  ;;  %v7569_v14 = vpop.permute.xlu1 %7568  ;;  %v7489_v35 = vld [vmem:[%s11547_s6 + $0xd8] sm:$0xff]  ;;  %v7784_v31 = vmax.f32 %v7432_v61, 0.0  ;;  %v6456_v34 = vadd.f32 %v6383_v16, %v10588_v27  ;;  %v6130_v17 = vrot.slane %v11224_v7, 3 }
 0x468   :  { %vm7521_vm4 = vcmp.gt.f32.partialorder %v7489_v35, 0.5  ;;  %vm7657_vm7 = vcmp.eq.s32.totalorder %v7569_v14, 1  ;;  %v11240_v35 = vpop.permute.xlu2 %7571 }
 0x469   :  { %v11195_v40 = vpop.f32.mrf.mxu2  ;;  %v7294_v39 = vadd.f32 %v7219_v53, %v6455_v50  ;;  %v7553_v55 = vsel %vm7521_vm4, 1, %v11582_v1  ;;  %v11226_v50 = vpack.c.bf16 %v5935_v12, %v5933_v33  ;;  %v7688_v33 = vsel %vm7656_vm6, %v7432_v61, 0.0 }
 0x46a   :  { %v11206_v20 = vpop.f32.mrf.mxu3  ;;  %vm7658_vm11 = vcmp.eq.s32.totalorder %v11240_v35, 1 }
 0x46b   :  { %v7397_v63 = vmul.f32 %v11097_v51, %v7294_v39  ;;  %7643 = vperm.xlu1 %8899, %v7554_v59   ;;  %7640 = vperm.xlu0 %8898, %v7553_v55   ;;  %v6132_v58 = vrot.slane %v11226_v50, 3  ;;  %v6131_v59 = vsel %vm6079_vm5, %v6126_v54, %v6130_v17 }
 0x46c   :  { %7260 = vmatmul.bf16.gmra.mxu1 %v6894_v5  ;;  %v6910_v5 = vrot.slane %v6908_v46, 4 }
 0x46d   :  { %v7433_v19 = vadd.f32 %v11121_v43, %v7397_v63  ;;  %v6905_v63 = vshrl.u32 %v11149_v41, 16  ;;  %v6133_v54 = vsel %vm6079_vm5, %v11583_v3, %v6132_v58 }
 0x46e   :  { %v7221_v13 = vpop.f32.mrf.mxu1  ;;  %v7134_v39 = vpop.f32.mrf.mxu0 }
 0x46f   :  { %v7222_v8 = vadd.f32 %v7221_v13, %v7132_v47  ;;  %v7689_v27 = vsel %vm7657_vm7, %v7433_v19, 0.0  ;;  %v7785_v16 = vmax.f32 %v7433_v19, 0.0  ;;  %v7816_v47 = vsel %vm7656_vm6, %v7784_v31, 0.0  ;;  %v7493_v13 = vld [vmem:[%s11547_s6 + $0xf8] sm:$0xff] }
 0x470   :  { %v8689_v12 = vpack.c.bf16 %v7689_v27, %v7688_v33  ;;  %v6385_v19 = vadd.f32 %v11167_v49, %v11156_v18  ;;  %v11259_v27 = vor.u32 %v6901_v11, %v6898_v30  ;;  %vm7525_vm8 = vcmp.gt.f32.partialorder %v7493_v13, 0.5  ;;  %v7492_v18 = vld [vmem:[%s11547_s6 + $0xf0] sm:$0xff] }
 0x471   :  { %v11233_v53 = vpop.f32.mrf.mxu2  ;;  %v7295_v61 = vadd.f32 %v7222_v8, %v6456_v34  ;;  %v7817_v55 = vsel %vm7657_vm7, %v7785_v16, 0.0  ;;  %v7557_v26 = vsel %vm7525_vm8, 1, %v11582_v1  ;;  %v6907_v49 = vrot.slane %v6905_v63, 3  ;;  %v5938_v63 = vld [vmem:[#allocation2 + $0x130] sm:$0xff] }
 0x472   :  { %v11244_v60 = vpop.f32.mrf.mxu3  ;;  %8841 = vst [vmem:[#allocation12 + $0x8] sm:$0xff] %v8689_v12   ;;  %v8769_v33 = vpack.c.bf16 %v7817_v55, %v7816_v47  ;;  %vm7524_vm9 = vcmp.gt.f32.partialorder %v7492_v18, 0.5  ;;  %v6457_v14 = vadd.f32 %v6385_v19, %v10601_v48  ;;  %v6903_v8 = vsel %vm3067_vm3, %v11179_v62, %v11259_v27  ;;  %v5936_v48 = vld [vmem:[#allocation2 + $0x420] sm:$0xff]  ;;  %v7575_v55 = vpop.permute.xlu2 %7574  ;;  %v5937_v19 = vld [vmem:[#allocation2 + $0x88] sm:$0xff] }
 0x473   :  { %v7398_v31 = vmul.f32 %v11097_v51, %v7295_v61  ;;  %7652 = vperm.xlu1 %8899, %v7557_v26   ;;  %v7556_v41 = vsel %vm7524_vm9, 1, %v11582_v1  ;;  %v11281_v47 = vor.u32 %v6910_v5, %v6907_v49  ;;  %v6388_v61 = vadd.f32 %v11206_v20, %v11195_v40  ;;  %v7482_v62 = vld [vmem:[%s11547_s6 + $0xa0] sm:$0xff] }
 0x474   :  { %8856 = vst [vmem:[#allocation13 + $0x8] sm:$0xff] %v8769_v33   ;;  %7649 = vperm.xlu0 %8898, %v7556_v41   ;;  %7176 = vmatmul.bf16.gmra.mxu0 %v6903_v8  ;;  %v6914_v13 = vshrl.u32 %v11224_v7, 16  ;;  %v6917_v33 = vshll.u32 %v11224_v7, 16  ;;  %vm7514_vm10 = vcmp.gt.f32.partialorder %v7482_v62, 0.5  ;;  %vm7659_vm12 = vcmp.eq.s32.totalorder %v7575_v55, 1 }
 0x475   :  { %v7434_v46 = vadd.f32 %v11121_v43, %v7398_v31  ;;  %v11293_v40 = vpack.c.bf16 %v5938_v63, %v5936_v48  ;;  %v6912_v26 = vsel %vm3067_vm3, %v11204_v23, %v11281_v47  ;;  %v6458_v49 = vadd.f32 %v6388_v61, %v10614_v21 }
 0x476   :  { %6342 = vmatmul.bf16.gmra.mxu2 %v6131_v59  ;;  %v7223_v30 = vpop.f32.mrf.mxu1  ;;  %v7137_v11 = vpop.f32.mrf.mxu0  ;;  %v6919_v8 = vrot.slane %v6917_v33, 4  ;;  %v6923_v61 = vshrl.u32 %v11226_v50, 16 }
 0x477   :  { %6431 = vmatmul.bf16.gmra.mxu3 %v6133_v54  ;;  %v7224_v16 = vadd.f32 %v7223_v30, %v7134_v39  ;;  %v5939_v39 = vld [vmem:[#allocation2 + $0x5f0] sm:$0xff]  ;;  %v7546_v54 = vsel %vm7514_vm10, 1, %v11582_v1  ;;  %v7786_v18 = vmax.f32 %v7434_v46, 0.0  ;;  %v6916_v30 = vrot.slane %v6914_v13, 3 }
 0x478   :  { %7619 = vperm.xlu2 %8900, %v7546_v54   ;;  %v11295_v20 = vpack.c.bf16 %v5939_v39, %v5937_v19  ;;  %v7690_v63 = vsel %vm7658_vm11, %v7434_v46, 0.0  ;;  %v6926_v19 = vshll.u32 %v11226_v50, 16  ;;  %v7485_v54 = vld [vmem:[%s11547_s6 + $0xb8] sm:$0xff] }
 0x479   :  { %v11272_v34 = vpop.f32.mrf.mxu2  ;;  %v7296_v59 = vadd.f32 %v7224_v16, %v6457_v14  ;;  %v6134_v16 = vrot.slane %v11293_v40, 3  ;;  %v7818_v46 = vsel %vm7658_vm11, %v7786_v18, 0.0  ;;  %vm7517_vm13 = vcmp.gt.f32.partialorder %v7485_v54, 0.5 }
 0x47a   :  { %v11278_v12 = vpop.f32.mrf.mxu3  ;;  %v6136_v48 = vrot.slane %v11295_v20, 3  ;;  %v6928_v55 = vrot.slane %v6926_v19, 4  ;;  %v5943_v19 = vld [vmem:[#allocation2 + $0xa8] sm:$0xff] }
 0x47b   :  { %v7399_v3 = vmul.f32 %v11097_v51, %v7296_v59  ;;  %v6135_v13 = vsel %vm6079_vm5, %v6130_v17, %v6134_v16  ;;  %v7549_v17 = vsel %vm7517_vm13, 1, %v11582_v1 }
 0x47c   :  { %7265 = vmatmul.bf16.gmra.mxu1 %v6912_v26  ;;  %v6137_v7 = vsel %vm6079_vm5, %v6132_v58, %v6136_v48 }
 0x47d   :  { %v7435_v14 = vadd.f32 %v11121_v43, %v7399_v3  ;;  %v6390_v3 = vadd.f32 %v11244_v60, %v11233_v53  ;;  %v6925_v60 = vrot.slane %v6923_v61, 3  ;;  %v7581_v61 = vpop.permute.xlu1 %7580 }
 0x47e   :  { %v7226_v5 = vpop.f32.mrf.mxu1  ;;  %v7139_v41 = vpop.f32.mrf.mxu0  ;;  %vm7661_vm0 = vcmp.eq.s32.totalorder %v7581_v61, 1 }
 0x47f   :  { %v7227_v59 = vadd.f32 %v7226_v5, %v7137_v11  ;;  %v7691_v23 = vsel %vm7659_vm12, %v7435_v14, 0.0  ;;  %v7787_v62 = vmax.f32 %v7435_v14, 0.0  ;;  %v11326_v5 = vor.u32 %v6919_v8, %v6916_v30  ;;  %v5940_v8 = vld [vmem:[#allocation2 + $0x230] sm:$0xff] }
 0x480   :  { %v8694_v21 = vpack.c.bf16 %v7691_v23, %v7690_v63  ;;  %7628 = vperm.xlu2 %8900, %v7549_v17   ;;  %v6459_v53 = vadd.f32 %v6390_v3, %v10633_v9  ;;  %v5942_v63 = vld [vmem:[#allocation2 + $0x110] sm:$0xff]  ;;  %v7578_v9 = vpop.permute.xlu0 %7577 }
 0x481   :  { %v11302_v31 = vpop.f32.mrf.mxu2  ;;  %v7297_v11 = vadd.f32 %v7227_v59, %v6458_v49  ;;  %v7819_v33 = vsel %vm7659_vm12, %v7787_v62, 0.0  ;;  %v6921_v50 = vsel %vm3067_vm3, %v11259_v27, %v11326_v5  ;;  %v11344_v62 = vor.u32 %v6928_v55, %v6925_v60  ;;  %v7488_v27 = vld [vmem:[%s11547_s6 + $0xd0] sm:$0xff] }
 0x482   :  { %v11311_v39 = vpop.f32.mrf.mxu3  ;;  %8842 = vst [vmem:[#allocation12 + $0x10] sm:$0xff] %v8694_v21   ;;  %v8774_v14 = vpack.c.bf16 %v7819_v33, %v7818_v46  ;;  %v6393_v21 = vadd.f32 %v11278_v12, %v11272_v34  ;;  %v6935_v46 = vshll.u32 %v11293_v40, 16  ;;  %vm7520_vm14 = vcmp.gt.f32.partialorder %v7488_v27, 0.5 }
 0x483   :  { %v7400_v35 = vmul.f32 %v11097_v51, %v7297_v11  ;;  %v7552_v33 = vsel %vm7520_vm14, 1, %v11582_v1  ;;  %vm7660_vm15 = vcmp.eq.s32.totalorder %v7578_v9, 1  ;;  %v11355_v34 = vpack.c.bf16 %v5942_v63, %v5940_v8 }
 0x484   :  { %8857 = vst [vmem:[#allocation13 + $0x10] sm:$0xff] %v8774_v14   ;;  %7181 = vmatmul.bf16.gmra.mxu0 %v6921_v50  ;;  %v6930_v54 = vsel %vm3067_vm3, %v11281_v47, %v11344_v62  ;;  %v6460_v14 = vadd.f32 %v6393_v21, %v10650_v28  ;;  %v6937_v55 = vrot.slane %v6935_v46, 4  ;;  %v6941_v28 = vshrl.u32 %v11295_v20, 16  ;;  %v7491_v46 = vld [vmem:[%s11547_s6 + $0xe8] sm:$0xff] }
 0x485   :  { %v7436_v23 = vadd.f32 %v11121_v43, %v7400_v35  ;;  %v6944_v21 = vshll.u32 %v11295_v20, 16  ;;  %vm7523_vm1 = vcmp.gt.f32.partialorder %v7491_v46, 0.5 }
 0x486   :  { %6347 = vmatmul.bf16.gmra.mxu2 %v6135_v13  ;;  %v7228_v26 = vpop.f32.mrf.mxu1  ;;  %v7142_v49 = vpop.f32.mrf.mxu0  ;;  %v6932_v13 = vshrl.u32 %v11293_v40, 16  ;;  %v6943_v9 = vrot.slane %v6941_v28, 3 }
 0x487   :  { %6436 = vmatmul.bf16.gmra.mxu3 %v6137_v7  ;;  %v7229_v58 = vadd.f32 %v7228_v26, %v7139_v41  ;;  %v5941_v41 = vld [vmem:[#allocation2 + $0x2e0] sm:$0xff]  ;;  %v7788_v3 = vmax.f32 %v7436_v23, 0.0  ;;  %v6138_v26 = vrot.slane %v11355_v34, 3  ;;  %v6946_v61 = vrot.slane %v6944_v21, 4 }
 0x488   :  { %7637 = vperm.xlu2 %8900, %v7552_v33   ;;  %v11357_v12 = vpack.c.bf16 %v5943_v19, %v5941_v41  ;;  %v6934_v60 = vrot.slane %v6932_v13, 3  ;;  %v6395_v13 = vadd.f32 %v11311_v39, %v11302_v31 }
 0x489   :  { %v11336_v18 = vpop.f32.mrf.mxu2  ;;  %v7298_v59 = vadd.f32 %v7229_v58, %v6459_v53  ;;  %v7692_v58 = vsel %vm7660_vm15, %v7436_v23, 0.0  ;;  %v6139_v41 = vsel %vm6079_vm5, %v6134_v16, %v6138_v26  ;;  %v7820_v19 = vsel %vm7660_vm15, %v7788_v3, 0.0 }
 0x48a   :  { %v11341_v30 = vpop.f32.mrf.mxu3  ;;  %v6140_v50 = vrot.slane %v11357_v12, 3  ;;  %v11386_v33 = vor.u32 %v6937_v55, %v6934_v60  ;;  %v7555_v16 = vsel %vm7523_vm1, 1, %v11582_v1  ;;  %v6461_v31 = vadd.f32 %v6395_v13, %v10664_v36 }
 0x48b   :  { %v7401_v11 = vmul.f32 %v11097_v51, %v7298_v59  ;;  %v11404_v60 = vor.u32 %v6946_v61, %v6943_v9  ;;  %v6398_v55 = vadd.f32 %v11341_v30, %v11336_v18 }
 0x48c   :  { %7270 = vmatmul.bf16.gmra.mxu1 %v6930_v54  ;;  %v6141_v40 = vsel %vm6079_vm5, %v6136_v48, %v6140_v50  ;;  %v6939_v20 = vsel %vm3067_vm3, %v11326_v5, %v11386_v33 }
 0x48d   :  { %v7437_v7 = vadd.f32 %v11121_v43, %v7401_v11  ;;  %v6462_v18 = vadd.f32 %v6398_v55, %v10675_v56 }
 0x48e   :  { %v7231_v53 = vpop.f32.mrf.mxu1  ;;  %v7144_v35 = vpop.f32.mrf.mxu0 }
 0x48f   :  { %v7232_v8 = vadd.f32 %v7231_v53, %v7142_v49  ;;  %v7693_v63 = vsel %vm7661_vm0, %v7437_v7, 0.0  ;;  %v7789_v47 = vmax.f32 %v7437_v7, 0.0  ;;  %v7584_v53 = vpop.permute.xlu2 %7583 }
 0x490   :  { %v8699_v59 = vpack.c.bf16 %v7693_v63, %v7692_v58  ;;  %7646 = vperm.xlu2 %8900, %v7555_v16   ;;  %v7587_v58 = vpop.permute.xlu0 %7586  ;;  %v6953_v63 = vshll.u32 %v11355_v34, 16  ;;  %vm7662_vm2 = vcmp.eq.s32.totalorder %v7584_v53, 1 }
 0x491   :  { %v11364_v17 = vpop.f32.mrf.mxu2  ;;  %v7299_v49 = vadd.f32 %v7232_v8, %v6460_v14  ;;  %v7821_v23 = vsel %vm7661_vm0, %v7789_v47, 0.0  ;;  %v6950_v8 = vshrl.u32 %v11355_v34, 16  ;;  %v5945_v47 = vld [vmem:[#allocation2 + $0x1a8] sm:$0x3f]  ;;  %vm7663_vm4 = vcmp.eq.s32.totalorder %v7587_v58, 1 }
 0x492   :  { %v11372_v27 = vpop.f32.mrf.mxu3  ;;  %8843 = vst [vmem:[#allocation12 + $0x18] sm:$0xff] %v8699_v59   ;;  %v8779_v11 = vpack.c.bf16 %v7821_v23, %v7820_v19  ;;  %v5979_v28 = vpack.c.bf16 %v5945_v47, %v5945_v47  ;;  %v6955_v46 = vrot.slane %v6953_v63, 4 }
 0x493   :  { %v7402_v39 = vmul.f32 %v11097_v51, %v7299_v49  ;;  %v6952_v13 = vrot.slane %v6950_v8, 3  ;;  %v6962_v8 = vshll.u32 %v11357_v12, 16 }
 0x494   :  { %8858 = vst [vmem:[#allocation13 + $0x18] sm:$0xff] %v8779_v11   ;;  %7186 = vmatmul.bf16.gmra.mxu0 %v6939_v20 }
 0x495   :  { %v7438_v36 = vadd.f32 %v11121_v43, %v7402_v39  ;;  %v11428_v55 = vor.u32 %v6955_v46, %v6952_v13  ;;  %v6964_v47 = vrot.slane %v6962_v8, 4 }
 0x496   :  { %6352 = vmatmul.bf16.gmra.mxu2 %v6139_v41  ;;  %v7233_v54 = vpop.f32.mrf.mxu1  ;;  %v7147_v14 = vpop.f32.mrf.mxu0  ;;  %v6948_v41 = vsel %vm3067_vm3, %v11344_v62, %v11404_v60  ;;  %v6959_v62 = vshrl.u32 %v11357_v12, 16 }
 0x497   :  { %6441 = vmatmul.bf16.gmra.mxu3 %v6141_v40  ;;  %v7234_v48 = vadd.f32 %v7233_v54, %v7144_v35  ;;  %v5944_v35 = vld [vmem:[#allocation2 + $0x190] sm:$0x3f]  ;;  %v7790_v21 = vmax.f32 %v7438_v36, 0.0  ;;  %v6144_v40 = vrot.slane %v5979_v28, 3  ;;  %v7694_v16 = vsel %vm7662_vm2, %v7438_v36, 0.0 }
 0x498   :  { %v5978_v59 = vpack.c.bf16 %v5944_v35, %v5944_v35  ;;  %v6961_v35 = vrot.slane %v6959_v62, 3 }
 0x499   :  { %v11396_v3 = vpop.f32.mrf.mxu2  ;;  %v7300_v1 = vadd.f32 %v7234_v48, %v6461_v31  ;;  %v7822_v20 = vsel %vm7662_vm2, %v7790_v21, 0.0  ;;  %v6145_v34 = vsel %vm6079_vm5, %v6140_v50, %v6144_v40  ;;  %v7590_v21 = vpop.permute.xlu1 %7589 }
 0x49a   :  { %v11401_v7 = vpop.f32.mrf.mxu3  ;;  %v6142_v11 = vrot.slane %v5978_v59, 3 }
 0x49b   :  { %v7403_v5 = vmul.f32 %v11097_v51, %v7300_v1 }
 0x49c   :  { %v6143_v54 = vsel %vm6079_vm5, %v6138_v26, %v6142_v11  ;;  %7275 = vmatmul.bf16.gmra.mxu1 %v6948_v41  ;;  %v6580_v26 = vld [vmem:[#allocation2 + $0x190] sm:$0x7f]  ;;  %v6403_v41 = vadd.f32 %v11401_v7, %v11396_v3  ;;  %vm7664_vm5 = vcmp.eq.s32.totalorder %v7590_v21, 1 }
 0x49d   :  { %v7439_v30 = vadd.f32 %v11121_v43, %v7403_v5  ;;  %v6957_v5 = vsel %vm3067_vm3, %v11386_v33, %v11428_v55  ;;  %v6614_v12 = vpack.c.bf16 %v6580_v26, %v6580_v26  ;;  %v6581_v33 = vld [vmem:[#allocation2 + $0x1a8] sm:$0x7f] }
 0x49e   :  { %v7236_v49 = vpop.f32.mrf.mxu1  ;;  %v7149_v23 = vpop.f32.mrf.mxu0 }
 0x49f   :  { %v7237_v31 = vadd.f32 %v7236_v49, %v7147_v14  ;;  %v7695_v39 = vsel %vm7663_vm4, %v7439_v30, 0.0  ;;  %v7791_v9 = vmax.f32 %v7439_v30, 0.0  ;;  %v6400_v14 = vadd.f32 %v11372_v27, %v11364_v17 }
 0x4a0   :  { %v8704_v61 = vpack.c.bf16 %v7695_v39, %v7694_v16  ;;  %v6965_v30 = vor.u32 %v6964_v47, %v6961_v35  ;;  %v6968_v49 = vshrl.u32 %v6614_v12, 16  ;;  %v6971_v13 = vshll.u32 %v6614_v12, 16 }
 0x4a1   :  { %v11416_v19 = vpop.f32.mrf.mxu2  ;;  %v7301_v48 = vadd.f32 %v7237_v31, %v6462_v18  ;;  %v7823_v1 = vsel %vm7663_vm4, %v7791_v9, 0.0  ;;  %v6463_v53 = vadd.f32 %v6400_v14, %v10691_v6  ;;  %v7593_v18 = vpop.permute.xlu2 %7592 }
 0x4a2   :  { %v6404_v56 = vpop.f32.mrf.mxu3  ;;  %8844 = vst [vmem:[#allocation12 + $0x20] sm:$0xff] %v8704_v61   ;;  %v8784_v36 = vpack.c.bf16 %v7823_v1, %v7822_v20  ;;  %vm7665_vm6 = vcmp.eq.s32.totalorder %v7593_v18, 1  ;;  %v6966_v39 = vsel %vm3067_vm3, %v11404_v60, %v6965_v30  ;;  %v6970_v7 = vrot.slane %v6968_v49, 3 }
 0x4a3   :  { %v7404_v58 = vmul.f32 %v11097_v51, %v7301_v48  ;;  %v6973_v9 = vrot.slane %v6971_v13, 4  ;;  %v6615_v61 = vpack.c.bf16 %v6581_v33, %v6581_v33  ;;  %v6405_v60 = vadd.f32 %v6404_v56, %v11416_v19 }
 0x4a4   :  { %8859 = vst [vmem:[#allocation13 + $0x20] sm:$0xff] %v8784_v36   ;;  %7191 = vmatmul.bf16.gmra.mxu0 %v6957_v5 }
 0x4a5   :  { %v7440_v6 = vadd.f32 %v11121_v43, %v7404_v58  ;;  %v6974_v26 = vor.u32 %v6973_v9, %v6970_v7  ;;  %v6980_v58 = vshll.u32 %v6615_v61, 16 }
 0x4a6   :  { %6357 = vmatmul.bf16.gmra.mxu2 %v6143_v54  ;;  %v7238_v17 = vpop.f32.mrf.mxu1  ;;  %v7152_v27 = vpop.f32.mrf.mxu0 }
 0x4a7   :  { %6446 = vmatmul.bf16.gmra.mxu3 %v6145_v34  ;;  %v7239_v59 = vadd.f32 %v7238_v17, %v7149_v23  ;;  %v7792_v11 = vmax.f32 %v7440_v6, 0.0  ;;  %v6464_v23 = vadd.f32 %v6403_v41, %v10710_v29  ;;  %v7696_v62 = vsel %vm7664_vm5, %v7440_v6, 0.0  ;;  %v7596_v6 = vpop.permute.xlu0 %7595 }
 0x4a8   :  { %v6465_v17 = vadd.f32 %v6405_v60, %v10720_v24  ;;  %v6975_v12 = vsel %vm3067_vm3, %v11428_v55, %v6974_v26  ;;  %v7599_v24 = vpop.permute.xlu1 %7598  ;;  %vm7666_vm7 = vcmp.eq.s32.totalorder %v7596_v6, 1 }
 0x4a9   :  { %v11436_v63 = vpop.f32.mrf.mxu2  ;;  %v7302_v28 = vadd.f32 %v7239_v59, %v6463_v53  ;;  %v7824_v29 = vsel %vm7664_vm5, %v7792_v11, 0.0  ;;  %v6977_v53 = vshrl.u32 %v6615_v61, 16  ;;  %vm7667_vm8 = vcmp.eq.s32.totalorder %v7599_v24, 1  ;;  %v7602_v26 = vpop.permute.xlu2 %7601 }
 0x4aa   :  { %v6407_v50 = vpop.f32.mrf.mxu3 }
 0x4ab   :  { %v7405_v46 = vmul.f32 %v11097_v51, %v7302_v28  ;;  %v6979_v59 = vrot.slane %v6977_v53, 3  ;;  %v6982_v28 = vrot.slane %v6980_v58, 4  ;;  %v6408_v18 = vadd.f32 %v6407_v50, %v11436_v63 }
 0x4ac   :  { %7280 = vmatmul.bf16.gmra.mxu1 %v6966_v39 }
 0x4ad   :  { %v7441_v40 = vadd.f32 %v11121_v43, %v7405_v46  ;;  %v6983_v49 = vor.u32 %v6982_v28, %v6979_v59  ;;  %v6466_v55 = vadd.f32 %v6408_v18, %v10737_v37 }
 0x4ae   :  { %v7241_v31 = vpop.f32.mrf.mxu1  ;;  %v7154_v3 = vpop.f32.mrf.mxu0 }
 0x4af   :  { %v7242_v54 = vadd.f32 %v7241_v31, %v7152_v27  ;;  %v7697_v20 = vsel %vm7665_vm6, %v7441_v40, 0.0  ;;  %v7793_v48 = vmax.f32 %v7441_v40, 0.0  ;;  %v6984_v40 = vsel %vm3067_vm3, %v6965_v30, %v6983_v49 }
 0x4b0   :  { %v8709_v1 = vpack.c.bf16 %v7697_v20, %v7696_v62  ;;  %vm7668_vm3 = vcmp.eq.s32.totalorder %v7602_v26, 1 }
 0x4b1   :  { %v6320_v16 = vpop.f32.mrf.mxu2  ;;  %v7303_v36 = vadd.f32 %v7242_v54, %v6464_v23  ;;  %v7825_v8 = vsel %vm7665_vm6, %v7793_v48, 0.0 }
 0x4b2   :  { %v6409_v14 = vpop.f32.mrf.mxu3  ;;  %8845 = vst [vmem:[#allocation12 + $0x28] sm:$0xff] %v8709_v1   ;;  %v8789_v34 = vpack.c.bf16 %v7825_v8, %v7824_v29 }
 0x4b3   :  { %v7406_v27 = vmul.f32 %v11097_v51, %v7303_v36  ;;  %v6410_v37 = vadd.f32 %v6409_v14, %v6320_v16 }
 0x4b4   :  { %8860 = vst [vmem:[#allocation13 + $0x28] sm:$0xff] %v8789_v34   ;;  %7196 = vmatmul.bf16.gmra.mxu0 %v6975_v12 }
 0x4b5   :  { %v7442_v41 = vadd.f32 %v11121_v43, %v7406_v27  ;;  %v6467_v48 = vadd.f32 %v6410_v37, %v10761_v0 }
 0x4b6   :  { %v7243_v35 = vpop.f32.mrf.mxu1  ;;  %v7157_v47 = vpop.f32.mrf.mxu0 }
 0x4b7   :  { %v7244_v21 = vadd.f32 %v7243_v35, %v7154_v3  ;;  %v7794_v46 = vmax.f32 %v7442_v41, 0.0  ;;  %v7698_v39 = vsel %vm7666_vm7, %v7442_v41, 0.0 }
 0x4b9   :  { %v6323_v5 = vpop.f32.mrf.mxu2  ;;  %v7304_v56 = vadd.f32 %v7244_v21, %v6465_v17  ;;  %v7826_v61 = vsel %vm7666_vm7, %v7794_v46, 0.0  ;;  %v7605_v17 = vpop.permute.xlu0 %7604 }
 0x4ba   :  { %v6412_v19 = vpop.f32.mrf.mxu3  ;;  %vm7669_vm9 = vcmp.eq.s32.totalorder %v7605_v17, 1 }
 0x4bb   :  { %v7407_v13 = vmul.f32 %v11097_v51, %v7304_v56  ;;  %v6413_v58 = vadd.f32 %v6412_v19, %v6323_v5 }
 0x4bc   :  { %7285 = vmatmul.bf16.gmra.mxu1 %v6984_v40 }
 0x4bd   :  { %v7443_v33 = vadd.f32 %v11121_v43, %v7407_v13  ;;  %v6468_v0 = vadd.f32 %v6413_v58, %v10783_v25 }
 0x4be   :  { %v7246_v23 = vpop.f32.mrf.mxu1  ;;  %v7159_v31 = vpop.f32.mrf.mxu0 }
 0x4bf   :  { %v7247_v3 = vadd.f32 %v7246_v23, %v7157_v47  ;;  %v7699_v63 = vsel %vm7667_vm8, %v7443_v33, 0.0  ;;  %v7795_v50 = vmax.f32 %v7443_v33, 0.0 }
 0x4c0   :  { %v8714_v7 = vpack.c.bf16 %v7699_v63, %v7698_v39  ;;  %v7608_v39 = vpop.permute.xlu1 %7607 }
 0x4c1   :  { %v6325_v11 = vpop.f32.mrf.mxu2  ;;  %v7305_v62 = vadd.f32 %v7247_v3, %v6466_v55  ;;  %v7827_v54 = vsel %vm7667_vm8, %v7795_v50, 0.0  ;;  %v7611_v50 = vpop.permute.xlu2 %7610  ;;  %vm7670_vm10 = vcmp.eq.s32.totalorder %v7608_v39, 1 }
 0x4c2   :  { %v6414_v9 = vpop.f32.mrf.mxu3  ;;  %8846 = vst [vmem:[#allocation12 + $0x30] sm:$0xff] %v8714_v7   ;;  %v8794_v20 = vpack.c.bf16 %v7827_v54, %v7826_v61  ;;  %vm7671_vm11 = vcmp.eq.s32.totalorder %v7611_v50, 1 }
 0x4c3   :  { %v7408_v30 = vmul.f32 %v11097_v51, %v7305_v62  ;;  %v6415_v24 = vadd.f32 %v6414_v9, %v6325_v11 }
 0x4c4   :  { %8861 = vst [vmem:[#allocation13 + $0x30] sm:$0xff] %v8794_v20  }
 0x4c5   :  { %v7444_v53 = vadd.f32 %v11121_v43, %v7408_v30  ;;  %v6469_v25 = vadd.f32 %v6415_v24, %v10804_v45 }
 0x4c6   :  { %v7248_v29 = vpop.f32.mrf.mxu1  ;;  %v7162_v36 = vpop.f32.mrf.mxu0 }
 0x4c7   :  { %v7249_v8 = vadd.f32 %v7248_v29, %v7159_v31  ;;  %v7796_v14 = vmax.f32 %v7444_v53, 0.0  ;;  %v7700_v59 = vsel %vm7668_vm3, %v7444_v53, 0.0 }
 0x4c9   :  { %v6328_v1 = vpop.f32.mrf.mxu2  ;;  %v7306_v34 = vadd.f32 %v7249_v8, %v6467_v48  ;;  %v7828_v5 = vsel %vm7668_vm3, %v7796_v14, 0.0 }
 0x4ca   :  { %v6417_v60 = vpop.f32.mrf.mxu3 }
 0x4cb   :  { %v7409_v16 = vmul.f32 %v11097_v51, %v7306_v34  ;;  %v6418_v63 = vadd.f32 %v6417_v60, %v6328_v1 }
 0x4cd   :  { %v7445_v27 = vadd.f32 %v11121_v43, %v7409_v16  ;;  %v6470_v45 = vadd.f32 %v6418_v63, %v10821_v52  ;;  %v11481_v52 = vld [vmem:[%s11545_s4] ss:$0 sm:$0xff] }
 0x4ce   :  { %v7251_v47 = vpop.f32.mrf.mxu1  ;;  %v7164_v12 = vpop.f32.mrf.mxu0 }
 0x4cf   :  { %v7252_v28 = vadd.f32 %v7251_v47, %v7162_v36  ;;  %v7701_v21 = vsel %vm7669_vm9, %v7445_v27, 0.0  ;;  %v7797_v56 = vmax.f32 %v7445_v27, 0.0 }
 0x4d0   :  { %v8719_v6 = vpack.c.bf16 %v7701_v21, %v7700_v59  ;;  %v7614_v59 = vpop.permute.xlu0 %7613 }
 0x4d1   :  { %v6330_v35 = vpop.f32.mrf.mxu2  ;;  %v7307_v19 = vadd.f32 %v7252_v28, %v6468_v0  ;;  %v7829_v18 = vsel %vm7669_vm9, %v7797_v56, 0.0  ;;  %v11488_v0 = vld [vmem:[%s11546_s5] ss:$0 sm:$0xff]  ;;  %vm7672_vm13 = vcmp.eq.s32.totalorder %v7614_v59, 1 }
 0x4d2   :  { %v6419_v41 = vpop.f32.mrf.mxu3  ;;  %8847 = vst [vmem:[#allocation12 + $0x38] sm:$0xff] %v8719_v6   ;;  %v8799_v49 = vpack.c.bf16 %v7829_v18, %v7828_v5 }
 0x4d3   :  { %v7410_v13 = vmul.f32 %v11097_v51, %v7307_v19 }
 0x4d4   :  { %8862 = vst [vmem:[#allocation13 + $0x38] sm:$0xff] %v8799_v49  }
 0x4d5   :  { %v7446_v3 = vadd.f32 %v11121_v43, %v7410_v13 }
 0x4d6   :  { %v7253_v55 = vpop.f32.mrf.mxu1  ;;  %v7167_v33 = vpop.f32.mrf.mxu0 }
 0x4d7   :  { %v7254_v23 = vadd.f32 %v7253_v55, %v7164_v12  ;;  %v7798_v7 = vmax.f32 %v7446_v3, 0.0  ;;  %v7702_v37 = vsel %vm7670_vm10, %v7446_v3, 0.0  ;;  %v7617_v12 = vpop.permute.xlu1 %7616 }
 0x4d8   :  { %vm7673_vm12 = vcmp.eq.s32.totalorder %v7617_v12, 1 }
 0x4d9   :  { %v6333_v46 = vpop.f32.mrf.mxu2  ;;  %v7308_v31 = vadd.f32 %v7254_v23, %v6469_v25  ;;  %v7830_v1 = vsel %vm7670_vm10, %v7798_v7, 0.0 }
 0x4da   :  { %v6422_v40 = vpop.f32.mrf.mxu3 }
 0x4db   :  { %v7411_v11 = vmul.f32 %v11097_v51, %v7308_v31  ;;  %v6420_v51 = vadd.f32 %v6419_v41, %v6330_v35  ;;  %v6423_v47 = vadd.f32 %v6422_v40, %v6333_v46 }
 0x4dd   :  { %v7447_v9 = vadd.f32 %v11121_v43, %v7411_v11  ;;  %v6471_v26 = vadd.f32 %v6420_v51, %v10833_v57  ;;  %v6472_v56 = vadd.f32 %v6423_v47, %v10843_v2 }
 0x4de   :  { %v7256_v62 = vpop.f32.mrf.mxu1  ;;  %v7169_v54 = vpop.f32.mrf.mxu0 }
 0x4df   :  { %v7257_v20 = vadd.f32 %v7256_v62, %v7167_v33  ;;  %v7703_v48 = vsel %vm7671_vm11, %v7447_v9, 0.0  ;;  %v7799_v30 = vmax.f32 %v7447_v9, 0.0  ;;  %v7623_v62 = vpop.permute.xlu0 %7622 }
 0x4e0   :  { %v8724_v29 = vpack.c.bf16 %v7703_v48, %v7702_v37  ;;  %vm7675_vm14 = vcmp.eq.s32.totalorder %v7623_v62, 1 }
 0x4e1   :  { %v6335_v61 = vpop.f32.mrf.mxu2  ;;  %v7309_v8 = vadd.f32 %v7257_v20, %v6470_v45  ;;  %v7831_v60 = vsel %vm7671_vm11, %v7799_v30, 0.0 }
 0x4e2   :  { %v6424_v36 = vpop.f32.mrf.mxu3  ;;  %8848 = vst [vmem:[#allocation12 + $0x40] sm:$0xff] %v8724_v29   ;;  %v8804_v34 = vpack.c.bf16 %v7831_v60, %v7830_v1 }
 0x4e3   :  { %v7412_v43 = vmul.f32 %v11481_v52, %v7309_v8  ;;  %v6425_v23 = vadd.f32 %v6424_v36, %v6335_v61 }
 0x4e4   :  { %8863 = vst [vmem:[#allocation13 + $0x40] sm:$0xff] %v8804_v34  }
 0x4e5   :  { %v7448_v27 = vadd.f32 %v11488_v0, %v7412_v43  ;;  %v6473_v2 = vadd.f32 %v6425_v23, %v10860_v38 }
 0x4e6   :  { %v7258_v58 = vpop.f32.mrf.mxu1  ;;  %v7172_v17 = vpop.f32.mrf.mxu0 }
 0x4e7   :  { %v7259_v16 = vadd.f32 %v7258_v58, %v7169_v54  ;;  %v7800_v57 = vmax.f32 %v7448_v27, 0.0  ;;  %v7704_v19 = vsel %vm7672_vm13, %v7448_v27, 0.0  ;;  %v7620_v54 = vpop.permute.xlu2 %7619 }
 0x4e8   :  { %vm7674_vm15 = vcmp.eq.s32.totalorder %v7620_v54, 1 }
 0x4e9   :  { %v6338_v53 = vpop.f32.mrf.mxu2  ;;  %v7310_v35 = vadd.f32 %v7259_v16, %v6471_v26  ;;  %v7832_v46 = vsel %vm7672_vm13, %v7800_v57, 0.0 }
 0x4ea   :  { %v6427_v14 = vpop.f32.mrf.mxu3 }
 0x4eb   :  { %v7413_v28 = vmul.f32 %v11481_v52, %v7310_v35  ;;  %v6428_v9 = vadd.f32 %v6427_v14, %v6338_v53 }
 0x4ed   :  { %v7449_v21 = vadd.f32 %v11488_v0, %v7413_v28  ;;  %v6474_v38 = vadd.f32 %v6428_v9, %v10889_v10 }
 0x4ee   :  { %v7261_v41 = vpop.f32.mrf.mxu1  ;;  %v7174_v5 = vpop.f32.mrf.mxu0 }
 0x4ef   :  { %v7705_v18 = vsel %vm7673_vm12, %v7449_v21, 0.0  ;;  %v7801_v24 = vmax.f32 %v7449_v21, 0.0  ;;  %v7262_v49 = vadd.f32 %v7261_v41, %v7172_v17 }
 0x4f0   :  { %v8729_v25 = vpack.c.bf16 %v7705_v18, %v7704_v19 }
 0x4f1   :  { %v6340_v6 = vpop.f32.mrf.mxu2  ;;  %v7833_v55 = vsel %vm7673_vm12, %v7801_v24, 0.0  ;;  %v7311_v33 = vadd.f32 %v7262_v49, %v6472_v56  ;;  %v7626_v56 = vpop.permute.xlu1 %7625 }
 0x4f2   :  { %v6429_v13 = vpop.f32.mrf.mxu3  ;;  %8849 = vst [vmem:[#allocation12 + $0x48] sm:$0xff] %v8729_v25   ;;  %v8809_v40 = vpack.c.bf16 %v7833_v55, %v7832_v46  ;;  %vm7676_vm0 = vcmp.eq.s32.totalorder %v7626_v56, 1 }
 0x4f3   :  { %v7414_v31 = vmul.f32 %v11481_v52, %v7311_v33  ;;  %v6430_v26 = vadd.f32 %v6429_v13, %v6340_v6  ;;  %v7629_v6 = vpop.permute.xlu2 %7628 }
 0x4f4   :  { %8864 = vst [vmem:[#allocation13 + $0x48] sm:$0xff] %v8809_v40   ;;  %vm7677_vm1 = vcmp.eq.s32.totalorder %v7629_v6, 1 }
 0x4f5   :  { %v7450_v7 = vadd.f32 %v11488_v0, %v7414_v31  ;;  %v6475_v10 = vadd.f32 %v6430_v26, %v10904_v32 }
 0x4f6   :  { %v7263_v39 = vpop.f32.mrf.mxu1  ;;  %v7177_v3 = vpop.f32.mrf.mxu0 }
 0x4f7   :  { %v7264_v63 = vadd.f32 %v7263_v39, %v7174_v5  ;;  %v7802_v37 = vmax.f32 %v7450_v7, 0.0  ;;  %v7706_v29 = vsel %vm7674_vm15, %v7450_v7, 0.0 }
 0x4f9   :  { %v6343_v50 = vpop.f32.mrf.mxu2  ;;  %v7312_v45 = vadd.f32 %v7264_v63, %v6473_v2  ;;  %v7834_v51 = vsel %vm7674_vm15, %v7802_v37, 0.0  ;;  %v7635_v54 = vpop.permute.xlu1 %7634 }
 0x4fa   :  { %v6432_v11 = vpop.f32.mrf.mxu3  ;;  %vm7679_vm2 = vcmp.eq.s32.totalorder %v7635_v54, 1 }
 0x4fb   :  { %v7415_v61 = vmul.f32 %v11481_v52, %v7312_v45  ;;  %v6433_v59 = vadd.f32 %v6432_v11, %v6343_v50 }
 0x4fd   :  { %v7451_v20 = vadd.f32 %v11488_v0, %v7415_v61  ;;  %v6476_v19 = vadd.f32 %v6433_v59, %v10926_v44  ;;  %v7632_v61 = vpop.permute.xlu0 %7631 }
 0x4fe   :  { %v7266_v48 = vpop.f32.mrf.mxu1  ;;  %v7179_v30 = vpop.f32.mrf.mxu0  ;;  %vm7678_vm4 = vcmp.eq.s32.totalorder %v7632_v61, 1  ;;  %v11585_v61 = vld [vmem:[#allocation23_spill] sm:$0xff] }
 0x4ff   :  { %v7707_v36 = vsel %vm7675_vm14, %v7451_v20, 0.0  ;;  %v7803_v1 = vmax.f32 %v7451_v20, 0.0  ;;  %v7267_v8 = vadd.f32 %v7266_v48, %v7177_v3 }
 0x500   :  { %v8734_v60 = vpack.c.bf16 %v7707_v36, %v7706_v29 }
 0x501   :  { %v7835_v34 = vsel %vm7675_vm14, %v7803_v1, 0.0  ;;  %v7313_v43 = vadd.f32 %v7267_v8, %v6474_v38  ;;  %v6345_v53 = vpop.f32.mrf.mxu2 }
 0x502   :  { %v6434_v58 = vpop.f32.mrf.mxu3  ;;  %8850 = vst [vmem:[#allocation12 + $0x50] sm:$0xff] %v8734_v60   ;;  %v8814_v17 = vpack.c.bf16 %v7835_v34, %v7834_v51 }
 0x503   :  { %v7416_v16 = vmul.f32 %v11481_v52, %v7313_v43  ;;  %v6435_v40 = vadd.f32 %v6434_v58, %v6345_v53 }
 0x504   :  { %8865 = vst [vmem:[#allocation13 + $0x50] sm:$0xff] %v8814_v17  }
 0x505   :  { %v7452_v47 = vadd.f32 %v11488_v0, %v7416_v16  ;;  %v6477_v44 = vadd.f32 %v6435_v40, %v10949_v42 }
 0x506   :  { %v7268_v14 = vpop.f32.mrf.mxu1  ;;  %v7182_v27 = vpop.f32.mrf.mxu0 }
 0x507   :  { %v7269_v35 = vadd.f32 %v7268_v14, %v7179_v30  ;;  %v7804_v41 = vmax.f32 %v7452_v47, 0.0  ;;  %v7708_v24 = vsel %vm7676_vm0, %v7452_v47, 0.0 }
 0x509   :  { %v7314_v12 = vadd.f32 %v7269_v35, %v6475_v10  ;;  %v6348_v57 = vpop.f32.mrf.mxu2  ;;  %v7836_v55 = vsel %vm7676_vm0, %v7804_v41, 0.0 }
 0x50a   :  { %v6437_v21 = vpop.f32.mrf.mxu3 }
 0x50b   :  { %v7417_v28 = vmul.f32 %v11481_v52, %v7314_v12  ;;  %v6438_v9 = vadd.f32 %v6437_v21, %v6348_v57  ;;  %v7641_v57 = vpop.permute.xlu0 %7640  ;;  %v7638_v21 = vpop.permute.xlu2 %7637 }
 0x50c   :  { %vm7681_vm5 = vcmp.eq.s32.totalorder %v7641_v57, 1  ;;  %vm7680_vm6 = vcmp.eq.s32.totalorder %v7638_v21, 1 }
 0x50d   :  { %v7453_v5 = vadd.f32 %v11488_v0, %v7417_v28  ;;  %v6478_v38 = vadd.f32 %v6438_v9, %v10972_v15  ;;  %v7644_v9 = vpop.permute.xlu1 %7643 }
 0x50e   :  { %v7271_v32 = vpop.f32.mrf.mxu1  ;;  %v7184_v18 = vpop.f32.mrf.mxu0  ;;  %vm7682_vm7 = vcmp.eq.s32.totalorder %v7644_v9, 1 }
 0x50f   :  { %v7709_v49 = vsel %vm7677_vm1, %v7453_v5, 0.0  ;;  %v7805_v25 = vmax.f32 %v7453_v5, 0.0  ;;  %v7272_v13 = vadd.f32 %v7271_v32, %v7182_v27 }
 0x510   :  { %v8739_v46 = vpack.c.bf16 %v7709_v49, %v7708_v24 }
 0x511   :  { %v7837_v33 = vsel %vm7677_vm1, %v7805_v25, 0.0  ;;  %v7315_v23 = vadd.f32 %v7272_v13, %v6476_v19  ;;  %v6350_v39 = vpop.f32.mrf.mxu2 }
 0x512   :  { %8851 = vst [vmem:[#allocation12 + $0x58] sm:$0xff] %v8739_v46   ;;  %v8819_v31 = vpack.c.bf16 %v7837_v33, %v7836_v55  ;;  %v6439_v3 = vpop.f32.mrf.mxu3 }
 0x513   :  { %v7418_v2 = vmul.f32 %v11481_v52, %v7315_v23  ;;  %v6440_v53 = vadd.f32 %v6439_v3, %v6350_v39 }
 0x514   :  { %8866 = vst [vmem:[#allocation13 + $0x58] sm:$0xff] %v8819_v31   ;;  %v11584_v31 = vld [vmem:[#allocation22_spill] sm:$0xff] }
 0x515   :  { %v7454_v7 = vadd.f32 %v11488_v0, %v7418_v2  ;;  %v6479_v17 = vadd.f32 %v6440_v53, %v10993_v22 }
 0x516   :  { %v7273_v63 = vpop.f32.mrf.mxu1  ;;  %v7187_v50 = vpop.f32.mrf.mxu0 }
 0x517   :  { %v7274_v11 = vadd.f32 %v7273_v63, %v7184_v18  ;;  %v7806_v37 = vmax.f32 %v7454_v7, 0.0  ;;  %v7710_v30 = vsel %vm7678_vm4, %v7454_v7, 0.0  ;;  %v7647_v7 = vpop.permute.xlu2 %7646 }
 0x518   :  { %vm7683_vm8 = vcmp.eq.s32.totalorder %v7647_v7, 1 }
 0x519   :  { %v7316_v45 = vadd.f32 %v7274_v11, %v6477_v44  ;;  %v6353_v8 = vpop.f32.mrf.mxu2  ;;  %v7838_v34 = vsel %vm7678_vm4, %v7806_v37, 0.0 }
 0x51a   :  { %v6442_v51 = vpop.f32.mrf.mxu3 }
 0x51b   :  { %v7419_v62 = vmul.f32 %v11481_v52, %v7316_v45  ;;  %v6443_v47 = vadd.f32 %v6442_v51, %v6353_v8 }
 0x51d   :  { %v7455_v20 = vadd.f32 %v11488_v0, %v7419_v62  ;;  %v6480_v41 = vadd.f32 %v6443_v47, %v11012_v4 }
 0x51e   :  { %v7276_v42 = vpop.f32.mrf.mxu1  ;;  %v7189_v48 = vpop.f32.mrf.mxu0 }
 0x51f   :  { %v7711_v29 = vsel %vm7679_vm2, %v7455_v20, 0.0  ;;  %v7807_v36 = vmax.f32 %v7455_v20, 0.0  ;;  %v7277_v1 = vadd.f32 %v7276_v42, %v7187_v50 }
 0x520   :  { %v8744_v60 = vpack.c.bf16 %v7711_v29, %v7710_v30 }
 0x521   :  { %v7839_v43 = vsel %vm7679_vm2, %v7807_v36, 0.0  ;;  %v7317_v26 = vadd.f32 %v7277_v1, %v6478_v38  ;;  %v6355_v12 = vpop.f32.mrf.mxu2 }
 0x522   :  { %8852 = vst [vmem:[#allocation12 + $0x60] sm:$0xff] %v8744_v60   ;;  %v8824_v58 = vpack.c.bf16 %v7839_v43, %v7838_v34  ;;  %v6444_v59 = vpop.f32.mrf.mxu3 }
 0x523   :  { %v7420_v15 = vmul.f32 %v11481_v52, %v7317_v26  ;;  %v6445_v55 = vadd.f32 %v6444_v59, %v6355_v12 }
 0x524   :  { %8867 = vst [vmem:[#allocation13 + $0x60] sm:$0xff] %v8824_v58   ;;  %v11586_v58 = vld [vmem:[#allocation24_spill] sm:$0xff] }
 0x525   :  { %v7456_v27 = vadd.f32 %v11488_v0, %v7420_v15  ;;  %v6481_v2 = vadd.f32 %v6445_v55, %v11584_v31 }
 0x526   :  { %v7278_v16 = vpop.f32.mrf.mxu1  ;;  %v7192_v10 = vpop.f32.mrf.mxu0 }
 0x527   :  { %v7279_v14 = vadd.f32 %v7278_v16, %v7189_v48  ;;  %v7808_v56 = vmax.f32 %v7456_v27, 0.0  ;;  %v7712_v5 = vsel %vm7680_vm6, %v7456_v27, 0.0  ;;  %v7653_v27 = vpop.permute.xlu1 %7652 }
 0x528   :  { %vm7685_vm3 = vcmp.eq.s32.totalorder %v7653_v27, 1 }
 0x529   :  { %v7318_v35 = vadd.f32 %v7279_v14, %v6479_v17  ;;  %v7840_v25 = vsel %vm7680_vm6, %v7808_v56, 0.0  ;;  %v6358_v23 = vpop.f32.mrf.mxu2 }
 0x52a   :  { %v6447_v40 = vpop.f32.mrf.mxu3 }
 0x52b   :  { %v7421_v28 = vmul.f32 %v11481_v52, %v7318_v35  ;;  %v6448_v50 = vadd.f32 %v6447_v40, %v6358_v23  ;;  %v7650_v35 = vpop.permute.xlu0 %7649 }
 0x52c   :  { %vm7684_vm9 = vcmp.eq.s32.totalorder %v7650_v35, 1 }
 0x52d   :  { %v7457_v6 = vadd.f32 %v11488_v0, %v7421_v28  ;;  %v6482_v37 = vadd.f32 %v6448_v50, %v11585_v61 }
 0x52e   :  { %v7281_v22 = vpop.f32.mrf.mxu1  ;;  %v7194_v49 = vpop.f32.mrf.mxu0 }
 0x52f   :  { %v7713_v19 = vsel %vm7681_vm5, %v7457_v6, 0.0  ;;  %v7809_v32 = vmax.f32 %v7457_v6, 0.0  ;;  %v7282_v18 = vadd.f32 %v7281_v22, %v7192_v10 }
 0x530   :  { %v8749_v24 = vpack.c.bf16 %v7713_v19, %v7712_v5 }
 0x531   :  { %v7841_v13 = vsel %vm7681_vm5, %v7809_v32, 0.0  ;;  %v7319_v46 = vadd.f32 %v7282_v18, %v6480_v41  ;;  %v6360_v20 = vpop.f32.mrf.mxu2 }
 0x532   :  { %8853 = vst [vmem:[#allocation12 + $0x68] sm:$0xff] %v8749_v24   ;;  %v8829_v33 = vpack.c.bf16 %v7841_v13, %v7840_v25  ;;  %v6449_v42 = vpop.f32.mrf.mxu3 }
 0x533   :  { %v7422_v4 = vmul.f32 %v11481_v52, %v7319_v46  ;;  %v6450_v34 = vadd.f32 %v6449_v42, %v6360_v20 }
 0x534   :  { %8868 = vst [vmem:[#allocation13 + $0x68] sm:$0xff] %v8829_v33  }
 0x535   :  { %v7458_v3 = vadd.f32 %v11488_v0, %v7422_v4  ;;  %v6483_v15 = vadd.f32 %v6450_v34, %v11586_v58 }
 0x536   :  { %v7283_v44 = vpop.f32.mrf.mxu1  ;;  %v7197_v11 = vpop.f32.mrf.mxu0 }
 0x537   :  { %v7284_v39 = vadd.f32 %v7283_v44, %v7194_v49  ;;  %v7810_v62 = vmax.f32 %v7458_v3, 0.0  ;;  %v7714_v48 = vsel %vm7682_vm7, %v7458_v3, 0.0 }
 0x539   :  { %v7320_v63 = vadd.f32 %v7284_v39, %v6481_v2  ;;  %v7842_v8 = vsel %vm7682_vm7, %v7810_v62, 0.0 }
 0x53b   :  { %v7423_v45 = vmul.f32 %v11481_v52, %v7320_v63 }
 0x53d   :  { %v7459_v54 = vadd.f32 %v11488_v0, %v7423_v45 }
 0x53e   :  { %v7286_v38 = vpop.f32.mrf.mxu1  ;;  %v7199_v26 = vpop.f32.mrf.mxu0 }
 0x53f   :  { %v7715_v30 = vsel %vm7683_vm8, %v7459_v54, 0.0  ;;  %v7811_v29 = vmax.f32 %v7459_v54, 0.0  ;;  %v7287_v36 = vadd.f32 %v7286_v38, %v7197_v11 }
 0x540   :  { %v8754_v1 = vpack.c.bf16 %v7715_v30, %v7714_v48 }
 0x541   :  { %v7843_v60 = vsel %vm7683_vm8, %v7811_v29, 0.0  ;;  %v7321_v51 = vadd.f32 %v7287_v36, %v6482_v37 }
 0x542   :  { %8854 = vst [vmem:[#allocation12 + $0x70] sm:$0xff] %v8754_v1   ;;  %v8834_v43 = vpack.c.bf16 %v7843_v60, %v7842_v8 }
 0x543   :  { %v7424_v53 = vmul.f32 %v11481_v52, %v7321_v51 }
 0x544   :  { %8869 = vst [vmem:[#allocation13 + $0x70] sm:$0xff] %v8834_v43  }
 0x545   :  { %v7460_v10 = vadd.f32 %v11488_v0, %v7424_v53 }
 0x546   :  { %v7288_v17 = vpop.f32.mrf.mxu1 }
 0x547   :  { %v7289_v16 = vadd.f32 %v7288_v17, %v7199_v26  ;;  %v7812_v12 = vmax.f32 %v7460_v10, 0.0  ;;  %v7716_v28 = vsel %vm7684_vm9, %v7460_v10, 0.0 }
 0x549   :  { %v7322_v14 = vadd.f32 %v7289_v16, %v6483_v15 }
 0x54b   :  { %v7425_v47 = vmul.f32 %v11481_v52, %v7322_v14  ;;  %v7844_v52 = vsel %vm7684_vm9, %v7812_v12, 0.0 }
 0x54d   :  { %v7461_v59 = vadd.f32 %v11488_v0, %v7425_v47 }
 0x54f   :  { %v7717_v57 = vsel %vm7685_vm3, %v7461_v59, 0.0  ;;  %v7813_v21 = vmax.f32 %v7461_v59, 0.0 }
 0x550   :  { %v8759_v56 = vpack.c.bf16 %v7717_v57, %v7716_v28 }
 0x551   :  { %v7845_v6 = vsel %vm7685_vm3, %v7813_v21, 0.0 }
 0x552   :  { %8855 = vst [vmem:[#allocation12 + $0x78] sm:$0xff] %v8759_v56   ;;  %v8839_v41 = vpack.c.bf16 %v7845_v6, %v7844_v52 }
 0x553   :  { %7926 = dma.vmem_to_hbm [thread:$0]  %s7919_s9, 2048, %s7921_s10, [#allocation6], %s9065_s27, %s9065_s27, %s9066_s28  }
 0x554   :  { %8870 = vst [vmem:[#allocation13 + $0x78] sm:$0xff] %v8839_v41  }
 0x555   :  { %7943 = dma.vmem_to_hbm [thread:$0]  %s7936_s11, 2048, %s7938_s12, [#allocation14], %s9065_s27, %s9065_s27, %s9066_s28  }
 0x556   :  { %9055 = dma.done.wait [#allocation6], 2048  }
 0x557   :  { %9056 = vsyncadd [#allocation6], 4294965248 }
 0x558   :  { %9057 = dma.done.wait [#allocation14], 2048  }
 0x559   :  { %9058 = vsyncadd [#allocation14], 4294965248 }
 0x55a   :  { %7952 = vsyncpa [#allocation5], 1 }
 0x55b   :  { %7953 = vsyncpa [#allocation8], 1 }
 0x55c   :  { %7954 = vsyncpa [#allocation11], 1 }
 0x55d   :  { %7955 = vsyncpa [#allocation6], 1 }
 0x55e   :  { %7956 = vsyncpa [#allocation14], 1 }

</bundles_post_ra>
